<compile_context>
chip_gen: v7x
topology: tpu7x:2x2x1
jax: 0.10.0
libtpu: 0.0.40
codegen_flags: <defaults>
</compile_context>

<pallas_src>
import jax
import jax.numpy as jnp
from jax import lax
from jax.experimental import pallas as pl
from jax.experimental.pallas import tpu as pltpu

K = 3                            # kernel size (stride=1, padding=1)
EPS = 1e-5                       # BatchNorm eps
VMEM_LIMIT = 32 * 1024 * 1024    # safe scoped-VMEM budget on v5e/v6e/v7x


# -----------------------------------------------------------------------------
# conv3d (3x3x3, stride 1, pad 1) + per-channel BN partial statistics.
# Optionally applies a fused per-channel affine + ReLU to the *input* tile
# (used to fold relu(bn1(.)) into conv2 so z1 never round-trips HBM).
# One grid step == one full sample.
# -----------------------------------------------------------------------------
def _make_conv_kernel(D, H, W, Ci, Co, PWpad, fuse_input):
    WCi = W * Ci
    WCo = W * Co
    ROWS = D * H                 # im2col rows per sample (multiple of 128 here)
    PB = K * K * PWpad           # lane-aligned im2col width

    def kernel(*refs):
        if fuse_input:
            (x_ref, w_ref, s_ref, t_ref,
             y_ref, sum_ref, ssq_ref, xp_ref, patch_ref) = refs
        else:
            (x_ref, w_ref,
             y_ref, sum_ref, ssq_ref, xp_ref, patch_ref) = refs

        x = x_ref[0]                                        # (D, H, W*Ci)
        if fuse_input:
            # fused relu(bn1(.)) on the tile already resident in VMEM
            x = jnp.maximum(x * s_ref[...] + t_ref[...], 0.0)

        # zero padding (padding=1) done once per sample in VMEM scratch.
        # x is written at LANE OFFSET 0; the W halo lives entirely in the
        # banded weight (zero rows), so no lane-shifted stores are needed.
        xp_ref[...] = jnp.zeros_like(xp_ref)
        xp_ref[1:D + 1, 1:H + 1, 0:WCi] = x

        # im2col: 9 lane-aligned strip copies (128-lane column offsets),
        # no per-strip reshape (patch scratch stays 3-D).
        for kd in range(K):
            for kh in range(K):
                idx = kd * K + kh
                patch_ref[:, :, idx * PWpad:(idx + 1) * PWpad] = \
                    xp_ref[kd:kd + D, kh:kh + H, :]

        # single deep MXU matmul per sample: (D*H, 9*128) @ (9*128, W*Co).
        # Leading-dim merge reshape of the contiguous patch buffer is free.
        acc = jnp.dot(patch_ref[...].reshape(ROWS, PB), w_ref[...],
                      preferred_element_type=jnp.float32)   # (ROWS, W*Co)

        # per-sample BN partial sums (finalized in plain JAX outside).
        sum_ref[...] = jnp.sum(acc, axis=0, keepdims=True).reshape(1, 1, WCo)
        ssq_ref[...] = jnp.sum(acc * acc, axis=0, keepdims=True).reshape(1, 1, WCo)

        # leading-dim split only (last dim unchanged) -> free reshape.
        y_ref[...] = acc.reshape(1, D, H, WCo)

    return kernel


def conv3d_bnstats_pallas(x, wb, W, Ci, Co, PWpad, scale=None, shift=None):
    """x: (N, D, H, W*Ci) f32; wb: banded weights (9*PWpad, W*Co).

    Returns (y, sum_partials, sumsq_partials):
      y:    (N, D, H, W*Co)
      sums: (N, 1, W*Co) per-sample channel partials (grouped w-major).
    """
    N, D, H, WCi = x.shape
    assert WCi == W * Ci
    assert WCi <= PWpad
    WCo = W * Co
    PB = K * K * PWpad
    # Banded-Toeplitz weight must fit comfortably in VMEM; gate it.
    # TODO(synk): fall back to accumulated shifted matmuls for large W*C.
    assert PB * WCo * 4 <= 4 * 1024 * 1024, "banded weight too large for VMEM"

    fuse = scale is not None
    kernel = _make_conv_kernel(D, H, W, Ci, Co, PWpad, fuse)

    in_specs = [
        pl.BlockSpec((1, D, H, WCi), lambda n: (n, 0, 0, 0)),
        pl.BlockSpec((PB, WCo), lambda n: (0, 0)),
    ]
    inputs = [x, wb]
    if fuse:
        row_spec = pl.BlockSpec((1, WCi), lambda n: (0, 0))
        in_specs += [row_spec, row_spec]
        inputs += [scale.reshape(1, WCi), shift.reshape(1, WCi)]

    out_shape = (
        jax.ShapeDtypeStruct((N, D, H, WCo), jnp.float32),
        jax.ShapeDtypeStruct((N, 1, WCo), jnp.float32),
        jax.ShapeDtypeStruct((N, 1, WCo), jnp.float32),
    )
    stat_spec = pl.BlockSpec((1, 1, WCo), lambda n: (n, 0, 0))
    out_specs = (
        pl.BlockSpec((1, D, H, WCo), lambda n: (n, 0, 0, 0)),
        stat_spec,
        stat_spec,
    )
    return pl.pallas_call(
        kernel,
        out_shape=out_shape,
        grid=(N,),
        in_specs=in_specs,
        out_specs=out_specs,
        scratch_shapes=[
            pltpu.VMEM((D + 2, H + 2, PWpad), jnp.float32),   # padded slab
            pltpu.VMEM((D, H, PB), jnp.float32),              # im2col patches
        ],
        compiler_params=pltpu.CompilerParams(
            dimension_semantics=("parallel",),
            vmem_limit_bytes=VMEM_LIMIT,
        ),
    )(*inputs)


# -----------------------------------------------------------------------------
# bn2 + residual + relu on a lane-dense (N, D, H*W*C) view, full-sample blocks
# -----------------------------------------------------------------------------
def _bn_add_relu_kernel(y_ref, r_ref, s_ref, t_ref, o_ref):
    o_ref[...] = jnp.maximum(y_ref[...] * s_ref[...] + t_ref[...] + r_ref[...],
                             0.0)


def bn_add_relu_pallas(y, resid, scale_row, shift_row):
    N, D, HWC = y.shape
    blk = pl.BlockSpec((1, D, HWC), lambda n: (n, 0, 0))
    row = pl.BlockSpec((1, HWC), lambda n: (0, 0))
    return pl.pallas_call(
        _bn_add_relu_kernel,
        out_shape=jax.ShapeDtypeStruct((N, D, HWC), jnp.float32),
        grid=(N,),
        in_specs=[blk, blk, row, row],
        out_specs=blk,
        compiler_params=pltpu.CompilerParams(
            dimension_semantics=("parallel",),
            vmem_limit_bytes=VMEM_LIMIT,
        ),
    )(y, resid, scale_row, shift_row)


# -----------------------------------------------------------------------------
# banded (Toeplitz-along-W) weight: (3,3,3,Ci,Co) -> (9*PWpad, W*Co).
# The input slab stores x at lane offset 0 (lane = w*Ci + ci for w in [0, W));
# W-padding terms are simply omitted (their inputs are zero), and rows beyond
# W*Ci are zero so each (kd, kh) block is 128-lane aligned.
# -----------------------------------------------------------------------------
def _band_weights(wt, W, PWpad):
    Kd, Kh, Kw, Ci, Co = wt.shape
    w9 = wt.reshape(Kd * Kh, Kw, Ci, Co)
    win = jnp.arange(W)[:, None]            # input w position (slab layout)
    wout = jnp.arange(W)[None, :]           # output w position
    band = jnp.zeros((Kd * Kh, W, Ci, W, Co), wt.dtype)
    for kw in range(Kw):
        sel = (win == wout + kw - 1).astype(wt.dtype)             # (W, W)
        band = band + sel[None, :, None, :, None] * w9[:, kw][:, None, :, None, :]
    band = band.reshape(Kd * Kh, W * Ci, W * Co)
    band = jnp.pad(band, ((0, 0), (0, PWpad - W * Ci), (0, 0)))   # lane-align
    return band.reshape(Kd * Kh * PWpad, W * Co)


# -----------------------------------------------------------------------------
# BasicBlock3D forward (training-mode BatchNorm, biased batch variance)
# -----------------------------------------------------------------------------
def basic_block3d(x_ncdhw, p):
    N, C, D, H, W = x_ncdhw.shape
    x = jnp.transpose(x_ncdhw, (0, 2, 3, 4, 1))          # NCDHW -> NDHWC
    xw = x.reshape(N, D, H, W * C)                       # W-major conv layout

    cnt = N * D * H * W
    PWpad = ((W * C + 127) // 128) * 128                 # lane-aligned strip width
    wb1 = _band_weights(p["w1"], W, PWpad)
    wb2 = _band_weights(p["w2"], W, PWpad)
    # conv bias dropped on purpose: it cancels exactly under training-mode BN.

    # ---- conv1 (+ fused BN1 statistics) ----
    y1, psum1, pssq1 = conv3d_bnstats_pallas(xw, wb1, W, C, C, PWpad)
    m1 = psum1.reshape(N, W, C).sum(axis=(0, 1)) / cnt
    q1 = pssq1.reshape(N, W, C).sum(axis=(0, 1)) / cnt
    v1 = q1 - m1 * m1
    s1 = p["g1"] / jnp.sqrt(v1 + EPS)
    t1 = p["be1"] - m1 * s1

    # ---- conv2 with relu(bn1(.)) fused into its input read (+ BN2 stats) ----
    y2, psum2, pssq2 = conv3d_bnstats_pallas(
        y1, wb2, W, C, C, PWpad, scale=jnp.tile(s1, W), shift=jnp.tile(t1, W))
    m2 = psum2.reshape(N, W, C).sum(axis=(0, 1)) / cnt
    q2 = pssq2.reshape(N, W, C).sum(axis=(0, 1)) / cnt
    v2 = q2 - m2 * m2
    s2 = p["g2"] / jnp.sqrt(v2 + EPS)
    t2 = p["be2"] - m2 * s2

    # ---- bn2 + residual + relu on a lane-dense (N, D, H*W*C) view ----
    out2d = bn_add_relu_pallas(
        y2.reshape(N, D, H * W * C),           # free view: same HBM layout
        x.reshape(N, D, H * W * C),
        jnp.tile(s2, H * W).reshape(1, H * W * C),
        jnp.tile(t2, H * W).reshape(1, H * W * C))
    out = out2d.reshape(N, D, H, W, C)
    return jnp.transpose(out, (0, 4, 1, 2, 3))           # NDHWC -> NCDHW


# -----------------------------------------------------------------------------
# Pure-JAX reference (keeps the conv bias; it cancels under training-mode BN)
# -----------------------------------------------------------------------------
def basic_block3d_ref(x_ncdhw, p):
    x = jnp.transpose(x_ncdhw, (0, 2, 3, 4, 1))

    def conv(a, w, b):
        return lax.conv_general_dilated(
            a, w, (1, 1, 1), [(1, 1)] * 3,
            dimension_numbers=("NDHWC", "DHWIO", "NDHWC"),
        ) + b.reshape(1, 1, 1, 1, -1)

    def bn(y, g, be):
        m = jnp.mean(y, axis=(0, 1, 2, 3))
        v = jnp.var(y, axis=(0, 1, 2, 3))
        return (y - m) / jnp.sqrt(v + EPS) * g + be

    z1 = jnp.maximum(bn(conv(x, p["w1"], p["b1"]), p["g1"], p["be1"]), 0.0)
    y2 = bn(conv(z1, p["w2"], p["b2"]), p["g2"], p["be2"])
    out = jnp.maximum(y2 + x, 0.0)
    return jnp.transpose(out, (0, 4, 1, 2, 3))


# -----------------------------------------------------------------------------
if __name__ == "__main__":
    N, C, D, H, W = 2, 4, 16, 16, 16                     # in_channels == out_channels
    keys = jax.random.split(jax.random.PRNGKey(0), 9)

    x = jax.random.normal(keys[0], (N, C, D, H, W), jnp.float32)   # NCDHW input

    params = {
        "w1": 0.1 * jax.random.normal(keys[1], (K, K, K, C, C), jnp.float32),
        "b1": 0.1 * jax.random.normal(keys[2], (C,), jnp.float32),
        "g1": 1.0 + 0.1 * jax.random.normal(keys[3], (C,), jnp.float32),
        "be1": 0.1 * jax.random.normal(keys[4], (C,), jnp.float32),
        "w2": 0.1 * jax.random.normal(keys[5], (K, K, K, C, C), jnp.float32),
        "b2": 0.1 * jax.random.normal(keys[6], (C,), jnp.float32),
        "g2": 1.0 + 0.1 * jax.random.normal(keys[7], (C,), jnp.float32),
        "be2": 0.1 * jax.random.normal(keys[8], (C,), jnp.float32),
    }

    out = jax.block_until_ready(jax.jit(basic_block3d)(x, params))
    ref = jax.block_until_ready(jax.jit(basic_block3d_ref)(x, params))

    assert out.shape == (N, C, D, H, W)
    err = float(jnp.max(jnp.abs(out - ref)))
    assert jnp.allclose(out, ref, rtol=1e-4, atol=1e-4), (
        f"mismatch vs reference: max abs err = {err}")
    print("KERNEL_OK")
</pallas_src>

<mosaic_0001>
module attributes {stable_mosaic.version = 11 : i64} {
  func.func @kernel(%arg0: i32, %arg1: memref<1x16x16x64xf32, #tpu.memory_space<vmem>>, %arg2: memref<1152x64xf32, #tpu.memory_space<vmem>>, %arg3: memref<1x16x16x64xf32, #tpu.memory_space<vmem>>, %arg4: memref<1x1x64xf32, #tpu.memory_space<vmem>>, %arg5: memref<1x1x64xf32, #tpu.memory_space<vmem>>, %arg6: memref<18x18x128xf32, #tpu.memory_space<vmem>>, %arg7: memref<16x16x1152xf32, #tpu.memory_space<vmem>>) attributes {dimension_semantics = [#tpu.dimension_semantics<parallel>], iteration_bounds = array<i64: 2>, scalar_prefetch = 0 : i64, scratch_operands = 2 : i64, tpu.core_type = #tpu.core_type<tc>, window_params = [{transform_indices = @transform_0, window_bounds = array<i64: 1, 16, 16, 64>}, {pipeline_mode = #tpu.pipeline_mode<synchronous>, transform_indices = @transform_1, window_bounds = array<i64: 1152, 64>}, {transform_indices = @transform_2, window_bounds = array<i64: 1, 16, 16, 64>}, {transform_indices = @transform_3, window_bounds = array<i64: 1, 1, 64>}, {transform_indices = @transform_4, window_bounds = array<i64: 1, 1, 64>}]} {
    %c0 = arith.constant 0 : index
    %c0_0 = arith.constant 0 : index
    %c0_1 = arith.constant 0 : index
    %c0_2 = arith.constant 0 : index
    %0 = vector.load %arg1[%c0, %c0_0, %c0_1, %c0_2] : memref<1x16x16x64xf32, #tpu.memory_space<vmem>>, vector<1x16x16x64xf32>
    %1 = vector.shape_cast %0 : vector<1x16x16x64xf32> to vector<16x16x64xf32>
    %cst = arith.constant 0.000000e+00 : f32
    %2 = vector.broadcast %cst : f32 to vector<18x18x128xf32>
    %c0_3 = arith.constant 0 : index
    %c0_4 = arith.constant 0 : index
    %c0_5 = arith.constant 0 : index
    %3 = vector.load %arg6[%c0_3, %c0_4, %c0_5] : memref<18x18x128xf32, #tpu.memory_space<vmem>>, vector<18x18x128xf32>
    tpu.vector_store %arg6[%c0_3, %c0_4, %c0_5], %2 {strides = array<i32>} : memref<18x18x128xf32, #tpu.memory_space<vmem>>, vector<18x18x128xf32>,
    %c1 = arith.constant 1 : index
    %c1_6 = arith.constant 1 : index
    %c0_7 = arith.constant 0 : index
    %4 = vector.load %arg6[%c1, %c1_6, %c0_7] : memref<18x18x128xf32, #tpu.memory_space<vmem>>, vector<16x16x64xf32>
    tpu.vector_store %arg6[%c1, %c1_6, %c0_7], %1 {strides = array<i32>} : memref<18x18x128xf32, #tpu.memory_space<vmem>>, vector<16x16x64xf32>,
    %c0_8 = arith.constant 0 : index
    %c0_9 = arith.constant 0 : index
    %c0_10 = arith.constant 0 : index
    %5 = vector.load %arg6[%c0_8, %c0_9, %c0_10] : memref<18x18x128xf32, #tpu.memory_space<vmem>>, vector<16x16x128xf32>
    %c0_11 = arith.constant 0 : index
    %c0_12 = arith.constant 0 : index
    %c0_13 = arith.constant 0 : index
    %6 = vector.load %arg7[%c0_11, %c0_12, %c0_13] : memref<16x16x1152xf32, #tpu.memory_space<vmem>>, vector<16x16x128xf32>
    tpu.vector_store %arg7[%c0_11, %c0_12, %c0_13], %5 {strides = array<i32>} : memref<16x16x1152xf32, #tpu.memory_space<vmem>>, vector<16x16x128xf32>,
    %c0_14 = arith.constant 0 : index
    %c1_15 = arith.constant 1 : index
    %c0_16 = arith.constant 0 : index
    %7 = vector.load %arg6[%c0_14, %c1_15, %c0_16] : memref<18x18x128xf32, #tpu.memory_space<vmem>>, vector<16x16x128xf32>
    %c0_17 = arith.constant 0 : index
    %c0_18 = arith.constant 0 : index
    %c128 = arith.constant 128 : index
    %8 = vector.load %arg7[%c0_17, %c0_18, %c128] : memref<16x16x1152xf32, #tpu.memory_space<vmem>>, vector<16x16x128xf32>
    tpu.vector_store %arg7[%c0_17, %c0_18, %c128], %7 {strides = array<i32>} : memref<16x16x1152xf32, #tpu.memory_space<vmem>>, vector<16x16x128xf32>,
    %c0_19 = arith.constant 0 : index
    %c2 = arith.constant 2 : index
    %c0_20 = arith.constant 0 : index
    %9 = vector.load %arg6[%c0_19, %c2, %c0_20] : memref<18x18x128xf32, #tpu.memory_space<vmem>>, vector<16x16x128xf32>
    %c0_21 = arith.constant 0 : index
    %c0_22 = arith.constant 0 : index
    %c256 = arith.constant 256 : index
    %10 = vector.load %arg7[%c0_21, %c0_22, %c256] : memref<16x16x1152xf32, #tpu.memory_space<vmem>>, vector<16x16x128xf32>
    tpu.vector_store %arg7[%c0_21, %c0_22, %c256], %9 {strides = array<i32>} : memref<16x16x1152xf32, #tpu.memory_space<vmem>>, vector<16x16x128xf32>,
    %c1_23 = arith.constant 1 : index
    %c0_24 = arith.constant 0 : index
    %c0_25 = arith.constant 0 : index
    %11 = vector.load %arg6[%c1_23, %c0_24, %c0_25] : memref<18x18x128xf32, #tpu.memory_space<vmem>>, vector<16x16x128xf32>
    %c0_26 = arith.constant 0 : index
    %c0_27 = arith.constant 0 : index
    %c384 = arith.constant 384 : index
    %12 = vector.load %arg7[%c0_26, %c0_27, %c384] : memref<16x16x1152xf32, #tpu.memory_space<vmem>>, vector<16x16x128xf32>
    tpu.vector_store %arg7[%c0_26, %c0_27, %c384], %11 {strides = array<i32>} : memref<16x16x1152xf32, #tpu.memory_space<vmem>>, vector<16x16x128xf32>,
    %c1_28 = arith.constant 1 : index
    %c1_29 = arith.constant 1 : index
    %c0_30 = arith.constant 0 : index
    %13 = vector.load %arg6[%c1_28, %c1_29, %c0_30] : memref<18x18x128xf32, #tpu.memory_space<vmem>>, vector<16x16x128xf32>
    %c0_31 = arith.constant 0 : index
    %c0_32 = arith.constant 0 : index
    %c512 = arith.constant 512 : index
    %14 = vector.load %arg7[%c0_31, %c0_32, %c512] : memref<16x16x1152xf32, #tpu.memory_space<vmem>>, vector<16x16x128xf32>
    tpu.vector_store %arg7[%c0_31, %c0_32, %c512], %13 {strides = array<i32>} : memref<16x16x1152xf32, #tpu.memory_space<vmem>>, vector<16x16x128xf32>,
    %c1_33 = arith.constant 1 : index
    %c2_34 = arith.constant 2 : index
    %c0_35 = arith.constant 0 : index
    %15 = vector.load %arg6[%c1_33, %c2_34, %c0_35] : memref<18x18x128xf32, #tpu.memory_space<vmem>>, vector<16x16x128xf32>
    %c0_36 = arith.constant 0 : index
    %c0_37 = arith.constant 0 : index
    %c640 = arith.constant 640 : index
    %16 = vector.load %arg7[%c0_36, %c0_37, %c640] : memref<16x16x1152xf32, #tpu.memory_space<vmem>>, vector<16x16x128xf32>
    tpu.vector_store %arg7[%c0_36, %c0_37, %c640], %15 {strides = array<i32>} : memref<16x16x1152xf32, #tpu.memory_space<vmem>>, vector<16x16x128xf32>,
    %c2_38 = arith.constant 2 : index
    %c0_39 = arith.constant 0 : index
    %c0_40 = arith.constant 0 : index
    %17 = vector.load %arg6[%c2_38, %c0_39, %c0_40] : memref<18x18x128xf32, #tpu.memory_space<vmem>>, vector<16x16x128xf32>
    %c0_41 = arith.constant 0 : index
    %c0_42 = arith.constant 0 : index
    %c768 = arith.constant 768 : index
    %18 = vector.load %arg7[%c0_41, %c0_42, %c768] : memref<16x16x1152xf32, #tpu.memory_space<vmem>>, vector<16x16x128xf32>
    tpu.vector_store %arg7[%c0_41, %c0_42, %c768], %17 {strides = array<i32>} : memref<16x16x1152xf32, #tpu.memory_space<vmem>>, vector<16x16x128xf32>,
    %c2_43 = arith.constant 2 : index
    %c1_44 = arith.constant 1 : index
    %c0_45 = arith.constant 0 : index
    %19 = vector.load %arg6[%c2_43, %c1_44, %c0_45] : memref<18x18x128xf32, #tpu.memory_space<vmem>>, vector<16x16x128xf32>
    %c0_46 = arith.constant 0 : index
    %c0_47 = arith.constant 0 : index
    %c896 = arith.constant 896 : index
    %20 = vector.load %arg7[%c0_46, %c0_47, %c896] : memref<16x16x1152xf32, #tpu.memory_space<vmem>>, vector<16x16x128xf32>
    tpu.vector_store %arg7[%c0_46, %c0_47, %c896], %19 {strides = array<i32>} : memref<16x16x1152xf32, #tpu.memory_space<vmem>>, vector<16x16x128xf32>,
    %c2_48 = arith.constant 2 : index
    %c2_49 = arith.constant 2 : index
    %c0_50 = arith.constant 0 : index
    %21 = vector.load %arg6[%c2_48, %c2_49, %c0_50] : memref<18x18x128xf32, #tpu.memory_space<vmem>>, vector<16x16x128xf32>
    %c0_51 = arith.constant 0 : index
    %c0_52 = arith.constant 0 : index
    %c1024 = arith.constant 1024 : index
    %22 = vector.load %arg7[%c0_51, %c0_52, %c1024] : memref<16x16x1152xf32, #tpu.memory_space<vmem>>, vector<16x16x128xf32>
    tpu.vector_store %arg7[%c0_51, %c0_52, %c1024], %21 {strides = array<i32>} : memref<16x16x1152xf32, #tpu.memory_space<vmem>>, vector<16x16x128xf32>,
    %c0_53 = arith.constant 0 : index
    %c0_54 = arith.constant 0 : index
    %c0_55 = arith.constant 0 : index
    %23 = vector.load %arg7[%c0_53, %c0_54, %c0_55] : memref<16x16x1152xf32, #tpu.memory_space<vmem>>, vector<16x16x1152xf32>
    %24 = vector.shape_cast %23 : vector<16x16x1152xf32> to vector<256x1152xf32>
    %c0_56 = arith.constant 0 : index
    %c0_57 = arith.constant 0 : index
    %25 = vector.load %arg2[%c0_56, %c0_57] : memref<1152x64xf32, #tpu.memory_space<vmem>>, vector<1152x64xf32>
    %cst_58 = arith.constant dense<0.000000e+00> : vector<256x64xf32>
    %26 = tpu.matmul %24, %25, %cst_58 {dimension_numbers = #tpu.dot_dimension_numbers<[1], [0], [0], [1], [0, 0, 1, 1], [], []>} : vector<256x1152xf32>, vector<1152x64xf32>, vector<256x64xf32> -> vector<256x64xf32>
    %cst_59 = arith.constant dense<0.000000e+00> : vector<64xf32>
    %27 = vector.multi_reduction <add>, %26, %cst_59 [0] : vector<256x64xf32> to vector<64xf32>
    %28 = vector.shape_cast %27 : vector<64xf32> to vector<1x64xf32>
    %29 = vector.shape_cast %28 : vector<1x64xf32> to vector<1x1x64xf32>
    %c0_60 = arith.constant 0 : index
    %c0_61 = arith.constant 0 : index
    %c0_62 = arith.constant 0 : index
    %30 = vector.load %arg4[%c0_60, %c0_61, %c0_62] : memref<1x1x64xf32, #tpu.memory_space<vmem>>, vector<1x1x64xf32>
    tpu.vector_store %arg4[%c0_60, %c0_61, %c0_62], %29 {strides = array<i32>} : memref<1x1x64xf32, #tpu.memory_space<vmem>>, vector<1x1x64xf32>,
    %31 = arith.mulf %26, %26 : vector<256x64xf32>
    %cst_63 = arith.constant dense<0.000000e+00> : vector<64xf32>
    %32 = vector.multi_reduction <add>, %31, %cst_63 [0] : vector<256x64xf32> to vector<64xf32>
    %33 = vector.shape_cast %32 : vector<64xf32> to vector<1x64xf32>
    %34 = vector.shape_cast %33 : vector<1x64xf32> to vector<1x1x64xf32>
    %c0_64 = arith.constant 0 : index
    %c0_65 = arith.constant 0 : index
    %c0_66 = arith.constant 0 : index
    %35 = vector.load %arg5[%c0_64, %c0_65, %c0_66] : memref<1x1x64xf32, #tpu.memory_space<vmem>>, vector<1x1x64xf32>
    tpu.vector_store %arg5[%c0_64, %c0_65, %c0_66], %34 {strides = array<i32>} : memref<1x1x64xf32, #tpu.memory_space<vmem>>, vector<1x1x64xf32>,
    %36 = vector.shape_cast %26 : vector<256x64xf32> to vector<1x16x16x64xf32>
    %c0_67 = arith.constant 0 : index
    %c0_68 = arith.constant 0 : index
    %c0_69 = arith.constant 0 : index
    %c0_70 = arith.constant 0 : index
    %37 = vector.load %arg3[%c0_67, %c0_68, %c0_69, %c0_70] : memref<1x16x16x64xf32, #tpu.memory_space<vmem>>, vector<1x16x16x64xf32>
    tpu.vector_store %arg3[%c0_67, %c0_68, %c0_69, %c0_70], %36 {strides = array<i32>} : memref<1x16x16x64xf32, #tpu.memory_space<vmem>>, vector<1x16x16x64xf32>,
    return
  }
  func.func @transform_0(%arg0: i32) -> (i32, i32, i32, i32) {
    %c0_i32 = arith.constant 0 : i32
    %c0_i32_0 = arith.constant 0 : i32
    %c0_i32_1 = arith.constant 0 : i32
    %c0_i32_2 = arith.constant 0 : i32
    return %arg0, %c0_i32, %c0_i32_0, %c0_i32_1 : i32, i32, i32, i32
  }
  func.func @transform_1(%arg0: i32) -> (i32, i32) {
    %c0_i32 = arith.constant 0 : i32
    %c0_i32_0 = arith.constant 0 : i32
    %c0_i32_1 = arith.constant 0 : i32
    return %c0_i32, %c0_i32_0 : i32, i32
  }
  func.func @transform_2(%arg0: i32) -> (i32, i32, i32, i32) {
    %c0_i32 = arith.constant 0 : i32
    %c0_i32_0 = arith.constant 0 : i32
    %c0_i32_1 = arith.constant 0 : i32
    %c0_i32_2 = arith.constant 0 : i32
    return %arg0, %c0_i32, %c0_i32_0, %c0_i32_1 : i32, i32, i32, i32
  }
  func.func @transform_3(%arg0: i32) -> (i32, i32, i32) {
    %c0_i32 = arith.constant 0 : i32
    %c0_i32_0 = arith.constant 0 : i32
    %c0_i32_1 = arith.constant 0 : i32
    return %arg0, %c0_i32, %c0_i32_0 : i32, i32, i32
  }
  func.func @transform_4(%arg0: i32) -> (i32, i32, i32) {
    %c0_i32 = arith.constant 0 : i32
    %c0_i32_0 = arith.constant 0 : i32
    %c0_i32_1 = arith.constant 0 : i32
    return %arg0, %c0_i32, %c0_i32_0 : i32, i32, i32
  }
}

module attributes {stable_mosaic.version = 11 : i64} {
  func.func @kernel(%arg0: i32, %arg1: memref<1x16x16x64xf32, #tpu.memory_space<vmem>>, %arg2: memref<1152x64xf32, #tpu.memory_space<vmem>>, %arg3: memref<1x64xf32, #tpu.memory_space<vmem>>, %arg4: memref<1x64xf32, #tpu.memory_space<vmem>>, %arg5: memref<1x16x16x64xf32, #tpu.memory_space<vmem>>, %arg6: memref<1x1x64xf32, #tpu.memory_space<vmem>>, %arg7: memref<1x1x64xf32, #tpu.memory_space<vmem>>, %arg8: memref<18x18x128xf32, #tpu.memory_space<vmem>>, %arg9: memref<16x16x1152xf32, #tpu.memory_space<vmem>>) attributes {dimension_semantics = [#tpu.dimension_semantics<parallel>], iteration_bounds = array<i64: 2>, scalar_prefetch = 0 : i64, scratch_operands = 2 : i64, tpu.core_type = #tpu.core_type<tc>, window_params = [{transform_indices = @transform_0, window_bounds = array<i64: 1, 16, 16, 64>}, {pipeline_mode = #tpu.pipeline_mode<synchronous>, transform_indices = @transform_1, window_bounds = array<i64: 1152, 64>}, {pipeline_mode = #tpu.pipeline_mode<synchronous>, transform_indices = @transform_2, window_bounds = array<i64: 1, 64>}, {pipeline_mode = #tpu.pipeline_mode<synchronous>, transform_indices = @transform_3, window_bounds = array<i64: 1, 64>}, {transform_indices = @transform_4, window_bounds = array<i64: 1, 16, 16, 64>}, {transform_indices = @transform_5, window_bounds = array<i64: 1, 1, 64>}, {transform_indices = @transform_6, window_bounds = array<i64: 1, 1, 64>}]} {
    %c0 = arith.constant 0 : index
    %c0_0 = arith.constant 0 : index
    %c0_1 = arith.constant 0 : index
    %c0_2 = arith.constant 0 : index
    %0 = vector.load %arg1[%c0, %c0_0, %c0_1, %c0_2] : memref<1x16x16x64xf32, #tpu.memory_space<vmem>>, vector<1x16x16x64xf32>
    %1 = vector.shape_cast %0 : vector<1x16x16x64xf32> to vector<16x16x64xf32>
    %c0_3 = arith.constant 0 : index
    %c0_4 = arith.constant 0 : index
    %2 = vector.load %arg3[%c0_3, %c0_4] : memref<1x64xf32, #tpu.memory_space<vmem>>, vector<1x64xf32>
    %3 = vector.shape_cast %2 : vector<1x64xf32> to vector<1x1x64xf32>
    %4 = vector.broadcast %3 : vector<1x1x64xf32> to vector<16x16x64xf32>
    %5 = arith.mulf %1, %4 : vector<16x16x64xf32>
    %c0_5 = arith.constant 0 : index
    %c0_6 = arith.constant 0 : index
    %6 = vector.load %arg4[%c0_5, %c0_6] : memref<1x64xf32, #tpu.memory_space<vmem>>, vector<1x64xf32>
    %7 = vector.shape_cast %6 : vector<1x64xf32> to vector<1x1x64xf32>
    %8 = vector.broadcast %7 : vector<1x1x64xf32> to vector<16x16x64xf32>
    %9 = arith.addf %5, %8 : vector<16x16x64xf32>
    %cst = arith.constant 0.000000e+00 : f32
    %10 = vector.broadcast %cst : f32 to vector<16x16x64xf32>
    %11 = arith.maximumf %9, %10 : vector<16x16x64xf32>
    %cst_7 = arith.constant 0.000000e+00 : f32
    %12 = vector.broadcast %cst_7 : f32 to vector<18x18x128xf32>
    %c0_8 = arith.constant 0 : index
    %c0_9 = arith.constant 0 : index
    %c0_10 = arith.constant 0 : index
    %13 = vector.load %arg8[%c0_8, %c0_9, %c0_10] : memref<18x18x128xf32, #tpu.memory_space<vmem>>, vector<18x18x128xf32>
    tpu.vector_store %arg8[%c0_8, %c0_9, %c0_10], %12 {strides = array<i32>} : memref<18x18x128xf32, #tpu.memory_space<vmem>>, vector<18x18x128xf32>,
    %c1 = arith.constant 1 : index
    %c1_11 = arith.constant 1 : index
    %c0_12 = arith.constant 0 : index
    %14 = vector.load %arg8[%c1, %c1_11, %c0_12] : memref<18x18x128xf32, #tpu.memory_space<vmem>>, vector<16x16x64xf32>
    tpu.vector_store %arg8[%c1, %c1_11, %c0_12], %11 {strides = array<i32>} : memref<18x18x128xf32, #tpu.memory_space<vmem>>, vector<16x16x64xf32>,
    %c0_13 = arith.constant 0 : index
    %c0_14 = arith.constant 0 : index
    %c0_15 = arith.constant 0 : index
    %15 = vector.load %arg8[%c0_13, %c0_14, %c0_15] : memref<18x18x128xf32, #tpu.memory_space<vmem>>, vector<16x16x128xf32>
    %c0_16 = arith.constant 0 : index
    %c0_17 = arith.constant 0 : index
    %c0_18 = arith.constant 0 : index
    %16 = vector.load %arg9[%c0_16, %c0_17, %c0_18] : memref<16x16x1152xf32, #tpu.memory_space<vmem>>, vector<16x16x128xf32>
    tpu.vector_store %arg9[%c0_16, %c0_17, %c0_18], %15 {strides = array<i32>} : memref<16x16x1152xf32, #tpu.memory_space<vmem>>, vector<16x16x128xf32>,
    %c0_19 = arith.constant 0 : index
    %c1_20 = arith.constant 1 : index
    %c0_21 = arith.constant 0 : index
    %17 = vector.load %arg8[%c0_19, %c1_20, %c0_21] : memref<18x18x128xf32, #tpu.memory_space<vmem>>, vector<16x16x128xf32>
    %c0_22 = arith.constant 0 : index
    %c0_23 = arith.constant 0 : index
    %c128 = arith.constant 128 : index
    %18 = vector.load %arg9[%c0_22, %c0_23, %c128] : memref<16x16x1152xf32, #tpu.memory_space<vmem>>, vector<16x16x128xf32>
    tpu.vector_store %arg9[%c0_22, %c0_23, %c128], %17 {strides = array<i32>} : memref<16x16x1152xf32, #tpu.memory_space<vmem>>, vector<16x16x128xf32>,
    %c0_24 = arith.constant 0 : index
    %c2 = arith.constant 2 : index
    %c0_25 = arith.constant 0 : index
    %19 = vector.load %arg8[%c0_24, %c2, %c0_25] : memref<18x18x128xf32, #tpu.memory_space<vmem>>, vector<16x16x128xf32>
    %c0_26 = arith.constant 0 : index
    %c0_27 = arith.constant 0 : index
    %c256 = arith.constant 256 : index
    %20 = vector.load %arg9[%c0_26, %c0_27, %c256] : memref<16x16x1152xf32, #tpu.memory_space<vmem>>, vector<16x16x128xf32>
    tpu.vector_store %arg9[%c0_26, %c0_27, %c256], %19 {strides = array<i32>} : memref<16x16x1152xf32, #tpu.memory_space<vmem>>, vector<16x16x128xf32>,
    %c1_28 = arith.constant 1 : index
    %c0_29 = arith.constant 0 : index
    %c0_30 = arith.constant 0 : index
    %21 = vector.load %arg8[%c1_28, %c0_29, %c0_30] : memref<18x18x128xf32, #tpu.memory_space<vmem>>, vector<16x16x128xf32>
    %c0_31 = arith.constant 0 : index
    %c0_32 = arith.constant 0 : index
    %c384 = arith.constant 384 : index
    %22 = vector.load %arg9[%c0_31, %c0_32, %c384] : memref<16x16x1152xf32, #tpu.memory_space<vmem>>, vector<16x16x128xf32>
    tpu.vector_store %arg9[%c0_31, %c0_32, %c384], %21 {strides = array<i32>} : memref<16x16x1152xf32, #tpu.memory_space<vmem>>, vector<16x16x128xf32>,
    %c1_33 = arith.constant 1 : index
    %c1_34 = arith.constant 1 : index
    %c0_35 = arith.constant 0 : index
    %23 = vector.load %arg8[%c1_33, %c1_34, %c0_35] : memref<18x18x128xf32, #tpu.memory_space<vmem>>, vector<16x16x128xf32>
    %c0_36 = arith.constant 0 : index
    %c0_37 = arith.constant 0 : index
    %c512 = arith.constant 512 : index
    %24 = vector.load %arg9[%c0_36, %c0_37, %c512] : memref<16x16x1152xf32, #tpu.memory_space<vmem>>, vector<16x16x128xf32>
    tpu.vector_store %arg9[%c0_36, %c0_37, %c512], %23 {strides = array<i32>} : memref<16x16x1152xf32, #tpu.memory_space<vmem>>, vector<16x16x128xf32>,
    %c1_38 = arith.constant 1 : index
    %c2_39 = arith.constant 2 : index
    %c0_40 = arith.constant 0 : index
    %25 = vector.load %arg8[%c1_38, %c2_39, %c0_40] : memref<18x18x128xf32, #tpu.memory_space<vmem>>, vector<16x16x128xf32>
    %c0_41 = arith.constant 0 : index
    %c0_42 = arith.constant 0 : index
    %c640 = arith.constant 640 : index
    %26 = vector.load %arg9[%c0_41, %c0_42, %c640] : memref<16x16x1152xf32, #tpu.memory_space<vmem>>, vector<16x16x128xf32>
    tpu.vector_store %arg9[%c0_41, %c0_42, %c640], %25 {strides = array<i32>} : memref<16x16x1152xf32, #tpu.memory_space<vmem>>, vector<16x16x128xf32>,
    %c2_43 = arith.constant 2 : index
    %c0_44 = arith.constant 0 : index
    %c0_45 = arith.constant 0 : index
    %27 = vector.load %arg8[%c2_43, %c0_44, %c0_45] : memref<18x18x128xf32, #tpu.memory_space<vmem>>, vector<16x16x128xf32>
    %c0_46 = arith.constant 0 : index
    %c0_47 = arith.constant 0 : index
    %c768 = arith.constant 768 : index
    %28 = vector.load %arg9[%c0_46, %c0_47, %c768] : memref<16x16x1152xf32, #tpu.memory_space<vmem>>, vector<16x16x128xf32>
    tpu.vector_store %arg9[%c0_46, %c0_47, %c768], %27 {strides = array<i32>} : memref<16x16x1152xf32, #tpu.memory_space<vmem>>, vector<16x16x128xf32>,
    %c2_48 = arith.constant 2 : index
    %c1_49 = arith.constant 1 : index
    %c0_50 = arith.constant 0 : index
    %29 = vector.load %arg8[%c2_48, %c1_49, %c0_50] : memref<18x18x128xf32, #tpu.memory_space<vmem>>, vector<16x16x128xf32>
    %c0_51 = arith.constant 0 : index
    %c0_52 = arith.constant 0 : index
    %c896 = arith.constant 896 : index
    %30 = vector.load %arg9[%c0_51, %c0_52, %c896] : memref<16x16x1152xf32, #tpu.memory_space<vmem>>, vector<16x16x128xf32>
    tpu.vector_store %arg9[%c0_51, %c0_52, %c896], %29 {strides = array<i32>} : memref<16x16x1152xf32, #tpu.memory_space<vmem>>, vector<16x16x128xf32>,
    %c2_53 = arith.constant 2 : index
    %c2_54 = arith.constant 2 : index
    %c0_55 = arith.constant 0 : index
    %31 = vector.load %arg8[%c2_53, %c2_54, %c0_55] : memref<18x18x128xf32, #tpu.memory_space<vmem>>, vector<16x16x128xf32>
    %c0_56 = arith.constant 0 : index
    %c0_57 = arith.constant 0 : index
    %c1024 = arith.constant 1024 : index
    %32 = vector.load %arg9[%c0_56, %c0_57, %c1024] : memref<16x16x1152xf32, #tpu.memory_space<vmem>>, vector<16x16x128xf32>
    tpu.vector_store %arg9[%c0_56, %c0_57, %c1024], %31 {strides = array<i32>} : memref<16x16x1152xf32, #tpu.memory_space<vmem>>, vector<16x16x128xf32>,
    %c0_58 = arith.constant 0 : index
    %c0_59 = arith.constant 0 : index
    %c0_60 = arith.constant 0 : index
    %33 = vector.load %arg9[%c0_58, %c0_59, %c0_60] : memref<16x16x1152xf32, #tpu.memory_space<vmem>>, vector<16x16x1152xf32>
    %34 = vector.shape_cast %33 : vector<16x16x1152xf32> to vector<256x1152xf32>
    %c0_61 = arith.constant 0 : index
    %c0_62 = arith.constant 0 : index
    %35 = vector.load %arg2[%c0_61, %c0_62] : memref<1152x64xf32, #tpu.memory_space<vmem>>, vector<1152x64xf32>
    %cst_63 = arith.constant dense<0.000000e+00> : vector<256x64xf32>
    %36 = tpu.matmul %34, %35, %cst_63 {dimension_numbers = #tpu.dot_dimension_numbers<[1], [0], [0], [1], [0, 0, 1, 1], [], []>} : vector<256x1152xf32>, vector<1152x64xf32>, vector<256x64xf32> -> vector<256x64xf32>
    %cst_64 = arith.constant dense<0.000000e+00> : vector<64xf32>
    %37 = vector.multi_reduction <add>, %36, %cst_64 [0] : vector<256x64xf32> to vector<64xf32>
    %38 = vector.shape_cast %37 : vector<64xf32> to vector<1x64xf32>
    %39 = vector.shape_cast %38 : vector<1x64xf32> to vector<1x1x64xf32>
    %c0_65 = arith.constant 0 : index
    %c0_66 = arith.constant 0 : index
    %c0_67 = arith.constant 0 : index
    %40 = vector.load %arg6[%c0_65, %c0_66, %c0_67] : memref<1x1x64xf32, #tpu.memory_space<vmem>>, vector<1x1x64xf32>
    tpu.vector_store %arg6[%c0_65, %c0_66, %c0_67], %39 {strides = array<i32>} : memref<1x1x64xf32, #tpu.memory_space<vmem>>, vector<1x1x64xf32>,
    %41 = arith.mulf %36, %36 : vector<256x64xf32>
    %cst_68 = arith.constant dense<0.000000e+00> : vector<64xf32>
    %42 = vector.multi_reduction <add>, %41, %cst_68 [0] : vector<256x64xf32> to vector<64xf32>
    %43 = vector.shape_cast %42 : vector<64xf32> to vector<1x64xf32>
    %44 = vector.shape_cast %43 : vector<1x64xf32> to vector<1x1x64xf32>
    %c0_69 = arith.constant 0 : index
    %c0_70 = arith.constant 0 : index
    %c0_71 = arith.constant 0 : index
    %45 = vector.load %arg7[%c0_69, %c0_70, %c0_71] : memref<1x1x64xf32, #tpu.memory_space<vmem>>, vector<1x1x64xf32>
    tpu.vector_store %arg7[%c0_69, %c0_70, %c0_71], %44 {strides = array<i32>} : memref<1x1x64xf32, #tpu.memory_space<vmem>>, vector<1x1x64xf32>,
    %46 = vector.shape_cast %36 : vector<256x64xf32> to vector<1x16x16x64xf32>
    %c0_72 = arith.constant 0 : index
    %c0_73 = arith.constant 0 : index
    %c0_74 = arith.constant 0 : index
    %c0_75 = arith.constant 0 : index
    %47 = vector.load %arg5[%c0_72, %c0_73, %c0_74, %c0_75] : memref<1x16x16x64xf32, #tpu.memory_space<vmem>>, vector<1x16x16x64xf32>
    tpu.vector_store %arg5[%c0_72, %c0_73, %c0_74, %c0_75], %46 {strides = array<i32>} : memref<1x16x16x64xf32, #tpu.memory_space<vmem>>, vector<1x16x16x64xf32>,
    return
  }
  func.func @transform_0(%arg0: i32) -> (i32, i32, i32, i32) {
    %c0_i32 = arith.constant 0 : i32
    %c0_i32_0 = arith.constant 0 : i32
    %c0_i32_1 = arith.constant 0 : i32
    %c0_i32_2 = arith.constant 0 : i32
    return %arg0, %c0_i32, %c0_i32_0, %c0_i32_1 : i32, i32, i32, i32
  }
  func.func @transform_1(%arg0: i32) -> (i32, i32) {
    %c0_i32 = arith.constant 0 : i32
    %c0_i32_0 = arith.constant 0 : i32
    %c0_i32_1 = arith.constant 0 : i32
    return %c0_i32, %c0_i32_0 : i32, i32
  }
  func.func @transform_2(%arg0: i32) -> (i32, i32) {
    %c0_i32 = arith.constant 0 : i32
    %c0_i32_0 = arith.constant 0 : i32
    %c0_i32_1 = arith.constant 0 : i32
    return %c0_i32, %c0_i32_0 : i32, i32
  }
  func.func @transform_3(%arg0: i32) -> (i32, i32) {
    %c0_i32 = arith.constant 0 : i32
    %c0_i32_0 = arith.constant 0 : i32
    %c0_i32_1 = arith.constant 0 : i32
    return %c0_i32, %c0_i32_0 : i32, i32
  }
  func.func @transform_4(%arg0: i32) -> (i32, i32, i32, i32) {
    %c0_i32 = arith.constant 0 : i32
    %c0_i32_0 = arith.constant 0 : i32
    %c0_i32_1 = arith.constant 0 : i32
    %c0_i32_2 = arith.constant 0 : i32
    return %arg0, %c0_i32, %c0_i32_0, %c0_i32_1 : i32, i32, i32, i32
  }
  func.func @transform_5(%arg0: i32) -> (i32, i32, i32) {
    %c0_i32 = arith.constant 0 : i32
    %c0_i32_0 = arith.constant 0 : i32
    %c0_i32_1 = arith.constant 0 : i32
    return %arg0, %c0_i32, %c0_i32_0 : i32, i32, i32
  }
  func.func @transform_6(%arg0: i32) -> (i32, i32, i32) {
    %c0_i32 = arith.constant 0 : i32
    %c0_i32_0 = arith.constant 0 : i32
    %c0_i32_1 = arith.constant 0 : i32
    return %arg0, %c0_i32, %c0_i32_0 : i32, i32, i32
  }
}

module attributes {stable_mosaic.version = 11 : i64} {
  func.func @_bn_add_relu_kernel(%arg0: i32, %arg1: memref<1x16x1024xf32, #tpu.memory_space<vmem>>, %arg2: memref<1x16x1024xf32, #tpu.memory_space<vmem>>, %arg3: memref<1x1024xf32, #tpu.memory_space<vmem>>, %arg4: memref<1x1024xf32, #tpu.memory_space<vmem>>, %arg5: memref<1x16x1024xf32, #tpu.memory_space<vmem>>) attributes {dimension_semantics = [#tpu.dimension_semantics<parallel>], iteration_bounds = array<i64: 2>, scalar_prefetch = 0 : i64, scratch_operands = 0 : i64, tpu.core_type = #tpu.core_type<tc>, window_params = [{transform_indices = @transform_0, window_bounds = array<i64: 1, 16, 1024>}, {transform_indices = @transform_1, window_bounds = array<i64: 1, 16, 1024>}, {pipeline_mode = #tpu.pipeline_mode<synchronous>, transform_indices = @transform_2, window_bounds = array<i64: 1, 1024>}, {pipeline_mode = #tpu.pipeline_mode<synchronous>, transform_indices = @transform_3, window_bounds = array<i64: 1, 1024>}, {transform_indices = @transform_4, window_bounds = array<i64: 1, 16, 1024>}]} {
    %c0 = arith.constant 0 : index
    %c0_0 = arith.constant 0 : index
    %c0_1 = arith.constant 0 : index
    %0 = vector.load %arg1[%c0, %c0_0, %c0_1] : memref<1x16x1024xf32, #tpu.memory_space<vmem>>, vector<1x16x1024xf32>
    %c0_2 = arith.constant 0 : index
    %c0_3 = arith.constant 0 : index
    %1 = vector.load %arg3[%c0_2, %c0_3] : memref<1x1024xf32, #tpu.memory_space<vmem>>, vector<1x1024xf32>
    %2 = vector.shape_cast %1 : vector<1x1024xf32> to vector<1x1x1024xf32>
    %3 = vector.broadcast %2 : vector<1x1x1024xf32> to vector<1x16x1024xf32>
    %4 = arith.mulf %0, %3 : vector<1x16x1024xf32>
    %c0_4 = arith.constant 0 : index
    %c0_5 = arith.constant 0 : index
    %5 = vector.load %arg4[%c0_4, %c0_5] : memref<1x1024xf32, #tpu.memory_space<vmem>>, vector<1x1024xf32>
    %6 = vector.shape_cast %5 : vector<1x1024xf32> to vector<1x1x1024xf32>
    %7 = vector.broadcast %6 : vector<1x1x1024xf32> to vector<1x16x1024xf32>
    %8 = arith.addf %4, %7 : vector<1x16x1024xf32>
    %c0_6 = arith.constant 0 : index
    %c0_7 = arith.constant 0 : index
    %c0_8 = arith.constant 0 : index
    %9 = vector.load %arg2[%c0_6, %c0_7, %c0_8] : memref<1x16x1024xf32, #tpu.memory_space<vmem>>, vector<1x16x1024xf32>
    %10 = arith.addf %8, %9 : vector<1x16x1024xf32>
    %cst = arith.constant 0.000000e+00 : f32
    %11 = vector.broadcast %cst : f32 to vector<1x16x1024xf32>
    %12 = arith.maximumf %10, %11 : vector<1x16x1024xf32>
    %c0_9 = arith.constant 0 : index
    %c0_10 = arith.constant 0 : index
    %c0_11 = arith.constant 0 : index
    %13 = vector.load %arg5[%c0_9, %c0_10, %c0_11] : memref<1x16x1024xf32, #tpu.memory_space<vmem>>, vector<1x16x1024xf32>
    tpu.vector_store %arg5[%c0_9, %c0_10, %c0_11], %12 {strides = array<i32>} : memref<1x16x1024xf32, #tpu.memory_space<vmem>>, vector<1x16x1024xf32>,
    return
  }
  func.func @transform_0(%arg0: i32) -> (i32, i32, i32) {
    %c0_i32 = arith.constant 0 : i32
    %c0_i32_0 = arith.constant 0 : i32
    %c0_i32_1 = arith.constant 0 : i32
    return %arg0, %c0_i32, %c0_i32_0 : i32, i32, i32
  }
  func.func @transform_1(%arg0: i32) -> (i32, i32, i32) {
    %c0_i32 = arith.constant 0 : i32
    %c0_i32_0 = arith.constant 0 : i32
    %c0_i32_1 = arith.constant 0 : i32
    return %arg0, %c0_i32, %c0_i32_0 : i32, i32, i32
  }
  func.func @transform_2(%arg0: i32) -> (i32, i32) {
    %c0_i32 = arith.constant 0 : i32
    %c0_i32_0 = arith.constant 0 : i32
    %c0_i32_1 = arith.constant 0 : i32
    return %c0_i32, %c0_i32_0 : i32, i32
  }
  func.func @transform_3(%arg0: i32) -> (i32, i32) {
    %c0_i32 = arith.constant 0 : i32
    %c0_i32_0 = arith.constant 0 : i32
    %c0_i32_1 = arith.constant 0 : i32
    return %c0_i32, %c0_i32_0 : i32, i32
  }
  func.func @transform_4(%arg0: i32) -> (i32, i32, i32) {
    %c0_i32 = arith.constant 0 : i32
    %c0_i32_0 = arith.constant 0 : i32
    %c0_i32_1 = arith.constant 0 : i32
    return %arg0, %c0_i32, %c0_i32_0 : i32, i32, i32
  }
}

</mosaic_0001>

<bundles_post_ra>
// kernel: tile.23
= control target key start
LH: loop header
LB: loop body
LE: loop exit
PB: predicated region body
PF: predicated region fallthrough
CT: control target
= control target key end

     0   :  { %s28_s0 = inlined_call_operand.vmem [shape: f32[4], index: 0, kind: input, shape index: {}]   ;;  %s29_s1 = inlined_call_operand.vmem [shape: f32[16,4], index: 1, kind: output, shape index: {}]  }
   0x1   :  { %v4_v0 = vld [vmem:[%s28_s0] ss:$0 sm:$0xff] }
   0x2   :  { %5 = vst [vmem:[%s29_s1] sm:$0xff] %v4_v0  ;;  %8 = vst [vmem:[%s29_s1 + $0x8] sm:$0xff] %v4_v0 }

// kernel: tile.28
= control target key start
LH: loop header
LB: loop body
LE: loop exit
PB: predicated region body
PF: predicated region fallthrough
CT: control target
= control target key end

     0   :  { %s131_s10 = smov 60   ;;  %s132_s11 = smov 52   ;;  %vm3_vm0 = vcmask 31744   ;;  %vm9_vm1 = vcmask 523744   ;;  %vm15_vm2 = vcmask 490944   ;;  %vm21_vm3 = vcmask 458144   ;;  %s207_s0 = inlined_call_operand.vmem [shape: f32[16,4], index: 0, kind: input, shape index: {}]   ;;  %s208_s1 = inlined_call_operand.vmem [shape: f32[1,64], index: 1, kind: output, shape index: {}]  }
   0x1   :  { %v101_v0 = vld [vmem:[%s207_s0 + $0xf] sm:$0x1]   ;;  %v103_v1 = vld [vmem:[%s207_s0 + $0xd] sm:$0x1]   ;;  %v102_v2 = vld [vmem:[%s207_s0 + $0xe] sm:$0x1]  }
   0x2   :  { %7 = vrot.lane.b32.xlu0 %v101_v0, %s131_s10  ;;  %19 = vrot.lane.b32.xlu1 %v103_v1, %s132_s11  ;;  %v104_v3 = vld [vmem:[%s207_s0 + $0xc] sm:$0x1]   ;;  %s133_s16 = smov 56   ;;  %s134_s17 = smov 48   ;;  %v105_v4 = vld [vmem:[%s207_s0 + $0xb] sm:$0x1]  }
   0x3   :  { %v106_v5 = vld [vmem:[%s207_s0 + $0xa] sm:$0x1]   ;;  %v2_v6 = vld [vmem:[%s207_s0] sm:$0x1]   ;;  %s135_s24 = smov 44   ;;  %s136_s25 = smov 40  }
   0x4   :  { %4 = vst.msk [vmem:[#allocation0] sm:$0x1] %vm3_vm0, %v2_v6   ;;  %v107_v7 = vld [vmem:[%s207_s0 + $0x9] sm:$0x1]   ;;  %v108_v8 = vld [vmem:[%s207_s0 + $0x8] sm:$0x1]  }
   0x5   :  { %s137_s30 = smov 36   ;;  %s138_s2 = smov 32   ;;  %v109_v9 = vld [vmem:[%s207_s0 + $0x7] sm:$0x1]   ;;  %v110_v10 = vld [vmem:[%s207_s0 + $0x6] sm:$0x1]  }
   0x6   :  { %13 = vrot.lane.b32.xlu0 %v102_v2, %s133_s16  ;;  %25 = vrot.lane.b32.xlu1 %v104_v3, %s134_s17  ;;  %s139_s7 = smov 28   ;;  %s140_s8 = smov 24   ;;  %v111_v11 = vld [vmem:[%s207_s0 + $0x5] sm:$0x1]   ;;  %v112_v12 = vld [vmem:[%s207_s0 + $0x4] sm:$0x1]  }
   0x7   :  { %s141_s13 = smov 20   ;;  %s142_s14 = smov 16   ;;  %v113_v13 = vld [vmem:[%s207_s0 + $0x3] sm:$0x1]   ;;  %v114_v14 = vld [vmem:[%s207_s0 + $0x2] sm:$0x1]  }
   0x8   :  { %s143_s19 = smov 12   ;;  %s144_s20 = smov 8   ;;  %v115_v15 = vld [vmem:[%s207_s0 + $0x1] sm:$0x1]   ;;  %vm27_vm4 = vcmask 425344   ;;  %vm33_vm5 = vcmask 392544  }
   0x9   :  { %s145_s0 = smov 4   ;;  %vm39_vm6 = vcmask 359744   ;;  %vm45_vm7 = vcmask 326944   ;;  %vm51_vm8 = vcmask 294144   ;;  %vm57_vm9 = vcmask 261344  }
   0xa   :  { %31 = vrot.lane.b32.xlu0 %v105_v4, %s135_s24  ;;  %37 = vrot.lane.b32.xlu1 %v106_v5, %s136_s25  ;;  %vm63_vm10 = vcmask 228544   ;;  %vm69_vm11 = vcmask 195744   ;;  %vm75_vm12 = vcmask 162944   ;;  %vm81_vm13 = vcmask 130144  }
   0xb   :  { %vm87_vm14 = vcmask 97344   ;;  %vm93_vm15 = vcmask 64544  }
   0xe   :  { %43 = vrot.lane.b32.xlu0 %v107_v7, %s137_s30  ;;  %49 = vrot.lane.b32.xlu1 %v108_v8, %s138_s2 }
  0x12   :  { %55 = vrot.lane.b32.xlu0 %v109_v9, %s139_s7  ;;  %61 = vrot.lane.b32.xlu1 %v110_v10, %s140_s8 }
  0x16   :  { %67 = vrot.lane.b32.xlu0 %v111_v11, %s141_s13  ;;  %73 = vrot.lane.b32.xlu1 %v112_v12, %s142_s14 }
  0x1a   :  { %79 = vrot.lane.b32.xlu0 %v113_v13, %s143_s19  ;;  %85 = vrot.lane.b32.xlu1 %v114_v14, %s144_s20 }
  0x1e   :  { %91 = vrot.lane.b32.xlu0 %v115_v15, %s145_s0 }
  0x74   :  { %v8_v16 = vpop.permute.xlu0 %7   ;;  %v20_v17 = vpop.permute.xlu1 %19  }
  0x75   :  { %10 = vst.msk [vmem:[#allocation0] sm:$0x1] %vm9_vm1, %v8_v16  }
  0x78   :  { %v14_v18 = vpop.permute.xlu0 %13   ;;  %v26_v19 = vpop.permute.xlu1 %25  }
  0x79   :  { %16 = vst.msk [vmem:[#allocation0] sm:$0x1] %vm15_vm2, %v14_v18  }
  0x7a   :  { %22 = vst.msk [vmem:[#allocation0] sm:$0x1] %vm21_vm3, %v20_v17  }
  0x7b   :  { %28 = vst.msk [vmem:[#allocation0] sm:$0x1] %vm27_vm4, %v26_v19  }
  0x7c   :  { %v32_v20 = vpop.permute.xlu0 %31   ;;  %v38_v21 = vpop.permute.xlu1 %37  }
  0x7d   :  { %34 = vst.msk [vmem:[#allocation0] sm:$0x1] %vm33_vm5, %v32_v20  }
  0x7e   :  { %40 = vst.msk [vmem:[#allocation0] sm:$0x1] %vm39_vm6, %v38_v21  }
  0x80   :  { %v44_v22 = vpop.permute.xlu0 %43   ;;  %v50_v23 = vpop.permute.xlu1 %49  }
  0x81   :  { %46 = vst.msk [vmem:[#allocation0] sm:$0x1] %vm45_vm7, %v44_v22  }
  0x82   :  { %52 = vst.msk [vmem:[#allocation0] sm:$0x1] %vm51_vm8, %v50_v23  }
  0x84   :  { %v56_v24 = vpop.permute.xlu0 %55   ;;  %v62_v25 = vpop.permute.xlu1 %61  }
  0x85   :  { %58 = vst.msk [vmem:[#allocation0] sm:$0x1] %vm57_vm9, %v56_v24  }
  0x86   :  { %64 = vst.msk [vmem:[#allocation0] sm:$0x1] %vm63_vm10, %v62_v25  }
  0x88   :  { %v68_v26 = vpop.permute.xlu0 %67   ;;  %v74_v27 = vpop.permute.xlu1 %73  }
  0x89   :  { %70 = vst.msk [vmem:[#allocation0] sm:$0x1] %vm69_vm11, %v68_v26  }
  0x8a   :  { %76 = vst.msk [vmem:[#allocation0] sm:$0x1] %vm75_vm12, %v74_v27  }
  0x8c   :  { %v80_v28 = vpop.permute.xlu0 %79   ;;  %v86_v29 = vpop.permute.xlu1 %85  }
  0x8d   :  { %82 = vst.msk [vmem:[#allocation0] sm:$0x1] %vm81_vm13, %v80_v28  }
  0x8e   :  { %88 = vst.msk [vmem:[#allocation0] sm:$0x1] %vm87_vm14, %v86_v29  }
  0x90   :  { %v92_v30 = vpop.permute.xlu0 %91  }
  0x91   :  { %94 = vst.msk [vmem:[#allocation0] sm:$0x1] %vm93_vm15, %v92_v30  }
  0x98   :  { %v98_v31 = vld [vmem:[#allocation0] sm:$0x1] }
  0x99   :  { %100 = vst [vmem:[%s208_s1] sm:$0x1] %v98_v31 }

// kernel: tile.33
= control target key start
LH: loop header
LB: loop body
LE: loop exit
PB: predicated region body
PF: predicated region fallthrough
CT: control target
= control target key end

     0   :  { %s208_s0 = inlined_call_operand.vmem [shape: f32[4], index: 0, kind: input, shape index: {}]   ;;  %s209_s1 = inlined_call_operand.vmem [shape: f32[256,4], index: 1, kind: output, shape index: {}]  }
   0x1   :  { %v4_v0 = vld [vmem:[%s208_s0] ss:$0 sm:$0xff] }
   0x2   :  { %5 = vst [vmem:[%s209_s1] sm:$0xff] %v4_v0  ;;  %68 = vst [vmem:[%s209_s1 + $0x8] sm:$0xff] %v4_v0 }
   0x3   :  { %69 = vst [vmem:[%s209_s1 + $0x10] sm:$0xff] %v4_v0  ;;  %70 = vst [vmem:[%s209_s1 + $0x18] sm:$0xff] %v4_v0 }
   0x4   :  { %71 = vst [vmem:[%s209_s1 + $0x20] sm:$0xff] %v4_v0  ;;  %72 = vst [vmem:[%s209_s1 + $0x28] sm:$0xff] %v4_v0 }
   0x5   :  { %73 = vst [vmem:[%s209_s1 + $0x30] sm:$0xff] %v4_v0  ;;  %74 = vst [vmem:[%s209_s1 + $0x38] sm:$0xff] %v4_v0 }
   0x6   :  { %75 = vst [vmem:[%s209_s1 + $0x40] sm:$0xff] %v4_v0  ;;  %76 = vst [vmem:[%s209_s1 + $0x48] sm:$0xff] %v4_v0 }
   0x7   :  { %77 = vst [vmem:[%s209_s1 + $0x50] sm:$0xff] %v4_v0  ;;  %78 = vst [vmem:[%s209_s1 + $0x58] sm:$0xff] %v4_v0 }
   0x8   :  { %79 = vst [vmem:[%s209_s1 + $0x60] sm:$0xff] %v4_v0  ;;  %80 = vst [vmem:[%s209_s1 + $0x68] sm:$0xff] %v4_v0 }
   0x9   :  { %81 = vst [vmem:[%s209_s1 + $0x70] sm:$0xff] %v4_v0  ;;  %82 = vst [vmem:[%s209_s1 + $0x78] sm:$0xff] %v4_v0 }
   0xa   :  { %83 = vst [vmem:[%s209_s1 + $0x80] sm:$0xff] %v4_v0  ;;  %84 = vst [vmem:[%s209_s1 + $0x88] sm:$0xff] %v4_v0 }
   0xb   :  { %85 = vst [vmem:[%s209_s1 + $0x90] sm:$0xff] %v4_v0  ;;  %86 = vst [vmem:[%s209_s1 + $0x98] sm:$0xff] %v4_v0 }
   0xc   :  { %87 = vst [vmem:[%s209_s1 + $0xa0] sm:$0xff] %v4_v0  ;;  %88 = vst [vmem:[%s209_s1 + $0xa8] sm:$0xff] %v4_v0 }
   0xd   :  { %89 = vst [vmem:[%s209_s1 + $0xb0] sm:$0xff] %v4_v0  ;;  %90 = vst [vmem:[%s209_s1 + $0xb8] sm:$0xff] %v4_v0 }
   0xe   :  { %91 = vst [vmem:[%s209_s1 + $0xc0] sm:$0xff] %v4_v0  ;;  %92 = vst [vmem:[%s209_s1 + $0xc8] sm:$0xff] %v4_v0 }
   0xf   :  { %93 = vst [vmem:[%s209_s1 + $0xd0] sm:$0xff] %v4_v0  ;;  %94 = vst [vmem:[%s209_s1 + $0xd8] sm:$0xff] %v4_v0 }
  0x10   :  { %95 = vst [vmem:[%s209_s1 + $0xe0] sm:$0xff] %v4_v0  ;;  %96 = vst [vmem:[%s209_s1 + $0xe8] sm:$0xff] %v4_v0 }
  0x11   :  { %97 = vst [vmem:[%s209_s1 + $0xf0] sm:$0xff] %v4_v0  ;;  %98 = vst [vmem:[%s209_s1 + $0xf8] sm:$0xff] %v4_v0 }

// kernel: tile.34
= control target key start
LH: loop header
LB: loop body
LE: loop exit
PB: predicated region body
PF: predicated region fallthrough
CT: control target
= control target key end

     0   :  { %vm5_vm0 = vcmask 1041409   ;;  %vm9_vm1 = vcmask 1042434   ;;  %vm13_vm2 = vcmask 1043459   ;;  %vm17_vm3 = vcmask 1044484   ;;  %s1465_s19 = smov 124   ;;  %s1466_s9 = smov 116   ;;  %s2522_s0 = inlined_call_operand.vmem [shape: f32[256,4], index: 0, kind: input, shape index: {}]   ;;  %s2523_s1 = inlined_call_operand.vmem [shape: f32[1,1024], index: 1, kind: output, shape index: {}]  }
   0x1   :  { %v1179_v0 = vld [vmem:[%s2522_s0 + $0x1f] sm:$0x1]   ;;  %vm21_vm4 = vcmask 1045509   ;;  %vm25_vm5 = vcmask 1046534   ;;  %vm29_vm6 = vcmask 1047559   ;;  %s1467_s26 = smov 120  }
   0x2   :  { %v1180_v1 = vld [vmem:[%s2522_s0 + $0x3e] sm:$0x2]   ;;  %v1195_v10 = vld [vmem:[%s2522_s0 + $0x1d] sm:$0x1]   ;;  %v1187_v25 = vld [vmem:[%s2522_s0 + $0x1e] sm:$0x1]  }
   0x3   :  { %v39_v2 = vsel %vm5_vm0, %v1180_v1, %v1179_v0  ;;  %v1181_v3 = vld [vmem:[%s2522_s0 + $0x5d] sm:$0x4]   ;;  %v1196_v11 = vld [vmem:[%s2522_s0 + $0x3c] sm:$0x2]   ;;  %v1188_v26 = vld [vmem:[%s2522_s0 + $0x3d] sm:$0x2]  }
   0x4   :  { %v1182_v4 = vld [vmem:[%s2522_s0 + $0x7c] sm:$0x8]   ;;  %v43_v6 = vsel %vm9_vm1, %v1181_v3, %v39_v2  ;;  %v1197_v12 = vld [vmem:[%s2522_s0 + $0x5b] sm:$0x4]   ;;  %v109_v15 = vsel %vm5_vm0, %v1196_v11, %v1195_v10  ;;  %v1189_v27 = vld [vmem:[%s2522_s0 + $0x5c] sm:$0x4]   ;;  %v74_v30 = vsel %vm5_vm0, %v1188_v26, %v1187_v25 }
   0x5   :  { %v1183_v5 = vld [vmem:[%s2522_s0 + $0x9b] sm:$0x10]   ;;  %v47_v9 = vsel %vm13_vm2, %v1182_v4, %v43_v6  ;;  %v1198_v16 = vld [vmem:[%s2522_s0 + $0x7a] sm:$0x8]   ;;  %v113_v19 = vsel %vm9_vm1, %v1197_v12, %v109_v15  ;;  %v1190_v31 = vld [vmem:[%s2522_s0 + $0x7b] sm:$0x8]   ;;  %v78_v34 = vsel %vm9_vm1, %v1189_v27, %v74_v30 }
   0x6   :  { %v1184_v7 = vld [vmem:[%s2522_s0 + $0xba] sm:$0x20]   ;;  %v51_v13 = vsel %vm17_vm3, %v1183_v5, %v47_v9  ;;  %v1199_v17 = vld [vmem:[%s2522_s0 + $0x99] sm:$0x10]   ;;  %v117_v24 = vsel %vm13_vm2, %v1198_v16, %v113_v19  ;;  %v1191_v32 = vld [vmem:[%s2522_s0 + $0x9a] sm:$0x10]   ;;  %v82_v39 = vsel %vm13_vm2, %v1190_v31, %v78_v34 }
   0x7   :  { %v1185_v8 = vld [vmem:[%s2522_s0 + $0xd9] sm:$0x40]   ;;  %v55_v18 = vsel %vm21_vm4, %v1184_v7, %v51_v13  ;;  %v1200_v20 = vld [vmem:[%s2522_s0 + $0xb8] sm:$0x20]   ;;  %v121_v29 = vsel %vm17_vm3, %v1199_v17, %v117_v24  ;;  %v1192_v35 = vld [vmem:[%s2522_s0 + $0xb9] sm:$0x20]   ;;  %v86_v44 = vsel %vm17_vm3, %v1191_v32, %v82_v39 }
   0x8   :  { %v1186_v14 = vld [vmem:[%s2522_s0 + $0xf8] sm:$0x80]   ;;  %v1201_v21 = vld [vmem:[%s2522_s0 + $0xd7] sm:$0x40]   ;;  %v59_v23 = vsel %vm25_vm5, %v1185_v8, %v55_v18  ;;  %v125_v33 = vsel %vm21_vm4, %v1200_v20, %v121_v29  ;;  %v1193_v36 = vld [vmem:[%s2522_s0 + $0xd8] sm:$0x40]   ;;  %v90_v49 = vsel %vm21_vm4, %v1192_v35, %v86_v44 }
   0x9   :  { %v1202_v22 = vld [vmem:[%s2522_s0 + $0xf6] sm:$0x80]   ;;  %v63_v28 = vsel %vm29_vm6, %v1186_v14, %v59_v23  ;;  %v1203_v37 = vld [vmem:[%s2522_s0 + $0x1c] sm:$0x1]   ;;  %v129_v38 = vsel %vm25_vm5, %v1201_v21, %v125_v33  ;;  %v1194_v45 = vld [vmem:[%s2522_s0 + $0xf7] sm:$0x80]   ;;  %v94_v54 = vsel %vm25_vm5, %v1193_v36, %v90_v49 }
   0xa   :  { %64 = vrot.lane.b32.xlu0 %v63_v28, %s1465_s19  ;;  %v1204_v40 = vld [vmem:[%s2522_s0 + $0x3b] sm:$0x2]   ;;  %v133_v43 = vsel %vm29_vm6, %v1202_v22, %v129_v38  ;;  %v1211_v53 = vld [vmem:[%s2522_s0 + $0x1b] sm:$0x1]   ;;  %v98_v59 = vsel %vm29_vm6, %v1194_v45, %v94_v54  ;;  %v1219_v3 = vld [vmem:[%s2522_s0 + $0x1a] sm:$0x1]  }
   0xb   :  { %v1205_v41 = vld [vmem:[%s2522_s0 + $0x5a] sm:$0x4]   ;;  %v144_v46 = vsel %vm5_vm0, %v1204_v40, %v1203_v37  ;;  %134 = vrot.lane.b32.xlu1 %v133_v43, %s1466_s9  ;;  %v1212_v56 = vld [vmem:[%s2522_s0 + $0x3a] sm:$0x2]   ;;  %v1220_v4 = vld [vmem:[%s2522_s0 + $0x39] sm:$0x2]  }
   0xc   :  { %v1206_v42 = vld [vmem:[%s2522_s0 + $0x79] sm:$0x8]   ;;  %v148_v50 = vsel %vm9_vm1, %v1205_v41, %v144_v46  ;;  %v1213_v57 = vld [vmem:[%s2522_s0 + $0x59] sm:$0x4]   ;;  %v179_v61 = vsel %vm5_vm0, %v1212_v56, %v1211_v53  ;;  %v214_v7 = vsel %vm5_vm0, %v1220_v4, %v1219_v3  ;;  %v1221_v8 = vld [vmem:[%s2522_s0 + $0x58] sm:$0x4]  }
   0xd   :  { %v1207_v47 = vld [vmem:[%s2522_s0 + $0x98] sm:$0x10]   ;;  %v152_v55 = vsel %vm13_vm2, %v1206_v42, %v148_v50  ;;  %v1214_v58 = vld [vmem:[%s2522_s0 + $0x78] sm:$0x8]   ;;  %v183_v1 = vsel %vm9_vm1, %v1213_v57, %v179_v61  ;;  %v1222_v9 = vld [vmem:[%s2522_s0 + $0x77] sm:$0x8]   ;;  %v218_v14 = vsel %vm9_vm1, %v1221_v8, %v214_v7 }
   0xe   :  { %v1208_v48 = vld [vmem:[%s2522_s0 + $0xb7] sm:$0x20]   ;;  %v156_v60 = vsel %vm17_vm3, %v1207_v47, %v152_v55  ;;  %v1215_v62 = vld [vmem:[%s2522_s0 + $0x97] sm:$0x10]   ;;  %99 = vrot.lane.b32.xlu0 %v98_v59, %s1467_s26  ;;  %v187_v6 = vsel %vm13_vm2, %v1214_v58, %v183_v1  ;;  %v1223_v10 = vld [vmem:[%s2522_s0 + $0x96] sm:$0x10]   ;;  %v222_v18 = vsel %vm13_vm2, %v1222_v9, %v218_v14 }
   0xf   :  { %v1209_v51 = vld [vmem:[%s2522_s0 + $0xd6] sm:$0x40]   ;;  %v1216_v63 = vld [vmem:[%s2522_s0 + $0xb6] sm:$0x20]   ;;  %v160_v0 = vsel %vm21_vm4, %v1208_v48, %v156_v60  ;;  %v191_v12 = vsel %vm17_vm3, %v1215_v62, %v187_v6  ;;  %v1224_v15 = vld [vmem:[%s2522_s0 + $0xb5] sm:$0x20]   ;;  %v226_v23 = vsel %vm17_vm3, %v1223_v10, %v222_v18 }
  0x10   :  { %v1210_v52 = vld [vmem:[%s2522_s0 + $0xf5] sm:$0x80]   ;;  %v1217_v2 = vld [vmem:[%s2522_s0 + $0xd5] sm:$0x40]   ;;  %v164_v5 = vsel %vm25_vm5, %v1209_v51, %v160_v0  ;;  %v1225_v16 = vld [vmem:[%s2522_s0 + $0xd4] sm:$0x40]   ;;  %v195_v17 = vsel %vm21_vm4, %v1216_v63, %v191_v12  ;;  %v230_v29 = vsel %vm21_vm4, %v1224_v15, %v226_v23 }
  0x11   :  { %v168_v11 = vsel %vm29_vm6, %v1210_v52, %v164_v5  ;;  %v1218_v13 = vld [vmem:[%s2522_s0 + $0xf4] sm:$0x80]   ;;  %s1468_s16 = smov 112   ;;  %v1226_v19 = vld [vmem:[%s2522_s0 + $0xf3] sm:$0x80]   ;;  %v199_v22 = vsel %vm25_vm5, %v1217_v2, %v195_v17  ;;  %s1469_s4 = smov 108   ;;  %v234_v33 = vsel %vm25_vm5, %v1225_v16, %v230_v29 }
  0x12   :  { %169 = vrot.lane.b32.xlu1 %v168_v11, %s1468_s16  ;;  %v1227_v20 = vld [vmem:[%s2522_s0 + $0x19] sm:$0x1]   ;;  %v203_v28 = vsel %vm29_vm6, %v1218_v13, %v199_v22  ;;  %v1235_v35 = vld [vmem:[%s2522_s0 + $0x18] sm:$0x1]   ;;  %v238_v38 = vsel %vm29_vm6, %v1226_v19, %v234_v33  ;;  %s1470_s17 = smov 104   ;;  %s1471_s5 = smov 100  }
  0x13   :  { %v1228_v21 = vld [vmem:[%s2522_s0 + $0x38] sm:$0x2]   ;;  %204 = vrot.lane.b32.xlu0 %v203_v28, %s1469_s4  ;;  %v1236_v36 = vld [vmem:[%s2522_s0 + $0x37] sm:$0x2]   ;;  %v1243_v51 = vld [vmem:[%s2522_s0 + $0x17] sm:$0x1]  }
  0x14   :  { %v249_v24 = vsel %vm5_vm0, %v1228_v21, %v1227_v20  ;;  %v1229_v25 = vld [vmem:[%s2522_s0 + $0x57] sm:$0x4]   ;;  %v1237_v37 = vld [vmem:[%s2522_s0 + $0x56] sm:$0x4]   ;;  %v284_v41 = vsel %vm5_vm0, %v1236_v36, %v1235_v35  ;;  %v1244_v52 = vld [vmem:[%s2522_s0 + $0x36] sm:$0x2]  }
  0x15   :  { %v1230_v26 = vld [vmem:[%s2522_s0 + $0x76] sm:$0x8]   ;;  %v253_v30 = vsel %vm9_vm1, %v1229_v25, %v249_v24  ;;  %v1238_v42 = vld [vmem:[%s2522_s0 + $0x75] sm:$0x8]   ;;  %v288_v45 = vsel %vm9_vm1, %v1237_v37, %v284_v41  ;;  %v1245_v53 = vld [vmem:[%s2522_s0 + $0x55] sm:$0x4]   ;;  %v319_v56 = vsel %vm5_vm0, %v1244_v52, %v1243_v51 }
  0x16   :  { %v1231_v27 = vld [vmem:[%s2522_s0 + $0x95] sm:$0x10]   ;;  %v257_v34 = vsel %vm13_vm2, %v1230_v26, %v253_v30  ;;  %v1239_v43 = vld [vmem:[%s2522_s0 + $0x94] sm:$0x10]   ;;  %239 = vrot.lane.b32.xlu1 %v238_v38, %s1470_s17  ;;  %v292_v50 = vsel %vm13_vm2, %v1238_v42, %v288_v45  ;;  %v1246_v57 = vld [vmem:[%s2522_s0 + $0x74] sm:$0x8]   ;;  %v323_v60 = vsel %vm9_vm1, %v1245_v53, %v319_v56 }
  0x17   :  { %v1232_v31 = vld [vmem:[%s2522_s0 + $0xb4] sm:$0x20]   ;;  %v261_v39 = vsel %vm17_vm3, %v1231_v27, %v257_v34  ;;  %v1240_v46 = vld [vmem:[%s2522_s0 + $0xb3] sm:$0x20]   ;;  %v296_v55 = vsel %vm17_vm3, %v1239_v43, %v292_v50  ;;  %v1247_v58 = vld [vmem:[%s2522_s0 + $0x93] sm:$0x10]   ;;  %v327_v1 = vsel %vm13_vm2, %v1246_v57, %v323_v60 }
  0x18   :  { %v1233_v32 = vld [vmem:[%s2522_s0 + $0xd3] sm:$0x40]   ;;  %v265_v44 = vsel %vm21_vm4, %v1232_v31, %v261_v39  ;;  %v1241_v47 = vld [vmem:[%s2522_s0 + $0xd2] sm:$0x40]   ;;  %v300_v59 = vsel %vm21_vm4, %v1240_v46, %v296_v55  ;;  %v1248_v61 = vld [vmem:[%s2522_s0 + $0xb2] sm:$0x20]   ;;  %v331_v6 = vsel %vm17_vm3, %v1247_v58, %v327_v1 }
  0x19   :  { %v1234_v40 = vld [vmem:[%s2522_s0 + $0xf2] sm:$0x80]   ;;  %v1242_v48 = vld [vmem:[%s2522_s0 + $0xf1] sm:$0x80]   ;;  %v269_v49 = vsel %vm25_vm5, %v1233_v32, %v265_v44  ;;  %v1249_v62 = vld [vmem:[%s2522_s0 + $0xd1] sm:$0x40]   ;;  %v304_v0 = vsel %vm25_vm5, %v1241_v47, %v300_v59  ;;  %v335_v11 = vsel %vm21_vm4, %v1248_v61, %v331_v6 }
  0x1a   :  { %v273_v54 = vsel %vm29_vm6, %v1234_v40, %v269_v49  ;;  %v1251_v63 = vld [vmem:[%s2522_s0 + $0x16] sm:$0x1]   ;;  %v308_v5 = vsel %vm29_vm6, %v1242_v48, %v304_v0  ;;  %v1250_v7 = vld [vmem:[%s2522_s0 + $0xf0] sm:$0x80]   ;;  %s1472_s24 = smov 96   ;;  %v339_v16 = vsel %vm25_vm5, %v1249_v62, %v335_v11  ;;  %s1473_s12 = smov 92  }
  0x1b   :  { %274 = vrot.lane.b32.xlu0 %v273_v54, %s1471_s5  ;;  %v1252_v2 = vld [vmem:[%s2522_s0 + $0x35] sm:$0x2]   ;;  %309 = vrot.lane.b32.xlu1 %v308_v5, %s1472_s24  ;;  %v1259_v15 = vld [vmem:[%s2522_s0 + $0x15] sm:$0x1]   ;;  %v343_v21 = vsel %vm29_vm6, %v1250_v7, %v339_v16  ;;  %s1474_s2 = smov 88   ;;  %s1475_s19 = smov 84  }
  0x1c   :  { %v1253_v3 = vld [vmem:[%s2522_s0 + $0x54] sm:$0x4]   ;;  %v354_v8 = vsel %vm5_vm0, %v1252_v2, %v1251_v63  ;;  %v1260_v18 = vld [vmem:[%s2522_s0 + $0x34] sm:$0x2]   ;;  %v1267_v29 = vld [vmem:[%s2522_s0 + $0x14] sm:$0x1]  }
  0x1d   :  { %v1254_v4 = vld [vmem:[%s2522_s0 + $0x73] sm:$0x8]   ;;  %v358_v12 = vsel %vm9_vm1, %v1253_v3, %v354_v8  ;;  %v1261_v19 = vld [vmem:[%s2522_s0 + $0x53] sm:$0x4]   ;;  %v389_v23 = vsel %vm5_vm0, %v1260_v18, %v1259_v15  ;;  %v1268_v30 = vld [vmem:[%s2522_s0 + $0x33] sm:$0x2]  }
  0x1e   :  { %v1255_v9 = vld [vmem:[%s2522_s0 + $0x92] sm:$0x10]   ;;  %v362_v17 = vsel %vm13_vm2, %v1254_v4, %v358_v12  ;;  %v1262_v20 = vld [vmem:[%s2522_s0 + $0x72] sm:$0x8]   ;;  %v393_v27 = vsel %vm9_vm1, %v1261_v19, %v389_v23  ;;  %v424_v33 = vsel %vm5_vm0, %v1268_v30, %v1267_v29  ;;  %v1269_v34 = vld [vmem:[%s2522_s0 + $0x52] sm:$0x4]  }
  0x1f   :  { %v1256_v10 = vld [vmem:[%s2522_s0 + $0xb1] sm:$0x20]   ;;  %v366_v22 = vsel %vm17_vm3, %v1255_v9, %v362_v17  ;;  %v1263_v24 = vld [vmem:[%s2522_s0 + $0x91] sm:$0x10]   ;;  %344 = vrot.lane.b32.xlu0 %v343_v21, %s1473_s12  ;;  %v397_v32 = vsel %vm13_vm2, %v1262_v20, %v393_v27  ;;  %v1270_v35 = vld [vmem:[%s2522_s0 + $0x71] sm:$0x8]   ;;  %v428_v40 = vsel %vm9_vm1, %v1269_v34, %v424_v33 }
  0x20   :  { %v1257_v13 = vld [vmem:[%s2522_s0 + $0xd0] sm:$0x40]   ;;  %v1264_v25 = vld [vmem:[%s2522_s0 + $0xb0] sm:$0x20]   ;;  %v370_v26 = vsel %vm21_vm4, %v1256_v10, %v366_v22  ;;  %v1271_v36 = vld [vmem:[%s2522_s0 + $0x90] sm:$0x10]   ;;  %v401_v38 = vsel %vm17_vm3, %v1263_v24, %v397_v32  ;;  %v432_v44 = vsel %vm13_vm2, %v1270_v35, %v428_v40 }
  0x21   :  { %v1258_v14 = vld [vmem:[%s2522_s0 + $0xef] sm:$0x80]   ;;  %v1265_v28 = vld [vmem:[%s2522_s0 + $0xcf] sm:$0x40]   ;;  %v374_v31 = vsel %vm25_vm5, %v1257_v13, %v370_v26  ;;  %v1272_v41 = vld [vmem:[%s2522_s0 + $0xaf] sm:$0x20]   ;;  %v405_v43 = vsel %vm21_vm4, %v1264_v25, %v401_v38  ;;  %v436_v49 = vsel %vm17_vm3, %v1271_v36, %v432_v44 }
  0x22   :  { %v378_v37 = vsel %vm29_vm6, %v1258_v14, %v374_v31  ;;  %v1266_v39 = vld [vmem:[%s2522_s0 + $0xee] sm:$0x80]   ;;  %v1273_v42 = vld [vmem:[%s2522_s0 + $0xce] sm:$0x40]   ;;  %v1275_v46 = vld [vmem:[%s2522_s0 + $0x13] sm:$0x1]   ;;  %v409_v48 = vsel %vm25_vm5, %v1265_v28, %v405_v43  ;;  %v440_v55 = vsel %vm21_vm4, %v1272_v41, %v436_v49 }
  0x23   :  { %379 = vrot.lane.b32.xlu1 %v378_v37, %s1474_s2  ;;  %v1274_v45 = vld [vmem:[%s2522_s0 + $0xed] sm:$0x80]   ;;  %v1276_v47 = vld [vmem:[%s2522_s0 + $0x32] sm:$0x2]   ;;  %v413_v54 = vsel %vm29_vm6, %v1266_v39, %v409_v48  ;;  %v444_v59 = vsel %vm25_vm5, %v1273_v42, %v440_v55  ;;  %v1283_v61 = vld [vmem:[%s2522_s0 + $0x12] sm:$0x1]  }
  0x24   :  { %v459_v50 = vsel %vm5_vm0, %v1276_v47, %v1275_v46  ;;  %v1277_v51 = vld [vmem:[%s2522_s0 + $0x51] sm:$0x4]   ;;  %414 = vrot.lane.b32.xlu0 %v413_v54, %s1475_s19  ;;  %v1284_v62 = vld [vmem:[%s2522_s0 + $0x31] sm:$0x2]   ;;  %v448_v0 = vsel %vm29_vm6, %v1274_v45, %v444_v59  ;;  %s1476_s3 = smov 80   ;;  %s1477_s20 = smov 76  }
  0x25   :  { %v1278_v52 = vld [vmem:[%s2522_s0 + $0x70] sm:$0x8]   ;;  %v463_v56 = vsel %vm9_vm1, %v1277_v51, %v459_v50  ;;  %v1285_v63 = vld [vmem:[%s2522_s0 + $0x50] sm:$0x4]   ;;  %v494_v3 = vsel %vm5_vm0, %v1284_v62, %v1283_v61  ;;  %v1291_v13 = vld [vmem:[%s2522_s0 + $0x11] sm:$0x1]  }
  0x26   :  { %v1279_v53 = vld [vmem:[%s2522_s0 + $0x8f] sm:$0x10]   ;;  %v467_v60 = vsel %vm13_vm2, %v1278_v52, %v463_v56  ;;  %v1286_v4 = vld [vmem:[%s2522_s0 + $0x6f] sm:$0x8]   ;;  %v498_v7 = vsel %vm9_vm1, %v1285_v63, %v494_v3  ;;  %v1292_v14 = vld [vmem:[%s2522_s0 + $0x30] sm:$0x2]  }
  0x27   :  { %v1280_v57 = vld [vmem:[%s2522_s0 + $0xae] sm:$0x20]   ;;  %v471_v1 = vsel %vm17_vm3, %v1279_v53, %v467_v60  ;;  %v1287_v5 = vld [vmem:[%s2522_s0 + $0x8e] sm:$0x10]   ;;  %449 = vrot.lane.b32.xlu1 %v448_v0, %s1476_s3  ;;  %v502_v12 = vsel %vm13_vm2, %v1286_v4, %v498_v7  ;;  %v1293_v15 = vld [vmem:[%s2522_s0 + $0x4f] sm:$0x4]   ;;  %v529_v18 = vsel %vm5_vm0, %v1292_v14, %v1291_v13 }
  0x28   :  { %v1281_v58 = vld [vmem:[%s2522_s0 + $0xcd] sm:$0x40]   ;;  %v475_v6 = vsel %vm21_vm4, %v1280_v57, %v471_v1  ;;  %v1288_v8 = vld [vmem:[%s2522_s0 + $0xad] sm:$0x20]   ;;  %v506_v17 = vsel %vm17_vm3, %v1287_v5, %v502_v12  ;;  %v1294_v19 = vld [vmem:[%s2522_s0 + $0x6e] sm:$0x8]   ;;  %v533_v22 = vsel %vm9_vm1, %v1293_v15, %v529_v18 }
  0x29   :  { %v1282_v2 = vld [vmem:[%s2522_s0 + $0xec] sm:$0x80]   ;;  %v1289_v9 = vld [vmem:[%s2522_s0 + $0xcc] sm:$0x40]   ;;  %v479_v11 = vsel %vm25_vm5, %v1281_v58, %v475_v6  ;;  %v1295_v20 = vld [vmem:[%s2522_s0 + $0x8d] sm:$0x10]   ;;  %v510_v21 = vsel %vm21_vm4, %v1288_v8, %v506_v17  ;;  %v537_v27 = vsel %vm13_vm2, %v1294_v19, %v533_v22 }
  0x2a   :  { %v1290_v10 = vld [vmem:[%s2522_s0 + $0xeb] sm:$0x80]   ;;  %v483_v16 = vsel %vm29_vm6, %v1282_v2, %v479_v11  ;;  %v1296_v23 = vld [vmem:[%s2522_s0 + $0xac] sm:$0x20]   ;;  %v1299_v25 = vld [vmem:[%s2522_s0 + $0x10] sm:$0x1]   ;;  %v514_v26 = vsel %vm25_vm5, %v1289_v9, %v510_v21  ;;  %v541_v32 = vsel %vm17_vm3, %v1295_v20, %v537_v27 }
  0x2b   :  { %484 = vrot.lane.b32.xlu0 %v483_v16, %s1477_s20  ;;  %v1297_v24 = vld [vmem:[%s2522_s0 + $0xcb] sm:$0x40]   ;;  %v1300_v28 = vld [vmem:[%s2522_s0 + $0x2f] sm:$0x2]   ;;  %v518_v31 = vsel %vm29_vm6, %v1290_v10, %v514_v26  ;;  %s1478_s10 = smov 72   ;;  %v545_v37 = vsel %vm21_vm4, %v1296_v23, %v541_v32  ;;  %s1479_s27 = smov 68  }
  0x2c   :  { %v1301_v29 = vld [vmem:[%s2522_s0 + $0x4e] sm:$0x4]   ;;  %v1298_v33 = vld [vmem:[%s2522_s0 + $0xea] sm:$0x80]   ;;  %v564_v34 = vsel %vm5_vm0, %v1300_v28, %v1299_v25  ;;  %519 = vrot.lane.b32.xlu1 %v518_v31, %s1478_s10  ;;  %v1307_v41 = vld [vmem:[%s2522_s0 + $0xf] sm:$0x1]   ;;  %v549_v42 = vsel %vm25_vm5, %v1297_v24, %v545_v37 }
  0x2d   :  { %v1302_v30 = vld [vmem:[%s2522_s0 + $0x6d] sm:$0x8]   ;;  %v568_v38 = vsel %vm9_vm1, %v1301_v29, %v564_v34  ;;  %v1308_v44 = vld [vmem:[%s2522_s0 + $0x2e] sm:$0x2]   ;;  %v553_v47 = vsel %vm29_vm6, %v1298_v33, %v549_v42  ;;  %v1315_v55 = vld [vmem:[%s2522_s0 + $0xe] sm:$0x1]  }
  0x2e   :  { %v1303_v35 = vld [vmem:[%s2522_s0 + $0x8c] sm:$0x10]   ;;  %v572_v43 = vsel %vm13_vm2, %v1302_v30, %v568_v38  ;;  %v1309_v45 = vld [vmem:[%s2522_s0 + $0x4d] sm:$0x4]   ;;  %v599_v49 = vsel %vm5_vm0, %v1308_v44, %v1307_v41  ;;  %v1316_v56 = vld [vmem:[%s2522_s0 + $0x2d] sm:$0x2]  }
  0x2f   :  { %v1304_v36 = vld [vmem:[%s2522_s0 + $0xab] sm:$0x20]   ;;  %v1310_v46 = vld [vmem:[%s2522_s0 + $0x6c] sm:$0x8]   ;;  %v576_v48 = vsel %vm17_vm3, %v1303_v35, %v572_v43  ;;  %554 = vrot.lane.b32.xlu0 %v553_v47, %s1479_s27  ;;  %v603_v53 = vsel %vm9_vm1, %v1309_v45, %v599_v49  ;;  %v634_v59 = vsel %vm5_vm0, %v1316_v56, %v1315_v55  ;;  %v1317_v60 = vld [vmem:[%s2522_s0 + $0x4c] sm:$0x4]  }
  0x30   :  { %v1305_v39 = vld [vmem:[%s2522_s0 + $0xca] sm:$0x40]   ;;  %v1311_v50 = vld [vmem:[%s2522_s0 + $0x8b] sm:$0x10]   ;;  %v580_v52 = vsel %vm21_vm4, %v1304_v36, %v576_v48  ;;  %v607_v58 = vsel %vm13_vm2, %v1310_v46, %v603_v53  ;;  %v1318_v61 = vld [vmem:[%s2522_s0 + $0x6b] sm:$0x8]   ;;  %v638_v2 = vsel %vm9_vm1, %v1317_v60, %v634_v59 }
  0x31   :  { %v1306_v40 = vld [vmem:[%s2522_s0 + $0xe9] sm:$0x80]   ;;  %v1312_v51 = vld [vmem:[%s2522_s0 + $0xaa] sm:$0x20]   ;;  %v584_v57 = vsel %vm25_vm5, %v1305_v39, %v580_v52  ;;  %v1319_v62 = vld [vmem:[%s2522_s0 + $0x8a] sm:$0x10]   ;;  %v611_v0 = vsel %vm17_vm3, %v1311_v50, %v607_v58  ;;  %v642_v6 = vsel %vm13_vm2, %v1318_v61, %v638_v2 }
  0x32   :  { %v1313_v54 = vld [vmem:[%s2522_s0 + $0xc9] sm:$0x40]   ;;  %v588_v63 = vsel %vm29_vm6, %v1306_v40, %v584_v57  ;;  %v1320_v3 = vld [vmem:[%s2522_s0 + $0xa9] sm:$0x20]   ;;  %s1480_s17 = smov 64   ;;  %v615_v5 = vsel %vm21_vm4, %v1312_v51, %v611_v0  ;;  %v646_v11 = vsel %vm17_vm3, %v1319_v62, %v642_v6  ;;  %s1481_s5 = smov 60  }
  0x33   :  { %v1314_v1 = vld [vmem:[%s2522_s0 + $0xe8] sm:$0x80]   ;;  %v1321_v4 = vld [vmem:[%s2522_s0 + $0xc8] sm:$0x40]   ;;  %589 = vrot.lane.b32.xlu1 %v588_v63, %s1480_s17  ;;  %v1323_v8 = vld [vmem:[%s2522_s0 + $0xd] sm:$0x1]   ;;  %v619_v10 = vsel %vm25_vm5, %v1313_v54, %v615_v5  ;;  %v650_v17 = vsel %vm21_vm4, %v1320_v3, %v646_v11 }
  0x34   :  { %v1322_v7 = vld [vmem:[%s2522_s0 + $0xe7] sm:$0x80]   ;;  %v1324_v9 = vld [vmem:[%s2522_s0 + $0x2c] sm:$0x2]   ;;  %v623_v16 = vsel %vm29_vm6, %v1314_v1, %v619_v10  ;;  %v654_v21 = vsel %vm25_vm5, %v1321_v4, %v650_v17  ;;  %v1331_v23 = vld [vmem:[%s2522_s0 + $0xc] sm:$0x1]  }
  0x35   :  { %v669_v12 = vsel %vm5_vm0, %v1324_v9, %v1323_v8  ;;  %v1325_v13 = vld [vmem:[%s2522_s0 + $0x4b] sm:$0x4]   ;;  %624 = vrot.lane.b32.xlu0 %v623_v16, %s1481_s5  ;;  %v1332_v24 = vld [vmem:[%s2522_s0 + $0x2b] sm:$0x2]   ;;  %v658_v26 = vsel %vm29_vm6, %v1322_v7, %v654_v21  ;;  %s1482_s18 = smov 56   ;;  %s1483_s6 = smov 52  }
  0x36   :  { %v1326_v14 = vld [vmem:[%s2522_s0 + $0x6a] sm:$0x8]   ;;  %v673_v18 = vsel %vm9_vm1, %v1325_v13, %v669_v12  ;;  %v1333_v25 = vld [vmem:[%s2522_s0 + $0x4a] sm:$0x4]   ;;  %v704_v29 = vsel %vm5_vm0, %v1332_v24, %v1331_v23  ;;  %v1339_v39 = vld [vmem:[%s2522_s0 + $0xb] sm:$0x1]  }
  0x37   :  { %v1327_v15 = vld [vmem:[%s2522_s0 + $0x89] sm:$0x10]   ;;  %v677_v22 = vsel %vm13_vm2, %v1326_v14, %v673_v18  ;;  %v1334_v30 = vld [vmem:[%s2522_s0 + $0x69] sm:$0x8]   ;;  %659 = vrot.lane.b32.xlu1 %v658_v26, %s1482_s18  ;;  %v708_v33 = vsel %vm9_vm1, %v1333_v25, %v704_v29  ;;  %v1340_v40 = vld [vmem:[%s2522_s0 + $0x2a] sm:$0x2]  }
  0x38   :  { %v1328_v19 = vld [vmem:[%s2522_s0 + $0xa8] sm:$0x20]   ;;  %v681_v27 = vsel %vm17_vm3, %v1327_v15, %v677_v22  ;;  %v1335_v31 = vld [vmem:[%s2522_s0 + $0x88] sm:$0x10]   ;;  %v712_v38 = vsel %vm13_vm2, %v1334_v30, %v708_v33  ;;  %v1341_v41 = vld [vmem:[%s2522_s0 + $0x49] sm:$0x4]   ;;  %v739_v44 = vsel %vm5_vm0, %v1340_v40, %v1339_v39 }
  0x39   :  { %v1329_v20 = vld [vmem:[%s2522_s0 + $0xc7] sm:$0x40]   ;;  %v685_v32 = vsel %vm21_vm4, %v1328_v19, %v681_v27  ;;  %v1336_v34 = vld [vmem:[%s2522_s0 + $0xa7] sm:$0x20]   ;;  %v716_v43 = vsel %vm17_vm3, %v1335_v31, %v712_v38  ;;  %v1342_v45 = vld [vmem:[%s2522_s0 + $0x68] sm:$0x8]   ;;  %v743_v48 = vsel %vm9_vm1, %v1341_v41, %v739_v44 }
  0x3a   :  { %v1330_v28 = vld [vmem:[%s2522_s0 + $0xe6] sm:$0x80]   ;;  %v1337_v35 = vld [vmem:[%s2522_s0 + $0xc6] sm:$0x40]   ;;  %v689_v37 = vsel %vm25_vm5, %v1329_v20, %v685_v32  ;;  %v1343_v46 = vld [vmem:[%s2522_s0 + $0x87] sm:$0x10]   ;;  %v720_v47 = vsel %vm21_vm4, %v1336_v34, %v716_v43  ;;  %v747_v53 = vsel %vm13_vm2, %v1342_v45, %v743_v48 }
  0x3b   :  { %v1338_v36 = vld [vmem:[%s2522_s0 + $0xe5] sm:$0x80]   ;;  %v693_v42 = vsel %vm29_vm6, %v1330_v28, %v689_v37  ;;  %v1344_v49 = vld [vmem:[%s2522_s0 + $0xa6] sm:$0x20]   ;;  %v1347_v51 = vld [vmem:[%s2522_s0 + $0xa] sm:$0x1]   ;;  %v724_v52 = vsel %vm25_vm5, %v1337_v35, %v720_v47  ;;  %v751_v58 = vsel %vm17_vm3, %v1343_v46, %v747_v53 }
  0x3c   :  { %694 = vrot.lane.b32.xlu0 %v693_v42, %s1483_s6  ;;  %v1345_v50 = vld [vmem:[%s2522_s0 + $0xc5] sm:$0x40]   ;;  %v1348_v54 = vld [vmem:[%s2522_s0 + $0x29] sm:$0x2]   ;;  %v728_v57 = vsel %vm29_vm6, %v1338_v36, %v724_v52  ;;  %s1484_s25 = smov 48   ;;  %v755_v63 = vsel %vm21_vm4, %v1344_v49, %v751_v58  ;;  %s1485_s13 = smov 44  }
  0x3d   :  { %v1349_v55 = vld [vmem:[%s2522_s0 + $0x48] sm:$0x4]   ;;  %v1346_v59 = vld [vmem:[%s2522_s0 + $0xe4] sm:$0x80]   ;;  %v774_v60 = vsel %vm5_vm0, %v1348_v54, %v1347_v51  ;;  %729 = vrot.lane.b32.xlu1 %v728_v57, %s1484_s25  ;;  %v1355_v3 = vld [vmem:[%s2522_s0 + $0x9] sm:$0x1]   ;;  %v759_v4 = vsel %vm25_vm5, %v1345_v50, %v755_v63 }
  0x3e   :  { %v1350_v56 = vld [vmem:[%s2522_s0 + $0x67] sm:$0x8]   ;;  %v778_v0 = vsel %vm9_vm1, %v1349_v55, %v774_v60  ;;  %v1356_v6 = vld [vmem:[%s2522_s0 + $0x28] sm:$0x2]   ;;  %v763_v9 = vsel %vm29_vm6, %v1346_v59, %v759_v4  ;;  %v1363_v17 = vld [vmem:[%s2522_s0 + $0x8] sm:$0x1]  }
  0x3f   :  { %v1351_v61 = vld [vmem:[%s2522_s0 + $0x86] sm:$0x10]   ;;  %v782_v5 = vsel %vm13_vm2, %v1350_v56, %v778_v0  ;;  %v1357_v7 = vld [vmem:[%s2522_s0 + $0x47] sm:$0x4]   ;;  %v809_v11 = vsel %vm5_vm0, %v1356_v6, %v1355_v3  ;;  %v1364_v18 = vld [vmem:[%s2522_s0 + $0x27] sm:$0x2]  }
  0x40   :  { %v1352_v62 = vld [vmem:[%s2522_s0 + $0xa5] sm:$0x20]   ;;  %v1358_v8 = vld [vmem:[%s2522_s0 + $0x66] sm:$0x8]   ;;  %v786_v10 = vsel %vm17_vm3, %v1351_v61, %v782_v5  ;;  %764 = vrot.lane.b32.xlu0 %v763_v9, %s1485_s13  ;;  %v813_v15 = vsel %vm9_vm1, %v1357_v7, %v809_v11  ;;  %v844_v21 = vsel %vm5_vm0, %v1364_v18, %v1363_v17  ;;  %v1365_v22 = vld [vmem:[%s2522_s0 + $0x46] sm:$0x4]  }
  0x41   :  { %v1353_v1 = vld [vmem:[%s2522_s0 + $0xc4] sm:$0x40]   ;;  %v1359_v12 = vld [vmem:[%s2522_s0 + $0x85] sm:$0x10]   ;;  %v790_v14 = vsel %vm21_vm4, %v1352_v62, %v786_v10  ;;  %v817_v20 = vsel %vm13_vm2, %v1358_v8, %v813_v15  ;;  %v1366_v23 = vld [vmem:[%s2522_s0 + $0x65] sm:$0x8]   ;;  %v848_v28 = vsel %vm9_vm1, %v1365_v22, %v844_v21 }
  0x42   :  { %v1354_v2 = vld [vmem:[%s2522_s0 + $0xe3] sm:$0x80]   ;;  %v1360_v13 = vld [vmem:[%s2522_s0 + $0xa4] sm:$0x20]   ;;  %v794_v19 = vsel %vm25_vm5, %v1353_v1, %v790_v14  ;;  %v1367_v24 = vld [vmem:[%s2522_s0 + $0x84] sm:$0x10]   ;;  %v821_v26 = vsel %vm17_vm3, %v1359_v12, %v817_v20  ;;  %v852_v32 = vsel %vm13_vm2, %v1366_v23, %v848_v28 }
  0x43   :  { %v1361_v16 = vld [vmem:[%s2522_s0 + $0xc3] sm:$0x40]   ;;  %v798_v25 = vsel %vm29_vm6, %v1354_v2, %v794_v19  ;;  %v1368_v29 = vld [vmem:[%s2522_s0 + $0xa3] sm:$0x20]   ;;  %s1486_s3 = smov 40   ;;  %v825_v31 = vsel %vm21_vm4, %v1360_v13, %v821_v26  ;;  %v856_v37 = vsel %vm17_vm3, %v1367_v24, %v852_v32  ;;  %s1487_s20 = smov 36  }
  0x44   :  { %v1362_v27 = vld [vmem:[%s2522_s0 + $0xe2] sm:$0x80]   ;;  %v1369_v30 = vld [vmem:[%s2522_s0 + $0xc2] sm:$0x40]   ;;  %799 = vrot.lane.b32.xlu1 %v798_v25, %s1486_s3  ;;  %v1371_v34 = vld [vmem:[%s2522_s0 + $0x7] sm:$0x1]   ;;  %v829_v36 = vsel %vm25_vm5, %v1361_v16, %v825_v31  ;;  %v860_v43 = vsel %vm21_vm4, %v1368_v29, %v856_v37 }
  0x45   :  { %v1370_v33 = vld [vmem:[%s2522_s0 + $0xe1] sm:$0x80]   ;;  %v1372_v35 = vld [vmem:[%s2522_s0 + $0x26] sm:$0x2]   ;;  %v833_v42 = vsel %vm29_vm6, %v1362_v27, %v829_v36  ;;  %v864_v47 = vsel %vm25_vm5, %v1369_v30, %v860_v43  ;;  %v1379_v49 = vld [vmem:[%s2522_s0 + $0x6] sm:$0x1]  }
  0x46   :  { %v879_v38 = vsel %vm5_vm0, %v1372_v35, %v1371_v34  ;;  %v1373_v39 = vld [vmem:[%s2522_s0 + $0x45] sm:$0x4]   ;;  %834 = vrot.lane.b32.xlu0 %v833_v42, %s1487_s20  ;;  %v1380_v50 = vld [vmem:[%s2522_s0 + $0x25] sm:$0x2]   ;;  %v868_v52 = vsel %vm29_vm6, %v1370_v33, %v864_v47  ;;  %s1488_s4 = smov 32   ;;  %s1489_s21 = smov 28  }
  0x47   :  { %v1374_v40 = vld [vmem:[%s2522_s0 + $0x64] sm:$0x8]   ;;  %v883_v44 = vsel %vm9_vm1, %v1373_v39, %v879_v38  ;;  %v1381_v51 = vld [vmem:[%s2522_s0 + $0x44] sm:$0x4]   ;;  %v914_v55 = vsel %vm5_vm0, %v1380_v50, %v1379_v49  ;;  %v1387_v1 = vld [vmem:[%s2522_s0 + $0x5] sm:$0x1]  }
  0x48   :  { %v1375_v41 = vld [vmem:[%s2522_s0 + $0x83] sm:$0x10]   ;;  %v887_v48 = vsel %vm13_vm2, %v1374_v40, %v883_v44  ;;  %v1382_v56 = vld [vmem:[%s2522_s0 + $0x63] sm:$0x8]   ;;  %869 = vrot.lane.b32.xlu1 %v868_v52, %s1488_s4  ;;  %v918_v59 = vsel %vm9_vm1, %v1381_v51, %v914_v55  ;;  %v1388_v2 = vld [vmem:[%s2522_s0 + $0x24] sm:$0x2]  }
  0x49   :  { %v1376_v45 = vld [vmem:[%s2522_s0 + $0xa2] sm:$0x20]   ;;  %v891_v53 = vsel %vm17_vm3, %v1375_v41, %v887_v48  ;;  %v1383_v57 = vld [vmem:[%s2522_s0 + $0x82] sm:$0x10]   ;;  %v922_v0 = vsel %vm13_vm2, %v1382_v56, %v918_v59  ;;  %v1389_v3 = vld [vmem:[%s2522_s0 + $0x43] sm:$0x4]   ;;  %v949_v6 = vsel %vm5_vm0, %v1388_v2, %v1387_v1 }
  0x4a   :  { %v1377_v46 = vld [vmem:[%s2522_s0 + $0xc1] sm:$0x40]   ;;  %v895_v58 = vsel %vm21_vm4, %v1376_v45, %v891_v53  ;;  %v1384_v60 = vld [vmem:[%s2522_s0 + $0xa1] sm:$0x20]   ;;  %v926_v5 = vsel %vm17_vm3, %v1383_v57, %v922_v0  ;;  %v1390_v7 = vld [vmem:[%s2522_s0 + $0x62] sm:$0x8]   ;;  %v953_v10 = vsel %vm9_vm1, %v1389_v3, %v949_v6 }
  0x4b   :  { %v1378_v54 = vld [vmem:[%s2522_s0 + $0xe0] sm:$0x80]   ;;  %v1385_v61 = vld [vmem:[%s2522_s0 + $0xc0] sm:$0x40]   ;;  %v899_v63 = vsel %vm25_vm5, %v1377_v46, %v895_v58  ;;  %v1391_v8 = vld [vmem:[%s2522_s0 + $0x81] sm:$0x10]   ;;  %v930_v9 = vsel %vm21_vm4, %v1384_v60, %v926_v5  ;;  %v957_v15 = vsel %vm13_vm2, %v1390_v7, %v953_v10 }
  0x4c   :  { %v1386_v62 = vld [vmem:[%s2522_s0 + $0xdf] sm:$0x80]   ;;  %v903_v4 = vsel %vm29_vm6, %v1378_v54, %v899_v63  ;;  %v1392_v11 = vld [vmem:[%s2522_s0 + $0xa0] sm:$0x20]   ;;  %v1395_v13 = vld [vmem:[%s2522_s0 + $0x4] sm:$0x1]   ;;  %v934_v14 = vsel %vm25_vm5, %v1385_v61, %v930_v9  ;;  %v961_v20 = vsel %vm17_vm3, %v1391_v8, %v957_v15 }
  0x4d   :  { %904 = vrot.lane.b32.xlu0 %v903_v4, %s1489_s21  ;;  %v1393_v12 = vld [vmem:[%s2522_s0 + $0xbf] sm:$0x40]   ;;  %v1396_v16 = vld [vmem:[%s2522_s0 + $0x23] sm:$0x2]   ;;  %v938_v19 = vsel %vm29_vm6, %v1386_v62, %v934_v14  ;;  %s1490_s11 = smov 24   ;;  %v965_v25 = vsel %vm21_vm4, %v1392_v11, %v961_v20  ;;  %s1491_s28 = smov 20  }
  0x4e   :  { %v1397_v17 = vld [vmem:[%s2522_s0 + $0x42] sm:$0x4]   ;;  %v1394_v21 = vld [vmem:[%s2522_s0 + $0xde] sm:$0x80]   ;;  %v984_v22 = vsel %vm5_vm0, %v1396_v16, %v1395_v13  ;;  %939 = vrot.lane.b32.xlu1 %v938_v19, %s1490_s11  ;;  %v1403_v29 = vld [vmem:[%s2522_s0 + $0x3] sm:$0x1]   ;;  %v969_v30 = vsel %vm25_vm5, %v1393_v12, %v965_v25 }
  0x4f   :  { %v1398_v18 = vld [vmem:[%s2522_s0 + $0x61] sm:$0x8]   ;;  %v988_v26 = vsel %vm9_vm1, %v1397_v17, %v984_v22  ;;  %v1404_v32 = vld [vmem:[%s2522_s0 + $0x22] sm:$0x2]   ;;  %v973_v35 = vsel %vm29_vm6, %v1394_v21, %v969_v30  ;;  %v1411_v43 = vld [vmem:[%s2522_s0 + $0x2] sm:$0x1]  }
  0x50   :  { %v1399_v23 = vld [vmem:[%s2522_s0 + $0x80] sm:$0x10]   ;;  %v992_v31 = vsel %vm13_vm2, %v1398_v18, %v988_v26  ;;  %v1405_v33 = vld [vmem:[%s2522_s0 + $0x41] sm:$0x4]   ;;  %v1019_v37 = vsel %vm5_vm0, %v1404_v32, %v1403_v29  ;;  %v1412_v44 = vld [vmem:[%s2522_s0 + $0x21] sm:$0x2]  }
  0x51   :  { %v1400_v24 = vld [vmem:[%s2522_s0 + $0x9f] sm:$0x20]   ;;  %v1406_v34 = vld [vmem:[%s2522_s0 + $0x60] sm:$0x8]   ;;  %v996_v36 = vsel %vm17_vm3, %v1399_v23, %v992_v31  ;;  %974 = vrot.lane.b32.xlu0 %v973_v35, %s1491_s28  ;;  %v1023_v41 = vsel %vm9_vm1, %v1405_v33, %v1019_v37  ;;  %v1054_v47 = vsel %vm5_vm0, %v1412_v44, %v1411_v43  ;;  %v1413_v48 = vld [vmem:[%s2522_s0 + $0x40] sm:$0x4]  }
  0x52   :  { %v1401_v27 = vld [vmem:[%s2522_s0 + $0xbe] sm:$0x40]   ;;  %v1407_v38 = vld [vmem:[%s2522_s0 + $0x7f] sm:$0x10]   ;;  %v1000_v40 = vsel %vm21_vm4, %v1400_v24, %v996_v36  ;;  %v1027_v46 = vsel %vm13_vm2, %v1406_v34, %v1023_v41  ;;  %v1414_v49 = vld [vmem:[%s2522_s0 + $0x5f] sm:$0x8]   ;;  %v1058_v54 = vsel %vm9_vm1, %v1413_v48, %v1054_v47 }
  0x53   :  { %v1402_v28 = vld [vmem:[%s2522_s0 + $0xdd] sm:$0x80]   ;;  %v1408_v39 = vld [vmem:[%s2522_s0 + $0x9e] sm:$0x20]   ;;  %v1004_v45 = vsel %vm25_vm5, %v1401_v27, %v1000_v40  ;;  %v1415_v50 = vld [vmem:[%s2522_s0 + $0x7e] sm:$0x10]   ;;  %v1031_v52 = vsel %vm17_vm3, %v1407_v38, %v1027_v46  ;;  %v1062_v58 = vsel %vm13_vm2, %v1414_v49, %v1058_v54 }
  0x54   :  { %v1409_v42 = vld [vmem:[%s2522_s0 + $0xbd] sm:$0x40]   ;;  %v1008_v51 = vsel %vm29_vm6, %v1402_v28, %v1004_v45  ;;  %v1416_v55 = vld [vmem:[%s2522_s0 + $0x9d] sm:$0x20]   ;;  %s1492_s18 = smov 16   ;;  %v1035_v57 = vsel %vm21_vm4, %v1408_v39, %v1031_v52  ;;  %v1066_v63 = vsel %vm17_vm3, %v1415_v50, %v1062_v58  ;;  %s1493_s4 = smov 12  }
  0x55   :  { %v1410_v53 = vld [vmem:[%s2522_s0 + $0xdc] sm:$0x80]   ;;  %v1417_v56 = vld [vmem:[%s2522_s0 + $0xbc] sm:$0x40]   ;;  %1009 = vrot.lane.b32.xlu1 %v1008_v51, %s1492_s18  ;;  %v1419_v60 = vld [vmem:[%s2522_s0 + $0x1] sm:$0x1]   ;;  %v1039_v62 = vsel %vm25_vm5, %v1409_v42, %v1035_v57  ;;  %v1070_v5 = vsel %vm21_vm4, %v1416_v55, %v1066_v63 }
  0x56   :  { %v1418_v59 = vld [vmem:[%s2522_s0 + $0xdb] sm:$0x80]   ;;  %v1420_v61 = vld [vmem:[%s2522_s0 + $0x20] sm:$0x2]   ;;  %v1043_v4 = vsel %vm29_vm6, %v1410_v53, %v1039_v62  ;;  %v1074_v8 = vsel %vm25_vm5, %v1417_v56, %v1070_v5  ;;  %v1173_v14 = vld [vmem:[%s2522_s0 + $0x3e] sm:$0x4]  }
  0x57   :  { %v1089_v0 = vsel %vm5_vm0, %v1420_v61, %v1419_v60  ;;  %v1421_v1 = vld [vmem:[%s2522_s0 + $0x3f] sm:$0x4]   ;;  %1044 = vrot.lane.b32.xlu0 %v1043_v4, %s1493_s4  ;;  %v1078_v11 = vsel %vm29_vm6, %v1418_v59, %v1074_v8  ;;  %s1494_s11 = smov 8   ;;  %v1174_v16 = vld [vmem:[%s2522_s0 + $0x5d] sm:$0x8]   ;;  %s1495_s22 = smov 4  }
  0x58   :  { %v1422_v2 = vld [vmem:[%s2522_s0 + $0x5e] sm:$0x8]   ;;  %v1093_v6 = vsel %vm9_vm1, %v1421_v1, %v1089_v0  ;;  %v2_v17 = vld [vmem:[%s2522_s0] sm:$0x1]   ;;  %vm31_vm7 = vcmask 31744   ;;  %vm66_vm8 = vcmask 1048544  }
  0x59   :  { %v1423_v3 = vld [vmem:[%s2522_s0 + $0x7d] sm:$0x10]   ;;  %v1097_v9 = vsel %vm13_vm2, %v1422_v2, %v1093_v6  ;;  %1079 = vrot.lane.b32.xlu1 %v1078_v11, %s1494_s11  ;;  %v1172_v18 = vld [vmem:[%s2522_s0 + $0x1f] sm:$0x2]   ;;  %vm101_vm9 = vcmask 1015744   ;;  %vm136_vm10 = vcmask 982944  }
  0x5a   :  { %v1424_v7 = vld [vmem:[%s2522_s0 + $0x9c] sm:$0x20]   ;;  %v1101_v12 = vsel %vm17_vm3, %v1423_v3, %v1097_v9  ;;  %v1175_v20 = vld [vmem:[%s2522_s0 + $0x7c] sm:$0x10]   ;;  %v6_v21 = vsel %vm5_vm0, %v1172_v18, %v2_v17  ;;  %vm171_vm11 = vcmask 950144   ;;  %vm206_vm12 = vcmask 917344  }
  0x5b   :  { %v1425_v10 = vld [vmem:[%s2522_s0 + $0xbb] sm:$0x40]   ;;  %v1105_v15 = vsel %vm21_vm4, %v1424_v7, %v1101_v12  ;;  %v1176_v23 = vld [vmem:[%s2522_s0 + $0x9b] sm:$0x20]   ;;  %v10_v24 = vsel %vm9_vm1, %v1173_v14, %v6_v21  ;;  %vm241_vm13 = vcmask 884544   ;;  %vm276_vm14 = vcmask 851744  }
  0x5c   :  { %v1426_v13 = vld [vmem:[%s2522_s0 + $0xda] sm:$0x80]   ;;  %v1109_v19 = vsel %vm25_vm5, %v1425_v10, %v1105_v15  ;;  %v1177_v25 = vld [vmem:[%s2522_s0 + $0xba] sm:$0x40]   ;;  %v14_v26 = vsel %vm13_vm2, %v1174_v16, %v10_v24  ;;  %vm311_vm15 = vcmask 818944   ;;  %vm346_vm0 = vcmask 786144  }
  0x5d   :  { %v1113_v22 = vsel %vm29_vm6, %v1426_v13, %v1109_v19  ;;  %v1178_v27 = vld [vmem:[%s2522_s0 + $0xd9] sm:$0x80]   ;;  %v18_v28 = vsel %vm17_vm3, %v1175_v20, %v14_v26  ;;  %vm381_vm1 = vcmask 753344   ;;  %vm416_vm2 = vcmask 720544  }
  0x5e   :  { %1114 = vrot.lane.b32.xlu0 %v1113_v22, %s1495_s22  ;;  %v22_v29 = vsel %vm21_vm4, %v1176_v23, %v18_v28  ;;  %vm451_vm3 = vcmask 687744   ;;  %vm486_vm4 = vcmask 654944  }
  0x5f   :  { %v26_v30 = vsel %vm25_vm5, %v1177_v25, %v22_v29  ;;  %vm521_vm5 = vcmask 622144  }
  0x60   :  { %v30_v31 = vsel %vm29_vm6, %v1178_v27, %v26_v30  ;;  %vm556_vm6 = vcmask 589344  }
  0x61   :  { %32 = vst.msk [vmem:[#allocation0] ss:$8 sm:$0xf] %vm31_vm7, %v30_v31   ;;  %33 = vst.msk [vmem:[#allocation0] ss:$8 sm:$0xf0] %vm31_vm7, %v30_v31  }
  0x62   :  { %vm591_vm7 = vcmask 556544  }
  0x7c   :  { %v65_v32 = vpop.permute.xlu0 %64  }
  0x7d   :  { %67 = vst.msk [vmem:[#allocation0] ss:$8 sm:$0xf] %vm66_vm8, %v65_v32   ;;  %68 = vst.msk [vmem:[#allocation0] ss:$8 sm:$0xf0] %vm66_vm8, %v65_v32   ;;  %v135_v33 = vpop.permute.xlu1 %134  }
  0x7e   :  { %vm626_vm8 = vcmask 523744  }
  0x80   :  { %v100_v34 = vpop.permute.xlu0 %99  }
  0x81   :  { %102 = vst.msk [vmem:[#allocation0] ss:$8 sm:$0xf] %vm101_vm9, %v100_v34   ;;  %103 = vst.msk [vmem:[#allocation0] ss:$8 sm:$0xf0] %vm101_vm9, %v100_v34  }
  0x82   :  { %137 = vst.msk [vmem:[#allocation0] ss:$8 sm:$0xf] %vm136_vm10, %v135_v33   ;;  %138 = vst.msk [vmem:[#allocation0] ss:$8 sm:$0xf0] %vm136_vm10, %v135_v33  }
  0x83   :  { %vm661_vm9 = vcmask 490944   ;;  %vm696_vm10 = vcmask 458144  }
  0x84   :  { %v170_v35 = vpop.permute.xlu1 %169  }
  0x85   :  { %172 = vst.msk [vmem:[#allocation0] ss:$8 sm:$0xf] %vm171_vm11, %v170_v35   ;;  %173 = vst.msk [vmem:[#allocation0] ss:$8 sm:$0xf0] %vm171_vm11, %v170_v35   ;;  %v205_v36 = vpop.permute.xlu0 %204  }
  0x86   :  { %207 = vst.msk [vmem:[#allocation0] ss:$8 sm:$0xf] %vm206_vm12, %v205_v36   ;;  %208 = vst.msk [vmem:[#allocation0] ss:$8 sm:$0xf0] %vm206_vm12, %v205_v36  }
  0x87   :  { %vm731_vm11 = vcmask 425344   ;;  %vm766_vm12 = vcmask 392544  }
  0x88   :  { %v240_v37 = vpop.permute.xlu1 %239  }
  0x89   :  { %242 = vst.msk [vmem:[#allocation0] ss:$8 sm:$0xf] %vm241_vm13, %v240_v37   ;;  %243 = vst.msk [vmem:[#allocation0] ss:$8 sm:$0xf0] %vm241_vm13, %v240_v37  }
  0x8a   :  { %vm801_vm13 = vcmask 359744  }
  0x8d   :  { %v275_v38 = vpop.permute.xlu0 %274   ;;  %v310_v39 = vpop.permute.xlu1 %309  }
  0x8e   :  { %277 = vst.msk [vmem:[#allocation0] ss:$8 sm:$0xf] %vm276_vm14, %v275_v38   ;;  %278 = vst.msk [vmem:[#allocation0] ss:$8 sm:$0xf0] %vm276_vm14, %v275_v38  }
  0x8f   :  { %312 = vst.msk [vmem:[#allocation0] ss:$8 sm:$0xf] %vm311_vm15, %v310_v39   ;;  %313 = vst.msk [vmem:[#allocation0] ss:$8 sm:$0xf0] %vm311_vm15, %v310_v39  }
  0x90   :  { %vm836_vm14 = vcmask 326944   ;;  %vm871_vm15 = vcmask 294144  }
  0x91   :  { %v345_v40 = vpop.permute.xlu0 %344  }
  0x92   :  { %347 = vst.msk [vmem:[#allocation0] ss:$8 sm:$0xf] %vm346_vm0, %v345_v40   ;;  %348 = vst.msk [vmem:[#allocation0] ss:$8 sm:$0xf0] %vm346_vm0, %v345_v40  }
  0x93   :  { %vm906_vm0 = vcmask 261344  }
  0x95   :  { %v380_v41 = vpop.permute.xlu1 %379  }
  0x96   :  { %382 = vst.msk [vmem:[#allocation0] ss:$8 sm:$0xf] %vm381_vm1, %v380_v41   ;;  %383 = vst.msk [vmem:[#allocation0] ss:$8 sm:$0xf0] %vm381_vm1, %v380_v41   ;;  %v415_v42 = vpop.permute.xlu0 %414  }
  0x97   :  { %417 = vst.msk [vmem:[#allocation0] ss:$8 sm:$0xf] %vm416_vm2, %v415_v42   ;;  %418 = vst.msk [vmem:[#allocation0] ss:$8 sm:$0xf0] %vm416_vm2, %v415_v42  }
  0x98   :  { %vm941_vm1 = vcmask 228544   ;;  %vm976_vm2 = vcmask 195744  }
  0x99   :  { %v450_v43 = vpop.permute.xlu1 %449  }
  0x9a   :  { %452 = vst.msk [vmem:[#allocation0] ss:$8 sm:$0xf] %vm451_vm3, %v450_v43   ;;  %453 = vst.msk [vmem:[#allocation0] ss:$8 sm:$0xf0] %vm451_vm3, %v450_v43  }
  0x9b   :  { %vm1011_vm3 = vcmask 162944  }
  0x9d   :  { %v485_v44 = vpop.permute.xlu0 %484  }
  0x9e   :  { %487 = vst.msk [vmem:[#allocation0] ss:$8 sm:$0xf] %vm486_vm4, %v485_v44   ;;  %488 = vst.msk [vmem:[#allocation0] ss:$8 sm:$0xf0] %vm486_vm4, %v485_v44   ;;  %v520_v45 = vpop.permute.xlu1 %519  }
  0x9f   :  { %522 = vst.msk [vmem:[#allocation0] ss:$8 sm:$0xf] %vm521_vm5, %v520_v45   ;;  %523 = vst.msk [vmem:[#allocation0] ss:$8 sm:$0xf0] %vm521_vm5, %v520_v45  }
  0xa0   :  { %vm1046_vm4 = vcmask 130144   ;;  %vm1081_vm5 = vcmask 97344  }
  0xa1   :  { %v555_v46 = vpop.permute.xlu0 %554  }
  0xa2   :  { %557 = vst.msk [vmem:[#allocation0] ss:$8 sm:$0xf] %vm556_vm6, %v555_v46   ;;  %558 = vst.msk [vmem:[#allocation0] ss:$8 sm:$0xf0] %vm556_vm6, %v555_v46  }
  0xa3   :  { %vm1116_vm6 = vcmask 64544  }
  0xa5   :  { %v590_v47 = vpop.permute.xlu1 %589  }
  0xa6   :  { %592 = vst.msk [vmem:[#allocation0] ss:$8 sm:$0xf] %vm591_vm7, %v590_v47   ;;  %593 = vst.msk [vmem:[#allocation0] ss:$8 sm:$0xf0] %vm591_vm7, %v590_v47  }
  0xa7   :  { %v625_v48 = vpop.permute.xlu0 %624  }
  0xa8   :  { %627 = vst.msk [vmem:[#allocation0] ss:$8 sm:$0xf] %vm626_vm8, %v625_v48   ;;  %628 = vst.msk [vmem:[#allocation0] ss:$8 sm:$0xf0] %vm626_vm8, %v625_v48  }
  0xa9   :  { %v660_v49 = vpop.permute.xlu1 %659  }
  0xaa   :  { %662 = vst.msk [vmem:[#allocation0] ss:$8 sm:$0xf] %vm661_vm9, %v660_v49   ;;  %663 = vst.msk [vmem:[#allocation0] ss:$8 sm:$0xf0] %vm661_vm9, %v660_v49  }
  0xae   :  { %v695_v50 = vpop.permute.xlu0 %694  }
  0xaf   :  { %697 = vst.msk [vmem:[#allocation0] ss:$8 sm:$0xf] %vm696_vm10, %v695_v50   ;;  %698 = vst.msk [vmem:[#allocation0] ss:$8 sm:$0xf0] %vm696_vm10, %v695_v50   ;;  %v730_v51 = vpop.permute.xlu1 %729  }
  0xb0   :  { %732 = vst.msk [vmem:[#allocation0] ss:$8 sm:$0xf] %vm731_vm11, %v730_v51   ;;  %733 = vst.msk [vmem:[#allocation0] ss:$8 sm:$0xf0] %vm731_vm11, %v730_v51  }
  0xb2   :  { %v765_v52 = vpop.permute.xlu0 %764  }
  0xb3   :  { %767 = vst.msk [vmem:[#allocation0] ss:$8 sm:$0xf] %vm766_vm12, %v765_v52   ;;  %768 = vst.msk [vmem:[#allocation0] ss:$8 sm:$0xf0] %vm766_vm12, %v765_v52  }
  0xb6   :  { %v800_v53 = vpop.permute.xlu1 %799  }
  0xb7   :  { %802 = vst.msk [vmem:[#allocation0] ss:$8 sm:$0xf] %vm801_vm13, %v800_v53   ;;  %803 = vst.msk [vmem:[#allocation0] ss:$8 sm:$0xf0] %vm801_vm13, %v800_v53  }
  0xb8   :  { %v835_v54 = vpop.permute.xlu0 %834  }
  0xb9   :  { %837 = vst.msk [vmem:[#allocation0] ss:$8 sm:$0xf] %vm836_vm14, %v835_v54   ;;  %838 = vst.msk [vmem:[#allocation0] ss:$8 sm:$0xf0] %vm836_vm14, %v835_v54  }
  0xba   :  { %v870_v55 = vpop.permute.xlu1 %869  }
  0xbb   :  { %872 = vst.msk [vmem:[#allocation0] ss:$8 sm:$0xf] %vm871_vm15, %v870_v55   ;;  %873 = vst.msk [vmem:[#allocation0] ss:$8 sm:$0xf0] %vm871_vm15, %v870_v55  }
  0xbf   :  { %v905_v56 = vpop.permute.xlu0 %904  }
  0xc0   :  { %907 = vst.msk [vmem:[#allocation0] ss:$8 sm:$0xf] %vm906_vm0, %v905_v56   ;;  %908 = vst.msk [vmem:[#allocation0] ss:$8 sm:$0xf0] %vm906_vm0, %v905_v56   ;;  %v940_v57 = vpop.permute.xlu1 %939  }
  0xc1   :  { %942 = vst.msk [vmem:[#allocation0] ss:$8 sm:$0xf] %vm941_vm1, %v940_v57   ;;  %943 = vst.msk [vmem:[#allocation0] ss:$8 sm:$0xf0] %vm941_vm1, %v940_v57  }
  0xc3   :  { %v975_v58 = vpop.permute.xlu0 %974  }
  0xc4   :  { %977 = vst.msk [vmem:[#allocation0] ss:$8 sm:$0xf] %vm976_vm2, %v975_v58   ;;  %978 = vst.msk [vmem:[#allocation0] ss:$8 sm:$0xf0] %vm976_vm2, %v975_v58  }
  0xc7   :  { %v1010_v59 = vpop.permute.xlu1 %1009  }
  0xc8   :  { %1012 = vst.msk [vmem:[#allocation0] ss:$8 sm:$0xf] %vm1011_vm3, %v1010_v59   ;;  %1013 = vst.msk [vmem:[#allocation0] ss:$8 sm:$0xf0] %vm1011_vm3, %v1010_v59  }
  0xc9   :  { %v1045_v60 = vpop.permute.xlu0 %1044  }
  0xca   :  { %1047 = vst.msk [vmem:[#allocation0] ss:$8 sm:$0xf] %vm1046_vm4, %v1045_v60   ;;  %1048 = vst.msk [vmem:[#allocation0] ss:$8 sm:$0xf0] %vm1046_vm4, %v1045_v60  }
  0xcb   :  { %v1080_v61 = vpop.permute.xlu1 %1079  }
  0xcc   :  { %1082 = vst.msk [vmem:[#allocation0] ss:$8 sm:$0xf] %vm1081_vm5, %v1080_v61   ;;  %1083 = vst.msk [vmem:[#allocation0] ss:$8 sm:$0xf0] %vm1081_vm5, %v1080_v61  }
  0xd0   :  { %v1115_v62 = vpop.permute.xlu0 %1114  }
  0xd1   :  { %1117 = vst.msk [vmem:[#allocation0] ss:$8 sm:$0xf] %vm1116_vm6, %v1115_v62   ;;  %1118 = vst.msk [vmem:[#allocation0] ss:$8 sm:$0xf0] %vm1116_vm6, %v1115_v62  }
  0xd8   :  { %v1122_v63 = vld [vmem:[#allocation0] sm:$0x1]  ;;  %v1126_v0 = vld [vmem:[#allocation0 + $0x8] sm:$0x1]  ;;  %v1131_v1 = vld [vmem:[#allocation0 + $0x10] sm:$0x1] }
  0xd9   :  { %1124 = vst [vmem:[%s2523_s1] sm:$0x1] %v1122_v63  ;;  %1427 = vst [vmem:[%s2523_s1 + $0x1] sm:$0x1] %v1126_v0  ;;  %v1137_v2 = vld [vmem:[#allocation0 + $0x18] sm:$0x1] }
  0xda   :  { %1428 = vst [vmem:[%s2523_s1 + $0x2] sm:$0x1] %v1131_v1  ;;  %v1143_v3 = vld [vmem:[#allocation0 + $0x20] sm:$0x1]  ;;  %v1149_v4 = vld [vmem:[#allocation0 + $0x28] sm:$0x1] }
  0xdb   :  { %1429 = vst [vmem:[%s2523_s1 + $0x3] sm:$0x1] %v1137_v2  ;;  %1430 = vst [vmem:[%s2523_s1 + $0x4] sm:$0x1] %v1143_v3  ;;  %v1155_v5 = vld [vmem:[#allocation0 + $0x30] sm:$0x1] }
  0xdc   :  { %1431 = vst [vmem:[%s2523_s1 + $0x5] sm:$0x1] %v1149_v4  ;;  %v1161_v6 = vld [vmem:[#allocation0 + $0x38] sm:$0x1]  ;;  %1432 = vst [vmem:[%s2523_s1 + $0x6] sm:$0x1] %v1155_v5 }
  0xdd   :  { %1433 = vst [vmem:[%s2523_s1 + $0x7] sm:$0x1] %v1161_v6 }

// kernel: basic_block3d.3
= control target key start
LH: loop header
LB: loop body
LE: loop exit
PB: predicated region body
PF: predicated region fallthrough
CT: control target
= control target key end

     0   :  { %s3358_s15 = smov 0   ;;  %s4995_s0 = inlined_call_operand.vmem [shape: f32[2,16,16,64], index: 0, kind: input, shape index: {}]   ;;  %s4996_s1 = inlined_call_operand.vmem [shape: f32[1152,64], index: 1, kind: input, shape index: {}]   ;;  %s4997_s2 = inlined_call_operand.vmem [shape: f32[2,16,16,64], index: 2, kind: output, shape index: {0}]   ;;  %s4998_s3 = inlined_call_operand.vmem [shape: f32[2,1,64], index: 3, kind: output, shape index: {1}]   ;;  %s4999_s4 = inlined_call_operand.vmem [shape: f32[2,1,64], index: 4, kind: output, shape index: {2}]  }
   0x1 LB: > { %s2779_s16 = sadd.s32 4294967295, %s3329_s15   ;;  %p2783_p0 = scmp.ge.s32.totalorder %s3329_s15, 1  ;;  %s3329_s15 = sphi %s3358_s15, %s15_s15  }
   0x2   : > { %p167_p1 = scmp.lt.s32.totalorder %s3329_s15, 3 }
   0x4   : > { %p168_p2 = pnand %p2783_p0, %p167_p1 }
   0x6   : > { %171 = sbr.rel (%p168_p2) target bundleno = 646 (0x286), region = 28 }
   0xd   : > { %v3369_v0 = vld [vmem:[%s4996_s1] sm:$0xff]  ;;  %v3374_v1 = vld [vmem:[%s4996_s1 + $0x8] sm:$0xff]  ;;  %v5000_v3 = vmov 0.0|0.0   ;;  %v3393_v6 = vld [vmem:[%s4996_s1 + $0x10] sm:$0xff]  ;;  %v3332_v8 = vmov 0.0   ;;  %p199_p3 = scmp.lt.s32.totalorder %s2779_s16, 1 }
   0xe   : > { %v3379_v2 = vld [vmem:[%s4996_s1 + $0x100] sm:$0xff]  ;;  %2920 = vmatprep.subr.bf16.mxu1 %v5000_v3  ;;  %2968 = vmatprep.subr.bf16.mxu0 %v5000_v3  ;;  %v2921_v4 = vpack.c.bf16 %v3374_v1, %v3369_v0  ;;  %v3388_v5 = vld [vmem:[%s4996_s1 + $0x108] sm:$0xff]  ;;  %v3398_v7 = vld [vmem:[%s4996_s1 + $0x18] sm:$0xff]  ;;  %247 = vst [vmem:[#allocation2] sm:$0xff] %v3332_v8  ;;  %vm302_vm0 = vcmask 523264   ;;  %vm2538_vm1 = vcmask 516096  }
   0xf   : > { %248 = vst [vmem:[#allocation2 + $0x8] sm:$0xff] %v3332_v8  ;;  %249 = vst [vmem:[#allocation2 + $0x10] sm:$0x3] %v3332_v8  ;;  %v2969_v9 = vpack.c.bf16 %v3388_v5, %v3379_v2  ;;  %v1234_v10 = vld [vmem:[%s4996_s1 + $0x110] sm:$0xff]  ;;  %v1235_v11 = vld [vmem:[%s4996_s1 + $0x118] sm:$0xff]  ;;  %v2924_v12 = vpack.c.bf16 %v3398_v7, %v3393_v6  ;;  %s5140_s16 = smov (!%p199_p3, %s2779_s16), 1 }
  0x10   : > { %250 = vst [vmem:[#allocation2 + $0x18] sm:$0xff] %v3332_v8  ;;  %251 = vst [vmem:[#allocation2 + $0x20] sm:$0xff] %v3332_v8  ;;  %2922 = vmatpush1.bf16.msra.mxu1 %v2921_v4  ;;  %v2972_v13 = vpack.c.bf16 %v1235_v11, %v1234_v10  ;;  %v1204_v14 = vld [vmem:[%s4996_s1 + $0x20] sm:$0xff]  ;;  %v1205_v15 = vld [vmem:[%s4996_s1 + $0x28] sm:$0xff]  ;;  %s2790_s7 = sshll.u32 %s5140_s16, 8  ;;  %s211_s14 = scalar_lea.vmem %s4998_s3, %s5140_s16 }
  0x11   : > { %252 = vst [vmem:[#allocation2 + $0x28] sm:$0x3] %v3332_v8  ;;  %253 = vst [vmem:[#allocation2 + $0x30] sm:$0xff] %v3332_v8  ;;  %2970 = vmatpush1.bf16.msra.mxu0 %v2969_v9  ;;  %2923 = vmatprep.subr.bf16.mxu1 %v5000_v3  ;;  %v1236_v16 = vld [vmem:[%s4996_s1 + $0x120] sm:$0xff]  ;;  %v1237_v17 = vld [vmem:[%s4996_s1 + $0x128] sm:$0xff]  ;;  %v2927_v18 = vpack.c.bf16 %v1205_v15, %v1204_v14  ;;  %s3532_s20 = scalar_lea.vmem %s4995_s0, %s2790_s7  ;;  %s4653_s12 = scalar_lea.vmem %s4997_s2, %s2790_s7 }
  0x12   : > { %254 = vst [vmem:[#allocation2 + $0x38] sm:$0xff] %v3332_v8  ;;  %255 = vst [vmem:[#allocation2 + $0x40] sm:$0x3] %v3332_v8  ;;  %2971 = vmatprep.subr.bf16.mxu0 %v5000_v3  ;;  %v2975_v19 = vpack.c.bf16 %v1237_v17, %v1236_v16  ;;  %v1206_v20 = vld [vmem:[%s4996_s1 + $0x30] sm:$0xff]  ;;  %v1207_v21 = vld [vmem:[%s4996_s1 + $0x38] sm:$0xff]  ;;  %s214_s19 = scalar_lea.vmem %s4999_s4, %s5140_s16 }
  0x13   : > { %256 = vst [vmem:[#allocation2 + $0x48] sm:$0xff] %v3332_v8  ;;  %257 = vst [vmem:[#allocation2 + $0x50] sm:$0xff] %v3332_v8  ;;  %v1238_v22 = vld [vmem:[%s4996_s1 + $0x130] sm:$0xff]  ;;  %v1239_v23 = vld [vmem:[%s4996_s1 + $0x138] sm:$0xff]  ;;  %v2930_v24 = vpack.c.bf16 %v1207_v21, %v1206_v20 }
  0x14   : > { %258 = vst [vmem:[#allocation2 + $0x58] sm:$0x3] %v3332_v8  ;;  %259 = vst [vmem:[#allocation2 + $0x60] sm:$0xff] %v3332_v8  ;;  %2925 = vmatpush1.bf16.msra.mxu1 %v2924_v12  ;;  %v2978_v25 = vpack.c.bf16 %v1239_v23, %v1238_v22  ;;  %v1208_v26 = vld [vmem:[%s4996_s1 + $0x40] sm:$0xff]  ;;  %v1209_v27 = vld [vmem:[%s4996_s1 + $0x48] sm:$0xff] }
  0x15   : > { %260 = vst [vmem:[#allocation2 + $0x68] sm:$0xff] %v3332_v8  ;;  %261 = vst [vmem:[#allocation2 + $0x70] sm:$0x3] %v3332_v8  ;;  %2973 = vmatpush1.bf16.msra.mxu0 %v2972_v13  ;;  %2926 = vmatprep.subr.bf16.mxu1 %v5000_v3  ;;  %v1240_v28 = vld [vmem:[%s4996_s1 + $0x140] sm:$0xff]  ;;  %v1241_v29 = vld [vmem:[%s4996_s1 + $0x148] sm:$0xff]  ;;  %v2933_v30 = vpack.c.bf16 %v1209_v27, %v1208_v26 }
  0x16   : > { %262 = vst [vmem:[#allocation2 + $0x78] sm:$0xff] %v3332_v8  ;;  %263 = vst [vmem:[#allocation2 + $0x80] sm:$0xff] %v3332_v8  ;;  %2974 = vmatprep.subr.bf16.mxu0 %v5000_v3  ;;  %v2981_v31 = vpack.c.bf16 %v1241_v29, %v1240_v28  ;;  %v1210_v32 = vld [vmem:[%s4996_s1 + $0x50] sm:$0xff]  ;;  %v1211_v33 = vld [vmem:[%s4996_s1 + $0x58] sm:$0xff] }
  0x17   : > { %264 = vst [vmem:[#allocation2 + $0x88] sm:$0x3] %v3332_v8  ;;  %265 = vst [vmem:[#allocation2 + $0x90] sm:$0xff] %v3332_v8  ;;  %v1242_v34 = vld [vmem:[%s4996_s1 + $0x150] sm:$0xff]  ;;  %v1243_v35 = vld [vmem:[%s4996_s1 + $0x158] sm:$0xff]  ;;  %v2936_v36 = vpack.c.bf16 %v1211_v33, %v1210_v32 }
  0x18   : > { %266 = vst [vmem:[#allocation2 + $0x98] sm:$0xff] %v3332_v8  ;;  %267 = vst [vmem:[#allocation2 + $0xa0] sm:$0x3] %v3332_v8  ;;  %2928 = vmatpush1.bf16.msra.mxu1 %v2927_v18  ;;  %v2984_v37 = vpack.c.bf16 %v1243_v35, %v1242_v34  ;;  %v1212_v38 = vld [vmem:[%s4996_s1 + $0x60] sm:$0xff]  ;;  %v1213_v39 = vld [vmem:[%s4996_s1 + $0x68] sm:$0xff] }
  0x19   : > { %268 = vst [vmem:[#allocation2 + $0xa8] sm:$0xff] %v3332_v8  ;;  %269 = vst [vmem:[#allocation2 + $0xb0] sm:$0xff] %v3332_v8  ;;  %2976 = vmatpush1.bf16.msra.mxu0 %v2975_v19  ;;  %2929 = vmatprep.subr.bf16.mxu1 %v5000_v3  ;;  %v1244_v40 = vld [vmem:[%s4996_s1 + $0x160] sm:$0xff]  ;;  %v1245_v41 = vld [vmem:[%s4996_s1 + $0x168] sm:$0xff]  ;;  %v2939_v44 = vpack.c.bf16 %v1213_v39, %v1212_v38 }
  0x1a   : > { %270 = vst [vmem:[#allocation2 + $0xb8] sm:$0x3] %v3332_v8  ;;  %271 = vst [vmem:[#allocation2 + $0xc0] sm:$0xff] %v3332_v8  ;;  %2977 = vmatprep.subr.bf16.mxu0 %v5000_v3  ;;  %v399_v42 = vld [vmem:[#allocation2 + $0x1] sm:$0xff]  ;;  %v1214_v45 = vld [vmem:[%s4996_s1 + $0x70] sm:$0xff]  ;;  %v2987_v47 = vpack.c.bf16 %v1245_v41, %v1244_v40 }
  0x1b   : > { %272 = vst [vmem:[#allocation2 + $0xc8] sm:$0xff] %v3332_v8  ;;  %273 = vst [vmem:[#allocation2 + $0xd0] sm:$0x3] %v3332_v8  ;;  %v215_v43 = vld [vmem:[%s3532_s20] sm:$0xff]  ;;  %1408 = vmatprep.mubr.f32.mxu1 %v399_v42  ;;  %v216_v46 = vld [vmem:[%s3532_s20 + $0x8] sm:$0xff] }
  0x1c   : > { %274 = vst [vmem:[#allocation2 + $0xd8] sm:$0xff] %v3332_v8  ;;  %275 = vst [vmem:[#allocation2 + $0xe0] sm:$0xff] %v3332_v8  ;;  %2931 = vmatpush1.bf16.msra.mxu1 %v2930_v24  ;;  %v1215_v48 = vld [vmem:[%s4996_s1 + $0x78] sm:$0xff]  ;;  %v1246_v49 = vld [vmem:[%s4996_s1 + $0x170] sm:$0xff] }
  0x1d   : > { %276 = vst [vmem:[#allocation2 + $0xe8] sm:$0x3] %v3332_v8  ;;  %277 = vst [vmem:[#allocation2 + $0xf0] sm:$0xff] %v3332_v8  ;;  %2979 = vmatpush1.bf16.msra.mxu0 %v2978_v25  ;;  %2932 = vmatprep.subr.bf16.mxu1 %v5000_v3  ;;  %v217_v50 = vld [vmem:[%s3532_s20 + $0x10] sm:$0xff]  ;;  %v1247_v51 = vld [vmem:[%s4996_s1 + $0x178] sm:$0xff]  ;;  %v2942_v56 = vpack.c.bf16 %v1215_v48, %v1214_v45 }
  0x1e   : > { %278 = vst [vmem:[#allocation2 + $0xf8] sm:$0xff] %v3332_v8  ;;  %279 = vst [vmem:[#allocation2 + $0x100] sm:$0x3] %v3332_v8  ;;  %2980 = vmatprep.subr.bf16.mxu0 %v5000_v3  ;;  %v218_v52 = vld [vmem:[%s3532_s20 + $0x18] sm:$0xff]  ;;  %v219_v53 = vld [vmem:[%s3532_s20 + $0x20] sm:$0xff]  ;;  %v2990_v59 = vpack.c.bf16 %v1247_v51, %v1246_v49 }
  0x1f   : > { %280 = vst [vmem:[#allocation2 + $0x108] sm:$0xff] %v3332_v8  ;;  %281 = vst [vmem:[#allocation2 + $0x110] sm:$0xff] %v3332_v8  ;;  %v220_v54 = vld [vmem:[%s3532_s20 + $0x28] sm:$0xff]  ;;  %v221_v55 = vld [vmem:[%s3532_s20 + $0x30] sm:$0xff] }
  0x20   : > { %282 = vst [vmem:[#allocation2 + $0x118] sm:$0x3] %v3332_v8  ;;  %283 = vst [vmem:[#allocation2 + $0x120] sm:$0xff] %v3332_v8  ;;  %2934 = vmatpush1.bf16.msra.mxu1 %v2933_v30  ;;  %v1216_v57 = vld [vmem:[%s4996_s1 + $0x80] sm:$0xff]  ;;  %v222_v58 = vld [vmem:[%s3532_s20 + $0x38] sm:$0xff] }
  0x21   : > { %284 = vst [vmem:[#allocation2 + $0x128] sm:$0xff] %v3332_v8  ;;  %285 = vst [vmem:[#allocation2 + $0x130] sm:$0x3] %v3332_v8  ;;  %2982 = vmatpush1.bf16.msra.mxu0 %v2981_v31  ;;  %2935 = vmatprep.subr.bf16.mxu1 %v5000_v3  ;;  %v1217_v60 = vld [vmem:[%s4996_s1 + $0x88] sm:$0xff]  ;;  %v1248_v61 = vld [vmem:[%s4996_s1 + $0x180] sm:$0xff] }
  0x22   : > { %286 = vst [vmem:[#allocation2 + $0x138] sm:$0xff] %v3332_v8  ;;  %287 = vst [vmem:[#allocation2 + $0x140] sm:$0xff] %v3332_v8  ;;  %2983 = vmatprep.subr.bf16.mxu0 %v5000_v3  ;;  %v223_v62 = vld [vmem:[%s3532_s20 + $0x40] sm:$0xff]  ;;  %v1249_v63 = vld [vmem:[%s4996_s1 + $0x188] sm:$0xff]  ;;  %v2945_v4 = vpack.c.bf16 %v1217_v60, %v1216_v57 }
  0x23   : > { %288 = vst [vmem:[#allocation2 + $0x148] sm:$0x3] %v3332_v8  ;;  %289 = vst [vmem:[#allocation2 + $0x150] sm:$0xff] %v3332_v8  ;;  %v224_v1 = vld [vmem:[%s3532_s20 + $0x48] sm:$0xff]  ;;  %v225_v2 = vld [vmem:[%s3532_s20 + $0x50] sm:$0xff]  ;;  %v2993_v5 = vpack.c.bf16 %v1249_v63, %v1248_v61 }
  0x24   : > { %290 = vst [vmem:[#allocation2 + $0x158] sm:$0xff] %v3332_v8  ;;  %291 = vst [vmem:[#allocation2 + $0x160] sm:$0x3] %v3332_v8  ;;  %2937 = vmatpush1.bf16.msra.mxu1 %v2936_v36  ;;  %v1218_v6 = vld [vmem:[%s4996_s1 + $0x90] sm:$0xff]  ;;  %v1219_v7 = vld [vmem:[%s4996_s1 + $0x98] sm:$0xff] }
  0x25   : > { %292 = vst [vmem:[#allocation2 + $0x168] sm:$0xff] %v3332_v8  ;;  %293 = vst [vmem:[#allocation2 + $0x170] sm:$0xff] %v3332_v8  ;;  %2985 = vmatpush1.bf16.msra.mxu0 %v2984_v37  ;;  %2938 = vmatprep.subr.bf16.mxu1 %v5000_v3  ;;  %v1250_v9 = vld [vmem:[%s4996_s1 + $0x190] sm:$0xff]  ;;  %v1251_v10 = vld [vmem:[%s4996_s1 + $0x198] sm:$0xff]  ;;  %v2948_v11 = vpack.c.bf16 %v1219_v7, %v1218_v6 }
  0x26   : > { %294 = vst [vmem:[#allocation2 + $0x178] sm:$0x3] %v3332_v8  ;;  %295 = vst [vmem:[#allocation2 + $0x180] sm:$0xff] %v3332_v8  ;;  %2986 = vmatprep.subr.bf16.mxu0 %v5000_v3  ;;  %v2996_v12 = vpack.c.bf16 %v1251_v10, %v1250_v9  ;;  %v1220_v13 = vld [vmem:[%s4996_s1 + $0xa0] sm:$0xff]  ;;  %v1221_v14 = vld [vmem:[%s4996_s1 + $0xa8] sm:$0xff] }
  0x27   : > { %296 = vst [vmem:[#allocation2 + $0x188] sm:$0xff] %v3332_v8  ;;  %297 = vst [vmem:[#allocation2 + $0x190] sm:$0x3] %v3332_v8  ;;  %v1252_v15 = vld [vmem:[%s4996_s1 + $0x1a0] sm:$0xff]  ;;  %v1253_v16 = vld [vmem:[%s4996_s1 + $0x1a8] sm:$0xff]  ;;  %v2951_v17 = vpack.c.bf16 %v1221_v14, %v1220_v13 }
  0x28   : > { %298 = vst [vmem:[#allocation2 + $0x198] sm:$0xff] %v3332_v8  ;;  %299 = vst [vmem:[#allocation2 + $0x1a0] sm:$0xff] %v3332_v8  ;;  %2940 = vmatpush1.bf16.msra.mxu1 %v2939_v44  ;;  %v2999_v18 = vpack.c.bf16 %v1253_v16, %v1252_v15  ;;  %v1222_v19 = vld [vmem:[%s4996_s1 + $0xb0] sm:$0xff]  ;;  %v1223_v20 = vld [vmem:[%s4996_s1 + $0xb8] sm:$0xff] }
  0x29   : > { %300 = vst [vmem:[#allocation2 + $0x1a8] sm:$0x3] %v3332_v8  ;;  %303 = vst.msk [vmem:[#allocation2 + $0x19] sm:$0xff] %vm302_vm0, %v215_v43  ;;  %2988 = vmatpush1.bf16.msra.mxu0 %v2987_v47  ;;  %2941 = vmatprep.subr.bf16.mxu1 %v5000_v3  ;;  %v226_v21 = vld [vmem:[%s3532_s20 + $0x58] sm:$0xff]  ;;  %v1254_v22 = vld [vmem:[%s4996_s1 + $0x1b0] sm:$0xff]  ;;  %v2954_v25 = vpack.c.bf16 %v1223_v20, %v1222_v19 }
  0x2a   : > { %304 = vst.msk [vmem:[#allocation2 + $0x21] sm:$0xff] %vm302_vm0, %v216_v46  ;;  %305 = vst.msk [vmem:[#allocation2 + $0x31] sm:$0xff] %vm302_vm0, %v217_v50  ;;  %2989 = vmatprep.subr.bf16.mxu0 %v5000_v3  ;;  %v1255_v23 = vld [vmem:[%s4996_s1 + $0x1b8] sm:$0xff]  ;;  %v227_v24 = vld [vmem:[%s3532_s20 + $0x60] sm:$0xff] }
  0x2b   : > { %306 = vst.msk [vmem:[#allocation2 + $0x39] sm:$0xff] %vm302_vm0, %v218_v52  ;;  %307 = vst.msk [vmem:[#allocation2 + $0x49] sm:$0xff] %vm302_vm0, %v219_v53  ;;  %v228_v26 = vld [vmem:[%s3532_s20 + $0x68] sm:$0xff]  ;;  %v229_v27 = vld [vmem:[%s3532_s20 + $0x70] sm:$0xff]  ;;  %v3002_v28 = vpack.c.bf16 %v1255_v23, %v1254_v22 }
  0x2c   : > { %308 = vst.msk [vmem:[#allocation2 + $0x51] sm:$0xff] %vm302_vm0, %v220_v54  ;;  %309 = vst.msk [vmem:[#allocation2 + $0x61] sm:$0xff] %vm302_vm0, %v221_v55  ;;  %2943 = vmatpush1.bf16.msra.mxu1 %v2942_v56  ;;  %v1224_v29 = vld [vmem:[%s4996_s1 + $0xc0] sm:$0xff]  ;;  %v1225_v30 = vld [vmem:[%s4996_s1 + $0xc8] sm:$0xff] }
  0x2d   : > { %310 = vst.msk [vmem:[#allocation2 + $0x69] sm:$0xff] %vm302_vm0, %v222_v58  ;;  %311 = vst.msk [vmem:[#allocation2 + $0x79] sm:$0xff] %vm302_vm0, %v223_v62  ;;  %2991 = vmatpush1.bf16.msra.mxu0 %v2990_v59  ;;  %2944 = vmatprep.subr.bf16.mxu1 %v5000_v3  ;;  %v1256_v31 = vld [vmem:[%s4996_s1 + $0x1c0] sm:$0xff]  ;;  %v1257_v32 = vld [vmem:[%s4996_s1 + $0x1c8] sm:$0xff]  ;;  %v2957_v35 = vpack.c.bf16 %v1225_v30, %v1224_v29 }
  0x2e   : > { %312 = vst.msk [vmem:[#allocation2 + $0x81] sm:$0xff] %vm302_vm0, %v224_v1  ;;  %313 = vst.msk [vmem:[#allocation2 + $0x91] sm:$0xff] %vm302_vm0, %v225_v2  ;;  %2992 = vmatprep.subr.bf16.mxu0 %v5000_v3  ;;  %v230_v33 = vld [vmem:[%s3532_s20 + $0x78] sm:$0xff]  ;;  %v231_v34 = vld [vmem:[%s3532_s20 + $0x80] sm:$0xff]  ;;  %v3005_v38 = vpack.c.bf16 %v1257_v32, %v1256_v31 }
  0x2f   : > { %314 = vst.msk [vmem:[#allocation2 + $0x99] sm:$0xff] %vm302_vm0, %v226_v21  ;;  %315 = vst.msk [vmem:[#allocation2 + $0xa9] sm:$0xff] %vm302_vm0, %v227_v24  ;;  %v232_v36 = vld [vmem:[%s3532_s20 + $0x88] sm:$0xff]  ;;  %v233_v37 = vld [vmem:[%s3532_s20 + $0x90] sm:$0xff] }
  0x30   : > { %v3593_v0 = vld [vmem:[#allocation2 + $0x18] sm:$0xff]  ;;  %2946 = vmatpush1.bf16.msra.mxu1 %v2945_v4  ;;  %316 = vst.msk [vmem:[#allocation2 + $0xb1] sm:$0xff] %vm302_vm0, %v228_v26  ;;  %317 = vst.msk [vmem:[#allocation2 + $0xc1] sm:$0xff] %vm302_vm0, %v229_v27  ;;  %v1226_v39 = vld [vmem:[%s4996_s1 + $0xd0] sm:$0xff] }
  0x31   : > { %1633 = vmatprep.mubr.f32.mxu0 %v3593_v0  ;;  %2994 = vmatpush1.bf16.msra.mxu0 %v2993_v5  ;;  %318 = vst.msk [vmem:[#allocation2 + $0xc9] sm:$0xff] %vm302_vm0, %v230_v33  ;;  %319 = vst.msk [vmem:[#allocation2 + $0xd9] sm:$0xff] %vm302_vm0, %v231_v34  ;;  %v1227_v40 = vld [vmem:[%s4996_s1 + $0xd8] sm:$0xff]  ;;  %v1258_v41 = vld [vmem:[%s4996_s1 + $0x1d0] sm:$0xff] }
  0x32   : > { %2947 = vmatprep.subr.bf16.mxu1 %v5000_v3  ;;  %2995 = vmatprep.subr.bf16.mxu0 %v5000_v3  ;;  %320 = vst.msk [vmem:[#allocation2 + $0xe1] sm:$0xff] %vm302_vm0, %v232_v36  ;;  %321 = vst.msk [vmem:[#allocation2 + $0xf1] sm:$0xff] %vm302_vm0, %v233_v37  ;;  %v1259_v42 = vld [vmem:[%s4996_s1 + $0x1d8] sm:$0xff]  ;;  %v2960_v43 = vpack.c.bf16 %v1227_v40, %v1226_v39  ;;  %v1228_v45 = vld [vmem:[%s4996_s1 + $0xe0] sm:$0xff] }
  0x33   : > { %v3008_v44 = vpack.c.bf16 %v1259_v42, %v1258_v41  ;;  %v1229_v46 = vld [vmem:[%s4996_s1 + $0xe8] sm:$0xff]  ;;  %v1260_v47 = vld [vmem:[%s4996_s1 + $0x1e0] sm:$0xff]  ;;  %v1230_v51 = vld [vmem:[%s4996_s1 + $0xf0] sm:$0xff] }
  0x34   : > { %2949 = vmatpush1.bf16.msra.mxu1 %v2948_v11  ;;  %v1261_v48 = vld [vmem:[%s4996_s1 + $0x1e8] sm:$0xff]  ;;  %v2963_v49 = vpack.c.bf16 %v1229_v46, %v1228_v45  ;;  %v1231_v52 = vld [vmem:[%s4996_s1 + $0xf8] sm:$0xff]  ;;  %v1262_v54 = vld [vmem:[%s4996_s1 + $0x1f0] sm:$0xff] }
  0x35   : > { %2997 = vmatpush1.bf16.msra.mxu0 %v2996_v12  ;;  %2950 = vmatprep.subr.bf16.mxu1 %v5000_v3  ;;  %v3011_v50 = vpack.c.bf16 %v1261_v48, %v1260_v47  ;;  %v234_v53 = vld [vmem:[%s3532_s20 + $0x98] sm:$0xff]  ;;  %v235_v56 = vld [vmem:[%s3532_s20 + $0xa0] sm:$0xff]  ;;  %v2966_v57 = vpack.c.bf16 %v1231_v52, %v1230_v51  ;;  %v236_v58 = vld [vmem:[%s3532_s20 + $0xa8] sm:$0xff] }
  0x36   : > { %2998 = vmatprep.subr.bf16.mxu0 %v5000_v3  ;;  %v1263_v55 = vld [vmem:[%s4996_s1 + $0x1f8] sm:$0xff]  ;;  %322 = vst.msk [vmem:[#allocation2 + $0xf9] sm:$0xff] %vm302_vm0, %v234_v53  ;;  %323 = vst.msk [vmem:[#allocation2 + $0x109] sm:$0xff] %vm302_vm0, %v235_v56  ;;  %v237_v60 = vld [vmem:[%s3532_s20 + $0xb0] sm:$0xff] }
  0x37   : > { %v3014_v59 = vpack.c.bf16 %v1263_v55, %v1262_v54  ;;  %324 = vst.msk [vmem:[#allocation2 + $0x111] sm:$0xff] %vm302_vm0, %v236_v58  ;;  %v1264_v61 = vld [vmem:[%s4996_s1 + $0x200] sm:$0xff]  ;;  %v1265_v62 = vld [vmem:[%s4996_s1 + $0x208] sm:$0xff]  ;;  %325 = vst.msk [vmem:[#allocation2 + $0x121] sm:$0xff] %vm302_vm0, %v237_v60 }
  0x38   : > { %2952 = vmatpush1.bf16.msra.mxu1 %v2951_v17  ;;  %v238_v63 = vld [vmem:[%s3532_s20 + $0xb8] sm:$0xff]  ;;  %v1296_v1 = vld [vmem:[%s4996_s1 + $0x300] sm:$0xff]  ;;  %v1297_v2 = vld [vmem:[%s4996_s1 + $0x308] sm:$0xff]  ;;  %v3017_v6 = vpack.c.bf16 %v1265_v62, %v1264_v61 }
  0x39   : > { %3000 = vmatpush1.bf16.msra.mxu0 %v2999_v18  ;;  %2953 = vmatprep.subr.bf16.mxu1 %v5000_v3  ;;  %326 = vst.msk [vmem:[#allocation2 + $0x129] sm:$0xff] %vm302_vm0, %v238_v63  ;;  %v239_v4 = vld [vmem:[%s3532_s20 + $0xc0] sm:$0xff]  ;;  %v400_v7 = vld [vmem:[#allocation2 + $0x9] sm:$0xff]  ;;  %v1267_v11 = vld [vmem:[%s4996_s1 + $0x218] sm:$0xff]  ;;  %v3749_v12 = vpack.c.bf16 %v1297_v2, %v1296_v1 }
  0x3a   : > { %3001 = vmatprep.subr.bf16.mxu0 %v5000_v3  ;;  %327 = vst.msk [vmem:[#allocation2 + $0x139] sm:$0xff] %vm302_vm0, %v239_v4  ;;  %v463_v5 = vld [vmem:[#allocation2 + $0x2] sm:$0xff]  ;;  %v1266_v10 = vld [vmem:[%s4996_s1 + $0x210] sm:$0xff]  ;;  %v1299_v14 = vld [vmem:[%s4996_s1 + $0x318] sm:$0xff] }
  0x3b   : > { %v528_v9 = vld [vmem:[#allocation2 + $0x20] sm:$0xff]  ;;  %v1298_v13 = vld [vmem:[%s4996_s1 + $0x310] sm:$0xff]  ;;  %v240_v15 = vld [vmem:[%s3532_s20 + $0xc8] sm:$0xff]  ;;  %v3020_v18 = vpack.c.bf16 %v1267_v11, %v1266_v10 }
  0x3c   : > { %2955 = vmatpush1.bf16.msra.mxu1 %v2954_v25  ;;  %328 = vst.msk [vmem:[#allocation2 + $0x141] sm:$0xff] %vm302_vm0, %v240_v15  ;;  %v464_v16 = vld [vmem:[#allocation2 + $0xa] sm:$0xff]  ;;  %v3760_v17 = vld [vmem:[#allocation2 + $0x19] sm:$0xff]  ;;  %v3772_v22 = vpack.c.bf16 %v1299_v14, %v1298_v13  ;;  %v3919_v15 = vld [vmem:[#allocation2 + $0x61] sm:$0xff] }
  0x3d   : > { %3003 = vmatpush1.bf16.msra.mxu0 %v3002_v28  ;;  %2956 = vmatprep.subr.bf16.mxu1 %v5000_v3  ;;  %v3762_v19 = vld [vmem:[#allocation2 + $0x30] sm:$0xff]  ;;  %v1268_v20 = vld [vmem:[%s4996_s1 + $0x220] sm:$0xff]  ;;  %v1269_v21 = vld [vmem:[%s4996_s1 + $0x228] sm:$0xff] }
  0x3e   : > { %3004 = vmatprep.subr.bf16.mxu0 %v5000_v3  ;;  %v1300_v23 = vld [vmem:[%s4996_s1 + $0x320] sm:$0xff]  ;;  %v1301_v24 = vld [vmem:[%s4996_s1 + $0x328] sm:$0xff]  ;;  %v241_v25 = vld [vmem:[%s3532_s20 + $0xd0] sm:$0xff]  ;;  %v3023_v27 = vpack.c.bf16 %v1269_v21, %v1268_v20 }
  0x3f   : > { %v3785_v26 = vld [vmem:[#allocation2 + $0x1a] sm:$0xff]  ;;  %v1270_v28 = vld [vmem:[%s4996_s1 + $0x230] sm:$0xff]  ;;  %329 = vst.msk [vmem:[#allocation2 + $0x151] sm:$0xff] %vm302_vm0, %v241_v25  ;;  %v3800_v31 = vpack.c.bf16 %v1301_v24, %v1300_v23  ;;  %v531_v39 = vld [vmem:[#allocation2 + $0x48] sm:$0xff] }
  0x40   : > { %2958 = vmatpush1.bf16.msra.mxu1 %v2957_v35  ;;  %v3793_v29 = vld [vmem:[#allocation2 + $0x38] sm:$0xff]  ;;  %v1302_v33 = vld [vmem:[%s4996_s1 + $0x330] sm:$0xff]  ;;  %v243_v35 = vld [vmem:[%s3532_s20 + $0xe0] sm:$0xff] }
  0x41   : > { %3006 = vmatpush1.bf16.msra.mxu0 %v3005_v38  ;;  %2959 = vmatprep.subr.bf16.mxu1 %v5000_v3  ;;  %v1271_v30 = vld [vmem:[%s4996_s1 + $0x238] sm:$0xff]  ;;  %v1272_v38 = vld [vmem:[%s4996_s1 + $0x240] sm:$0xff]  ;;  %331 = vst.msk [vmem:[#allocation2 + $0x169] sm:$0xff] %vm302_vm0, %v243_v35  ;;  %v1273_v40 = vld [vmem:[%s4996_s1 + $0x248] sm:$0xff] }
  0x42   : > { %3007 = vmatprep.subr.bf16.mxu0 %v5000_v3  ;;  %v242_v32 = vld [vmem:[%s3532_s20 + $0xd8] sm:$0xff]  ;;  %v3026_v37 = vpack.c.bf16 %v1271_v30, %v1270_v28  ;;  %v244_v42 = vld [vmem:[%s3532_s20 + $0xe8] sm:$0xff]  ;;  %v245_v45 = vld [vmem:[%s3532_s20 + $0xf0] sm:$0xff]  ;;  %v3029_v48 = vpack.c.bf16 %v1273_v40, %v1272_v38 }
  0x43   : > { %v1303_v34 = vld [vmem:[%s4996_s1 + $0x338] sm:$0xff]  ;;  %330 = vst.msk [vmem:[#allocation2 + $0x159] sm:$0xff] %vm302_vm0, %v242_v32  ;;  %332 = vst.msk [vmem:[#allocation2 + $0x171] sm:$0xff] %vm302_vm0, %v244_v42  ;;  %v1274_v51 = vld [vmem:[%s4996_s1 + $0x250] sm:$0xff] }
  0x44   : > { %2961 = vmatpush1.bf16.msra.mxu1 %v2960_v43  ;;  %v3818_v36 = vld [vmem:[#allocation2 + $0x31] sm:$0xff]  ;;  %v3829_v41 = vpack.c.bf16 %v1303_v34, %v1302_v33  ;;  %v1304_v43 = vld [vmem:[%s4996_s1 + $0x340] sm:$0xff]  ;;  %333 = vst.msk [vmem:[#allocation2 + $0x181] sm:$0xff] %vm302_vm0, %v245_v45  ;;  %v1277_v61 = vld [vmem:[%s4996_s1 + $0x268] sm:$0xff] }
  0x45   : > { %3009 = vmatpush1.bf16.msra.mxu0 %v3008_v44  ;;  %2962 = vmatprep.subr.bf16.mxu1 %v5000_v3  ;;  %v1305_v44 = vld [vmem:[%s4996_s1 + $0x348] sm:$0xff]  ;;  %v3844_v46 = vld [vmem:[#allocation2 + $0x32] sm:$0xff]  ;;  %v3870_v56 = vld [vmem:[#allocation2 + $0x3a] sm:$0xff] }
  0x46   : > { %3010 = vmatprep.subr.bf16.mxu0 %v5000_v3  ;;  %v3846_v47 = vld [vmem:[#allocation2 + $0x39] sm:$0xff]  ;;  %v3857_v53 = vpack.c.bf16 %v1305_v44, %v1304_v43  ;;  %v1306_v54 = vld [vmem:[%s4996_s1 + $0x350] sm:$0xff]  ;;  %v1309_v1 = vld [vmem:[%s4996_s1 + $0x368] sm:$0xff] }
  0x47   : > { %v1275_v52 = vld [vmem:[%s4996_s1 + $0x258] sm:$0xff]  ;;  %v1276_v60 = vld [vmem:[%s4996_s1 + $0x260] sm:$0xff]  ;;  %v3894_v2 = vld [vmem:[#allocation2 + $0x4a] sm:$0xff] }
  0x48   : > { %2964 = vmatpush1.bf16.msra.mxu1 %v2963_v49  ;;  %v246_v49 = vld [vmem:[%s3532_s20 + $0xf8] sm:$0xff]  ;;  %v3032_v58 = vpack.c.bf16 %v1275_v52, %v1274_v51  ;;  %v1308_v63 = vld [vmem:[%s4996_s1 + $0x360] sm:$0xff]  ;;  %v1310_v11 = vld [vmem:[%s4996_s1 + $0x370] sm:$0xff] }
  0x49   : > { %3012 = vmatpush1.bf16.msra.mxu0 %v3011_v50  ;;  %2965 = vmatprep.subr.bf16.mxu1 %v5000_v3  ;;  %v532_v50 = vld [vmem:[#allocation2 + $0x50] sm:$0xff]  ;;  %334 = vst.msk [vmem:[#allocation2 + $0x189] sm:$0xff] %vm302_vm0, %v246_v49  ;;  %v1307_v55 = vld [vmem:[%s4996_s1 + $0x358] sm:$0xff]  ;;  %v3906_v10 = vpack.c.bf16 %v1309_v1, %v1308_v63  ;;  %v1281_v20 = vld [vmem:[%s4996_s1 + $0x288] sm:$0xff] }
  0x4a   : > { %3013 = vmatprep.subr.bf16.mxu0 %v5000_v3  ;;  %v3882_v62 = vpack.c.bf16 %v1307_v55, %v1306_v54  ;;  %v3896_v4 = vld [vmem:[#allocation2 + $0x51] sm:$0xff]  ;;  %v1312_v23 = vld [vmem:[%s4996_s1 + $0x380] sm:$0xff]  ;;  %v1313_v24 = vld [vmem:[%s4996_s1 + $0x388] sm:$0xff] }
  0x4b   : > { %v1311_v13 = vld [vmem:[%s4996_s1 + $0x378] sm:$0xff]  ;;  %v3940_v25 = vld [vmem:[#allocation2 + $0x62] sm:$0xff]  ;;  %v1282_v30 = vld [vmem:[%s4996_s1 + $0x290] sm:$0xff]  ;;  %v3952_v33 = vpack.c.bf16 %v1313_v24, %v1312_v23 }
  0x4c   : > { %2967 = vmatpush1.bf16.msra.mxu1 %v2966_v57  ;;  %v3872_v57 = vld [vmem:[#allocation2 + $0x49] sm:$0xff]  ;;  %v3917_v14 = vld [vmem:[#allocation2 + $0x52] sm:$0xff]  ;;  %v3929_v21 = vpack.c.bf16 %v1311_v13, %v1310_v11  ;;  %v1284_v42 = vld [vmem:[%s4996_s1 + $0x2a0] sm:$0xff] }
  0x4d   : > { %3015 = vmatpush1.bf16.msra.mxu0 %v3014_v59  ;;  %3144 = vmatprep.subr.bf16.mxu1 %v5000_v3  ;;  %v533_v59 = vld [vmem:[#allocation2 + $0x60] sm:$0xff]  ;;  %v1283_v32 = vld [vmem:[%s4996_s1 + $0x298] sm:$0xff]  ;;  %v1314_v34 = vld [vmem:[%s4996_s1 + $0x390] sm:$0xff] }
  0x4e   : > { %3016 = vmatprep.subr.bf16.mxu0 %v5000_v3  ;;  %v1315_v35 = vld [vmem:[%s4996_s1 + $0x398] sm:$0xff]  ;;  %v3967_v40 = vld [vmem:[#allocation2 + $0x90] sm:$0xff]  ;;  %v1285_v43 = vld [vmem:[%s4996_s1 + $0x2a8] sm:$0xff] }
  0x4f   : > { %1409 = vmatmul.mubr.f32.vlgmr.msra.gmra.mrb[0].mxu1 %v3332_v8  ;;  %v3965_v38 = vld [vmem:[#allocation2 + $0x79] sm:$0xff]  ;;  %v3977_v44 = vpack.c.bf16 %v1315_v35, %v1314_v34  ;;  %v3047_v51 = vpack.c.bf16 %v1285_v43, %v1284_v42  ;;  %v1286_v54 = vld [vmem:[%s4996_s1 + $0x2b0] sm:$0xff]  ;;  %v1321_v13 = vld [vmem:[%s4996_s1 + $0x3c8] sm:$0xff] }
  0x50   : > { %1634 = vmatmul.mubr.f32.vlgmr.msra.gmra.mrb[0].mxu0 %v463_v5  ;;  %1413 = vmatprep.mubr.f32.mxu1 %v400_v7  ;;  %v3035_v5 = vpack.c.bf16 %v1277_v61, %v1276_v60  ;;  %v1278_v7 = vld [vmem:[%s4996_s1 + $0x270] sm:$0xff]  ;;  %v1316_v45 = vld [vmem:[%s4996_s1 + $0x3a0] sm:$0xff]  ;;  %v3993_v52 = vld [vmem:[#allocation2 + $0x98] sm:$0xff] }
  0x51   : > { %3018 = vmatpush1.bf16.msra.mxu0 %v3017_v6  ;;  %1638 = vmatprep.mubr.f32.mxu0 %v528_v9  ;;  %v534_v6 = vld [vmem:[#allocation2 + $0x68] sm:$0xff]  ;;  %v3989_v49 = vld [vmem:[#allocation2 + $0x7a] sm:$0xff]  ;;  %v4017_v63 = vld [vmem:[#allocation2 + $0x91] sm:$0xff] }
  0x52   : > { %3019 = vmatprep.subr.bf16.mxu0 %v5000_v3  ;;  %3160 = vmatpush1.bf16.msra.mxu1 %v3749_v12  ;;  %v1287_v55 = vld [vmem:[%s4996_s1 + $0x2b8] sm:$0xff]  ;;  %v4015_v61 = vld [vmem:[#allocation2 + $0x82] sm:$0xff]  ;;  %v1290_v23 = vld [vmem:[%s4996_s1 + $0x2d0] sm:$0xff] }
  0x53   : > { %1414 = vmatmul.mubr.f32.gmra.mrb[2].mxu1 %v3332_v8  ;;  %3145 = vmatprep.subr.bf16.mxu1 %v5000_v3  ;;  %v3787_v8 = vld [vmem:[#allocation2 + $0x21] sm:$0xff]  ;;  %v1319_v60 = vld [vmem:[%s4996_s1 + $0x3b8] sm:$0xff]  ;;  %v3050_v1 = vpack.c.bf16 %v1287_v55, %v1286_v54  ;;  %v4070_v34 = vld [vmem:[#allocation2 + $0xa9] sm:$0xff] }
  0x54   : > { %1639 = vmatmul.mubr.f32.gmra.mrb[2].mxu0 %v464_v16  ;;  %1418 = vmatprep.mubr.f32.mxu1 %v3760_v17  ;;  %v1320_v11 = vld [vmem:[%s4996_s1 + $0x3c0] sm:$0xff]  ;;  %v1291_v24 = vld [vmem:[%s4996_s1 + $0x2d8] sm:$0xff]  ;;  %v1293_v43 = vld [vmem:[%s4996_s1 + $0x2e8] sm:$0xff] }
  0x55   : > { %1643 = vmatprep.mubr.f32.mxu0 %v3762_v19  ;;  %3021 = vmatpush1.bf16.msra.mxu0 %v3020_v18  ;;  %v535_v18 = vld [vmem:[#allocation2 + $0x78] sm:$0xff]  ;;  %v3056_v35 = vpack.c.bf16 %v1291_v24, %v1290_v23  ;;  %v1292_v42 = vld [vmem:[%s4996_s1 + $0x2e0] sm:$0xff]  ;;  %v4095_v54 = vld [vmem:[#allocation2 + $0xaa] sm:$0xff] }
  0x56   : > { %3022 = vmatprep.subr.bf16.mxu0 %v5000_v3  ;;  %3161 = vmatpush1.bf16.msra.mxu1 %v3772_v22  ;;  %5063 = vst [vmem:[#allocation9_spill] sm:$0xff] %v4095_v54  ;;  %v4097_v55 = vld [vmem:[#allocation2 + $0xb1] sm:$0xff]  ;;  %v1329_v23 = vld [vmem:[%s4996_s1 + $0x408] sm:$0xff] }
  0x57   : > { %1419 = vmatmul.mubr.f32.gmra.mrb[4].mxu1 %v3593_v0  ;;  %3146 = vmatprep.subr.bf16.mxu1 %v5000_v3  ;;  %v3816_v0 = vld [vmem:[#allocation2 + $0x22] sm:$0xff]  ;;  %v4128_v24 = vld [vmem:[#allocation2 + $0xb2] sm:$0xff] }
  0x58   : > { %1644 = vmatmul.mubr.f32.gmra.mrb[4].mxu0 %v3785_v26  ;;  %1423 = vmatprep.mubr.f32.mxu1 %v3787_v8  ;;  %5065 = vst [vmem:[#allocation11_spill] sm:$0xff] %v4128_v24 }
  0x59   : > { %1648 = vmatprep.mubr.f32.mxu0 %v3793_v29  ;;  %3024 = vmatpush1.bf16.msra.mxu0 %v3023_v27  ;;  %v3942_v27 = vld [vmem:[#allocation2 + $0x69] sm:$0xff] }
  0x5a   : > { %3025 = vmatprep.subr.bf16.mxu0 %v5000_v3  ;;  %3162 = vmatpush1.bf16.msra.mxu1 %v3800_v31 }
  0x5b   : > { %1424 = vmatmul.mubr.f32.gmra.mrb[6].mxu1 %v528_v9  ;;  %3147 = vmatprep.subr.bf16.mxu1 %v5000_v3  ;;  %v1279_v9 = vld [vmem:[%s4996_s1 + $0x278] sm:$0xff] }
  0x5c   : > { %1649 = vmatmul.mubr.f32.gmra.mrb[6].mxu0 %v3816_v0  ;;  %1428 = vmatprep.mubr.f32.mxu1 %v3818_v36  ;;  %v3038_v16 = vpack.c.bf16 %v1279_v9, %v1278_v7  ;;  %v1289_v7 = vld [vmem:[%s4996_s1 + $0x2c8] sm:$0xff] }
  0x5d   : > { %1653 = vmatprep.mubr.f32.mxu0 %v531_v39  ;;  %3027 = vmatpush1.bf16.msra.mxu0 %v3026_v37  ;;  %v3963_v37 = vld [vmem:[#allocation2 + $0x6a] sm:$0xff] }
  0x5e   : > { %3028 = vmatprep.subr.bf16.mxu0 %v5000_v3  ;;  %3163 = vmatpush1.bf16.msra.mxu1 %v3829_v41 }
  0x5f   : > { %1429 = vmatmul.mubr.f32.gmra.mrb[8].mxu1 %v3762_v19  ;;  %3148 = vmatprep.subr.bf16.mxu1 %v5000_v3  ;;  %v1280_v19 = vld [vmem:[%s4996_s1 + $0x280] sm:$0xff] }
  0x60   : > { %1654 = vmatmul.mubr.f32.gmra.mrb[8].mxu0 %v3844_v46  ;;  %1433 = vmatprep.mubr.f32.mxu1 %v3846_v47  ;;  %v3041_v28 = vpack.c.bf16 %v1281_v20, %v1280_v19  ;;  %v4045_v20 = vld [vmem:[#allocation2 + $0xb0] sm:$0xff] }
  0x61   : > { %1658 = vmatprep.mubr.f32.mxu0 %v532_v50  ;;  %3030 = vmatpush1.bf16.msra.mxu0 %v3029_v48  ;;  %v1317_v48 = vld [vmem:[%s4996_s1 + $0x3a8] sm:$0xff] }
  0x62   : > { %3031 = vmatprep.subr.bf16.mxu0 %v5000_v3  ;;  %3164 = vmatpush1.bf16.msra.mxu1 %v3857_v53 }
  0x63   : > { %1434 = vmatmul.mubr.f32.gmra.mrb[10].mxu1 %v3793_v29  ;;  %3149 = vmatprep.subr.bf16.mxu1 %v5000_v3  ;;  %v536_v29 = vld [vmem:[#allocation2 + $0x80] sm:$0xff] }
  0x64   : > { %1659 = vmatmul.mubr.f32.gmra.mrb[10].mxu0 %v3870_v56  ;;  %1438 = vmatprep.mubr.f32.mxu1 %v3872_v57 }
  0x65   : > { %1663 = vmatprep.mubr.f32.mxu0 %v533_v59  ;;  %3033 = vmatpush1.bf16.msra.mxu0 %v3032_v58  ;;  %v4003_v58 = vpack.c.bf16 %v1317_v48, %v1316_v45  ;;  %v1324_v48 = vld [vmem:[%s4996_s1 + $0x3e0] sm:$0xff] }
  0x66   : > { %3034 = vmatprep.subr.bf16.mxu0 %v5000_v3  ;;  %3165 = vmatpush1.bf16.msra.mxu1 %v3882_v62 }
  0x67   : > { %1439 = vmatmul.mubr.f32.gmra.mrb[12].mxu1 %v531_v39  ;;  %3150 = vmatprep.subr.bf16.mxu1 %v5000_v3  ;;  %v3044_v39 = vpack.c.bf16 %v1283_v32, %v1282_v30  ;;  %5058 = vst [vmem:[#allocation4_spill] sm:$0xff] %v4003_v58  ;;  %v1323_v30 = vld [vmem:[%s4996_s1 + $0x3d8] sm:$0xff] }
  0x68   : > { %1664 = vmatmul.mubr.f32.gmra.mrb[12].mxu0 %v3894_v2  ;;  %1443 = vmatprep.mubr.f32.mxu1 %v3896_v4  ;;  %v4068_v32 = vld [vmem:[#allocation2 + $0x9a] sm:$0xff] }
  0x69   : > { %1668 = vmatprep.mubr.f32.mxu0 %v534_v6  ;;  %3036 = vmatpush1.bf16.msra.mxu0 %v3035_v5  ;;  %v4019_v5 = vld [vmem:[#allocation2 + $0xa8] sm:$0xff]  ;;  %5061 = vst [vmem:[#allocation7_spill] sm:$0xff] %v4068_v32 }
  0x6a   : > { %3037 = vmatprep.subr.bf16.mxu0 %v5000_v3  ;;  %3166 = vmatpush1.bf16.msra.mxu1 %v3906_v10 }
  0x6b   : > { %1444 = vmatmul.mubr.f32.gmra.mrb[14].mxu1 %v532_v50  ;;  %3151 = vmatprep.subr.bf16.mxu1 %v5000_v3  ;;  %v3991_v50 = vld [vmem:[#allocation2 + $0x81] sm:$0xff] }
  0x6c   : > { %1669 = vmatmul.mubr.f32.gmra.mrb[14].mxu0 %v3917_v14  ;;  %1448 = vmatprep.mubr.f32.mxu1 %v3919_v15 }
  0x6d   : > { %1673 = vmatprep.mubr.f32.mxu0 %v535_v18  ;;  %3039 = vmatpush1.bf16.msra.mxu0 %v3038_v16  ;;  %v4041_v16 = vld [vmem:[#allocation2 + $0x92] sm:$0xff] }
  0x6e   : > { %3040 = vmatprep.subr.bf16.mxu0 %v5000_v3  ;;  %3167 = vmatpush1.bf16.msra.mxu1 %v3929_v21 }
  0x6f   : > { %1449 = vmatmul.mubr.f32.gmra.mrb[16].mxu1 %v533_v59  ;;  %3152 = vmatprep.subr.bf16.mxu1 %v5000_v3  ;;  %v1318_v59 = vld [vmem:[%s4996_s1 + $0x3b0] sm:$0xff] }
  0x70   : > { %1674 = vmatmul.mubr.f32.gmra.mrb[16].mxu0 %v3940_v25  ;;  %1453 = vmatprep.mubr.f32.mxu1 %v3942_v27  ;;  %v4029_v9 = vpack.c.bf16 %v1319_v60, %v1318_v59  ;;  %v3059_v59 = vpack.c.bf16 %v1293_v43, %v1292_v42  ;;  %v4099_v60 = vld [vmem:[#allocation2 + $0xc8] sm:$0xff] }
  0x71   : > { %1678 = vmatprep.mubr.f32.mxu0 %v536_v29  ;;  %3042 = vmatpush1.bf16.msra.mxu0 %v3041_v28  ;;  %v4055_v28 = vpack.c.bf16 %v1321_v13, %v1320_v11  ;;  %v1326_v11 = vld [vmem:[%s4996_s1 + $0x3f0] sm:$0xff]  ;;  %v1327_v13 = vld [vmem:[%s4996_s1 + $0x3f8] sm:$0xff] }
  0x72   : > { %3043 = vmatprep.subr.bf16.mxu0 %v5000_v3  ;;  %3168 = vmatpush1.bf16.msra.mxu1 %v3952_v33  ;;  %5059 = vst [vmem:[#allocation5_spill] sm:$0xff] %v4029_v9  ;;  %v4136_v42 = vpack.c.bf16 %v1327_v13, %v1326_v11  ;;  %v4162_v11 = vld [vmem:[#allocation2 + $0xf0] sm:$0xff]  ;;  %v4168_v13 = vld [vmem:[#allocation2 + $0xda] sm:$0xff] }
  0x73   : > { %1454 = vmatmul.mubr.f32.gmra.mrb[18].mxu1 %v534_v6  ;;  %3153 = vmatprep.subr.bf16.mxu1 %v5000_v3  ;;  %v1288_v6 = vld [vmem:[%s4996_s1 + $0x2c0] sm:$0xff]  ;;  %5060 = vst [vmem:[#allocation6_spill] sm:$0xff] %v4055_v28  ;;  %5069 = vst [vmem:[#allocation15_spill] sm:$0xff] %v4168_v13 }
  0x74   : > { %1679 = vmatmul.mubr.f32.gmra.mrb[18].mxu0 %v3963_v37  ;;  %1458 = vmatprep.mubr.f32.mxu1 %v3965_v38  ;;  %v3053_v19 = vpack.c.bf16 %v1289_v7, %v1288_v6  ;;  %v1295_v6 = vld [vmem:[%s4996_s1 + $0x2f8] sm:$0xff]  ;;  %5066 = vst [vmem:[#allocation12_spill] sm:$0xff] %v4136_v42 }
  0x75   : > { %1683 = vmatprep.mubr.f32.mxu0 %v3967_v40  ;;  %3045 = vmatpush1.bf16.msra.mxu0 %v3044_v39  ;;  %v4072_v39 = vld [vmem:[#allocation2 + $0xc0] sm:$0xff] }
  0x76   : > { %3046 = vmatprep.subr.bf16.mxu0 %v5000_v3  ;;  %3169 = vmatpush1.bf16.msra.mxu1 %v3977_v44 }
  0x77   : > { %1459 = vmatmul.mubr.f32.gmra.mrb[20].mxu1 %v535_v18  ;;  %3154 = vmatprep.subr.bf16.mxu1 %v5000_v3  ;;  %v4043_v18 = vld [vmem:[#allocation2 + $0x99] sm:$0xff] }
  0x78   : > { %1684 = vmatmul.mubr.f32.gmra.mrb[20].mxu0 %v3989_v49  ;;  %1463 = vmatprep.mubr.f32.mxu1 %v3991_v50 }
  0x79   : > { %1688 = vmatprep.mubr.f32.mxu0 %v3993_v52  ;;  %3048 = vmatpush1.bf16.msra.mxu0 %v3047_v51  ;;  %v1325_v51 = vld [vmem:[%s4996_s1 + $0x3e8] sm:$0xff] }
  0x7a   : > { %3049 = vmatprep.subr.bf16.mxu0 %v5000_v3  ;;  %3170 = vmatpush1.bf16.msra.mxu1 %v4003_v58  ;;  %v4109_v7 = vpack.c.bf16 %v1325_v51, %v1324_v48  ;;  %v4145_v48 = vld [vmem:[#allocation2 + $0xc2] sm:$0xff] }
  0x7b   : > { %1464 = vmatmul.mubr.f32.gmra.mrb[22].mxu1 %v536_v29  ;;  %3155 = vmatprep.subr.bf16.mxu1 %v5000_v3  ;;  %v1322_v29 = vld [vmem:[%s4996_s1 + $0x3d0] sm:$0xff]  ;;  %5067 = vst [vmem:[#allocation13_spill] sm:$0xff] %v4145_v48  ;;  %v4228_v58 = vld [vmem:[#allocation2 + $0x122] sm:$0xff] }
  0x7c   : > { %1689 = vmatmul.mubr.f32.gmra.mrb[22].mxu0 %v4015_v61  ;;  %1468 = vmatprep.mubr.f32.mxu1 %v4017_v63  ;;  %v4082_v45 = vpack.c.bf16 %v1323_v30, %v1322_v29  ;;  %5064 = vst [vmem:[#allocation10_spill] sm:$0xff] %v4109_v7  ;;  %v4130_v29 = vld [vmem:[#allocation2 + $0xc1] sm:$0xff]  ;;  %v4147_v51 = vld [vmem:[#allocation2 + $0xc9] sm:$0xff]  ;;  %5080 = vst [vmem:[#allocation26_spill] sm:$0xff] %v4228_v58 }
  0x7d   : > { %1693 = vmatprep.mubr.f32.mxu0 %v4019_v5  ;;  %3051 = vmatpush1.bf16.msra.mxu0 %v3050_v1  ;;  %v1294_v1 = vld [vmem:[%s4996_s1 + $0x2f0] sm:$0xff] }
  0x7e   : > { %3052 = vmatprep.subr.bf16.mxu0 %v5000_v3  ;;  %3171 = vmatpush1.bf16.msra.mxu1 %v4029_v9  ;;  %5062 = vst [vmem:[#allocation8_spill] sm:$0xff] %v4082_v45  ;;  %v3062_v30 = vpack.c.bf16 %v1295_v6, %v1294_v1  ;;  %v4158_v1 = vld [vmem:[#allocation2 + $0xca] sm:$0xff]  ;;  %v4160_v6 = vld [vmem:[#allocation2 + $0xd9] sm:$0xff] }
  0x7f   : > { %1469 = vmatmul.mubr.f32.gmra.mrb[24].mxu1 %v3967_v40  ;;  %3156 = vmatprep.subr.bf16.mxu1 %v5000_v3  ;;  %5068 = vst [vmem:[#allocation14_spill] sm:$0xff] %v4158_v1  ;;  %v4218_v9 = vld [vmem:[#allocation2 + $0x112] sm:$0xff] }
  0x80   : > { %1694 = vmatmul.mubr.f32.gmra.mrb[24].mxu0 %v4041_v16  ;;  %1473 = vmatprep.mubr.f32.mxu1 %v4043_v18  ;;  %5077 = vst [vmem:[#allocation23_spill] sm:$0xff] %v4218_v9 }
  0x81   : > { %1698 = vmatprep.mubr.f32.mxu0 %v4045_v20  ;;  %3054 = vmatpush1.bf16.msra.mxu0 %v3053_v19  ;;  %v1328_v19 = vld [vmem:[%s4996_s1 + $0x400] sm:$0xff] }
  0x82   : > { %3055 = vmatprep.subr.bf16.mxu0 %v5000_v3  ;;  %3172 = vmatpush1.bf16.msra.mxu1 %v4055_v28  ;;  %v4140_v43 = vpack.c.bf16 %v1329_v23, %v1328_v19  ;;  %v4170_v19 = vld [vmem:[#allocation2 + $0xe1] sm:$0xff]  ;;  %v4172_v23 = vld [vmem:[#allocation2 + $0xf8] sm:$0xff]  ;;  %v4208_v28 = vld [vmem:[#allocation2 + $0x10a] sm:$0xff] }
  0x83   : > { %1474 = vmatmul.mubr.f32.gmra.mrb[26].mxu1 %v3993_v52  ;;  %3157 = vmatprep.subr.bf16.mxu1 %v5000_v3  ;;  %5075 = vst [vmem:[#allocation21_spill] sm:$0xff] %v4208_v28 }
  0x84   : > { %1699 = vmatmul.mubr.f32.gmra.mrb[26].mxu0 %v4068_v32  ;;  %1478 = vmatprep.mubr.f32.mxu1 %v4070_v34  ;;  %v4232_v32 = vld [vmem:[#allocation2 + $0x140] sm:$0xff] }
  0x85   : > { %1703 = vmatprep.mubr.f32.mxu0 %v4072_v39  ;;  %3057 = vmatpush1.bf16.msra.mxu0 %v3056_v35  ;;  %v4132_v35 = vld [vmem:[#allocation2 + $0xd8] sm:$0xff]  ;;  %5082 = vst [vmem:[#allocation28_spill] sm:$0xff] %v4232_v32 }
  0x86   : > { %3058 = vmatprep.subr.bf16.mxu0 %v5000_v3  ;;  %3173 = vmatpush1.bf16.msra.mxu1 %v4082_v45  ;;  %v4198_v45 = vld [vmem:[#allocation2 + $0xfa] sm:$0xff] }
  0x87   : > { %1479 = vmatmul.mubr.f32.gmra.mrb[28].mxu1 %v4019_v5  ;;  %3158 = vmatprep.subr.bf16.mxu1 %v5000_v3  ;;  %5073 = vst [vmem:[#allocation19_spill] sm:$0xff] %v4198_v45 }
  0x88   : > { %1704 = vmatmul.mubr.f32.gmra.mrb[28].mxu0 %v4095_v54  ;;  %1483 = vmatprep.mubr.f32.mxu1 %v4097_v55  ;;  %v4222_v54 = vld [vmem:[#allocation2 + $0x138] sm:$0xff] }
  0x89   : > { %1708 = vmatprep.mubr.f32.mxu0 %v4099_v60  ;;  %3060 = vmatpush1.bf16.msra.mxu0 %v3059_v59  ;;  %v4149_v59 = vld [vmem:[#allocation2 + $0xe0] sm:$0xff]  ;;  %5079 = vst [vmem:[#allocation25_spill] sm:$0xff] %v4222_v54 }
  0x8a   : > { %3061 = vmatprep.subr.bf16.mxu0 %v5000_v3  ;;  %3174 = vmatpush1.bf16.msra.mxu1 %v4109_v7  ;;  %v4188_v7 = vld [vmem:[#allocation2 + $0xf2] sm:$0xff] }
  0x8b   : > { %1484 = vmatmul.mubr.f32.gmra.mrb[30].mxu1 %v4045_v20  ;;  %3159 = vmatprep.subr.bf16.mxu1 %v5000_v3  ;;  %5071 = vst [vmem:[#allocation17_spill] sm:$0xff] %v4188_v7 }
  0x8c   : > { %1709 = vmatmul.mubr.f32.gmra.mrb[30].mxu0 %v4128_v24  ;;  %1488 = vmatprep.mubr.f32.mxu1 %v4130_v29  ;;  %v4212_v24 = vld [vmem:[#allocation2 + $0x128] sm:$0xff] }
  0x8d   : > { %1713 = vmatprep.mubr.f32.mxu0 %v4132_v35  ;;  %3063 = vmatpush1.bf16.msra.mxu0 %v3062_v30  ;;  %v4178_v30 = vld [vmem:[#allocation2 + $0xe2] sm:$0xff]  ;;  %5076 = vst [vmem:[#allocation22_spill] sm:$0xff] %v4212_v24 }
  0x8e   : > { %3175 = vmatpush1.bf16.msra.mxu1 %v4136_v42  ;;  %3064 = vmatprep.subr.bf16.mxu0 %v5000_v3  ;;  %5070 = vst [vmem:[#allocation16_spill] sm:$0xff] %v4178_v30  ;;  %v4180_v3 = vld [vmem:[#allocation2 + $0xf1] sm:$0xff]  ;;  %v4182_v42 = vld [vmem:[#allocation2 + $0x108] sm:$0xff] }
  0x8f   : > { %1489 = vmatmul.mubr.f32.gmra.mrb[32].mxu1 %v4072_v39  ;;  %3113 = vmatprep.subr.bf16.mxu1 %v4140_v43 }
  0x90   : > { %1714 = vmatmul.mubr.f32.gmra.mrb[32].mxu0 %v4145_v48  ;;  %1493 = vmatprep.mubr.f32.mxu1 %v4147_v51  ;;  %v4202_v48 = vld [vmem:[#allocation2 + $0x120] sm:$0xff] }
  0x91   : > { %1718 = vmatprep.mubr.f32.mxu0 %v4149_v59  ;;  %5074 = vst [vmem:[#allocation20_spill] sm:$0xff] %v4202_v48 }
  0x93   : > { %1494 = vmatmul.mubr.f32.gmra.mrb[34].mxu1 %v4099_v60 }
  0x94   : > { %1719 = vmatmul.mubr.f32.gmra.mrb[34].mxu0 %v4158_v1  ;;  %1498 = vmatprep.mubr.f32.mxu1 %v4160_v6  ;;  %v4192_v1 = vld [vmem:[#allocation2 + $0x110] sm:$0xff] }
  0x95   : > { %1723 = vmatprep.mubr.f32.mxu0 %v4162_v11  ;;  %5072 = vst [vmem:[#allocation18_spill] sm:$0xff] %v4192_v1 }
  0x97   : > { %1499 = vmatmul.mubr.f32.gmra.mrb[36].mxu1 %v4132_v35 }
  0x98   : > { %1724 = vmatmul.mubr.f32.gmra.mrb[36].mxu0 %v4168_v13  ;;  %1503 = vmatprep.mubr.f32.mxu1 %v4170_v19  ;;  %v4190_v13 = vld [vmem:[#allocation2 + $0xf9] sm:$0xff] }
  0x99   : > { %1728 = vmatprep.mubr.f32.mxu0 %v4172_v23 }
  0x9b   : > { %1504 = vmatmul.mubr.f32.gmra.mrb[38].mxu1 %v4149_v59 }
  0x9c   : > { %1729 = vmatmul.mubr.f32.gmra.mrb[38].mxu0 %v4178_v30  ;;  %1508 = vmatprep.mubr.f32.mxu1 %v4180_v3  ;;  %v4200_v30 = vld [vmem:[#allocation2 + $0x109] sm:$0xff] }
  0x9d   : > { %1733 = vmatprep.mubr.f32.mxu0 %v4182_v42 }
  0x9f   : > { %1509 = vmatmul.mubr.f32.gmra.mrb[40].mxu1 %v4162_v11 }
  0xa0   : > { %1734 = vmatmul.mubr.f32.gmra.mrb[40].mxu0 %v4188_v7  ;;  %1513 = vmatprep.mubr.f32.mxu1 %v4190_v13  ;;  %v4210_v7 = vld [vmem:[#allocation2 + $0x111] sm:$0xff] }
  0xa1   : > { %1738 = vmatprep.mubr.f32.mxu0 %v4192_v1 }
  0xa3   : > { %1514 = vmatmul.mubr.f32.gmra.mrb[42].mxu1 %v4172_v23 }
  0xa4   : > { %1739 = vmatmul.mubr.f32.gmra.mrb[42].mxu0 %v4198_v45  ;;  %1518 = vmatprep.mubr.f32.mxu1 %v4200_v30  ;;  %v4220_v45 = vld [vmem:[#allocation2 + $0x121] sm:$0xff] }
  0xa5   : > { %1743 = vmatprep.mubr.f32.mxu0 %v4202_v48  ;;  %5078 = vst [vmem:[#allocation24_spill] sm:$0xff] %v4220_v45 }
  0xa7   : > { %1519 = vmatmul.mubr.f32.gmra.mrb[44].mxu1 %v4182_v42 }
  0xa8   : > { %1744 = vmatmul.mubr.f32.gmra.mrb[44].mxu0 %v4208_v28  ;;  %1523 = vmatprep.mubr.f32.mxu1 %v4210_v7  ;;  %v4230_v28 = vld [vmem:[#allocation2 + $0x129] sm:$0xff] }
  0xa9   : > { %1748 = vmatprep.mubr.f32.mxu0 %v4212_v24  ;;  %5081 = vst [vmem:[#allocation27_spill] sm:$0xff] %v4230_v28 }
  0xab   : > { %1524 = vmatmul.mubr.f32.gmra.mrb[46].mxu1 %v4192_v1  ;;  %v4238_v1 = vld [vmem:[#allocation2 + $0x12a] sm:$0xff] }
  0xac   : > { %1749 = vmatmul.mubr.f32.gmra.mrb[46].mxu0 %v4218_v9  ;;  %1528 = vmatprep.mubr.f32.mxu1 %v4220_v45  ;;  %5083 = vst [vmem:[#allocation29_spill] sm:$0xff] %v4238_v1  ;;  %v4240_v9 = vld [vmem:[#allocation2 + $0x139] sm:$0xff]  ;;  %v4242_v45 = vld [vmem:[#allocation2 + $0x150] sm:$0xff] }
  0xad   : > { %1753 = vmatprep.mubr.f32.mxu0 %v4222_v54  ;;  %5084 = vst [vmem:[#allocation30_spill] sm:$0xff] %v4240_v9  ;;  %5085 = vst [vmem:[#allocation31_spill] sm:$0xff] %v4242_v45 }
  0xaf   : > { %1529 = vmatmul.mubr.f32.gmra.mrb[48].mxu1 %v4202_v48  ;;  %v4248_v48 = vld [vmem:[#allocation2 + $0x13a] sm:$0xff] }
  0xb0   : > { %1754 = vmatmul.mubr.f32.gmra.mrb[48].mxu0 %v4228_v58  ;;  %1533 = vmatprep.mubr.f32.mxu1 %v4230_v28  ;;  %5086 = vst [vmem:[#allocation32_spill] sm:$0xff] %v4248_v48  ;;  %v4250_v58 = vld [vmem:[#allocation2 + $0x141] sm:$0xff]  ;;  %v4252_v28 = vld [vmem:[#allocation2 + $0x158] sm:$0xff] }
  0xb1   : > { %1758 = vmatprep.mubr.f32.mxu0 %v4232_v32  ;;  %5087 = vst [vmem:[#allocation33_spill] sm:$0xff] %v4250_v58  ;;  %5088 = vst [vmem:[#allocation34_spill] sm:$0xff] %v4252_v28 }
  0xb3   : > { %1534 = vmatmul.mubr.f32.gmra.mrb[50].mxu1 %v4212_v24  ;;  %v4258_v24 = vld [vmem:[#allocation2 + $0x142] sm:$0xff] }
  0xb4   : > { %1759 = vmatmul.mubr.f32.gmra.mrb[50].mxu0 %v4238_v1  ;;  %1538 = vmatprep.mubr.f32.mxu1 %v4240_v9  ;;  %5089 = vst [vmem:[#allocation35_spill] sm:$0xff] %v4258_v24  ;;  %v4260_v1 = vld [vmem:[#allocation2 + $0x151] sm:$0xff]  ;;  %v4262_v9 = vld [vmem:[#allocation2 + $0x168] sm:$0xff] }
  0xb5   : > { %1763 = vmatprep.mubr.f32.mxu0 %v4242_v45  ;;  %5090 = vst [vmem:[#allocation36_spill] sm:$0xff] %v4260_v1 }
  0xb7   : > { %1539 = vmatmul.mubr.f32.gmra.mrb[52].mxu1 %v4222_v54  ;;  %v4268_v54 = vld [vmem:[#allocation2 + $0x152] sm:$0xff] }
  0xb8   : > { %1764 = vmatmul.mubr.f32.gmra.mrb[52].mxu0 %v4248_v48  ;;  %1543 = vmatprep.mubr.f32.mxu1 %v4250_v58  ;;  %5091 = vst [vmem:[#allocation37_spill] sm:$0xff] %v4268_v54  ;;  %v4270_v48 = vld [vmem:[#allocation2 + $0x159] sm:$0xff]  ;;  %v4272_v58 = vld [vmem:[#allocation2 + $0x170] sm:$0xff] }
  0xb9   : > { %1768 = vmatprep.mubr.f32.mxu0 %v4252_v28  ;;  %5092 = vst [vmem:[#allocation38_spill] sm:$0xff] %v4270_v48 }
  0xbb   : > { %1544 = vmatmul.mubr.f32.gmra.mrb[54].mxu1 %v4232_v32  ;;  %v4278_v32 = vld [vmem:[#allocation2 + $0x15a] sm:$0xff] }
  0xbc   : > { %1769 = vmatmul.mubr.f32.gmra.mrb[54].mxu0 %v4258_v24  ;;  %1548 = vmatprep.mubr.f32.mxu1 %v4260_v1  ;;  %5093 = vst [vmem:[#allocation39_spill] sm:$0xff] %v4278_v32  ;;  %v4280_v24 = vld [vmem:[#allocation2 + $0x169] sm:$0xff]  ;;  %v4282_v1 = vld [vmem:[#allocation2 + $0x180] sm:$0xff] }
  0xbd   : > { %1773 = vmatprep.mubr.f32.mxu0 %v4262_v9  ;;  %5094 = vst [vmem:[#allocation40_spill] sm:$0xff] %v4282_v1 }
  0xbf   : > { %1549 = vmatmul.mubr.f32.gmra.mrb[56].mxu1 %v4242_v45  ;;  %v4288_v45 = vld [vmem:[#allocation2 + $0x16a] sm:$0xff] }
  0xc0   : > { %1774 = vmatmul.mubr.f32.gmra.mrb[56].mxu0 %v4268_v54  ;;  %1553 = vmatprep.mubr.f32.mxu1 %v4270_v48  ;;  %5095 = vst [vmem:[#allocation41_spill] sm:$0xff] %v4288_v45  ;;  %v4290_v54 = vld [vmem:[#allocation2 + $0x171] sm:$0xff]  ;;  %v4292_v48 = vld [vmem:[#allocation2 + $0x188] sm:$0xff] }
  0xc1   : > { %1778 = vmatprep.mubr.f32.mxu0 %v4272_v58  ;;  %5096 = vst [vmem:[#allocation42_spill] sm:$0xff] %v4292_v48 }
  0xc3   : > { %1554 = vmatmul.mubr.f32.gmra.mrb[58].mxu1 %v4252_v28  ;;  %v4298_v28 = vld [vmem:[#allocation2 + $0x172] sm:$0xff] }
  0xc4   : > { %1779 = vmatmul.mubr.f32.gmra.mrb[58].mxu0 %v4278_v32  ;;  %1558 = vmatprep.mubr.f32.mxu1 %v4280_v24  ;;  %5097 = vst [vmem:[#allocation43_spill] sm:$0xff] %v4298_v28  ;;  %v1330_v32 = vld [vmem:[%s4996_s1 + $0x410] sm:$0xff] }
  0xc5   : > { %1783 = vmatprep.mubr.f32.mxu0 %v4282_v1  ;;  %v1333_v1 = vld [vmem:[%s4996_s1 + $0x428] sm:$0xff] }
  0xc7   : > { %1559 = vmatmul.mubr.f32.gmra.mrb[60].mxu1 %v4262_v9 }
  0xc8   : > { %1784 = vmatmul.mubr.f32.gmra.mrb[60].mxu0 %v4288_v45  ;;  %1563 = vmatprep.mubr.f32.mxu1 %v4290_v54  ;;  %v1331_v45 = vld [vmem:[%s4996_s1 + $0x418] sm:$0xff] }
  0xc9   : > { %1788 = vmatprep.mubr.f32.mxu0 %v4292_v48  ;;  %v3116_v48 = vpack.c.bf16 %v1331_v45, %v1330_v32  ;;  %v5120_v32 = vld [vmem:[#allocation12_spill] sm:$0xff] }
  0xca   : > { %v5123_v45 = vld [vmem:[#allocation16_spill] sm:$0xff] }
  0xcb   : > { %1564 = vmatmul.mubr.f32.gmra.mrb[62].mxu1 %v4272_v58 }
  0xcc   : > { %1789 = vmatmul.mubr.f32.gmra.mrb[62].mxu0 %v4298_v28  ;;  %2123 = vmatprep.mubr.f32.mxu1 %v4017_v63  ;;  %v1332_v28 = vld [vmem:[%s4996_s1 + $0x420] sm:$0xff] }
  0xcd   : > { %1858 = vmatprep.mubr.f32.mxu0 %v3785_v26  ;;  %v5098_v26 = vmov 0.0|0.0  }
  0xcf   : > { %2124 = vmatmul.mubr.f32.vlgmr.msra.gmra.mrb[64].mxu1 %v3967_v40  ;;  %v1334_v40 = vld [vmem:[%s4996_s1 + $0x430] sm:$0xff] }
  0xd0   : > { %1859 = vmatmul.mubr.f32.vlgmr.msra.gmra.mrb[0].mxu0 %v3760_v17  ;;  %2128 = vmatprep.mubr.f32.mxu1 %v4043_v18  ;;  %v3120_v17 = vpack.c.bf16 %v1333_v1, %v1332_v28  ;;  %v5119_v28 = vld [vmem:[#allocation15_spill] sm:$0xff]  ;;  %v5131_v1 = vld [vmem:[#allocation26_spill] sm:$0xff] }
  0xd1   : > { %3066 = vmatpush1.bf16.msra.mxu0 %v3749_v12  ;;  %1863 = vmatprep.mubr.f32.mxu0 %v3816_v0  ;;  %v1335_v12 = vld [vmem:[%s4996_s1 + $0x438] sm:$0xff]  ;;  %v1336_v0 = vld [vmem:[%s4996_s1 + $0x440] sm:$0xff] }
  0xd2   : > { %3067 = vmatprep.subr.bf16.mxu0 %v5098_v26  ;;  %3115 = vmatpush3.bf16.msra.mxu1 %v4140_v43  ;;  %v4460_v43 = vld [vmem:[#allocation2 + $0x189] sm:$0xff] }
  0xd3   : > { %2129 = vmatmul.mubr.f32.gmra.mrb[66].mxu1 %v3993_v52  ;;  %3117 = vmatprep.subr.bf16.mxu1 %v3116_v48  ;;  %v5112_v52 = vld [vmem:[#allocation8_spill] sm:$0xff] }
  0xd4   : > { %1864 = vmatmul.mubr.f32.gmra.mrb[2].mxu0 %v3787_v8  ;;  %2133 = vmatprep.mubr.f32.mxu1 %v4070_v34  ;;  %v3124_v8 = vpack.c.bf16 %v1335_v12, %v1334_v40  ;;  %v5133_v40 = vld [vmem:[#allocation32_spill] sm:$0xff] }
  0xd5   : > { %1868 = vmatprep.mubr.f32.mxu0 %v3844_v46  ;;  %3069 = vmatpush1.bf16.msra.mxu0 %v3772_v22  ;;  %v1337_v46 = vld [vmem:[%s4996_s1 + $0x448] sm:$0xff] }
  0xd6   : > { %3070 = vmatprep.subr.bf16.mxu0 %v5098_v26  ;;  %3119 = vmatpush3.bf16.msra.mxu1 %v3116_v48  ;;  %v3128_v22 = vpack.c.bf16 %v1337_v46, %v1336_v0  ;;  %v5128_v48 = vld [vmem:[#allocation40_spill] sm:$0xff] }
  0xd7   : > { %2134 = vmatmul.mubr.f32.gmra.mrb[68].mxu1 %v4019_v5  ;;  %3121 = vmatprep.subr.bf16.mxu1 %v3120_v17  ;;  %v5115_v5 = vld [vmem:[#allocation14_spill] sm:$0xff]  ;;  %v850_v12 = vld [vmem:[#allocation2 + $0x4a] sm:$0xff]  ;;  %v851_v46 = vld [vmem:[#allocation2 + $0x52] sm:$0xff] }
  0xd8   : > { %1869 = vmatmul.mubr.f32.gmra.mrb[4].mxu0 %v3818_v36  ;;  %2138 = vmatprep.mubr.f32.mxu1 %v4097_v55  ;;  %v1338_v36 = vld [vmem:[%s4996_s1 + $0x450] sm:$0xff] }
  0xd9   : > { %1873 = vmatprep.mubr.f32.mxu0 %v3870_v56  ;;  %3072 = vmatpush1.bf16.msra.mxu0 %v3800_v31  ;;  %v1339_v56 = vld [vmem:[%s4996_s1 + $0x458] sm:$0xff] }
  0xda   : > { %3073 = vmatprep.subr.bf16.mxu0 %v5098_v26  ;;  %3123 = vmatpush3.bf16.msra.mxu1 %v3120_v17  ;;  %v3132_v31 = vpack.c.bf16 %v1339_v56, %v1338_v36  ;;  %v852_v36 = vld [vmem:[#allocation2 + $0x62] sm:$0xff] }
  0xdb   : > { %2139 = vmatmul.mubr.f32.gmra.mrb[70].mxu1 %v4045_v20  ;;  %3125 = vmatprep.subr.bf16.mxu1 %v3124_v8  ;;  %v5118_v20 = vld [vmem:[#allocation36_spill] sm:$0xff] }
  0xdc   : > { %1874 = vmatmul.mubr.f32.gmra.mrb[6].mxu0 %v3846_v47  ;;  %2143 = vmatprep.mubr.f32.mxu1 %v4130_v29  ;;  %v1340_v47 = vld [vmem:[%s4996_s1 + $0x460] sm:$0xff] }
  0xdd   : > { %1878 = vmatprep.mubr.f32.mxu0 %v3894_v2  ;;  %3075 = vmatpush1.bf16.msra.mxu0 %v3829_v41  ;;  %v1341_v2 = vld [vmem:[%s4996_s1 + $0x468] sm:$0xff] }
  0xde   : > { %3076 = vmatprep.subr.bf16.mxu0 %v5098_v26  ;;  %3127 = vmatpush3.bf16.msra.mxu1 %v3124_v8  ;;  %v3136_v41 = vpack.c.bf16 %v1341_v2, %v1340_v47  ;;  %v853_v47 = vld [vmem:[#allocation2 + $0x6a] sm:$0xff]  ;;  %v5135_v2 = vld [vmem:[#allocation37_spill] sm:$0xff] }
  0xdf   : > { %2144 = vmatmul.mubr.f32.gmra.mrb[72].mxu1 %v4072_v39  ;;  %3129 = vmatprep.subr.bf16.mxu1 %v3128_v22  ;;  %v5122_v39 = vld [vmem:[#allocation38_spill] sm:$0xff] }
  0xe0   : > { %1879 = vmatmul.mubr.f32.gmra.mrb[8].mxu0 %v3872_v57  ;;  %2148 = vmatprep.mubr.f32.mxu1 %v4147_v51  ;;  %v1342_v57 = vld [vmem:[%s4996_s1 + $0x470] sm:$0xff] }
  0xe1   : > { %1883 = vmatprep.mubr.f32.mxu0 %v3917_v14  ;;  %3078 = vmatpush1.bf16.msra.mxu0 %v3857_v53  ;;  %v1343_v14 = vld [vmem:[%s4996_s1 + $0x478] sm:$0xff] }
  0xe2   : > { %3079 = vmatprep.subr.bf16.mxu0 %v5098_v26  ;;  %3131 = vmatpush3.bf16.msra.mxu1 %v3128_v22  ;;  %v3140_v53 = vpack.c.bf16 %v1343_v14, %v1342_v57  ;;  %v5134_v22 = vld [vmem:[#allocation35_spill] sm:$0xff] }
  0xe3   : > { %2149 = vmatmul.mubr.f32.gmra.mrb[74].mxu1 %v4099_v60  ;;  %3133 = vmatprep.subr.bf16.mxu1 %v3132_v31  ;;  %v5125_v60 = vld [vmem:[#allocation17_spill] sm:$0xff] }
  0xe4   : > { %1884 = vmatmul.mubr.f32.gmra.mrb[10].mxu0 %v3896_v4  ;;  %2153 = vmatprep.mubr.f32.mxu1 %v4160_v6  ;;  %v5100_v4 = vld [vmem:[#allocation4_spill] sm:$0xff] }
  0xe5   : > { %1888 = vmatprep.mubr.f32.mxu0 %v3940_v25  ;;  %3081 = vmatpush1.bf16.msra.mxu0 %v3882_v62  ;;  %v5099_v62 = vld [vmem:[#allocation7_spill] sm:$0xff]  ;;  %v5104_v25 = vld [vmem:[#allocation5_spill] sm:$0xff] }
  0xe6   : > { %3082 = vmatprep.subr.bf16.mxu0 %v5098_v26  ;;  %3135 = vmatpush3.bf16.msra.mxu1 %v3132_v31 }
  0xe7   : > { %2154 = vmatmul.mubr.f32.gmra.mrb[76].mxu1 %v4132_v35  ;;  %3137 = vmatprep.subr.bf16.mxu1 %v3136_v41  ;;  %v4454_v35 = vld [vmem:[#allocation2 + $0x181] sm:$0xff] }
  0xe8   : > { %1889 = vmatmul.mubr.f32.gmra.mrb[12].mxu0 %v3919_v15  ;;  %2158 = vmatprep.mubr.f32.mxu1 %v4170_v19  ;;  %v5102_v15 = vld [vmem:[#allocation24_spill] sm:$0xff] }
  0xe9   : > { %1893 = vmatprep.mubr.f32.mxu0 %v3963_v37  ;;  %3084 = vmatpush1.bf16.msra.mxu0 %v3906_v10  ;;  %v5101_v10 = vld [vmem:[#allocation18_spill] sm:$0xff]  ;;  %v5107_v37 = vld [vmem:[#allocation11_spill] sm:$0xff] }
  0xea   : > { %3085 = vmatprep.subr.bf16.mxu0 %v5098_v26  ;;  %3139 = vmatpush3.bf16.msra.mxu1 %v3136_v41  ;;  %v854_v41 = vld [vmem:[#allocation2 + $0x7a] sm:$0xff] }
  0xeb   : > { %2159 = vmatmul.mubr.f32.gmra.mrb[78].mxu1 %v4149_v59  ;;  %3141 = vmatprep.subr.bf16.mxu1 %v3140_v53 }
  0xec   : > { %1894 = vmatmul.mubr.f32.gmra.mrb[14].mxu0 %v3942_v27  ;;  %2163 = vmatprep.mubr.f32.mxu1 %v4180_v3  ;;  %v5105_v27 = vld [vmem:[#allocation20_spill] sm:$0xff] }
  0xed   : > { %1898 = vmatprep.mubr.f32.mxu0 %v3989_v49  ;;  %3087 = vmatpush1.bf16.msra.mxu0 %v3929_v21  ;;  %v5103_v21 = vld [vmem:[#allocation9_spill] sm:$0xff]  ;;  %v5110_v49 = vld [vmem:[#allocation30_spill] sm:$0xff] }
  0xee   : > { %3088 = vmatprep.subr.bf16.mxu0 %v5098_v26  ;;  %3143 = vmatpush3.bf16.msra.mxu1 %v3140_v53  ;;  %v855_v53 = vld [vmem:[#allocation2 + $0x82] sm:$0xff] }
  0xef   : > { %2164 = vmatmul.mubr.f32.gmra.mrb[80].mxu1 %v4162_v11 }
  0xf0   : > { %1899 = vmatmul.mubr.f32.gmra.mrb[16].mxu0 %v3965_v38  ;;  %2168 = vmatprep.mubr.f32.mxu1 %v4190_v13  ;;  %v5108_v38 = vld [vmem:[#allocation6_spill] sm:$0xff] }
  0xf1   : > { %1903 = vmatprep.mubr.f32.mxu0 %v4015_v61  ;;  %3090 = vmatpush1.bf16.msra.mxu0 %v3952_v33  ;;  %v5106_v33 = vld [vmem:[#allocation27_spill] sm:$0xff]  ;;  %v5113_v61 = vld [vmem:[#allocation25_spill] sm:$0xff] }
  0xf2   : > { %3091 = vmatprep.subr.bf16.mxu0 %v5098_v26 }
  0xf3   : > { %2169 = vmatmul.mubr.f32.gmra.mrb[82].mxu1 %v4172_v23  ;;  %v5132_v23 = vld [vmem:[#allocation29_spill] sm:$0xff] }
  0xf4   : > { %1904 = vmatmul.mubr.f32.gmra.mrb[18].mxu0 %v3991_v50  ;;  %2173 = vmatprep.mubr.f32.mxu1 %v4200_v30  ;;  %v5111_v50 = vld [vmem:[#allocation13_spill] sm:$0xff] }
  0xf5   : > { %1908 = vmatprep.mubr.f32.mxu0 %v4041_v16  ;;  %3093 = vmatpush1.bf16.msra.mxu0 %v3977_v44  ;;  %v5109_v44 = vld [vmem:[#allocation22_spill] sm:$0xff] }
  0xf6   : > { %3094 = vmatprep.subr.bf16.mxu0 %v5098_v26  ;;  %v5116_v16 = vld [vmem:[#allocation10_spill] sm:$0xff] }
  0xf7   : > { %2174 = vmatmul.mubr.f32.gmra.mrb[84].mxu1 %v4182_v42  ;;  %v5127_v42 = vld [vmem:[#allocation21_spill] sm:$0xff] }
  0xf8   : > { %1909 = vmatmul.mubr.f32.gmra.mrb[20].mxu0 %v4017_v63  ;;  %2178 = vmatprep.mubr.f32.mxu1 %v4210_v7  ;;  %v5114_v63 = vld [vmem:[#allocation33_spill] sm:$0xff] }
  0xf9   : > { %1913 = vmatprep.mubr.f32.mxu0 %v5099_v62  ;;  %3096 = vmatpush1.bf16.msra.mxu0 %v5100_v4  ;;  %v5136_v62 = vld [vmem:[#allocation39_spill] sm:$0xff]  ;;  %v856_v4 = vld [vmem:[#allocation2 + $0x92] sm:$0xff] }
  0xfa   : > { %3097 = vmatprep.subr.bf16.mxu0 %v5098_v26 }
  0xfb   : > { %2179 = vmatmul.mubr.f32.gmra.mrb[86].mxu1 %v5101_v10 }
  0xfc   : > { %1914 = vmatmul.mubr.f32.gmra.mrb[22].mxu0 %v4043_v18  ;;  %2183 = vmatprep.mubr.f32.mxu1 %v5102_v15  ;;  %v5117_v18 = vld [vmem:[#allocation28_spill] sm:$0xff] }
  0xfd   : > { %1918 = vmatprep.mubr.f32.mxu0 %v5103_v21  ;;  %3099 = vmatpush1.bf16.msra.mxu0 %v5104_v25  ;;  %v857_v21 = vld [vmem:[#allocation2 + $0x9a] sm:$0xff] }
  0xfe   : > { %3100 = vmatprep.subr.bf16.mxu0 %v5098_v26  ;;  %v5137_v25 = vld [vmem:[#allocation41_spill] sm:$0xff] }
  0xff   : > { %2184 = vmatmul.mubr.f32.gmra.mrb[88].mxu1 %v5105_v27  ;;  %v858_v27 = vld [vmem:[#allocation2 + $0xaa] sm:$0xff] }
 0x100   : > { %1919 = vmatmul.mubr.f32.gmra.mrb[24].mxu0 %v4070_v34  ;;  %2188 = vmatprep.mubr.f32.mxu1 %v5106_v33  ;;  %v5121_v34 = vld [vmem:[#allocation31_spill] sm:$0xff] }
 0x101   : > { %1923 = vmatprep.mubr.f32.mxu0 %v5107_v37  ;;  %3102 = vmatpush1.bf16.msra.mxu0 %v5108_v38  ;;  %v859_v38 = vld [vmem:[#allocation2 + $0xb2] sm:$0xff] }
 0x102   : > { %3103 = vmatprep.subr.bf16.mxu0 %v5098_v26 }
 0x103   : > { %2189 = vmatmul.mubr.f32.gmra.mrb[90].mxu1 %v5109_v44  ;;  %v5138_v44 = vld [vmem:[#allocation43_spill] sm:$0xff] }
 0x104   : > { %1924 = vmatmul.mubr.f32.gmra.mrb[26].mxu0 %v4097_v55  ;;  %2193 = vmatprep.mubr.f32.mxu1 %v5110_v49  ;;  %v5124_v55 = vld [vmem:[#allocation34_spill] sm:$0xff] }
 0x105   : > { %1928 = vmatprep.mubr.f32.mxu0 %v5111_v50  ;;  %3105 = vmatpush1.bf16.msra.mxu0 %v5112_v52  ;;  %v4499_v50 = vld [vmem:[#allocation2 + $0x182] sm:$0xff] }
 0x106   : > { %3106 = vmatprep.subr.bf16.mxu0 %v5098_v26 }
 0x107   : > { %2194 = vmatmul.mubr.f32.gmra.mrb[92].mxu1 %v5113_v61 }
 0x108   : > { %1929 = vmatmul.mubr.f32.gmra.mrb[28].mxu0 %v4130_v29  ;;  %2198 = vmatprep.mubr.f32.mxu1 %v5114_v63  ;;  %v5126_v29 = vld [vmem:[#allocation19_spill] sm:$0xff] }
 0x109   : > { %1933 = vmatprep.mubr.f32.mxu0 %v5115_v5  ;;  %3108 = vmatpush1.bf16.msra.mxu0 %v5116_v16  ;;  %v862_v5 = vld [vmem:[#allocation2 + $0xda] sm:$0xff]  ;;  %v4505_v16 = vld [vmem:[#allocation2 + $0x18a] sm:$0xff] }
 0x10a   : > { %3109 = vmatprep.subr.bf16.mxu0 %v5098_v26 }
 0x10b   : > { %2199 = vmatmul.mubr.f32.gmra.mrb[94].mxu1 %v5117_v18 }
 0x10c   : > { %1934 = vmatmul.mubr.f32.gmra.mrb[30].mxu0 %v4147_v51  ;;  %2203 = vmatprep.mubr.f32.mxu1 %v5118_v20 }
 0x10d   : > { %1938 = vmatprep.mubr.f32.mxu0 %v5119_v28  ;;  %3111 = vmatpush1.bf16.msra.mxu0 %v5120_v32  ;;  %v864_v28 = vld [vmem:[#allocation2 + $0xf2] sm:$0xff] }
 0x10e   : > { %v784_v32 = vld [vmem:[#allocation2 + $0x31] sm:$0xff] }
 0x10f   : > { %2204 = vmatmul.mubr.f32.gmra.mrb[96].mxu1 %v5121_v34 }
 0x110   : > { %1939 = vmatmul.mubr.f32.gmra.mrb[32].mxu0 %v4160_v6  ;;  %2208 = vmatprep.mubr.f32.mxu1 %v5122_v39  ;;  %v815_v6 = vld [vmem:[#allocation2 + $0x1a1] sm:$0xff] }
 0x111   : > { %1943 = vmatprep.mubr.f32.mxu0 %v5123_v45  ;;  %v720_v45 = vld [vmem:[#allocation2 + $0x30] sm:$0xff] }
 0x113   : > { %2209 = vmatmul.mubr.f32.gmra.mrb[98].mxu1 %v5124_v55  ;;  %v785_v55 = vld [vmem:[#allocation2 + $0x39] sm:$0xff] }
 0x114   : > { %1944 = vmatmul.mubr.f32.gmra.mrb[34].mxu0 %v4170_v19  ;;  %2213 = vmatprep.mubr.f32.mxu1 %v4280_v24 }
 0x115   : > { %1948 = vmatprep.mubr.f32.mxu0 %v5125_v60 }
 0x117   : > { %2214 = vmatmul.mubr.f32.gmra.mrb[100].mxu1 %v4262_v9  ;;  %v814_v9 = vld [vmem:[#allocation2 + $0x199] sm:$0xff] }
 0x118   : > { %1949 = vmatmul.mubr.f32.gmra.mrb[36].mxu0 %v4180_v3  ;;  %2218 = vmatprep.mubr.f32.mxu1 %v4290_v54  ;;  %v5129_v3 = vld [vmem:[#allocation23_spill] sm:$0xff] }
 0x119   : > { %1953 = vmatprep.mubr.f32.mxu0 %v5126_v29 }
 0x11b   : > { %2219 = vmatmul.mubr.f32.gmra.mrb[102].mxu1 %v4272_v58  ;;  %v5130_v58 = vld [vmem:[#allocation42_spill] sm:$0xff] }
 0x11c   : > { %1954 = vmatmul.mubr.f32.gmra.mrb[38].mxu0 %v4190_v13  ;;  %2223 = vmatprep.mubr.f32.mxu1 %v4454_v35  ;;  %v3322_v13 = vld [vmem:[#allocation2] sm:$0xff] }
 0x11d   : > { %1958 = vmatprep.mubr.f32.mxu0 %v5127_v42 }
 0x11f   : > { %2224 = vmatmul.mubr.f32.gmra.mrb[104].mxu1 %v5128_v48  ;;  %v786_v48 = vld [vmem:[#allocation2 + $0x49] sm:$0xff] }
 0x120   : > { %1959 = vmatmul.mubr.f32.gmra.mrb[40].mxu0 %v4200_v30  ;;  %2228 = vmatprep.mubr.f32.mxu1 %v4460_v43  ;;  %v848_v30 = vld [vmem:[#allocation2 + $0x32] sm:$0xff] }
 0x121   : > { %1963 = vmatprep.mubr.f32.mxu0 %v5129_v3 }
 0x122   : > { %v4466_v51 = vpop.f32.mrb[0].mxu1 }
 0x123   : > { %2229 = vmatmul.mubr.f32.gmra.mrb[106].mxu1 %v5130_v58  ;;  %v1412_v59 = vpop.f32.mrb[1].mxu1  ;;  %v722_v58 = vld [vmem:[#allocation2 + $0x48] sm:$0xff] }
 0x124   : > { %1964 = vmatmul.mubr.f32.gmra.mrb[42].mxu0 %v4210_v7  ;;  %2233 = vmatprep.mubr.f32.mxu1 %v814_v9  ;;  %v849_v7 = vld [vmem:[#allocation2 + $0x3a] sm:$0xff]  ;;  %v787_v59 = vld [vmem:[#allocation2 + $0x51] sm:$0xff] }
 0x125   : > { %1968 = vmatprep.mubr.f32.mxu0 %v5131_v1 }
 0x126   : > { %v4471_v11 = vpop.f32.mrb[2].mxu1 }
 0x127   : > { %2234 = vmatmul.mubr.f32.gmra.mrb[108].mxu1 %v3322_v13  ;;  %v1417_v19 = vpop.f32.mrb[3].mxu1 }
 0x128   : > { %1969 = vmatmul.mubr.f32.gmra.mrb[44].mxu0 %v5102_v15  ;;  %2238 = vmatprep.mubr.f32.mxu1 %v815_v6  ;;  %v788_v19 = vld [vmem:[#allocation2 + $0x61] sm:$0xff] }
 0x129   : > { %1973 = vmatprep.mubr.f32.mxu0 %v5132_v23 }
 0x12a   : > { %v4475_v26 = vpop.f32.mrb[4].mxu1 }
 0x12b   : > { %2239 = vmatmul.mubr.f32.gmra.mrb[110].mxu1 %v3322_v13  ;;  %v1422_v17 = vpop.f32.mrb[5].mxu1 }
 0x12c   : > { %1974 = vmatmul.mubr.f32.gmra.mrb[46].mxu0 %v5106_v33  ;;  %2872 = vmatprep.mubr.f32.mxu1 %v848_v30  ;;  %v789_v17 = vld [vmem:[#allocation2 + $0x69] sm:$0xff] }
 0x12d   : > { %1978 = vmatprep.mubr.f32.mxu0 %v5133_v40 }
 0x12e   : > { %v4479_v8 = vpop.f32.mrb[6].mxu1 }
 0x12f   : > { %2873 = vmatmul.mubr.f32.vlgmr.msra.gmra.mrb[112].mxu1 %v849_v7  ;;  %v1427_v0 = vpop.f32.mrb[7].mxu1 }
 0x130   : > { %1979 = vmatmul.mubr.f32.gmra.mrb[48].mxu0 %v5110_v49  ;;  %2875 = vmatprep.mubr.f32.mxu1 %v850_v12  ;;  %v860_v49 = vld [vmem:[#allocation2 + $0xc2] sm:$0xff]  ;;  %v790_v12 = vld [vmem:[#allocation2 + $0x79] sm:$0xff] }
 0x131   : > { %1983 = vmatprep.mubr.f32.mxu0 %v5134_v22 }
 0x132   : > { %v4483_v56 = vpop.f32.mrb[8].mxu1 }
 0x133   : > { %2876 = vmatmul.mubr.f32.gmra.mrb[114].mxu1 %v851_v46  ;;  %v1432_v31 = vpop.f32.mrb[9].mxu1 }
 0x134   : > { %1984 = vmatmul.mubr.f32.gmra.mrb[50].mxu0 %v5114_v63  ;;  %2878 = vmatprep.mubr.f32.mxu1 %v852_v36  ;;  %v861_v63 = vld [vmem:[#allocation2 + $0xca] sm:$0xff]  ;;  %v878_v36 = vld [vmem:[#allocation2 + $0x19a] sm:$0xff] }
 0x135   : > { %1988 = vmatprep.mubr.f32.mxu0 %v5135_v2  ;;  %v791_v31 = vld [vmem:[#allocation2 + $0x81] sm:$0xff] }
 0x136   : > { %v4487_v57 = vpop.f32.mrb[10].mxu1 }
 0x137   : > { %2879 = vmatmul.mubr.f32.gmra.mrb[116].mxu1 %v853_v47  ;;  %v1437_v14 = vpop.f32.mrb[11].mxu1 }
 0x138   : > { %1989 = vmatmul.mubr.f32.gmra.mrb[52].mxu0 %v5118_v20  ;;  %2881 = vmatprep.mubr.f32.mxu1 %v854_v41  ;;  %v863_v20 = vld [vmem:[#allocation2 + $0xe2] sm:$0xff] }
 0x139   : > { %1993 = vmatprep.mubr.f32.mxu0 %v5136_v62  ;;  %v879_v41 = vld [vmem:[#allocation2 + $0x1a2] sm:$0xff] }
 0x13a   : > { %v4491_v10 = vpop.f32.mrb[12].mxu1  ;;  %v727_v14 = vld [vmem:[#allocation2 + $0x80] sm:$0xff] }
 0x13b   : > { %2882 = vmatmul.mubr.f32.gmra.mrb[118].mxu1 %v855_v53  ;;  %v1442_v15 = vpop.f32.mrb[13].mxu1 }
 0x13c   : > { %1994 = vmatmul.mubr.f32.gmra.mrb[54].mxu0 %v5122_v39  ;;  %2884 = vmatprep.mubr.f32.mxu1 %v856_v4  ;;  %v865_v39 = vld [vmem:[#allocation2 + $0xfa] sm:$0xff] }
 0x13d   : > { %1998 = vmatprep.mubr.f32.mxu0 %v5137_v25 }
 0x13e   : > { %v4495_v33 = vpop.f32.mrb[14].mxu1 }
 0x13f   : > { %2885 = vmatmul.mubr.f32.gmra.mrb[120].mxu1 %v857_v21  ;;  %v1447_v37 = vpop.f32.mrb[15].mxu1 }
 0x140   : > { %1999 = vmatmul.mubr.f32.gmra.mrb[56].mxu0 %v4280_v24  ;;  %2887 = vmatprep.mubr.f32.mxu1 %v858_v27 }
 0x141   : > { %2003 = vmatprep.mubr.f32.mxu0 %v5138_v44 }
 0x142   : > { %v4501_v52 = vpop.f32.mrb[16].mxu1 }
 0x143   : > { %2888 = vmatmul.mubr.f32.gmra.mrb[122].mxu1 %v859_v38  ;;  %v1452_v61 = vpop.f32.mrb[17].mxu1 }
 0x144   : > { %2004 = vmatmul.mubr.f32.gmra.mrb[58].mxu0 %v4290_v54  ;;  %2890 = vmatprep.mubr.f32.mxu1 %v860_v49 }
 0x145   : > { %2008 = vmatprep.mubr.f32.mxu0 %v4499_v50 }
 0x146   : > { %v4507_v24 = vpop.f32.mrb[18].mxu1 }
 0x147   : > { %2891 = vmatmul.mubr.f32.gmra.mrb[124].mxu1 %v861_v63  ;;  %v1457_v18 = vpop.f32.mrb[19].mxu1 }
 0x148   : > { %2009 = vmatmul.mubr.f32.gmra.mrb[60].mxu0 %v4454_v35  ;;  %2893 = vmatprep.mubr.f32.mxu1 %v862_v5  ;;  %v721_v35 = vld [vmem:[#allocation2 + $0x38] sm:$0xff] }
 0x149   : > { %2013 = vmatprep.mubr.f32.mxu0 %v4505_v16 }
 0x14a   : > { %v4511_v54 = vpop.f32.mrb[20].mxu1 }
 0x14b   : > { %2894 = vmatmul.mubr.f32.gmra.mrb[126].mxu1 %v863_v20  ;;  %v1462_v34 = vpop.f32.mrb[21].mxu1 }
 0x14c   : > { %2014 = vmatmul.mubr.f32.gmra.mrb[62].mxu0 %v4460_v43  ;;  %2896 = vmatprep.mubr.f32.mxu1 %v864_v28 }
 0x14d   : > { %2083 = vmatprep.mubr.f32.mxu0 %v784_v32 }
 0x14e   : > { %v4514_v60 = vpop.f32.mrb[22].mxu1 }
 0x14f   : > { %2897 = vmatmul.mubr.f32.gmra.mrb[128].mxu1 %v865_v39  ;;  %v1467_v29 = vpop.f32.mrb[23].mxu1 }
 0x150   : > { %2084 = vmatmul.mubr.f32.vlgmr.msra.gmra.mrb[0].mxu0 %v720_v45  ;;  %2899 = vmatprep.mubr.f32.mxu1 %v5127_v42  ;;  %v723_v42 = vld [vmem:[#allocation2 + $0x50] sm:$0xff] }
 0x151   : > { %2088 = vmatprep.mubr.f32.mxu0 %v785_v55 }
 0x152   : > { %v4517_v9 = vpop.f32.mrb[24].mxu1 }
 0x153   : > { %2900 = vmatmul.mubr.f32.gmra.mrb[130].mxu1 %v5129_v3  ;;  %v1472_v43 = vpop.f32.mrb[25].mxu1 }
 0x154   : > { %2089 = vmatmul.mubr.f32.gmra.mrb[2].mxu0 %v721_v35  ;;  %2902 = vmatprep.mubr.f32.mxu1 %v5131_v1  ;;  %v724_v1 = vld [vmem:[#allocation2 + $0x60] sm:$0xff] }
 0x155   : > { %2093 = vmatprep.mubr.f32.mxu0 %v786_v48 }
 0x156   : > { %v4521_v6 = vpop.f32.mrb[26].mxu1 }
 0x157   : > { %2903 = vmatmul.mubr.f32.gmra.mrb[132].mxu1 %v5132_v23  ;;  %v1477_v13 = vpop.f32.mrb[27].mxu1 }
 0x158   : > { %2094 = vmatmul.mubr.f32.gmra.mrb[4].mxu0 %v722_v58  ;;  %2905 = vmatprep.mubr.f32.mxu1 %v5133_v40  ;;  %v725_v40 = vld [vmem:[#allocation2 + $0x68] sm:$0xff] }
 0x159   : > { %2098 = vmatprep.mubr.f32.mxu0 %v787_v59 }
 0x15a   : > { %v4525_v30 = vpop.f32.mrb[28].mxu1 }
 0x15b   : > { %2906 = vmatmul.mubr.f32.gmra.mrb[134].mxu1 %v5134_v22  ;;  %v1482_v3 = vpop.f32.mrb[29].mxu1  ;;  %v726_v22 = vld [vmem:[#allocation2 + $0x78] sm:$0xff] }
 0x15c   : > { %2099 = vmatmul.mubr.f32.gmra.mrb[6].mxu0 %v723_v42  ;;  %2908 = vmatprep.mubr.f32.mxu1 %v5135_v2 }
 0x15d   : > { %2103 = vmatprep.mubr.f32.mxu0 %v788_v19 }
 0x15e   : > { %v4529_v7 = vpop.f32.mrb[30].mxu1 }
 0x15f   : > { %2909 = vmatmul.mubr.f32.gmra.mrb[136].mxu1 %v5136_v62  ;;  %v1487_v23 = vpop.f32.mrb[31].mxu1 }
 0x160   : > { %2104 = vmatmul.mubr.f32.gmra.mrb[8].mxu0 %v724_v1  ;;  %2911 = vmatprep.mubr.f32.mxu1 %v5137_v25 }
 0x161   : > { %2108 = vmatprep.mubr.f32.mxu0 %v789_v17 }
 0x162   : > { %v4533_v0 = vpop.f32.mrb[32].mxu1 }
 0x163   : > { %2912 = vmatmul.mubr.f32.gmra.mrb[138].mxu1 %v5138_v44  ;;  %v1492_v46 = vpop.f32.mrb[33].mxu1 }
 0x164   : > { %2109 = vmatmul.mubr.f32.gmra.mrb[10].mxu0 %v725_v40  ;;  %2914 = vmatprep.mubr.f32.mxu1 %v4499_v50 }
 0x165   : > { %2113 = vmatprep.mubr.f32.mxu0 %v790_v12 }
 0x166   : > { %v4537_v47 = vpop.f32.mrb[34].mxu1 }
 0x167   : > { %2915 = vmatmul.mubr.f32.gmra.mrb[140].mxu1 %v4505_v16  ;;  %v1497_v2 = vpop.f32.mrb[35].mxu1 }
 0x168   : > { %2114 = vmatmul.mubr.f32.gmra.mrb[12].mxu0 %v726_v22  ;;  %2917 = vmatprep.mubr.f32.mxu1 %v878_v36 }
 0x169   : > { %2118 = vmatprep.mubr.f32.mxu0 %v791_v31 }
 0x16a   : > { %v4540_v53 = vpop.f32.mrb[36].mxu1 }
 0x16b   : > { %2918 = vmatmul.mubr.f32.gmra.mrb[142].mxu1 %v879_v41  ;;  %v1502_v62 = vpop.f32.mrb[37].mxu1 }
 0x16c   : > { %2119 = vmatmul.mubr.f32.gmra.mrb[14].mxu0 %v727_v14 }
 0x16e   : > { %v4542_v4 = vpop.f32.mrb[38].mxu1 }
 0x16f   : > { %v1507_v15 = vpop.f32.mrb[39].mxu1 }
 0x172   : > { %v4544_v21 = vpop.f32.mrb[40].mxu1 }
 0x173   : > { %v1512_v25 = vpop.f32.mrb[41].mxu1 }
 0x176   : > { %v4546_v27 = vpop.f32.mrb[42].mxu1 }
 0x177   : > { %v1517_v37 = vpop.f32.mrb[43].mxu1 }
 0x17a   : > { %v4548_v38 = vpop.f32.mrb[44].mxu1 }
 0x17b   : > { %v1522_v44 = vpop.f32.mrb[45].mxu1 }
 0x17e   : > { %v4550_v49 = vpop.f32.mrb[46].mxu1 }
 0x17f   : > { %v1527_v50 = vpop.f32.mrb[47].mxu1 }
 0x182   : > { %v4552_v61 = vpop.f32.mrb[48].mxu1 }
 0x183   : > { %v1532_v63 = vpop.f32.mrb[49].mxu1 }
 0x186   : > { %v4554_v5 = vpop.f32.mrb[50].mxu1 }
 0x187   : > { %v1537_v16 = vpop.f32.mrb[51].mxu1 }
 0x18a   : > { %v4556_v18 = vpop.f32.mrb[52].mxu1 }
 0x18b   : > { %v1542_v20 = vpop.f32.mrb[53].mxu1 }
 0x18e   : > { %v4558_v28 = vpop.f32.mrb[54].mxu1 }
 0x18f   : > { %v1547_v32 = vpop.f32.mrb[55].mxu1 }
 0x192   : > { %v4560_v34 = vpop.f32.mrb[56].mxu1 }
 0x193   : > { %v1552_v39 = vpop.f32.mrb[57].mxu1 }
 0x196   : > { %v4562_v45 = vpop.f32.mrb[58].mxu1 }
 0x197   : > { %v1557_v55 = vpop.f32.mrb[59].mxu1 }
 0x19a   : > { %v4564_v29 = vpop.f32.mrb[60].mxu1 }
 0x19b   : > { %v1562_v35 = vpop.f32.mrb[61].mxu1 }
 0x19e   : > { %v4566_v48 = vpop.f32.mrb[62].mxu1 }
 0x19f   : > { %v1567_v43 = vpop.f32.mrb[63].mxu1 }
 0x1a2   : > { %v2125_v58 = vpop.f32.mrb[64].mxu1 }
 0x1a3   : > { %v2127_v59 = vpop.f32.mrb[65].mxu1 }
 0x1a6   : > { %v2130_v13 = vpop.f32.mrb[66].mxu1 }
 0x1a7   : > { %v2132_v42 = vpop.f32.mrb[67].mxu1 }
 0x1aa   : > { %v2135_v19 = vpop.f32.mrb[68].mxu1 }
 0x1ab   : > { %v2137_v3 = vpop.f32.mrb[69].mxu1 }
 0x1ae   : > { %v2140_v1 = vpop.f32.mrb[70].mxu1 }
 0x1af   : > { %v2142_v17 = vpop.f32.mrb[71].mxu1 }
 0x1b2   : > { %v2145_v23 = vpop.f32.mrb[72].mxu1 }
 0x1b3   : > { %v2147_v40 = vpop.f32.mrb[73].mxu1 }
 0x1b6   : > { %v2150_v12 = vpop.f32.mrb[74].mxu1 }
 0x1b7   : > { %v2152_v46 = vpop.f32.mrb[75].mxu1 }
 0x1ba   : > { %v2155_v22 = vpop.f32.mrb[76].mxu1 }
 0x1bb   : > { %v2157_v36 = vpop.f32.mrb[77].mxu1 }
 0x1be   : > { %v2160_v31 = vpop.f32.mrb[78].mxu1 }
 0x1bf   : > { %v2162_v2 = vpop.f32.mrb[79].mxu1 }
 0x1c2   : > { %v2165_v41 = vpop.f32.mrb[80].mxu1 }
 0x1c3   : > { %v1900_v14 = vpop.f32.mrb[16].mxu0  ;;  %v2167_v62 = vpop.f32.mrb[81].mxu1 }
 0x1c4   : > { %v3184_v15 = vadd.f32 %v1900_v14, %v4501_v52  ;;  %v1902_v25 = vpop.f32.mrb[17].mxu0 }
 0x1c6   : > { %v4569_v37 = vadd.f32 %v3184_v15, %v2125_v58  ;;  %v2170_v44 = vpop.f32.mrb[82].mxu1 }
 0x1c7   : > { %v1905_v50 = vpop.f32.mrb[18].mxu0  ;;  %v2172_v63 = vpop.f32.mrb[83].mxu1 }
 0x1c8   : > { %v3186_v16 = vadd.f32 %v1905_v50, %v4507_v24  ;;  %v1907_v20 = vpop.f32.mrb[19].mxu0 }
 0x1ca   : > { %v4572_v32 = vadd.f32 %v3186_v16, %v2130_v13  ;;  %v2175_v39 = vpop.f32.mrb[84].mxu1 }
 0x1cb   : > { %v1910_v55 = vpop.f32.mrb[20].mxu0  ;;  %v2177_v35 = vpop.f32.mrb[85].mxu1 }
 0x1cc   : > { %v3188_v43 = vadd.f32 %v1910_v55, %v4511_v54  ;;  %v1912_v59 = vpop.f32.mrb[21].mxu0 }
 0x1ce   : > { %v4575_v42 = vadd.f32 %v3188_v43, %v2135_v19  ;;  %v2180_v52 = vpop.f32.mrb[86].mxu1 }
 0x1cf   : > { %v1915_v3 = vpop.f32.mrb[22].mxu0  ;;  %v2182_v58 = vpop.f32.mrb[87].mxu1 }
 0x1d0   : > { %v3190_v17 = vadd.f32 %v1915_v3, %v4514_v60  ;;  %v1917_v40 = vpop.f32.mrb[23].mxu0 }
 0x1d2   : > { %v4578_v46 = vadd.f32 %v3190_v17, %v2140_v1  ;;  %v2185_v24 = vpop.f32.mrb[88].mxu1 }
 0x1d3   : > { %v1920_v36 = vpop.f32.mrb[24].mxu0  ;;  %v2187_v13 = vpop.f32.mrb[89].mxu1 }
 0x1d4   : > { %v3192_v2 = vadd.f32 %v1920_v36, %v4517_v9  ;;  %v1922_v14 = vpop.f32.mrb[25].mxu0 }
 0x1d6   : > { %v4581_v62 = vadd.f32 %v3192_v2, %v2145_v23  ;;  %v2190_v54 = vpop.f32.mrb[90].mxu1 }
 0x1d7   : > { %v1925_v15 = vpop.f32.mrb[26].mxu0  ;;  %v2192_v19 = vpop.f32.mrb[91].mxu1 }
 0x1d8   : > { %v3194_v25 = vadd.f32 %v1925_v15, %v4521_v6  ;;  %v1927_v50 = vpop.f32.mrb[27].mxu0 }
 0x1da   : > { %v4584_v63 = vadd.f32 %v3194_v25, %v2150_v12  ;;  %v2195_v60 = vpop.f32.mrb[92].mxu1 }
 0x1db   : > { %v1930_v16 = vpop.f32.mrb[28].mxu0  ;;  %v2197_v1 = vpop.f32.mrb[93].mxu1 }
 0x1dc   : > { %v3196_v20 = vadd.f32 %v1930_v16, %v4525_v30  ;;  %v1932_v55 = vpop.f32.mrb[29].mxu0 }
 0x1de   : > { %v4587_v35 = vadd.f32 %v3196_v20, %v2155_v22  ;;  %v2200_v9 = vpop.f32.mrb[94].mxu1 }
 0x1df   : > { %v1935_v43 = vpop.f32.mrb[30].mxu0  ;;  %v2202_v23 = vpop.f32.mrb[95].mxu1 }
 0x1e0   : > { %v3198_v59 = vadd.f32 %v1935_v43, %v4529_v7  ;;  %v1937_v3 = vpop.f32.mrb[31].mxu0 }
 0x1e2   : > { %v4590_v58 = vadd.f32 %v3198_v59, %v2160_v31  ;;  %v2205_v6 = vpop.f32.mrb[96].mxu1 }
 0x1e3   : > { %v1940_v17 = vpop.f32.mrb[32].mxu0  ;;  %v2207_v12 = vpop.f32.mrb[97].mxu1 }
 0x1e4   : > { %v3200_v40 = vadd.f32 %v1940_v17, %v4533_v0  ;;  %v1942_v36 = vpop.f32.mrb[33].mxu0 }
 0x1e6   : > { %v4593_v13 = vadd.f32 %v3200_v40, %v2165_v41  ;;  %v2210_v30 = vpop.f32.mrb[98].mxu1 }
 0x1e7   : > { %v1945_v2 = vpop.f32.mrb[34].mxu0  ;;  %v2212_v22 = vpop.f32.mrb[99].mxu1 }
 0x1e8   : > { %v3202_v14 = vadd.f32 %v1945_v2, %v4537_v47  ;;  %v1947_v15 = vpop.f32.mrb[35].mxu0 }
 0x1ea   : > { %v4596_v19 = vadd.f32 %v3202_v14, %v2170_v44  ;;  %v2215_v7 = vpop.f32.mrb[100].mxu1 }
 0x1eb   : > { %v1950_v25 = vpop.f32.mrb[36].mxu0  ;;  %v2217_v31 = vpop.f32.mrb[101].mxu1 }
 0x1ec   : > { %v3204_v50 = vadd.f32 %v1950_v25, %v4540_v53  ;;  %v1952_v16 = vpop.f32.mrb[37].mxu0 }
 0x1ee   : > { %v4599_v1 = vadd.f32 %v3204_v50, %v2175_v39  ;;  %v2220_v0 = vpop.f32.mrb[102].mxu1 }
 0x1ef   : > { %v1955_v20 = vpop.f32.mrb[38].mxu0  ;;  %v2222_v41 = vpop.f32.mrb[103].mxu1 }
 0x1f0   : > { %v3206_v55 = vadd.f32 %v1955_v20, %v4542_v4  ;;  %v1957_v43 = vpop.f32.mrb[39].mxu0 }
 0x1f2   : > { %v4602_v23 = vadd.f32 %v3206_v55, %v2180_v52  ;;  %v2225_v47 = vpop.f32.mrb[104].mxu1 }
 0x1f3   : > { %v1960_v59 = vpop.f32.mrb[40].mxu0  ;;  %v2227_v44 = vpop.f32.mrb[105].mxu1 }
 0x1f4   : > { %v3208_v3 = vadd.f32 %v1960_v59, %v4544_v21  ;;  %v1962_v17 = vpop.f32.mrb[41].mxu0 }
 0x1f6   : > { %v4605_v12 = vadd.f32 %v3208_v3, %v2185_v24  ;;  %v4607_v53 = vpop.f32.mrb[106].mxu1 }
 0x1f7   : > { %v1965_v39 = vpop.f32.mrb[42].mxu0  ;;  %v2232_v40 = vpop.f32.mrb[107].mxu1 }
 0x1f8   : > { %v3210_v36 = vadd.f32 %v1965_v39, %v4546_v27  ;;  %v1967_v2 = vpop.f32.mrb[43].mxu0 }
 0x1fa   : > { %v4610_v22 = vpop.f32.mrb[108].mxu1  ;;  %v4612_v4 = vadd.f32 %v3210_v36, %v2190_v54 }
 0x1fb   : > { %v1970_v52 = vpop.f32.mrb[44].mxu0  ;;  %v2237_v14 = vpop.f32.mrb[109].mxu1 }
 0x1fc   : > { %v3212_v15 = vadd.f32 %v1970_v52, %v4548_v38  ;;  %v1972_v25 = vpop.f32.mrb[45].mxu0 }
 0x1fe   : > { %v4615_v21 = vpop.f32.mrb[110].mxu1  ;;  %v4617_v24 = vadd.f32 %v3212_v15, %v2195_v60 }
 0x1ff   : > { %v1975_v31 = vpop.f32.mrb[46].mxu0  ;;  %v2242_v50 = vpop.f32.mrb[111].mxu1 }
 0x200   : > { %v3214_v16 = vadd.f32 %v1975_v31, %v4550_v49  ;;  %v1977_v20 = vpop.f32.mrb[47].mxu0 }
 0x202   : > { %v4620_v27 = vpop.f32.mrb[112].mxu1  ;;  %v4622_v41 = vadd.f32 %v3214_v16, %v2200_v9 }
 0x203   : > { %v1980_v54 = vpop.f32.mrb[48].mxu0  ;;  %v4624_v55 = vpop.f32.mrb[113].mxu1 }
 0x204   : > { %v3216_v43 = vadd.f32 %v1980_v54, %v4552_v61  ;;  %v1982_v38 = vpop.f32.mrb[49].mxu0 }
 0x206   : > { %v4627_v59 = vpop.f32.mrb[114].mxu1  ;;  %v4629_v44 = vadd.f32 %v3216_v43, %v2205_v6 }
 0x207   : > { %v1985_v60 = vpop.f32.mrb[50].mxu0  ;;  %v4631_v3 = vpop.f32.mrb[115].mxu1 }
 0x208   : > { %v3218_v49 = vadd.f32 %v1985_v60, %v4554_v5  ;;  %v1987_v17 = vpop.f32.mrb[51].mxu0 }
 0x20a   : > { %v4634_v39 = vpop.f32.mrb[116].mxu1  ;;  %v4636_v9 = vadd.f32 %v3218_v49, %v2210_v30 }
 0x20b   : > { %v1990_v40 = vpop.f32.mrb[52].mxu0  ;;  %v4638_v36 = vpop.f32.mrb[117].mxu1 }
 0x20c   : > { %v3220_v61 = vadd.f32 %v1990_v40, %v4556_v18  ;;  %v1992_v2 = vpop.f32.mrb[53].mxu0 }
 0x20e   : > { %v4641_v52 = vpop.f32.mrb[118].mxu1  ;;  %v4643_v6 = vadd.f32 %v3220_v61, %v2215_v7 }
 0x20f   : > { %v1995_v14 = vpop.f32.mrb[54].mxu0  ;;  %v4645_v15 = vpop.f32.mrb[119].mxu1 }
 0x210   : > { %v3222_v5 = vadd.f32 %v1995_v14, %v4558_v28  ;;  %v1997_v25 = vpop.f32.mrb[55].mxu0 }
 0x212   : > { %v2886_v18 = vpop.f32.mrb[120].mxu1  ;;  %v4655_v30 = vadd.f32 %v3222_v5, %v2220_v0 }
 0x213   : > { %v2000_v31 = vpop.f32.mrb[56].mxu0  ;;  %v4658_v7 = vadd.f32 %v4572_v32, %v2886_v18  ;;  %v2350_v50 = vpop.f32.mrb[121].mxu1 }
 0x214   : > { %v3224_v28 = vadd.f32 %v2000_v31, %v4560_v34  ;;  %v2002_v16 = vpop.f32.mrb[57].mxu0  ;;  %v4662_v20 = vadd.f32 %v4569_v37, %v2350_v50 }
 0x215   : > { %2651 = vst.msk [vmem:[%s4653_s12 + $0x48] sm:$0xff] %vm302_vm0, %v4658_v7 }
 0x216   : > { %2650 = vst.msk [vmem:[%s4653_s12 + $0x40] sm:$0xff] %vm302_vm0, %v4662_v20  ;;  %v2889_v0 = vpop.f32.mrb[122].mxu1  ;;  %v4670_v54 = vadd.f32 %v3224_v28, %v2225_v47 }
 0x217   : > { %v2005_v43 = vpop.f32.mrb[58].mxu0  ;;  %v4673_v32 = vadd.f32 %v4578_v46, %v2889_v0  ;;  %v2360_v34 = vpop.f32.mrb[123].mxu1 }
 0x218   : > { %v3226_v38 = vadd.f32 %v2005_v43, %v4562_v45  ;;  %v2007_v37 = vpop.f32.mrb[59].mxu0  ;;  %v4677_v60 = vadd.f32 %v4575_v42, %v2360_v34 }
 0x219   : > { %2653 = vst.msk [vmem:[%s4653_s12 + $0x58] sm:$0xff] %vm302_vm0, %v4673_v32 }
 0x21a   : > { %2652 = vst.msk [vmem:[%s4653_s12 + $0x50] sm:$0xff] %vm302_vm0, %v4677_v60  ;;  %v2892_v47 = vpop.f32.mrb[124].mxu1  ;;  %v4686_v49 = vadd.f32 %v3226_v38, %v4607_v53 }
 0x21b   : > { %v2010_v46 = vpop.f32.mrb[60].mxu0  ;;  %v4689_v17 = vadd.f32 %v4584_v63, %v2892_v47  ;;  %v2370_v45 = vpop.f32.mrb[125].mxu1 }
 0x21c   : > { %v3228_v42 = vadd.f32 %v2010_v46, %v4564_v29  ;;  %v2012_v40 = vpop.f32.mrb[61].mxu0  ;;  %v4693_v61 = vadd.f32 %v4581_v62, %v2370_v45 }
 0x21d   : > { %2655 = vst.msk [vmem:[%s4653_s12 + $0x68] sm:$0xff] %vm302_vm0, %v4689_v17 }
 0x21e   : > { %2654 = vst.msk [vmem:[%s4653_s12 + $0x60] sm:$0xff] %vm302_vm0, %v4693_v61  ;;  %v2895_v53 = vpop.f32.mrb[126].mxu1  ;;  %v4702_v2 = vadd.f32 %v3228_v42, %v4610_v22 }
 0x21f   : > { %v2015_v63 = vpop.f32.mrb[62].mxu0  ;;  %v4705_v14 = vadd.f32 %v4590_v58, %v2895_v53  ;;  %v2380_v29 = vpop.f32.mrb[127].mxu1 }
 0x220   : > { %v3230_v62 = vadd.f32 %v2015_v63, %v4566_v48  ;;  %v2017_v5 = vpop.f32.mrb[63].mxu0  ;;  %v4709_v25 = vadd.f32 %v4587_v35, %v2380_v29 }
 0x221   : > { %2657 = vst.msk [vmem:[%s4653_s12 + $0x78] sm:$0xff] %vm302_vm0, %v4705_v14 }
 0x222   : > { %2656 = vst.msk [vmem:[%s4653_s12 + $0x70] sm:$0xff] %vm302_vm0, %v4709_v25  ;;  %v2898_v22 = vpop.f32.mrb[128].mxu1  ;;  %v4718_v18 = vadd.f32 %v3230_v62, %v4615_v21 }
 0x223   : > { %v2085_v58 = vpop.f32.mrb[0].mxu0  ;;  %v4721_v31 = vadd.f32 %v4596_v19, %v2898_v22  ;;  %v2390_v48 = vpop.f32.mrb[129].mxu1 }
 0x224   : > { %v3176_v35 = vadd.f32 %v2085_v58, %v4466_v51  ;;  %v2087_v50 = vpop.f32.mrb[1].mxu0  ;;  %v4725_v28 = vadd.f32 %v4593_v13, %v2390_v48 }
 0x225   : > { %2659 = vst.msk [vmem:[%s4653_s12 + $0x88] sm:$0xff] %vm302_vm0, %v4721_v31 }
 0x226   : > { %v2311_v16 = vadd.f32 %v3176_v35, %v4624_v55  ;;  %2658 = vst.msk [vmem:[%s4653_s12 + $0x80] sm:$0xff] %vm302_vm0, %v4725_v28  ;;  %v2901_v21 = vpop.f32.mrb[130].mxu1 }
 0x227   : > { %v2090_v0 = vpop.f32.mrb[2].mxu0  ;;  %v4735_v19 = vadd.f32 %v4602_v23, %v2901_v21  ;;  %v2400_v43 = vpop.f32.mrb[131].mxu1 }
 0x228   : > { %2642 = vst.msk [vmem:[%s4653_s12] sm:$0xff] %vm302_vm0, %v2311_v16  ;;  %v3177_v51 = vadd.f32 %v2090_v0, %v4471_v11  ;;  %v2092_v13 = vpop.f32.mrb[3].mxu0  ;;  %v4744_v55 = vadd.f32 %v4599_v1, %v2400_v43  ;;  %v2540_v34 = vmul.f32 %v2311_v16, %v2311_v16  ;;  %v2469_v23 = vsel %vm302_vm0, %v2311_v16, 0.0 }
 0x229   : > { %2661 = vst.msk [vmem:[%s4653_s12 + $0x98] sm:$0xff] %vm302_vm0, %v4735_v19 }
 0x22a   : > { %v2316_v38 = vadd.f32 %v3177_v51, %v4620_v27  ;;  %v2904_v37 = vpop.f32.mrb[132].mxu1  ;;  %2660 = vst.msk [vmem:[%s4653_s12 + $0x90] sm:$0xff] %vm302_vm0, %v4744_v55 }
 0x22b   : > { %v2095_v47 = vpop.f32.mrb[4].mxu0  ;;  %v4752_v11 = vadd.f32 %v4612_v4, %v2904_v37  ;;  %v2410_v46 = vpop.f32.mrb[133].mxu1  ;;  %v2572_v4 = vsel %vm302_vm0, %v2540_v34, 0.0 }
 0x22c   : > { %v2470_v45 = vsel %vm302_vm0, %v2316_v38, 0.0  ;;  %v2541_v1 = vmul.f32 %v2316_v38, %v2316_v38  ;;  %2643 = vst.msk [vmem:[%s4653_s12 + $0x8] sm:$0xff] %vm302_vm0, %v2316_v38  ;;  %v3178_v42 = vadd.f32 %v2095_v47, %v4475_v26  ;;  %v2097_v27 = vpop.f32.mrb[5].mxu0  ;;  %v4759_v40 = vadd.f32 %v4605_v12, %v2410_v46 }
 0x22d   : > { %v2471_v53 = vadd.f32 %v2470_v45, %v2469_v23  ;;  %2663 = vst.msk [vmem:[%s4653_s12 + $0xa8] sm:$0xff] %vm302_vm0, %v4752_v11 }
 0x22e   : > { %v2573_v63 = vsel %vm302_vm0, %v2541_v1, 0.0  ;;  %v2321_v29 = vadd.f32 %v3178_v42, %v4631_v3  ;;  %2662 = vst.msk [vmem:[%s4653_s12 + $0xa0] sm:$0xff] %vm302_vm0, %v4759_v40  ;;  %v2907_v26 = vpop.f32.mrb[134].mxu1 }
 0x22f   : > { %v2574_v62 = vadd.f32 %v2573_v63, %v2572_v4  ;;  %v2100_v5 = vpop.f32.mrb[6].mxu0  ;;  %v4771_v12 = vadd.f32 %v4622_v41, %v2907_v26  ;;  %v2420_v22 = vpop.f32.mrb[135].mxu1 }
 0x230   : > { %v2472_v58 = vsel %vm302_vm0, %v2321_v29, 0.0  ;;  %v2542_v48 = vmul.f32 %v2321_v29, %v2321_v29  ;;  %2644 = vst.msk [vmem:[%s4653_s12 + $0x10] sm:$0xff] %vm302_vm0, %v2321_v29  ;;  %v3179_v35 = vadd.f32 %v2100_v5, %v4479_v8  ;;  %v2102_v3 = vpop.f32.mrb[7].mxu0  ;;  %v4781_v16 = vadd.f32 %v4617_v24, %v2420_v22 }
 0x231   : > { %v2473_v50 = vadd.f32 %v2472_v58, %v2471_v53  ;;  %2665 = vst.msk [vmem:[%s4653_s12 + $0xb8] sm:$0xff] %vm302_vm0, %v4771_v12 }
 0x232   : > { %v2575_v41 = vsel %vm302_vm0, %v2542_v48, 0.0  ;;  %v2326_v21 = vadd.f32 %v3179_v35, %v4627_v59  ;;  %v2910_v0 = vpop.f32.mrb[136].mxu1  ;;  %2664 = vst.msk [vmem:[%s4653_s12 + $0xb0] sm:$0xff] %vm302_vm0, %v4781_v16 }
 0x233   : > { %v2576_v43 = vadd.f32 %v2575_v41, %v2574_v62  ;;  %v2105_v8 = vpop.f32.mrb[8].mxu0  ;;  %v2430_v51 = vpop.f32.mrb[137].mxu1  ;;  %v4793_v38 = vadd.f32 %v4636_v9, %v2910_v0 }
 0x234   : > { %v2474_v13 = vsel %vm302_vm0, %v2326_v21, 0.0  ;;  %v2543_v34 = vmul.f32 %v2326_v21, %v2326_v21  ;;  %2645 = vst.msk [vmem:[%s4653_s12 + $0x18] sm:$0xff] %vm302_vm0, %v2326_v21  ;;  %v3180_v24 = vadd.f32 %v2105_v8, %v4483_v56  ;;  %v2107_v59 = vpop.f32.mrb[9].mxu0  ;;  %v4796_v23 = vadd.f32 %v4629_v44, %v2430_v51 }
 0x235   : > { %v2475_v37 = vadd.f32 %v2474_v13, %v2473_v50  ;;  %2667 = vst.msk [vmem:[%s4653_s12 + $0xc8] sm:$0xff] %vm302_vm0, %v4793_v38 }
 0x236   : > { %v2577_v47 = vsel %vm302_vm0, %v2543_v34, 0.0  ;;  %v2331_v46 = vadd.f32 %v3180_v24, %v4638_v36  ;;  %v2913_v45 = vpop.f32.mrb[138].mxu1  ;;  %2666 = vst.msk [vmem:[%s4653_s12 + $0xc0] sm:$0xff] %vm302_vm0, %v4796_v23 }
 0x237   : > { %v2578_v1 = vadd.f32 %v2577_v47, %v2576_v43  ;;  %v2110_v56 = vpop.f32.mrb[10].mxu0  ;;  %v4807_v9 = vadd.f32 %v4655_v30, %v2913_v45  ;;  %v2440_v42 = vpop.f32.mrb[139].mxu1 }
 0x238   : > { %v2476_v44 = vsel %vm302_vm0, %v2331_v46, 0.0  ;;  %v2544_v27 = vmul.f32 %v2331_v46, %v2331_v46  ;;  %2646 = vst.msk [vmem:[%s4653_s12 + $0x20] sm:$0xff] %vm302_vm0, %v2331_v46  ;;  %v3181_v36 = vadd.f32 %v2110_v56, %v4487_v57  ;;  %v2112_v53 = vpop.f32.mrb[11].mxu0  ;;  %v4819_v29 = vadd.f32 %v4643_v6, %v2440_v42 }
 0x239   : > { %v2477_v4 = vadd.f32 %v2476_v44, %v2475_v37  ;;  %2669 = vst.msk [vmem:[%s4653_s12 + $0xd8] sm:$0xff] %vm302_vm0, %v4807_v9  ;;  %v2549_v46 = vmul.f32 %v4658_v7, %v4658_v7  ;;  %v2486_v42 = vsel %vm302_vm0, %v4658_v7, 0.0  ;;  %v2490_v7 = vsel %vm302_vm0, %v4673_v32, 0.0 }
 0x23a   : > { %v2579_v63 = vsel %vm302_vm0, %v2544_v27, 0.0  ;;  %v2336_v30 = vadd.f32 %v3181_v36, %v4634_v39  ;;  %v2916_v26 = vpop.f32.mrb[140].mxu1  ;;  %2668 = vst.msk [vmem:[%s4653_s12 + $0xd0] sm:$0xff] %vm302_vm0, %v4819_v29  ;;  %v2550_v27 = vmul.f32 %v4677_v60, %v4677_v60 }
 0x23b   : > { %v2580_v62 = vadd.f32 %v2579_v63, %v2578_v1  ;;  %v2115_v5 = vpop.f32.mrb[12].mxu0  ;;  %v4822_v22 = vadd.f32 %v4686_v49, %v2916_v26  ;;  %v2450_v57 = vpop.f32.mrb[141].mxu1  ;;  %v2551_v63 = vmul.f32 %v4673_v32, %v4673_v32  ;;  %v2494_v32 = vsel %vm302_vm0, %v4689_v17, 0.0 }
 0x23c   : > { %v2478_v58 = vsel %vm302_vm0, %v2336_v30, 0.0  ;;  %v2545_v48 = vmul.f32 %v2336_v30, %v2336_v30  ;;  %2647 = vst.msk [vmem:[%s4653_s12 + $0x28] sm:$0xff] %vm302_vm0, %v2336_v30  ;;  %v2117_v39 = vpop.f32.mrb[13].mxu0  ;;  %v3182_v6 = vadd.f32 %v2115_v5, %v4491_v10  ;;  %v4836_v3 = vadd.f32 %v4670_v54, %v2450_v57 }
 0x23d   : > { %v2479_v35 = vadd.f32 %v2478_v58, %v2477_v4  ;;  %2671 = vst.msk [vmem:[%s4653_s12 + $0xe8] sm:$0xff] %vm302_vm0, %v4822_v22  ;;  %v2589_v4 = vsel %vm302_vm0, %v2549_v46, 0.0  ;;  %v2552_v5 = vmul.f32 %v4693_v61, %v4693_v61  ;;  %v2553_v39 = vmul.f32 %v4689_v17, %v4689_v17 }
 0x23e   : > { %v2581_v49 = vsel %vm302_vm0, %v2545_v48, 0.0  ;;  %v2919_v50 = vpop.f32.mrb[142].mxu1  ;;  %v2341_v21 = vadd.f32 %v3182_v6, %v4645_v15  ;;  %2670 = vst.msk [vmem:[%s4653_s12 + $0xe0] sm:$0xff] %vm302_vm0, %v4836_v3  ;;  %v2593_v48 = vsel %vm302_vm0, %v2551_v63, 0.0  ;;  %v2498_v17 = vsel %vm302_vm0, %v4705_v14, 0.0 }
 0x23f   : > { %v2582_v41 = vadd.f32 %v2581_v49, %v2580_v62  ;;  %v2120_v0 = vpop.f32.mrb[14].mxu0  ;;  %v4840_v43 = vadd.f32 %v4718_v18, %v2919_v50  ;;  %v2460_v10 = vpop.f32.mrb[143].mxu1  ;;  %v2591_v62 = vsel %vm302_vm0, %v2550_v27, 0.0  ;;  %v2595_v49 = vsel %vm302_vm0, %v2552_v5, 0.0 }
 0x240   : > { %v3183_v8 = vadd.f32 %v2120_v0, %v4495_v33  ;;  %v2122_v51 = vpop.f32.mrb[15].mxu0  ;;  %v4847_v54 = vadd.f32 %v4702_v2, %v2460_v10  ;;  %v2480_v13 = vsel %vm302_vm0, %v2341_v21, 0.0  ;;  %v2546_v34 = vmul.f32 %v2341_v21, %v2341_v21  ;;  %2648 = vst.msk [vmem:[%s4653_s12 + $0x30] sm:$0xff] %vm302_vm0, %v2341_v21 }
 0x241   : > { %2673 = vst.msk [vmem:[%s4653_s12 + $0xf8] sm:$0xff] %vm302_vm0, %v4840_v43  ;;  %v2481_v15 = vadd.f32 %v2480_v13, %v2479_v35  ;;  %v2548_v2 = vmul.f32 %v4662_v20, %v4662_v20  ;;  %v2554_v50 = vmul.f32 %v4709_v25, %v4709_v25  ;;  %v2597_v0 = vsel %vm302_vm0, %v2553_v39, 0.0 }
 0x242   : > { %v2346_v18 = vadd.f32 %v3183_v8, %v4641_v52  ;;  %2672 = vst.msk [vmem:[%s4653_s12 + $0xf0] sm:$0xff] %vm302_vm0, %v4847_v54  ;;  %v2583_v33 = vsel %vm302_vm0, %v2546_v34, 0.0  ;;  %v2484_v52 = vsel %vm302_vm0, %v4662_v20, 0.0  ;;  %v2488_v20 = vsel %vm302_vm0, %v4677_v60, 0.0 }
 0x243   : > { %v2584_v24 = vadd.f32 %v2583_v33, %v2582_v41  ;;  %v2587_v44 = vsel %vm302_vm0, %v2548_v2, 0.0  ;;  %v2492_v60 = vsel %vm302_vm0, %v4693_v61, 0.0  ;;  %v2555_v10 = vmul.f32 %v4705_v14, %v4705_v14 }
 0x244   : > { %v2482_v59 = vsel %vm302_vm0, %v2346_v18, 0.0  ;;  %v2547_v37 = vmul.f32 %v2346_v18, %v2346_v18  ;;  %2649 = vst.msk [vmem:[%s4653_s12 + $0x38] sm:$0xff] %vm302_vm0, %v2346_v18  ;;  %v2496_v61 = vsel %vm302_vm0, %v4709_v25, 0.0  ;;  %v2599_v13 = vsel %vm302_vm0, %v2554_v50, 0.0 }
 0x245   : > { %v2483_v47 = vadd.f32 %v2482_v59, %v2481_v15  ;;  %v2556_v34 = vmul.f32 %v4725_v28, %v4725_v28  ;;  %v2601_v33 = vsel %vm302_vm0, %v2555_v10, 0.0  ;;  %v2557_v2 = vmul.f32 %v4721_v31, %v4721_v31 }
 0x246   : > { %v2585_v45 = vsel %vm302_vm0, %v2547_v37, 0.0  ;;  %v2500_v25 = vsel %vm302_vm0, %v4725_v28, 0.0  ;;  %v2502_v14 = vsel %vm302_vm0, %v4721_v31, 0.0  ;;  %v2504_v28 = vsel %vm302_vm0, %v4744_v55, 0.0 }
 0x247   : > { %v2485_v1 = vadd.f32 %v2484_v52, %v2483_v47  ;;  %v2586_v56 = vadd.f32 %v2585_v45, %v2584_v24  ;;  %v2603_v37 = vsel %vm302_vm0, %v2556_v34, 0.0  ;;  %v2558_v47 = vmul.f32 %v4744_v55, %v4744_v55 }
 0x248   : > { %v2605_v45 = vsel %vm302_vm0, %v2557_v2, 0.0  ;;  %v2506_v31 = vsel %vm302_vm0, %v4735_v19, 0.0  ;;  %v2560_v27 = vmul.f32 %v4759_v40, %v4759_v40  ;;  %v2561_v63 = vmul.f32 %v4752_v11, %v4752_v11 }
 0x249   : > { %v2487_v36 = vadd.f32 %v2486_v42, %v2485_v1  ;;  %v2588_v53 = vadd.f32 %v2587_v44, %v2586_v56  ;;  %v2559_v1 = vmul.f32 %v4735_v19, %v4735_v19  ;;  %v2607_v44 = vsel %vm302_vm0, %v2558_v47, 0.0 }
 0x24a   : > { %v2508_v55 = vsel %vm302_vm0, %v4759_v40, 0.0  ;;  %v2510_v19 = vsel %vm302_vm0, %v4752_v11, 0.0  ;;  %v2512_v40 = vsel %vm302_vm0, %v4781_v16, 0.0  ;;  %v2514_v11 = vsel %vm302_vm0, %v4771_v12, 0.0 }
 0x24b   : > { %v2489_v30 = vadd.f32 %v2488_v20, %v2487_v36  ;;  %v2590_v26 = vadd.f32 %v2589_v4, %v2588_v53  ;;  %v2609_v4 = vsel %vm302_vm0, %v2559_v1, 0.0  ;;  %v2565_v50 = vmul.f32 %v4793_v38, %v4793_v38 }
 0x24c   : > { %v2566_v10 = vmul.f32 %v4819_v29, %v4819_v29  ;;  %v2570_v47 = vmul.f32 %v4847_v54, %v4847_v54  ;;  %v2571_v1 = vmul.f32 %v4840_v43, %v4840_v43 }
 0x24d   : > { %v2491_v57 = vadd.f32 %v2490_v7, %v2489_v30  ;;  %v2592_v58 = vadd.f32 %v2591_v62, %v2590_v26  ;;  %v2611_v26 = vsel %vm302_vm0, %v2560_v27, 0.0  ;;  %v2562_v7 = vmul.f32 %v4781_v16, %v4781_v16 }
 0x24e   : > { %v2516_v16 = vsel %vm302_vm0, %v4796_v23, 0.0  ;;  %v2633_v27 = vsel %vm302_vm0, %v2571_v1, 0.0 }
 0x24f   : > { %v2493_v35 = vadd.f32 %v2492_v60, %v2491_v57  ;;  %v2594_v6 = vadd.f32 %v2593_v48, %v2592_v58  ;;  %v2613_v57 = vsel %vm302_vm0, %v2561_v63, 0.0  ;;  %v2563_v58 = vmul.f32 %v4771_v12, %v4771_v12 }
 0x250   : > { %v2615_v60 = vsel %vm302_vm0, %v2562_v7, 0.0  ;;  %v2518_v12 = vsel %vm302_vm0, %v4793_v38, 0.0  ;;  %v2522_v38 = vsel %vm302_vm0, %v4807_v9, 0.0 }
 0x251   : > { %v2495_v41 = vadd.f32 %v2494_v32, %v2493_v35  ;;  %v2596_v21 = vadd.f32 %v2595_v49, %v2594_v6  ;;  %v2564_v35 = vmul.f32 %v4796_v23, %v4796_v23  ;;  %v2617_v49 = vsel %vm302_vm0, %v2563_v58, 0.0 }
 0x252   : > { %v2520_v23 = vsel %vm302_vm0, %v4819_v29, 0.0  ;;  %v2524_v29 = vsel %vm302_vm0, %v4836_v3, 0.0 }
 0x253   : > { %v2497_v8 = vadd.f32 %v2496_v61, %v2495_v41  ;;  %v2598_v51 = vadd.f32 %v2597_v0, %v2596_v21  ;;  %v2619_v0 = vsel %vm302_vm0, %v2564_v35, 0.0 }
 0x255   : > { %v2499_v15 = vadd.f32 %v2498_v17, %v2497_v8  ;;  %v2600_v18 = vadd.f32 %v2599_v13, %v2598_v51  ;;  %v2621_v51 = vsel %vm302_vm0, %v2565_v50, 0.0  ;;  %v2567_v17 = vmul.f32 %v4807_v9, %v4807_v9 }
 0x256   : > { %v2526_v9 = vsel %vm302_vm0, %v4822_v22, 0.0 }
 0x257   : > { %v2501_v24 = vadd.f32 %v2500_v25, %v2499_v15  ;;  %v2602_v59 = vadd.f32 %v2601_v33, %v2600_v18  ;;  %v2623_v15 = vsel %vm302_vm0, %v2566_v10, 0.0  ;;  %v2568_v18 = vmul.f32 %v4836_v3, %v4836_v3 }
 0x258   : > { %v2625_v25 = vsel %vm302_vm0, %v2567_v17, 0.0  ;;  %v2528_v3 = vsel %vm302_vm0, %v4847_v54, 0.0 }
 0x259   : > { %v2503_v46 = vadd.f32 %v2502_v14, %v2501_v24  ;;  %v2604_v52 = vadd.f32 %v2603_v37, %v2602_v59  ;;  %v2569_v24 = vmul.f32 %v4822_v22, %v4822_v22  ;;  %v2627_v37 = vsel %vm302_vm0, %v2568_v18, 0.0 }
 0x25a   : > { %v2530_v22 = vsel %vm302_vm0, %v4840_v43, 0.0 }
 0x25b   : > { %v2606_v56 = vadd.f32 %v2605_v45, %v2604_v52  ;;  %v2505_v42 = vadd.f32 %v2504_v28, %v2503_v46  ;;  %v2629_v45 = vsel %vm302_vm0, %v2569_v24, 0.0 }
 0x25d   : > { %v2507_v36 = vadd.f32 %v2506_v31, %v2505_v42  ;;  %v2608_v53 = vadd.f32 %v2607_v44, %v2606_v56  ;;  %v2631_v42 = vsel %vm302_vm0, %v2570_v47, 0.0 }
 0x25f   : > { %v2509_v20 = vadd.f32 %v2508_v55, %v2507_v36  ;;  %v2610_v30 = vadd.f32 %v2609_v4, %v2608_v53 }
 0x261   : > { %v2511_v62 = vadd.f32 %v2510_v19, %v2509_v20  ;;  %v2612_v5 = vadd.f32 %v2611_v26, %v2610_v30 }
 0x263   : > { %v2513_v48 = vadd.f32 %v2512_v40, %v2511_v62  ;;  %v2614_v39 = vadd.f32 %v2613_v57, %v2612_v5 }
 0x265   : > { %v2515_v6 = vadd.f32 %v2514_v11, %v2513_v48  ;;  %v2616_v32 = vadd.f32 %v2615_v60, %v2614_v39 }
 0x267   : > { %v2517_v41 = vadd.f32 %v2516_v16, %v2515_v6  ;;  %v2618_v21 = vadd.f32 %v2617_v49, %v2616_v32 }
 0x269   : > { %v2519_v61 = vadd.f32 %v2518_v12, %v2517_v41  ;;  %v2620_v8 = vadd.f32 %v2619_v0, %v2618_v21 }
 0x26b   : > { %v2521_v13 = vadd.f32 %v2520_v23, %v2519_v61  ;;  %v2622_v34 = vadd.f32 %v2621_v51, %v2620_v8 }
 0x26d   : > { %v2523_v33 = vadd.f32 %v2522_v38, %v2521_v13  ;;  %v2624_v2 = vadd.f32 %v2623_v15, %v2622_v34 }
 0x26f   : > { %v2525_v59 = vadd.f32 %v2524_v29, %v2523_v33  ;;  %v2626_v14 = vadd.f32 %v2625_v25, %v2624_v2 }
 0x271   : > { %v2527_v46 = vadd.f32 %v2526_v9, %v2525_v59  ;;  %v2628_v52 = vadd.f32 %v2627_v37, %v2626_v14 }
 0x273   : > { %v2529_v28 = vadd.f32 %v2528_v3, %v2527_v46  ;;  %v2630_v56 = vadd.f32 %v2629_v45, %v2628_v52 }
 0x275   : > { %v2531_v31 = vadd.f32 %v2530_v22, %v2529_v28  ;;  %v2632_v44 = vadd.f32 %v2631_v42, %v2630_v56 }
 0x277   : > { %v2532_v36 = vrot.slane %v2531_v31, 4  ;;  %v2634_v53 = vadd.f32 %v2633_v27, %v2632_v44 }
 0x279   : > { %v2533_v4 = vadd.f32 %v2532_v36, %v2531_v31  ;;  %v2635_v63 = vrot.slane %v2634_v53, 4 }
 0x27b   : > { %v2534_v55 = vrot.slane %v2533_v4, 2  ;;  %v2636_v20 = vadd.f32 %v2635_v63, %v2634_v53 }
 0x27d   : > { %v2535_v54 = vadd.f32 %v2534_v55, %v2533_v4  ;;  %v2637_v30 = vrot.slane %v2636_v20, 2 }
 0x27f   : > { %v2536_v19 = vrot.slane %v2535_v54, 1  ;;  %v2638_v26 = vadd.f32 %v2637_v30, %v2636_v20 }
 0x281   : > { %v2537_v43 = vadd.f32 %v2536_v19, %v2535_v54  ;;  %v2639_v7 = vrot.slane %v2638_v26, 1 }
 0x283   : > { %2539 = vst.msk [vmem:[%s211_s14] sm:$0x1] %vm2538_vm1, %v2537_v43  ;;  %v2640_v62 = vadd.f32 %v2639_v7, %v2638_v26 }
 0x285   : > { %2641 = vst.msk [vmem:[%s214_s19] sm:$0x1] %vm2538_vm1, %v2640_v62 }
 0x286 PF: > { %s15_s15 = sadd.s32 1, %s3329_s15  }
 0x287   : > { %p12_p4 = scmp.ge.s32.totalorder %s15_s15, 4  }
 0x289   :  { %14 = sbr.rel (!%p12_p4) target bundleno = 1 (0x1), region = 84 }

// kernel: basic_block3d.5
= control target key start
LH: loop header
LB: loop body
LE: loop exit
PB: predicated region body
PF: predicated region fallthrough
CT: control target
= control target key end

     0   :  { %s538_s15 = smov 0   ;;  %s707_s0 = inlined_call_operand.vmem [shape: f32[2,16,1024], index: 0, kind: input, shape index: {}]   ;;  %s708_s1 = inlined_call_operand.vmem [shape: f32[2,16,1024], index: 1, kind: input, shape index: {}]   ;;  %s709_s2 = inlined_call_operand.vmem [shape: f32[1,1024], index: 2, kind: input, shape index: {}]   ;;  %s710_s3 = inlined_call_operand.vmem [shape: f32[1,1024], index: 3, kind: input, shape index: {}]   ;;  %s711_s4 = inlined_call_operand.vmem [shape: f32[2,16,1024], index: 4, kind: output, shape index: {}]  }
   0x1 LB: > { %s481_s16 = sadd.s32 4294967295, %s511_s15   ;;  %p485_p0 = scmp.ge.s32.totalorder %s511_s15, 1  ;;  %s511_s15 = sphi %s538_s15, %s14_s15  }
   0x2   : > { %p172_p1 = scmp.lt.s32.totalorder %s511_s15, 3 }
   0x4   : > { %p173_p2 = pnand %p485_p0, %p172_p1 }
   0x5   : > { %p203_p3 = scmp.lt.s32.totalorder (!%p173_p2), %s481_s16, 1  ;;  %v236_v0 = vlaneseq (!%p173_p2)  ;;  %v234_v2 = vld [vmem:[%s709_s2] sm:$0xff] (!%p173_p2) }
   0x6   : > { %176 = sbr.rel (%p173_p2) target bundleno = 41 (0x29), region = 36  ;;  %v554_v3 = vld [vmem:[%s710_s3] sm:$0xff] (!%p173_p2) }
   0x7   : > { %v546_v1 = vshrl.u32 (!%p173_p2), %v236_v0, 7 }
   0x9   : > { %v238_v4 = vsub.s32 (!%p173_p2), 0, %v546_v1  ;;  %v242_v5 = vsub.s32 (!%p173_p2), 1, %v546_v1  ;;  %v246_v6 = vsub.s32 (!%p173_p2), 2, %v546_v1  ;;  %v250_v7 = vsub.s32 (!%p173_p2), 3, %v546_v1 }
   0xa   : > { %v254_v8 = vsub.s32 (!%p173_p2), 4, %v546_v1  ;;  %v258_v9 = vsub.s32 (!%p173_p2), 5, %v546_v1  ;;  %v262_v10 = vsub.s32 (!%p173_p2), 6, %v546_v1  ;;  %v266_v11 = vsub.s32 (!%p173_p2), 7, %v546_v1 }
   0xb   : > { %v579_v13 = vrot.slane (!%p173_p2), %v234_v2, %v238_v4  ;;  %v582_v14 = vrot.slane (!%p173_p2), %v554_v3, %v238_v4  ;;  %v585_v16 = vrot.slane (!%p173_p2), %v234_v2, %v242_v5  ;;  %v588_v17 = vrot.slane (!%p173_p2), %v554_v3, %v242_v5 }
   0xc   : > { %v591_v19 = vrot.slane (!%p173_p2), %v234_v2, %v246_v6  ;;  %v594_v20 = vrot.slane (!%p173_p2), %v554_v3, %v246_v6  ;;  %v596_v21 = vrot.slane (!%p173_p2), %v234_v2, %v250_v7  ;;  %v599_v22 = vrot.slane (!%p173_p2), %v554_v3, %v250_v7 }
   0xd   : > { %s713_s16 = smov (!%p203_p3, %s481_s16), 1  ;;  %v605_v27 = vrot.slane %v234_v2, %v254_v8  ;;  %v608_v28 = vrot.slane %v554_v3, %v254_v8  ;;  %v615_v34 = vrot.slane %v234_v2, %v258_v9  ;;  %v618_v35 = vrot.slane %v554_v3, %v258_v9 }
   0xe   : > { %s556_s21 = sshll.u32 %s713_s16, 7  ;;  %v626_v42 = vrot.slane %v234_v2, %v262_v10  ;;  %v633_v47 = vrot.slane %v554_v3, %v262_v10  ;;  %v649_v58 = vrot.slane %v234_v2, %v266_v11 }
   0xf   : > { %s566_s24 = scalar_lea.vmem %s707_s0, %s556_s21  ;;  %s576_s27 = scalar_lea.vmem %s708_s1, %s556_s21 }
  0x10   : > { %v218_v12 = vld [vmem:[%s566_s24] sm:$0xff]  ;;  %v219_v15 = vld [vmem:[%s566_s24 + $0x8] sm:$0xff]  ;;  %v220_v18 = vld [vmem:[%s566_s24 + $0x10] sm:$0xff]  ;;  %s643_s30 = scalar_lea.vmem %s711_s4, %s556_s21 }
  0x11   : > { %v276_v23 = vmul.f32 %v579_v13, %v218_v12  ;;  %v277_v24 = vmul.f32 %v585_v16, %v219_v15  ;;  %v221_v25 = vld [vmem:[%s566_s24 + $0x18] sm:$0xff]  ;;  %v222_v26 = vld [vmem:[%s566_s24 + $0x20] sm:$0xff]  ;;  %v351_v30 = vld [vmem:[%s576_s27 + $0x8] sm:$0xff]  ;;  %v278_v31 = vmul.f32 %v591_v19, %v220_v18  ;;  %v325_v15 = vrot.slane %v554_v3, %v266_v11 }
  0x12   : > { %v350_v29 = vld [vmem:[%s576_s27] sm:$0xff]  ;;  %v279_v32 = vmul.f32 %v596_v21, %v221_v25  ;;  %v223_v33 = vld [vmem:[%s566_s24 + $0x28] sm:$0xff]  ;;  %v352_v38 = vld [vmem:[%s576_s27 + $0x10] sm:$0xff]  ;;  %v280_v40 = vmul.f32 %v605_v27, %v222_v26 }
  0x13   : > { %v334_v36 = vadd.f32 %v582_v14, %v276_v23  ;;  %v335_v37 = vadd.f32 %v588_v17, %v277_v24  ;;  %v353_v39 = vld [vmem:[%s576_s27 + $0x18] sm:$0xff]  ;;  %v224_v41 = vld [vmem:[%s566_s24 + $0x30] sm:$0xff]  ;;  %v336_v43 = vadd.f32 %v594_v20, %v278_v31  ;;  %v354_v45 = vld [vmem:[%s576_s27 + $0x20] sm:$0xff]  ;;  %v281_v46 = vmul.f32 %v615_v34, %v223_v33 }
  0x14   : > { %v337_v44 = vadd.f32 %v599_v22, %v279_v32  ;;  %v338_v50 = vadd.f32 %v608_v28, %v280_v40  ;;  %v355_v51 = vld [vmem:[%s576_s27 + $0x28] sm:$0xff]  ;;  %v282_v52 = vmul.f32 %v626_v42, %v224_v41  ;;  %v225_v53 = vld [vmem:[%s566_s24 + $0x38] sm:$0xff]  ;;  %v356_v57 = vld [vmem:[%s576_s27 + $0x30] sm:$0xff] }
  0x15   : > { %v366_v48 = vadd.f32 %v350_v29, %v334_v36  ;;  %v367_v49 = vadd.f32 %v351_v30, %v335_v37  ;;  %v368_v54 = vadd.f32 %v352_v38, %v336_v43  ;;  %v339_v56 = vadd.f32 %v618_v35, %v281_v46  ;;  %v226_v59 = vld [vmem:[%s566_s24 + $0x40] sm:$0xff]  ;;  %v227_v0 = vld [vmem:[%s566_s24 + $0x48] sm:$0xff]  ;;  %v228_v4 = vld [vmem:[%s566_s24 + $0x50] sm:$0xff] }
  0x16   : > { %v369_v55 = vadd.f32 %v353_v39, %v337_v44  ;;  %v370_v62 = vadd.f32 %v354_v45, %v338_v50  ;;  %v340_v63 = vadd.f32 %v633_v47, %v282_v52  ;;  %v229_v5 = vld [vmem:[%s566_s24 + $0x58] sm:$0xff]  ;;  %v283_v2 = vmul.f32 %v649_v58, %v225_v53  ;;  %v230_v9 = vld [vmem:[%s566_s24 + $0x60] sm:$0xff]  ;;  %v231_v23 = vld [vmem:[%s566_s24 + $0x68] sm:$0xff] }
  0x17   : > { %v382_v60 = vmax.f32 %v366_v48, 0.0  ;;  %v383_v61 = vmax.f32 %v367_v49, 0.0  ;;  %v384_v6 = vmax.f32 %v368_v54, 0.0  ;;  %v371_v8 = vadd.f32 %v355_v51, %v339_v56  ;;  %v357_v25 = vld [vmem:[%s576_s27 + $0x38] sm:$0xff]  ;;  %v358_v26 = vld [vmem:[%s576_s27 + $0x40] sm:$0xff]  ;;  %v232_v3 = vld [vmem:[%s566_s24 + $0x70] sm:$0xff] }
  0x18   : > { %v385_v7 = vmax.f32 %v369_v55, 0.0  ;;  %v386_v10 = vmax.f32 %v370_v62, 0.0  ;;  %v372_v12 = vadd.f32 %v356_v57, %v340_v63  ;;  %v284_v18 = vmul.f32 %v579_v13, %v226_v59  ;;  %v359_v32 = vld [vmem:[%s576_s27 + $0x48] sm:$0xff]  ;;  %v360_v33 = vld [vmem:[%s576_s27 + $0x50] sm:$0xff]  ;;  %v361_v36 = vld [vmem:[%s576_s27 + $0x58] sm:$0xff] }
  0x19   : > { %398 = vst [vmem:[%s643_s30] sm:$0xff] %v382_v60  ;;  %399 = vst [vmem:[%s643_s30 + $0x8] sm:$0xff] %v383_v61  ;;  %v387_v24 = vmax.f32 %v371_v8, 0.0  ;;  %v285_v29 = vmul.f32 %v585_v16, %v227_v0  ;;  %v286_v30 = vmul.f32 %v591_v19, %v228_v4  ;;  %v287_v1 = vmul.f32 %v596_v21, %v229_v5  ;;  %v362_v38 = vld [vmem:[%s576_s27 + $0x60] sm:$0xff]  ;;  %v363_v43 = vld [vmem:[%s576_s27 + $0x68] sm:$0xff] }
  0x1a   : > { %400 = vst [vmem:[%s643_s30 + $0x10] sm:$0xff] %v384_v6  ;;  %401 = vst [vmem:[%s643_s30 + $0x18] sm:$0xff] %v385_v7  ;;  %v388_v11 = vmax.f32 %v372_v12, 0.0  ;;  %v341_v13 = vadd.f32 %v325_v15, %v283_v2  ;;  %v342_v31 = vadd.f32 %v582_v14, %v284_v18  ;;  %v288_v37 = vmul.f32 %v605_v27, %v230_v9  ;;  %v233_v46 = vld [vmem:[%s566_s24 + $0x78] sm:$0xff] }
  0x1b   : > { %402 = vst [vmem:[%s643_s30 + $0x20] sm:$0xff] %v386_v10  ;;  %403 = vst [vmem:[%s643_s30 + $0x28] sm:$0xff] %v387_v24  ;;  %v343_v16 = vadd.f32 %v588_v17, %v285_v29  ;;  %v344_v19 = vadd.f32 %v594_v20, %v286_v30  ;;  %v345_v21 = vadd.f32 %v599_v22, %v287_v1  ;;  %v364_v22 = vld [vmem:[%s576_s27 + $0x70] sm:$0xff]  ;;  %v365_v56 = vld [vmem:[%s576_s27 + $0x78] sm:$0xff] }
  0x1c   : > { %v289_v39 = vmul.f32 %v615_v34, %v231_v23  ;;  %404 = vst [vmem:[%s643_s30 + $0x30] sm:$0xff] %v388_v11  ;;  %v373_v40 = vadd.f32 %v357_v25, %v341_v13  ;;  %v374_v14 = vadd.f32 %v358_v26, %v342_v31  ;;  %v346_v41 = vadd.f32 %v608_v28, %v288_v37 }
  0x1d   : > { %v290_v27 = vmul.f32 %v626_v42, %v232_v3  ;;  %v375_v44 = vadd.f32 %v359_v32, %v343_v16  ;;  %v376_v17 = vadd.f32 %v360_v33, %v344_v19  ;;  %v377_v45 = vadd.f32 %v361_v36, %v345_v21 }
  0x1e   : > { %v347_v20 = vadd.f32 %v618_v35, %v289_v39  ;;  %v389_v34 = vmax.f32 %v373_v40, 0.0  ;;  %v390_v48 = vmax.f32 %v374_v14, 0.0  ;;  %v378_v49 = vadd.f32 %v362_v38, %v346_v41 }
  0x1f   : > { %v348_v28 = vadd.f32 %v633_v47, %v290_v27  ;;  %v391_v50 = vmax.f32 %v375_v44, 0.0  ;;  %v392_v42 = vmax.f32 %v376_v17, 0.0  ;;  %v393_v51 = vmax.f32 %v377_v45, 0.0 }
  0x20   : > { %v379_v52 = vadd.f32 %v363_v43, %v347_v20  ;;  %405 = vst [vmem:[%s643_s30 + $0x38] sm:$0xff] %v389_v34  ;;  %406 = vst [vmem:[%s643_s30 + $0x40] sm:$0xff] %v390_v48  ;;  %v394_v35 = vmax.f32 %v378_v49, 0.0  ;;  %v291_v54 = vmul.f32 %v649_v58, %v233_v46 }
  0x21   : > { %v380_v53 = vadd.f32 %v364_v22, %v348_v28  ;;  %407 = vst [vmem:[%s643_s30 + $0x48] sm:$0xff] %v391_v50  ;;  %408 = vst [vmem:[%s643_s30 + $0x50] sm:$0xff] %v392_v42 }
  0x22   : > { %409 = vst [vmem:[%s643_s30 + $0x58] sm:$0xff] %v393_v51  ;;  %v395_v55 = vmax.f32 %v379_v52, 0.0  ;;  %410 = vst [vmem:[%s643_s30 + $0x60] sm:$0xff] %v394_v35  ;;  %v349_v57 = vadd.f32 %v325_v15, %v291_v54 }
  0x23   : > { %v396_v47 = vmax.f32 %v380_v53, 0.0 }
  0x24   : > { %411 = vst [vmem:[%s643_s30 + $0x68] sm:$0xff] %v395_v55  ;;  %v381_v59 = vadd.f32 %v365_v56, %v349_v57 }
  0x25   : > { %412 = vst [vmem:[%s643_s30 + $0x70] sm:$0xff] %v396_v47 }
  0x26   : > { %v397_v60 = vmax.f32 %v381_v59, 0.0 }
  0x28   : > { %413 = vst [vmem:[%s643_s30 + $0x78] sm:$0xff] %v397_v60 }
  0x29 PF: > { %s14_s15 = sadd.s32 1, %s511_s15  }
  0x2a   : > { %p11_p4 = scmp.ge.s32.totalorder %s14_s15, 4  }
  0x2c   :  { %13 = sbr.rel (!%p11_p4) target bundleno = 1 (0x1), region = 69 }

// kernel: basic_block3d.4
= control target key start
LH: loop header
LB: loop body
LE: loop exit
PB: predicated region body
PF: predicated region fallthrough
CT: control target
= control target key end

     0   :  { %s3534_s21 = smov 0   ;;  %s5248_s0 = inlined_call_operand.vmem [shape: f32[2,16,16,64], index: 0, kind: input, shape index: {}]   ;;  %s5249_s1 = inlined_call_operand.vmem [shape: f32[1152,64], index: 1, kind: input, shape index: {}]   ;;  %s5250_s2 = inlined_call_operand.vmem [shape: f32[1,64], index: 2, kind: input, shape index: {}]   ;;  %s5251_s3 = inlined_call_operand.vmem [shape: f32[1,64], index: 3, kind: input, shape index: {}]   ;;  %s5252_s4 = inlined_call_operand.vmem [shape: f32[2,16,16,64], index: 4, kind: output, shape index: {0}]   ;;  %s5253_s5 = inlined_call_operand.vmem [shape: f32[2,1,64], index: 5, kind: output, shape index: {1}]   ;;  %s5254_s6 = inlined_call_operand.vmem [shape: f32[2,1,64], index: 6, kind: output, shape index: {2}]  }
   0x1 LB: > { %s2943_s22 = sadd.s32 4294967295, %s3495_s21   ;;  %p2947_p0 = scmp.ge.s32.totalorder %s3495_s21, 1  ;;  %s3495_s21 = sphi %s3534_s21, %s17_s21  }
   0x2   : > { %p217_p1 = scmp.lt.s32.totalorder %s3495_s21, 3 }
   0x4   : > { %p218_p2 = pnand %p2947_p0, %p217_p1 }
   0x6   : > { %221 = sbr.rel (%p218_p2) target bundleno = 646 (0x286), region = 36 }
   0xd   : > { %v3545_v0 = vld [vmem:[%s5249_s1] sm:$0xff]  ;;  %v3550_v1 = vld [vmem:[%s5249_s1 + $0x8] sm:$0xff]  ;;  %v5255_v3 = vmov 0.0|0.0   ;;  %v3569_v6 = vld [vmem:[%s5249_s1 + $0x10] sm:$0xff]  ;;  %v3498_v8 = vmov 0.0   ;;  %p253_p3 = scmp.lt.s32.totalorder %s2943_s22, 1 }
   0xe   : > { %v3555_v2 = vld [vmem:[%s5249_s1 + $0x100] sm:$0xff]  ;;  %3086 = vmatprep.subr.bf16.mxu1 %v5255_v3  ;;  %3134 = vmatprep.subr.bf16.mxu0 %v5255_v3  ;;  %v3087_v4 = vpack.c.bf16 %v3550_v1, %v3545_v0  ;;  %v3564_v5 = vld [vmem:[%s5249_s1 + $0x108] sm:$0xff]  ;;  %v3574_v7 = vld [vmem:[%s5249_s1 + $0x18] sm:$0xff]  ;;  %411 = vst [vmem:[#allocation2] sm:$0xff] %v3498_v8  ;;  %vm466_vm0 = vcmask 523264   ;;  %vm2702_vm1 = vcmask 516096  }
   0xf   : > { %412 = vst [vmem:[#allocation2 + $0x8] sm:$0xff] %v3498_v8  ;;  %413 = vst [vmem:[#allocation2 + $0x10] sm:$0x3] %v3498_v8  ;;  %v3135_v9 = vpack.c.bf16 %v3564_v5, %v3555_v2  ;;  %v1398_v10 = vld [vmem:[%s5249_s1 + $0x110] sm:$0xff]  ;;  %v1399_v11 = vld [vmem:[%s5249_s1 + $0x118] sm:$0xff]  ;;  %v3090_v12 = vpack.c.bf16 %v3574_v7, %v3569_v6  ;;  %s5378_s22 = smov (!%p253_p3, %s2943_s22), 1 }
  0x10   : > { %414 = vst [vmem:[#allocation2 + $0x18] sm:$0xff] %v3498_v8  ;;  %415 = vst [vmem:[#allocation2 + $0x20] sm:$0xff] %v3498_v8  ;;  %3088 = vmatpush1.bf16.msra.mxu1 %v3087_v4  ;;  %v3138_v13 = vpack.c.bf16 %v1399_v11, %v1398_v10  ;;  %v1368_v14 = vld [vmem:[%s5249_s1 + $0x20] sm:$0xff]  ;;  %v1369_v15 = vld [vmem:[%s5249_s1 + $0x28] sm:$0xff]  ;;  %s2956_s17 = sshll.u32 %s5378_s22, 8  ;;  %s265_s9 = scalar_lea.vmem %s5253_s5, %s5378_s22 }
  0x11   : > { %416 = vst [vmem:[#allocation2 + $0x28] sm:$0x3] %v3498_v8  ;;  %417 = vst [vmem:[#allocation2 + $0x30] sm:$0xff] %v3498_v8  ;;  %3136 = vmatpush1.bf16.msra.mxu0 %v3135_v9  ;;  %3089 = vmatprep.subr.bf16.mxu1 %v5255_v3  ;;  %v1400_v16 = vld [vmem:[%s5249_s1 + $0x120] sm:$0xff]  ;;  %v1401_v17 = vld [vmem:[%s5249_s1 + $0x128] sm:$0xff]  ;;  %v3093_v18 = vpack.c.bf16 %v1369_v15, %v1368_v14  ;;  %s3708_s30 = scalar_lea.vmem %s5248_s0, %s2956_s17  ;;  %s4906_s7 = scalar_lea.vmem %s5252_s4, %s2956_s17 }
  0x12   : > { %418 = vst [vmem:[#allocation2 + $0x38] sm:$0xff] %v3498_v8  ;;  %419 = vst [vmem:[#allocation2 + $0x40] sm:$0x3] %v3498_v8  ;;  %3137 = vmatprep.subr.bf16.mxu0 %v5255_v3  ;;  %v3141_v19 = vpack.c.bf16 %v1401_v17, %v1400_v16  ;;  %v1370_v20 = vld [vmem:[%s5249_s1 + $0x30] sm:$0xff]  ;;  %v1371_v21 = vld [vmem:[%s5249_s1 + $0x38] sm:$0xff]  ;;  %s268_s12 = scalar_lea.vmem %s5254_s6, %s5378_s22 }
  0x13   : > { %420 = vst [vmem:[#allocation2 + $0x48] sm:$0xff] %v3498_v8  ;;  %421 = vst [vmem:[#allocation2 + $0x50] sm:$0xff] %v3498_v8  ;;  %v1402_v22 = vld [vmem:[%s5249_s1 + $0x130] sm:$0xff]  ;;  %v1403_v23 = vld [vmem:[%s5249_s1 + $0x138] sm:$0xff]  ;;  %v3096_v24 = vpack.c.bf16 %v1371_v21, %v1370_v20 }
  0x14   : > { %422 = vst [vmem:[#allocation2 + $0x58] sm:$0x3] %v3498_v8  ;;  %423 = vst [vmem:[#allocation2 + $0x60] sm:$0xff] %v3498_v8  ;;  %3091 = vmatpush1.bf16.msra.mxu1 %v3090_v12  ;;  %v3144_v25 = vpack.c.bf16 %v1403_v23, %v1402_v22  ;;  %v1372_v26 = vld [vmem:[%s5249_s1 + $0x40] sm:$0xff]  ;;  %v1373_v27 = vld [vmem:[%s5249_s1 + $0x48] sm:$0xff] }
  0x15   : > { %424 = vst [vmem:[#allocation2 + $0x68] sm:$0xff] %v3498_v8  ;;  %425 = vst [vmem:[#allocation2 + $0x70] sm:$0x3] %v3498_v8  ;;  %3139 = vmatpush1.bf16.msra.mxu0 %v3138_v13  ;;  %3092 = vmatprep.subr.bf16.mxu1 %v5255_v3  ;;  %v1404_v28 = vld [vmem:[%s5249_s1 + $0x140] sm:$0xff]  ;;  %v1405_v29 = vld [vmem:[%s5249_s1 + $0x148] sm:$0xff]  ;;  %v3099_v30 = vpack.c.bf16 %v1373_v27, %v1372_v26 }
  0x16   : > { %426 = vst [vmem:[#allocation2 + $0x78] sm:$0xff] %v3498_v8  ;;  %427 = vst [vmem:[#allocation2 + $0x80] sm:$0xff] %v3498_v8  ;;  %3140 = vmatprep.subr.bf16.mxu0 %v5255_v3  ;;  %v3147_v31 = vpack.c.bf16 %v1405_v29, %v1404_v28  ;;  %v1374_v32 = vld [vmem:[%s5249_s1 + $0x50] sm:$0xff]  ;;  %v1375_v33 = vld [vmem:[%s5249_s1 + $0x58] sm:$0xff] }
  0x17   : > { %428 = vst [vmem:[#allocation2 + $0x88] sm:$0x3] %v3498_v8  ;;  %429 = vst [vmem:[#allocation2 + $0x90] sm:$0xff] %v3498_v8  ;;  %v1406_v34 = vld [vmem:[%s5249_s1 + $0x150] sm:$0xff]  ;;  %v1407_v35 = vld [vmem:[%s5249_s1 + $0x158] sm:$0xff]  ;;  %v3102_v36 = vpack.c.bf16 %v1375_v33, %v1374_v32 }
  0x18   : > { %430 = vst [vmem:[#allocation2 + $0x98] sm:$0xff] %v3498_v8  ;;  %431 = vst [vmem:[#allocation2 + $0xa0] sm:$0x3] %v3498_v8  ;;  %3094 = vmatpush1.bf16.msra.mxu1 %v3093_v18  ;;  %v3150_v37 = vpack.c.bf16 %v1407_v35, %v1406_v34  ;;  %v1376_v38 = vld [vmem:[%s5249_s1 + $0x60] sm:$0xff]  ;;  %v1377_v39 = vld [vmem:[%s5249_s1 + $0x68] sm:$0xff] }
  0x19   : > { %432 = vst [vmem:[#allocation2 + $0xa8] sm:$0xff] %v3498_v8  ;;  %433 = vst [vmem:[#allocation2 + $0xb0] sm:$0xff] %v3498_v8  ;;  %3142 = vmatpush1.bf16.msra.mxu0 %v3141_v19  ;;  %3095 = vmatprep.subr.bf16.mxu1 %v5255_v3  ;;  %v1408_v40 = vld [vmem:[%s5249_s1 + $0x160] sm:$0xff]  ;;  %v1409_v41 = vld [vmem:[%s5249_s1 + $0x168] sm:$0xff]  ;;  %v3105_v46 = vpack.c.bf16 %v1377_v39, %v1376_v38 }
  0x1a   : > { %434 = vst [vmem:[#allocation2 + $0xb8] sm:$0x3] %v3498_v8  ;;  %435 = vst [vmem:[#allocation2 + $0xc0] sm:$0xff] %v3498_v8  ;;  %3143 = vmatprep.subr.bf16.mxu0 %v5255_v3  ;;  %v563_v42 = vld [vmem:[#allocation2 + $0x1] sm:$0xff]  ;;  %v3728_v44 = vld [vmem:[%s5250_s2] ss:$0 sm:$0xff]  ;;  %v3153_v50 = vpack.c.bf16 %v1409_v41, %v1408_v40 }
  0x1b   : > { %436 = vst [vmem:[#allocation2 + $0xc8] sm:$0xff] %v3498_v8  ;;  %437 = vst [vmem:[#allocation2 + $0xd0] sm:$0x3] %v3498_v8  ;;  %v269_v43 = vld [vmem:[%s3708_s30] sm:$0xff]  ;;  %1572 = vmatprep.mubr.f32.mxu1 %v563_v42  ;;  %v1378_v47 = vld [vmem:[%s5249_s1 + $0x70] sm:$0xff] }
  0x1c   : > { %438 = vst [vmem:[#allocation2 + $0xd8] sm:$0xff] %v3498_v8  ;;  %439 = vst [vmem:[#allocation2 + $0xe0] sm:$0xff] %v3498_v8  ;;  %3097 = vmatpush1.bf16.msra.mxu1 %v3096_v24  ;;  %v3733_v45 = vld [vmem:[%s5251_s3] ss:$0 sm:$0xff]  ;;  %v1379_v48 = vld [vmem:[%s5249_s1 + $0x78] sm:$0xff]  ;;  %v308_v49 = vmul.f32 %v3728_v44, %v269_v43 }
  0x1d   : > { %440 = vst [vmem:[#allocation2 + $0xe8] sm:$0x3] %v3498_v8  ;;  %441 = vst [vmem:[#allocation2 + $0xf0] sm:$0xff] %v3498_v8  ;;  %3145 = vmatpush1.bf16.msra.mxu0 %v3144_v25  ;;  %3098 = vmatprep.subr.bf16.mxu1 %v5255_v3  ;;  %v270_v51 = vld [vmem:[%s3708_s30 + $0x8] sm:$0xff]  ;;  %v271_v52 = vld [vmem:[%s3708_s30 + $0x10] sm:$0xff]  ;;  %v3108_v59 = vpack.c.bf16 %v1379_v48, %v1378_v47 }
  0x1e   : > { %442 = vst [vmem:[#allocation2 + $0xf8] sm:$0xff] %v3498_v8  ;;  %443 = vst [vmem:[#allocation2 + $0x100] sm:$0x3] %v3498_v8  ;;  %3146 = vmatprep.subr.bf16.mxu0 %v5255_v3  ;;  %v1410_v53 = vld [vmem:[%s5249_s1 + $0x170] sm:$0xff]  ;;  %v1411_v54 = vld [vmem:[%s5249_s1 + $0x178] sm:$0xff]  ;;  %v347_v55 = vadd.f32 %v3733_v45, %v308_v49  ;;  %v309_v56 = vmul.f32 %v3728_v44, %v270_v51  ;;  %v310_v57 = vmul.f32 %v3728_v44, %v271_v52 }
  0x1f   : > { %444 = vst [vmem:[#allocation2 + $0x108] sm:$0xff] %v3498_v8  ;;  %445 = vst [vmem:[#allocation2 + $0x110] sm:$0xff] %v3498_v8  ;;  %v272_v58 = vld [vmem:[%s3708_s30 + $0x18] sm:$0xff]  ;;  %v3759_v60 = vld [vmem:[%s5249_s1 + $0x80] sm:$0xff]  ;;  %v3156_v9 = vpack.c.bf16 %v1411_v54, %v1410_v53 }
  0x20   : > { %446 = vst [vmem:[#allocation2 + $0x118] sm:$0x3] %v3498_v8  ;;  %447 = vst [vmem:[#allocation2 + $0x120] sm:$0xff] %v3498_v8  ;;  %3100 = vmatpush1.bf16.msra.mxu1 %v3099_v30  ;;  %v3764_v61 = vld [vmem:[%s5249_s1 + $0x88] sm:$0xff]  ;;  %v311_v62 = vmul.f32 %v3728_v44, %v272_v58  ;;  %v273_v63 = vld [vmem:[%s3708_s30 + $0x20] sm:$0xff]  ;;  %v379_v1 = vmax.f32 %v347_v55, 0.0  ;;  %v348_v2 = vadd.f32 %v3733_v45, %v309_v56 }
  0x21   : > { %448 = vst [vmem:[#allocation2 + $0x128] sm:$0xff] %v3498_v8  ;;  %449 = vst [vmem:[#allocation2 + $0x130] sm:$0x3] %v3498_v8  ;;  %3148 = vmatpush1.bf16.msra.mxu0 %v3147_v31  ;;  %3101 = vmatprep.subr.bf16.mxu1 %v5255_v3  ;;  %v3771_v0 = vld [vmem:[%s5249_s1 + $0x180] sm:$0xff]  ;;  %v349_v4 = vadd.f32 %v3733_v45, %v310_v57  ;;  %v312_v5 = vmul.f32 %v3728_v44, %v273_v63  ;;  %v274_v6 = vld [vmem:[%s3708_s30 + $0x28] sm:$0xff] }
  0x22   : > { %450 = vst [vmem:[#allocation2 + $0x138] sm:$0xff] %v3498_v8  ;;  %451 = vst [vmem:[#allocation2 + $0x140] sm:$0xff] %v3498_v8  ;;  %3149 = vmatprep.subr.bf16.mxu0 %v5255_v3  ;;  %v275_v7 = vld [vmem:[%s3708_s30 + $0x30] sm:$0xff]  ;;  %v1413_v10 = vld [vmem:[%s5249_s1 + $0x188] sm:$0xff]  ;;  %v350_v11 = vadd.f32 %v3733_v45, %v311_v62  ;;  %v313_v12 = vmul.f32 %v3728_v44, %v274_v6  ;;  %v380_v15 = vmax.f32 %v348_v2, 0.0 }
  0x23   : > { %452 = vst [vmem:[#allocation2 + $0x148] sm:$0x3] %v3498_v8  ;;  %453 = vst [vmem:[#allocation2 + $0x150] sm:$0xff] %v3498_v8  ;;  %v276_v13 = vld [vmem:[%s3708_s30 + $0x38] sm:$0xff]  ;;  %v277_v14 = vld [vmem:[%s3708_s30 + $0x40] sm:$0xff]  ;;  %v381_v16 = vmax.f32 %v349_v4, 0.0  ;;  %v351_v17 = vadd.f32 %v3733_v45, %v312_v5  ;;  %v314_v18 = vmul.f32 %v3728_v44, %v275_v7  ;;  %v3111_v20 = vpack.c.bf16 %v3764_v61, %v3759_v60 }
  0x24   : > { %454 = vst [vmem:[#allocation2 + $0x158] sm:$0xff] %v3498_v8  ;;  %455 = vst [vmem:[#allocation2 + $0x160] sm:$0x3] %v3498_v8  ;;  %3103 = vmatpush1.bf16.msra.mxu1 %v3102_v36  ;;  %v278_v19 = vld [vmem:[%s3708_s30 + $0x48] sm:$0xff]  ;;  %v382_v21 = vmax.f32 %v350_v11, 0.0  ;;  %v352_v22 = vadd.f32 %v3733_v45, %v313_v12  ;;  %v315_v23 = vmul.f32 %v3728_v44, %v276_v13  ;;  %v279_v24 = vld [vmem:[%s3708_s30 + $0x50] sm:$0xff] }
  0x25   : > { %456 = vst [vmem:[#allocation2 + $0x168] sm:$0xff] %v3498_v8  ;;  %457 = vst [vmem:[#allocation2 + $0x170] sm:$0xff] %v3498_v8  ;;  %3151 = vmatpush1.bf16.msra.mxu0 %v3150_v37  ;;  %3104 = vmatprep.subr.bf16.mxu1 %v5255_v3  ;;  %v3159_v25 = vpack.c.bf16 %v1413_v10, %v3771_v0  ;;  %v1382_v26 = vld [vmem:[%s5249_s1 + $0x90] sm:$0xff]  ;;  %v383_v27 = vmax.f32 %v351_v17, 0.0  ;;  %v353_v28 = vadd.f32 %v3733_v45, %v314_v18  ;;  %v280_v30 = vld [vmem:[%s3708_s30 + $0x58] sm:$0xff] }
  0x26   : > { %458 = vst [vmem:[#allocation2 + $0x178] sm:$0x3] %v3498_v8  ;;  %459 = vst [vmem:[#allocation2 + $0x180] sm:$0xff] %v3498_v8  ;;  %3152 = vmatprep.subr.bf16.mxu0 %v5255_v3  ;;  %v316_v29 = vmul.f32 %v3728_v44, %v277_v14  ;;  %v281_v31 = vld [vmem:[%s3708_s30 + $0x60] sm:$0xff]  ;;  %v1383_v32 = vld [vmem:[%s5249_s1 + $0x98] sm:$0xff]  ;;  %v384_v35 = vmax.f32 %v352_v22, 0.0  ;;  %v354_v36 = vadd.f32 %v3733_v45, %v315_v23 }
  0x27   : > { %460 = vst [vmem:[#allocation2 + $0x188] sm:$0xff] %v3498_v8  ;;  %461 = vst [vmem:[#allocation2 + $0x190] sm:$0x3] %v3498_v8  ;;  %v1414_v33 = vld [vmem:[%s5249_s1 + $0x190] sm:$0xff]  ;;  %v1415_v34 = vld [vmem:[%s5249_s1 + $0x198] sm:$0xff]  ;;  %v317_v37 = vmul.f32 %v3728_v44, %v278_v19  ;;  %v318_v38 = vmul.f32 %v3728_v44, %v279_v24  ;;  %v385_v39 = vmax.f32 %v353_v28, 0.0  ;;  %v319_v41 = vmul.f32 %v3728_v44, %v280_v30 }
  0x28   : > { %462 = vst [vmem:[#allocation2 + $0x198] sm:$0xff] %v3498_v8  ;;  %463 = vst [vmem:[#allocation2 + $0x1a0] sm:$0xff] %v3498_v8  ;;  %3106 = vmatpush1.bf16.msra.mxu1 %v3105_v46  ;;  %v355_v40 = vadd.f32 %v3733_v45, %v316_v29  ;;  %v282_v42 = vld [vmem:[%s3708_s30 + $0x68] sm:$0xff]  ;;  %v386_v43 = vmax.f32 %v354_v36, 0.0  ;;  %v320_v48 = vmul.f32 %v3728_v44, %v281_v31  ;;  %v283_v49 = vld [vmem:[%s3708_s30 + $0x70] sm:$0xff] }
  0x29   : > { %464 = vst [vmem:[#allocation2 + $0x1a8] sm:$0x3] %v3498_v8  ;;  %3154 = vmatpush1.bf16.msra.mxu0 %v3153_v50  ;;  %3107 = vmatprep.subr.bf16.mxu1 %v5255_v3  ;;  %467 = vst.msk [vmem:[#allocation2 + $0x19] sm:$0xff] %vm466_vm0, %v379_v1  ;;  %v356_v46 = vadd.f32 %v3733_v45, %v317_v37  ;;  %v357_v47 = vadd.f32 %v3733_v45, %v318_v38  ;;  %v284_v54 = vld [vmem:[%s3708_s30 + $0x78] sm:$0xff]  ;;  %v285_v55 = vld [vmem:[%s3708_s30 + $0x80] sm:$0xff] }
  0x2a   : > { %3155 = vmatprep.subr.bf16.mxu0 %v5255_v3  ;;  %468 = vst.msk [vmem:[#allocation2 + $0x21] sm:$0xff] %vm466_vm0, %v380_v15  ;;  %469 = vst.msk [vmem:[#allocation2 + $0x31] sm:$0xff] %vm466_vm0, %v381_v16  ;;  %v3114_v50 = vpack.c.bf16 %v1383_v32, %v1382_v26  ;;  %v3162_v51 = vpack.c.bf16 %v1415_v34, %v1414_v33  ;;  %v387_v52 = vmax.f32 %v355_v40, 0.0  ;;  %v1384_v56 = vld [vmem:[%s5249_s1 + $0xa0] sm:$0xff]  ;;  %v1385_v57 = vld [vmem:[%s5249_s1 + $0xa8] sm:$0xff] }
  0x2b   : > { %470 = vst.msk [vmem:[#allocation2 + $0x39] sm:$0xff] %vm466_vm0, %v382_v21  ;;  %471 = vst.msk [vmem:[#allocation2 + $0x49] sm:$0xff] %vm466_vm0, %v383_v27  ;;  %v358_v53 = vadd.f32 %v3733_v45, %v319_v41  ;;  %v389_v60 = vmax.f32 %v357_v47, 0.0  ;;  %v359_v61 = vadd.f32 %v3733_v45, %v320_v48  ;;  %v321_v62 = vmul.f32 %v3728_v44, %v282_v42  ;;  %v1416_v63 = vld [vmem:[%s5249_s1 + $0x1a0] sm:$0xff]  ;;  %v1417_v0 = vld [vmem:[%s5249_s1 + $0x1a8] sm:$0xff] }
  0x2c   : > { %3109 = vmatpush1.bf16.msra.mxu1 %v3108_v59  ;;  %472 = vst.msk [vmem:[#allocation2 + $0x51] sm:$0xff] %vm466_vm0, %v384_v35  ;;  %473 = vst.msk [vmem:[#allocation2 + $0x61] sm:$0xff] %vm466_vm0, %v385_v39  ;;  %v388_v59 = vmax.f32 %v356_v46, 0.0  ;;  %v322_v2 = vmul.f32 %v3728_v44, %v283_v49  ;;  %v286_v4 = vld [vmem:[%s3708_s30 + $0x88] sm:$0xff]  ;;  %v323_v7 = vmul.f32 %v3728_v44, %v284_v54  ;;  %v1386_v14 = vld [vmem:[%s5249_s1 + $0xb0] sm:$0xff] }
  0x2d   : > { %3157 = vmatpush1.bf16.msra.mxu0 %v3156_v9  ;;  %3110 = vmatprep.subr.bf16.mxu1 %v5255_v3  ;;  %474 = vst.msk [vmem:[#allocation2 + $0x69] sm:$0xff] %vm466_vm0, %v386_v43  ;;  %475 = vst.msk [vmem:[#allocation2 + $0x79] sm:$0xff] %vm466_vm0, %v387_v52  ;;  %v390_v1 = vmax.f32 %v358_v53, 0.0  ;;  %v391_v5 = vmax.f32 %v359_v61, 0.0  ;;  %v360_v6 = vadd.f32 %v3733_v45, %v321_v62  ;;  %v1387_v15 = vld [vmem:[%s5249_s1 + $0xb8] sm:$0xff]  ;;  %v1418_v19 = vld [vmem:[%s5249_s1 + $0x1b0] sm:$0xff] }
  0x2e   : > { %3158 = vmatprep.subr.bf16.mxu0 %v5255_v3  ;;  %476 = vst.msk [vmem:[#allocation2 + $0x81] sm:$0xff] %vm466_vm0, %v388_v59  ;;  %477 = vst.msk [vmem:[#allocation2 + $0x91] sm:$0xff] %vm466_vm0, %v389_v60  ;;  %v324_v9 = vmul.f32 %v3728_v44, %v285_v55  ;;  %v3117_v10 = vpack.c.bf16 %v1385_v57, %v1384_v56  ;;  %v361_v11 = vadd.f32 %v3733_v45, %v322_v2  ;;  %v1388_v28 = vld [vmem:[%s5249_s1 + $0xc0] sm:$0xff]  ;;  %v1389_v29 = vld [vmem:[%s5249_s1 + $0xc8] sm:$0xff] }
  0x2f   : > { %478 = vst.msk [vmem:[#allocation2 + $0x99] sm:$0xff] %vm466_vm0, %v390_v1  ;;  %v325_v12 = vmul.f32 %v3728_v44, %v286_v4  ;;  %v3165_v13 = vpack.c.bf16 %v1417_v0, %v1416_v63  ;;  %479 = vst.msk [vmem:[#allocation2 + $0xa9] sm:$0xff] %vm466_vm0, %v391_v5  ;;  %v392_v16 = vmax.f32 %v360_v6, 0.0  ;;  %v362_v17 = vadd.f32 %v3733_v45, %v323_v7  ;;  %v1420_v30 = vld [vmem:[%s5249_s1 + $0x1c0] sm:$0xff]  ;;  %v1421_v31 = vld [vmem:[%s5249_s1 + $0x1c8] sm:$0xff] }
  0x30   : > { %3112 = vmatpush1.bf16.msra.mxu1 %v3111_v20  ;;  %v3841_v58 = vld [vmem:[#allocation2 + $0x18] sm:$0xff]  ;;  %v363_v18 = vadd.f32 %v3733_v45, %v324_v9  ;;  %v393_v21 = vmax.f32 %v361_v11, 0.0  ;;  %v3123_v32 = vpack.c.bf16 %v1389_v29, %v1388_v28  ;;  %v3171_v33 = vpack.c.bf16 %v1421_v31, %v1420_v30  ;;  %v1390_v34 = vld [vmem:[%s5249_s1 + $0xd0] sm:$0xff]  ;;  %v1392_v40 = vld [vmem:[%s5249_s1 + $0xe0] sm:$0xff] }
  0x31   : > { %3160 = vmatpush1.bf16.msra.mxu0 %v3159_v25  ;;  %3113 = vmatprep.subr.bf16.mxu1 %v5255_v3  ;;  %v1419_v20 = vld [vmem:[%s5249_s1 + $0x1b8] sm:$0xff]  ;;  %v364_v22 = vadd.f32 %v3733_v45, %v325_v12  ;;  %480 = vst.msk [vmem:[#allocation2 + $0xb1] sm:$0xff] %vm466_vm0, %v392_v16  ;;  %v394_v23 = vmax.f32 %v362_v17, 0.0  ;;  %v3120_v25 = vpack.c.bf16 %v1387_v15, %v1386_v14  ;;  %v1422_v36 = vld [vmem:[%s5249_s1 + $0x1d0] sm:$0xff]  ;;  %v1393_v41 = vld [vmem:[%s5249_s1 + $0xe8] sm:$0xff] }
  0x32   : > { %3161 = vmatprep.subr.bf16.mxu0 %v5255_v3  ;;  %1797 = vmatprep.mubr.f32.mxu0 %v3841_v58  ;;  %v395_v24 = vmax.f32 %v363_v18, 0.0  ;;  %481 = vst.msk [vmem:[#allocation2 + $0xc1] sm:$0xff] %vm466_vm0, %v393_v21  ;;  %v3168_v27 = vpack.c.bf16 %v1419_v20, %v1418_v19  ;;  %v1391_v35 = vld [vmem:[%s5249_s1 + $0xd8] sm:$0xff]  ;;  %v1424_v42 = vld [vmem:[%s5249_s1 + $0x1e0] sm:$0xff]  ;;  %v1425_v43 = vld [vmem:[%s5249_s1 + $0x1e8] sm:$0xff]  ;;  %v3129_v47 = vpack.c.bf16 %v1393_v41, %v1392_v40 }
  0x33   : > { %v396_v26 = vmax.f32 %v364_v22, 0.0  ;;  %482 = vst.msk [vmem:[#allocation2 + $0xc9] sm:$0xff] %vm466_vm0, %v394_v23  ;;  %v1423_v37 = vld [vmem:[%s5249_s1 + $0x1d8] sm:$0xff]  ;;  %v3126_v38 = vpack.c.bf16 %v1391_v35, %v1390_v34  ;;  %v287_v46 = vld [vmem:[%s3708_s30 + $0x90] sm:$0xff]  ;;  %v3177_v49 = vpack.c.bf16 %v1425_v43, %v1424_v42  ;;  %v289_v57 = vld [vmem:[%s3708_s30 + $0xa0] sm:$0xff] }
  0x34   : > { %3115 = vmatpush1.bf16.msra.mxu1 %v3114_v50  ;;  %483 = vst.msk [vmem:[#allocation2 + $0xd9] sm:$0xff] %vm466_vm0, %v395_v24  ;;  %v3174_v39 = vpack.c.bf16 %v1423_v37, %v1422_v36  ;;  %v326_v48 = vmul.f32 %v3728_v44, %v287_v46  ;;  %v1394_v50 = vld [vmem:[%s5249_s1 + $0xf0] sm:$0xff]  ;;  %v288_v52 = vld [vmem:[%s3708_s30 + $0x98] sm:$0xff]  ;;  %v328_v59 = vmul.f32 %v3728_v44, %v289_v57  ;;  %v290_v63 = vld [vmem:[%s3708_s30 + $0xa8] sm:$0xff] }
  0x35   : > { %3163 = vmatpush1.bf16.msra.mxu0 %v3162_v51  ;;  %3116 = vmatprep.subr.bf16.mxu1 %v5255_v3  ;;  %484 = vst.msk [vmem:[#allocation2 + $0xe1] sm:$0xff] %vm466_vm0, %v396_v26  ;;  %v1395_v51 = vld [vmem:[%s5249_s1 + $0xf8] sm:$0xff]  ;;  %v1426_v53 = vld [vmem:[%s5249_s1 + $0x1f0] sm:$0xff]  ;;  %v327_v56 = vmul.f32 %v3728_v44, %v288_v52  ;;  %v329_v2 = vmul.f32 %v3728_v44, %v290_v63  ;;  %v1428_v5 = vld [vmem:[%s5249_s1 + $0x200] sm:$0xff] }
  0x36   : > { %3164 = vmatprep.subr.bf16.mxu0 %v5255_v3  ;;  %v1427_v54 = vld [vmem:[%s5249_s1 + $0x1f8] sm:$0xff]  ;;  %v365_v55 = vadd.f32 %v3733_v45, %v326_v48  ;;  %v3132_v60 = vpack.c.bf16 %v1395_v51, %v1394_v50  ;;  %v367_v1 = vadd.f32 %v3733_v45, %v328_v59  ;;  %v291_v4 = vld [vmem:[%s3708_s30 + $0xb0] sm:$0xff]  ;;  %v1429_v6 = vld [vmem:[%s5249_s1 + $0x208] sm:$0xff] }
  0x37   : > { %v366_v62 = vadd.f32 %v3733_v45, %v327_v56  ;;  %v3180_v0 = vpack.c.bf16 %v1427_v54, %v1426_v53  ;;  %v330_v9 = vmul.f32 %v3728_v44, %v291_v4  ;;  %v1460_v11 = vld [vmem:[%s5249_s1 + $0x300] sm:$0xff]  ;;  %v1461_v12 = vld [vmem:[%s5249_s1 + $0x308] sm:$0xff]  ;;  %v368_v14 = vadd.f32 %v3733_v45, %v329_v2  ;;  %v1430_v22 = vld [vmem:[%s5249_s1 + $0x210] sm:$0xff] }
  0x38   : > { %3118 = vmatpush1.bf16.msra.mxu1 %v3117_v10  ;;  %v397_v61 = vmax.f32 %v365_v55, 0.0  ;;  %v292_v10 = vld [vmem:[%s3708_s30 + $0xb8] sm:$0xff]  ;;  %v293_v16 = vld [vmem:[%s3708_s30 + $0xc0] sm:$0xff]  ;;  %v3183_v20 = vpack.c.bf16 %v1429_v6, %v1428_v5  ;;  %v564_v21 = vld [vmem:[#allocation2 + $0x9] sm:$0xff]  ;;  %v3992_v28 = vpack.c.bf16 %v1461_v12, %v1460_v11 }
  0x39   : > { %3166 = vmatpush1.bf16.msra.mxu0 %v3165_v13  ;;  %3119 = vmatprep.subr.bf16.mxu1 %v5255_v3  ;;  %v398_v7 = vmax.f32 %v366_v62, 0.0  ;;  %v399_v13 = vmax.f32 %v367_v1, 0.0  ;;  %v331_v15 = vmul.f32 %v3728_v44, %v292_v10  ;;  %v627_v17 = vld [vmem:[#allocation2 + $0x2] sm:$0xff]  ;;  %v369_v18 = vadd.f32 %v3733_v45, %v330_v9  ;;  %v1463_v34 = vld [vmem:[%s5249_s1 + $0x318] sm:$0xff]  ;;  %v628_v40 = vld [vmem:[#allocation2 + $0xa] sm:$0xff] }
  0x3a   : > { %3167 = vmatprep.subr.bf16.mxu0 %v5255_v3  ;;  %485 = vst.msk [vmem:[#allocation2 + $0xf1] sm:$0xff] %vm466_vm0, %v397_v61  ;;  %v332_v19 = vmul.f32 %v3728_v44, %v293_v16  ;;  %v400_v23 = vmax.f32 %v368_v14, 0.0  ;;  %v3987_v26 = vld [vmem:[#allocation2 + $0x20] sm:$0xff]  ;;  %v4014_v48 = vld [vmem:[#allocation2 + $0x30] sm:$0xff]  ;;  %v1433_v50 = vld [vmem:[%s5249_s1 + $0x228] sm:$0xff] }
  0x3b   : > { %486 = vst.msk [vmem:[#allocation2 + $0xf9] sm:$0xff] %vm466_vm0, %v398_v7  ;;  %487 = vst.msk [vmem:[#allocation2 + $0x109] sm:$0xff] %vm466_vm0, %v399_v13  ;;  %v370_v24 = vadd.f32 %v3733_v45, %v331_v15  ;;  %v401_v29 = vmax.f32 %v369_v18, 0.0  ;;  %v565_v41 = vld [vmem:[#allocation2 + $0x19] sm:$0xff]  ;;  %v1465_v55 = vld [vmem:[%s5249_s1 + $0x328] sm:$0xff] }
  0x3c   : > { %3121 = vmatpush1.bf16.msra.mxu1 %v3120_v25  ;;  %v294_v25 = vld [vmem:[%s3708_s30 + $0xc8] sm:$0xff]  ;;  %v371_v30 = vadd.f32 %v3733_v45, %v332_v19  ;;  %488 = vst.msk [vmem:[#allocation2 + $0x111] sm:$0xff] %vm466_vm0, %v400_v23  ;;  %v1464_v54 = vld [vmem:[%s5249_s1 + $0x320] sm:$0xff]  ;;  %v1434_v1 = vld [vmem:[%s5249_s1 + $0x230] sm:$0xff] }
  0x3d   : > { %3169 = vmatpush1.bf16.msra.mxu0 %v3168_v27  ;;  %3122 = vmatprep.subr.bf16.mxu1 %v5255_v3  ;;  %v1431_v27 = vld [vmem:[%s5249_s1 + $0x218] sm:$0xff]  ;;  %v333_v31 = vmul.f32 %v3728_v44, %v294_v25  ;;  %v402_v35 = vmax.f32 %v370_v24, 0.0  ;;  %489 = vst.msk [vmem:[#allocation2 + $0x121] sm:$0xff] %vm466_vm0, %v401_v29  ;;  %v298_v63 = vld [vmem:[%s3708_s30 + $0xe8] sm:$0xff]  ;;  %v4052_v4 = vpack.c.bf16 %v1465_v55, %v1464_v54  ;;  %v1466_v7 = vld [vmem:[%s5249_s1 + $0x330] sm:$0xff] }
  0x3e   : > { %3170 = vmatprep.subr.bf16.mxu0 %v5255_v3  ;;  %v403_v37 = vmax.f32 %v371_v30, 0.0  ;;  %v3186_v42 = vpack.c.bf16 %v1431_v27, %v1430_v22  ;;  %v629_v59 = vld [vmem:[#allocation2 + $0x1a] sm:$0xff]  ;;  %v337_v6 = vmul.f32 %v3728_v44, %v298_v63  ;;  %v567_v11 = vld [vmem:[#allocation2 + $0x31] sm:$0xff]  ;;  %v4070_v14 = vld [vmem:[#allocation2 + $0x48] sm:$0xff] }
  0x3f   : > { %490 = vst.msk [vmem:[#allocation2 + $0x129] sm:$0xff] %vm466_vm0, %v402_v35  ;;  %v1435_v2 = vld [vmem:[%s5249_s1 + $0x238] sm:$0xff]  ;;  %v1436_v13 = vld [vmem:[%s5249_s1 + $0x240] sm:$0xff]  ;;  %v1437_v15 = vld [vmem:[%s5249_s1 + $0x248] sm:$0xff] }
  0x40   : > { %3124 = vmatpush1.bf16.msra.mxu1 %v3123_v32  ;;  %v295_v32 = vld [vmem:[%s3708_s30 + $0xd0] sm:$0xff]  ;;  %491 = vst.msk [vmem:[#allocation2 + $0x139] sm:$0xff] %vm466_vm0, %v403_v37  ;;  %v1467_v9 = vld [vmem:[%s5249_s1 + $0x338] sm:$0xff]  ;;  %v376_v10 = vadd.f32 %v3733_v45, %v337_v6  ;;  %v3192_v12 = vpack.c.bf16 %v1435_v2, %v1434_v1  ;;  %v1468_v19 = vld [vmem:[%s5249_s1 + $0x340] sm:$0xff]  ;;  %v3195_v24 = vpack.c.bf16 %v1437_v15, %v1436_v13 }
  0x41   : > { %3172 = vmatpush1.bf16.msra.mxu0 %v3171_v33  ;;  %3125 = vmatprep.subr.bf16.mxu1 %v5255_v3  ;;  %v1462_v33 = vld [vmem:[%s5249_s1 + $0x310] sm:$0xff]  ;;  %v334_v36 = vmul.f32 %v3728_v44, %v295_v32  ;;  %v4077_v16 = vpack.c.bf16 %v1467_v9, %v1466_v7  ;;  %v568_v23 = vld [vmem:[#allocation2 + $0x39] sm:$0xff]  ;;  %v1477_v1 = vld [vmem:[%s5249_s1 + $0x388] sm:$0xff] }
  0x42   : > { %3173 = vmatprep.subr.bf16.mxu0 %v5255_v3  ;;  %v4024_v51 = vpack.c.bf16 %v1463_v34, %v1462_v33  ;;  %v299_v18 = vld [vmem:[%s3708_s30 + $0xf0] sm:$0xff]  ;;  %v1439_v29 = vld [vmem:[%s5249_s1 + $0x258] sm:$0xff]  ;;  %v4181_v2 = vld [vmem:[#allocation2 + $0x62] sm:$0xff] }
  0x43   : > { %v373_v43 = vadd.f32 %v3733_v45, %v334_v36  ;;  %v631_v22 = vld [vmem:[#allocation2 + $0x32] sm:$0xff]  ;;  %v632_v35 = vld [vmem:[#allocation2 + $0x3a] sm:$0xff]  ;;  %v569_v36 = vld [vmem:[#allocation2 + $0x49] sm:$0xff] }
  0x44   : > { %3127 = vmatpush1.bf16.msra.mxu1 %v3126_v38  ;;  %v372_v38 = vadd.f32 %v3733_v45, %v333_v31  ;;  %v1438_v27 = vld [vmem:[%s5249_s1 + $0x250] sm:$0xff]  ;;  %v1471_v32 = vld [vmem:[%s5249_s1 + $0x358] sm:$0xff]  ;;  %v700_v7 = vld [vmem:[#allocation2 + $0x80] sm:$0xff] }
  0x45   : > { %3175 = vmatpush1.bf16.msra.mxu0 %v3174_v39  ;;  %3128 = vmatprep.subr.bf16.mxu1 %v5255_v3  ;;  %v296_v39 = vld [vmem:[%s3708_s30 + $0xd8] sm:$0xff]  ;;  %v405_v56 = vmax.f32 %v373_v43, 0.0  ;;  %v1470_v31 = vld [vmem:[%s5249_s1 + $0x350] sm:$0xff]  ;;  %v3198_v37 = vpack.c.bf16 %v1439_v29, %v1438_v27  ;;  %v1473_v43 = vld [vmem:[%s5249_s1 + $0x368] sm:$0xff] }
  0x46   : > { %3176 = vmatprep.subr.bf16.mxu0 %v5255_v3  ;;  %v335_v46 = vmul.f32 %v3728_v44, %v296_v39  ;;  %v404_v52 = vmax.f32 %v372_v38, 0.0  ;;  %v300_v34 = vld [vmem:[%s3708_s30 + $0xf8] sm:$0xff]  ;;  %v697_v39 = vld [vmem:[#allocation2 + $0x60] sm:$0xff]  ;;  %v1474_v55 = vld [vmem:[%s5249_s1 + $0x370] sm:$0xff] }
  0x47   : > { %493 = vst.msk [vmem:[#allocation2 + $0x151] sm:$0xff] %vm466_vm0, %v405_v56  ;;  %v339_v38 = vmul.f32 %v3728_v44, %v300_v34  ;;  %v1475_v56 = vld [vmem:[%s5249_s1 + $0x378] sm:$0xff]  ;;  %v1446_v9 = vld [vmem:[%s5249_s1 + $0x290] sm:$0xff]  ;;  %v4256_v34 = vld [vmem:[#allocation2 + $0x82] sm:$0xff] }
  0x48   : > { %3130 = vmatpush1.bf16.msra.mxu1 %v3129_v47  ;;  %v297_v47 = vld [vmem:[%s3708_s30 + $0xe0] sm:$0xff]  ;;  %v374_v57 = vadd.f32 %v3733_v45, %v335_v46  ;;  %492 = vst.msk [vmem:[#allocation2 + $0x141] sm:$0xff] %vm466_vm0, %v404_v52  ;;  %v698_v52 = vld [vmem:[#allocation2 + $0x68] sm:$0xff]  ;;  %v4169_v63 = vpack.c.bf16 %v1475_v56, %v1474_v55  ;;  %v1450_v27 = vld [vmem:[%s5249_s1 + $0x2b0] sm:$0xff] }
  0x49   : > { %3178 = vmatpush1.bf16.msra.mxu0 %v3177_v49  ;;  %3131 = vmatprep.subr.bf16.mxu1 %v5255_v3  ;;  %v1432_v49 = vld [vmem:[%s5249_s1 + $0x220] sm:$0xff]  ;;  %v336_v53 = vmul.f32 %v3728_v44, %v297_v47  ;;  %v378_v46 = vadd.f32 %v3733_v45, %v339_v38  ;;  %v4135_v47 = vld [vmem:[#allocation2 + $0x4a] sm:$0xff]  ;;  %v1451_v29 = vld [vmem:[%s5249_s1 + $0x2b8] sm:$0xff] }
  0x4a   : > { %3179 = vmatprep.subr.bf16.mxu0 %v5255_v3  ;;  %v3189_v61 = vpack.c.bf16 %v1433_v50, %v1432_v49  ;;  %v406_v62 = vmax.f32 %v374_v57, 0.0  ;;  %v4157_v57 = vld [vmem:[#allocation2 + $0x52] sm:$0xff]  ;;  %v4204_v13 = vld [vmem:[#allocation2 + $0x6a] sm:$0xff]  ;;  %v1452_v38 = vld [vmem:[%s5249_s1 + $0x2c0] sm:$0xff] }
  0x4b   : > { %v410_v50 = vmax.f32 %v378_v46, 0.0  ;;  %v4284_v46 = vld [vmem:[#allocation2 + $0x99] sm:$0xff] }
  0x4c   : > { %3133 = vmatpush1.bf16.msra.mxu1 %v3132_v60  ;;  %v566_v60 = vld [vmem:[#allocation2 + $0x21] sm:$0xff]  ;;  %494 = vst.msk [vmem:[#allocation2 + $0x159] sm:$0xff] %vm466_vm0, %v406_v62  ;;  %v1487_v55 = vld [vmem:[%s5249_s1 + $0x3d8] sm:$0xff] }
  0x4d   : > { %3181 = vmatpush1.bf16.msra.mxu0 %v3180_v0  ;;  %3310 = vmatprep.subr.bf16.mxu1 %v5255_v3  ;;  %v4042_v0 = vld [vmem:[#allocation2 + $0x38] sm:$0xff]  ;;  %498 = vst.msk [vmem:[#allocation2 + $0x189] sm:$0xff] %vm466_vm0, %v410_v50  ;;  %v1445_v62 = vld [vmem:[%s5249_s1 + $0x288] sm:$0xff]  ;;  %v1454_v50 = vld [vmem:[%s5249_s1 + $0x2d0] sm:$0xff] }
  0x4e   : > { %3182 = vmatprep.subr.bf16.mxu0 %v5255_v3  ;;  %v4309_v56 = vld [vmem:[#allocation2 + $0x9a] sm:$0xff] }
  0x4f   : > { %1573 = vmatmul.mubr.f32.vlgmr.msra.gmra.mrb[0].mxu1 %v3498_v8 }
  0x50   : > { %1798 = vmatmul.mubr.f32.vlgmr.msra.gmra.mrb[0].mxu0 %v627_v17  ;;  %1577 = vmatprep.mubr.f32.mxu1 %v564_v21  ;;  %v408_v17 = vmax.f32 %v376_v10, 0.0  ;;  %v338_v21 = vmul.f32 %v3728_v44, %v299_v18  ;;  %v1472_v44 = vld [vmem:[%s5249_s1 + $0x360] sm:$0xff]  ;;  %v1447_v10 = vld [vmem:[%s5249_s1 + $0x298] sm:$0xff] }
  0x51   : > { %3184 = vmatpush1.bf16.msra.mxu0 %v3183_v20  ;;  %1802 = vmatprep.mubr.f32.mxu0 %v3987_v26  ;;  %v1469_v20 = vld [vmem:[%s5249_s1 + $0x348] sm:$0xff]  ;;  %v4145_v54 = vpack.c.bf16 %v1473_v43, %v1472_v44  ;;  %v3210_v15 = vpack.c.bf16 %v1447_v10, %v1446_v9  ;;  %v1448_v18 = vld [vmem:[%s5249_s1 + $0x2a0] sm:$0xff]  ;;  %v4282_v43 = vld [vmem:[#allocation2 + $0x92] sm:$0xff] }
  0x52   : > { %3185 = vmatprep.subr.bf16.mxu0 %v5255_v3  ;;  %3326 = vmatpush1.bf16.msra.mxu1 %v3992_v28  ;;  %496 = vst.msk [vmem:[#allocation2 + $0x171] sm:$0xff] %vm466_vm0, %v408_v17  ;;  %v377_v25 = vadd.f32 %v3733_v45, %v338_v21  ;;  %v4102_v30 = vpack.c.bf16 %v1469_v20, %v1468_v19  ;;  %v4208_v17 = vld [vmem:[#allocation2 + $0x90] sm:$0xff]  ;;  %v1449_v19 = vld [vmem:[%s5249_s1 + $0x2a8] sm:$0xff]  ;;  %v1480_v21 = vld [vmem:[%s5249_s1 + $0x3a0] sm:$0xff] }
  0x53   : > { %1578 = vmatmul.mubr.f32.gmra.mrb[2].mxu1 %v3498_v8  ;;  %3311 = vmatprep.subr.bf16.mxu1 %v5255_v3  ;;  %v375_v8 = vadd.f32 %v3733_v45, %v336_v53  ;;  %v1442_v53 = vld [vmem:[%s5249_s1 + $0x270] sm:$0xff]  ;;  %v1443_v45 = vld [vmem:[%s5249_s1 + $0x278] sm:$0xff]  ;;  %v1485_v44 = vld [vmem:[%s5249_s1 + $0x3c8] sm:$0xff] }
  0x54   : > { %1803 = vmatmul.mubr.f32.gmra.mrb[2].mxu0 %v628_v40  ;;  %1582 = vmatprep.mubr.f32.mxu1 %v565_v41  ;;  %v409_v33 = vmax.f32 %v377_v25, 0.0  ;;  %v1440_v40 = vld [vmem:[%s5249_s1 + $0x260] sm:$0xff]  ;;  %v1441_v41 = vld [vmem:[%s5249_s1 + $0x268] sm:$0xff]  ;;  %v3213_v25 = vpack.c.bf16 %v1449_v19, %v1448_v18  ;;  %v4338_v10 = vld [vmem:[#allocation2 + $0xb1] sm:$0xff] }
  0x55   : > { %1807 = vmatprep.mubr.f32.mxu0 %v4014_v48  ;;  %3187 = vmatpush1.bf16.msra.mxu0 %v3186_v42  ;;  %v407_v5 = vmax.f32 %v375_v8, 0.0  ;;  %v4124_v42 = vpack.c.bf16 %v1471_v32, %v1470_v31  ;;  %v3201_v49 = vpack.c.bf16 %v1441_v41, %v1440_v40  ;;  %v4159_v8 = vld [vmem:[#allocation2 + $0x61] sm:$0xff]  ;;  %v1482_v32 = vld [vmem:[%s5249_s1 + $0x3b0] sm:$0xff]  ;;  %v1459_v18 = vld [vmem:[%s5249_s1 + $0x2f8] sm:$0xff] }
  0x56   : > { %3188 = vmatprep.subr.bf16.mxu0 %v5255_v3  ;;  %3327 = vmatpush1.bf16.msra.mxu1 %v4024_v51  ;;  %497 = vst.msk [vmem:[#allocation2 + $0x181] sm:$0xff] %vm466_vm0, %v409_v33  ;;  %v1483_v33 = vld [vmem:[%s5249_s1 + $0x3b8] sm:$0xff]  ;;  %v1484_v41 = vld [vmem:[%s5249_s1 + $0x3c0] sm:$0xff]  ;;  %v4336_v9 = vld [vmem:[#allocation2 + $0xaa] sm:$0xff] }
  0x57   : > { %1583 = vmatmul.mubr.f32.gmra.mrb[4].mxu1 %v3841_v58  ;;  %3312 = vmatprep.subr.bf16.mxu1 %v5255_v3  ;;  %495 = vst.msk [vmem:[#allocation2 + $0x169] sm:$0xff] %vm466_vm0, %v407_v5  ;;  %v630_v58 = vld [vmem:[#allocation2 + $0x22] sm:$0xff]  ;;  %v4270_v40 = vpack.c.bf16 %v1483_v33, %v1482_v32 }
  0x58   : > { %1808 = vmatmul.mubr.f32.gmra.mrb[4].mxu0 %v629_v59  ;;  %1587 = vmatprep.mubr.f32.mxu1 %v566_v60  ;;  %v3204_v59 = vpack.c.bf16 %v1443_v45, %v1442_v53  ;;  %v699_v60 = vld [vmem:[#allocation2 + $0x78] sm:$0xff]  ;;  %v4183_v5 = vld [vmem:[#allocation2 + $0x69] sm:$0xff]  ;;  %v4296_v53 = vpack.c.bf16 %v1485_v44, %v1484_v41  ;;  %v4371_v32 = vld [vmem:[#allocation2 + $0xc1] sm:$0xff] }
  0x59   : > { %1812 = vmatprep.mubr.f32.mxu0 %v4042_v0  ;;  %3190 = vmatpush1.bf16.msra.mxu0 %v3189_v61  ;;  %v1444_v61 = vld [vmem:[%s5249_s1 + $0x280] sm:$0xff]  ;;  %v1486_v45 = vld [vmem:[%s5249_s1 + $0x3d0] sm:$0xff] }
  0x5a   : > { %3191 = vmatprep.subr.bf16.mxu0 %v5255_v3  ;;  %3328 = vmatpush1.bf16.msra.mxu1 %v4052_v4  ;;  %v3207_v6 = vpack.c.bf16 %v1445_v62, %v1444_v61  ;;  %5306 = vst [vmem:[#allocation4_spill] sm:$0xff] %v4296_v53  ;;  %v4313_v61 = vld [vmem:[#allocation2 + $0xc0] sm:$0xff]  ;;  %v4388_v44 = vld [vmem:[#allocation2 + $0xc9] sm:$0xff] }
  0x5b   : > { %1588 = vmatmul.mubr.f32.gmra.mrb[6].mxu1 %v3987_v26  ;;  %3313 = vmatprep.subr.bf16.mxu1 %v5255_v3  ;;  %v4092_v26 = vld [vmem:[#allocation2 + $0x50] sm:$0xff]  ;;  %v1456_v62 = vld [vmem:[%s5249_s1 + $0x2e0] sm:$0xff] }
  0x5c   : > { %1813 = vmatmul.mubr.f32.gmra.mrb[6].mxu0 %v630_v58  ;;  %1592 = vmatprep.mubr.f32.mxu1 %v567_v11  ;;  %v1478_v11 = vld [vmem:[%s5249_s1 + $0x390] sm:$0xff]  ;;  %v4386_v41 = vld [vmem:[#allocation2 + $0xc2] sm:$0xff] }
  0x5d   : > { %1817 = vmatprep.mubr.f32.mxu0 %v4070_v14  ;;  %3193 = vmatpush1.bf16.msra.mxu0 %v3192_v12  ;;  %v1479_v12 = vld [vmem:[%s5249_s1 + $0x398] sm:$0xff]  ;;  %5310 = vst [vmem:[#allocation8_spill] sm:$0xff] %v4386_v41 }
  0x5e   : > { %3194 = vmatprep.subr.bf16.mxu0 %v5255_v3  ;;  %3329 = vmatpush1.bf16.msra.mxu1 %v4077_v16  ;;  %v4218_v20 = vpack.c.bf16 %v1479_v12, %v1478_v11  ;;  %v4340_v12 = vld [vmem:[#allocation2 + $0xc8] sm:$0xff] }
  0x5f   : > { %1593 = vmatmul.mubr.f32.gmra.mrb[8].mxu1 %v4014_v48  ;;  %3314 = vmatprep.subr.bf16.mxu1 %v5255_v3  ;;  %v570_v48 = vld [vmem:[#allocation2 + $0x51] sm:$0xff] }
  0x60   : > { %1818 = vmatmul.mubr.f32.gmra.mrb[8].mxu0 %v631_v22  ;;  %1597 = vmatprep.mubr.f32.mxu1 %v568_v23  ;;  %v1481_v22 = vld [vmem:[%s5249_s1 + $0x3a8] sm:$0xff]  ;;  %v4230_v23 = vld [vmem:[#allocation2 + $0x7a] sm:$0xff] }
  0x61   : > { %1822 = vmatprep.mubr.f32.mxu0 %v4092_v26  ;;  %3196 = vmatpush1.bf16.msra.mxu0 %v3195_v24  ;;  %v4232_v24 = vld [vmem:[#allocation2 + $0x81] sm:$0xff]  ;;  %v4244_v31 = vpack.c.bf16 %v1481_v22, %v1480_v21  ;;  %v1490_v21 = vld [vmem:[%s5249_s1 + $0x3f0] sm:$0xff]  ;;  %v1491_v22 = vld [vmem:[%s5249_s1 + $0x3f8] sm:$0xff] }
  0x62   : > { %3197 = vmatprep.subr.bf16.mxu0 %v5255_v3  ;;  %3330 = vmatpush1.bf16.msra.mxu1 %v4102_v30 }
  0x63   : > { %1598 = vmatmul.mubr.f32.gmra.mrb[10].mxu1 %v4042_v0  ;;  %3315 = vmatprep.subr.bf16.mxu1 %v5255_v3  ;;  %v1476_v0 = vld [vmem:[%s5249_s1 + $0x380] sm:$0xff] }
  0x64   : > { %1823 = vmatmul.mubr.f32.gmra.mrb[10].mxu0 %v632_v35  ;;  %1602 = vmatprep.mubr.f32.mxu1 %v569_v36  ;;  %v4193_v58 = vpack.c.bf16 %v1477_v1, %v1476_v0  ;;  %v4258_v35 = vld [vmem:[#allocation2 + $0x91] sm:$0xff]  ;;  %v3216_v36 = vpack.c.bf16 %v1451_v29, %v1450_v27  ;;  %v1457_v0 = vld [vmem:[%s5249_s1 + $0x2e8] sm:$0xff]  ;;  %v4323_v1 = vpack.c.bf16 %v1487_v55, %v1486_v45  ;;  %v4409_v55 = vld [vmem:[#allocation2 + $0xda] sm:$0xff] }
  0x65   : > { %1827 = vmatprep.mubr.f32.mxu0 %v697_v39  ;;  %3199 = vmatpush1.bf16.msra.mxu0 %v3198_v37  ;;  %v4260_v37 = vld [vmem:[#allocation2 + $0xa8] sm:$0xff]  ;;  %v3225_v11 = vpack.c.bf16 %v1457_v0, %v1456_v62  ;;  %v4369_v29 = vld [vmem:[#allocation2 + $0xb2] sm:$0xff]  ;;  %5312 = vst [vmem:[#allocation10_spill] sm:$0xff] %v4409_v55 }
  0x66   : > { %3200 = vmatprep.subr.bf16.mxu0 %v5255_v3  ;;  %3331 = vmatpush1.bf16.msra.mxu1 %v4124_v42  ;;  %5307 = vst [vmem:[#allocation5_spill] sm:$0xff] %v4323_v1  ;;  %v1493_v27 = vld [vmem:[%s5249_s1 + $0x408] sm:$0xff]  ;;  %v4403_v45 = vld [vmem:[#allocation2 + $0xf0] sm:$0xff]  ;;  %v4413_v62 = vld [vmem:[#allocation2 + $0xf8] sm:$0xff] }
  0x67   : > { %1603 = vmatmul.mubr.f32.gmra.mrb[12].mxu1 %v4070_v14  ;;  %3316 = vmatprep.subr.bf16.mxu1 %v5255_v3  ;;  %v4206_v14 = vld [vmem:[#allocation2 + $0x79] sm:$0xff]  ;;  %v4419_v0 = vld [vmem:[#allocation2 + $0xe2] sm:$0xff] }
  0x68   : > { %1828 = vmatmul.mubr.f32.gmra.mrb[12].mxu0 %v4135_v47  ;;  %1607 = vmatprep.mubr.f32.mxu1 %v570_v48  ;;  %5313 = vst [vmem:[#allocation11_spill] sm:$0xff] %v4419_v0 }
  0x69   : > { %1832 = vmatprep.mubr.f32.mxu0 %v698_v52  ;;  %3202 = vmatpush1.bf16.msra.mxu0 %v3201_v49  ;;  %v4286_v49 = vld [vmem:[#allocation2 + $0xb0] sm:$0xff] }
  0x6a   : > { %3203 = vmatprep.subr.bf16.mxu0 %v5255_v3  ;;  %3332 = vmatpush1.bf16.msra.mxu1 %v4145_v54 }
  0x6b   : > { %1608 = vmatmul.mubr.f32.gmra.mrb[14].mxu1 %v4092_v26  ;;  %3317 = vmatprep.subr.bf16.mxu1 %v5255_v3  ;;  %v4234_v26 = vld [vmem:[#allocation2 + $0x98] sm:$0xff] }
  0x6c   : > { %1833 = vmatmul.mubr.f32.gmra.mrb[14].mxu0 %v4157_v57  ;;  %1612 = vmatprep.mubr.f32.mxu1 %v4159_v8 }
  0x6d   : > { %1837 = vmatprep.mubr.f32.mxu0 %v699_v60  ;;  %3205 = vmatpush1.bf16.msra.mxu0 %v3204_v59  ;;  %v4311_v59 = vld [vmem:[#allocation2 + $0xa9] sm:$0xff] }
  0x6e   : > { %3206 = vmatprep.subr.bf16.mxu0 %v5255_v3  ;;  %3333 = vmatpush1.bf16.msra.mxu1 %v4169_v63 }
  0x6f   : > { %1613 = vmatmul.mubr.f32.gmra.mrb[16].mxu1 %v697_v39  ;;  %3318 = vmatprep.subr.bf16.mxu1 %v5255_v3  ;;  %v1453_v39 = vld [vmem:[%s5249_s1 + $0x2c8] sm:$0xff] }
  0x70   : > { %1838 = vmatmul.mubr.f32.gmra.mrb[16].mxu0 %v4181_v2  ;;  %1617 = vmatprep.mubr.f32.mxu1 %v4183_v5  ;;  %v3219_v48 = vpack.c.bf16 %v1453_v39, %v1452_v38  ;;  %v4377_v38 = vpack.c.bf16 %v1491_v22, %v1490_v21  ;;  %v4439_v21 = vld [vmem:[#allocation2 + $0xfa] sm:$0xff]  ;;  %v4441_v22 = vld [vmem:[#allocation2 + $0x109] sm:$0xff] }
  0x71   : > { %1842 = vmatprep.mubr.f32.mxu0 %v700_v7  ;;  %3208 = vmatpush1.bf16.msra.mxu0 %v3207_v6  ;;  %v1488_v6 = vld [vmem:[%s5249_s1 + $0x3e0] sm:$0xff]  ;;  %5315 = vst [vmem:[#allocation13_spill] sm:$0xff] %v4439_v21 }
  0x72   : > { %3209 = vmatprep.subr.bf16.mxu0 %v5255_v3  ;;  %3334 = vmatpush1.bf16.msra.mxu1 %v4193_v58  ;;  %5309 = vst [vmem:[#allocation7_spill] sm:$0xff] %v4377_v38 }
  0x73   : > { %1618 = vmatmul.mubr.f32.gmra.mrb[18].mxu1 %v698_v52  ;;  %3319 = vmatprep.subr.bf16.mxu1 %v5255_v3  ;;  %v1455_v52 = vld [vmem:[%s5249_s1 + $0x2d8] sm:$0xff] }
  0x74   : > { %1843 = vmatmul.mubr.f32.gmra.mrb[18].mxu0 %v4204_v13  ;;  %1622 = vmatprep.mubr.f32.mxu1 %v4206_v14 }
  0x75   : > { %1847 = vmatprep.mubr.f32.mxu0 %v4208_v17  ;;  %3211 = vmatpush1.bf16.msra.mxu0 %v3210_v15  ;;  %v1458_v15 = vld [vmem:[%s5249_s1 + $0x2f0] sm:$0xff] }
  0x76   : > { %3212 = vmatprep.subr.bf16.mxu0 %v5255_v3  ;;  %3335 = vmatpush1.bf16.msra.mxu1 %v4218_v20  ;;  %v3228_v33 = vpack.c.bf16 %v1459_v18, %v1458_v15  ;;  %v4431_v15 = vld [vmem:[#allocation2 + $0xf9] sm:$0xff]  ;;  %v4433_v18 = vld [vmem:[#allocation2 + $0x110] sm:$0xff] }
  0x77   : > { %1623 = vmatmul.mubr.f32.gmra.mrb[20].mxu1 %v699_v60  ;;  %3320 = vmatprep.subr.bf16.mxu1 %v5255_v3  ;;  %v3222_v60 = vpack.c.bf16 %v1455_v52, %v1454_v50  ;;  %v4399_v50 = vld [vmem:[#allocation2 + $0xca] sm:$0xff]  ;;  %v4401_v52 = vld [vmem:[#allocation2 + $0xd9] sm:$0xff] }
  0x78   : > { %1848 = vmatmul.mubr.f32.gmra.mrb[20].mxu0 %v4230_v23  ;;  %1627 = vmatprep.mubr.f32.mxu1 %v4232_v24  ;;  %5311 = vst [vmem:[#allocation9_spill] sm:$0xff] %v4399_v50 }
  0x79   : > { %1852 = vmatprep.mubr.f32.mxu0 %v4234_v26  ;;  %3214 = vmatpush1.bf16.msra.mxu0 %v3213_v25  ;;  %v1492_v25 = vld [vmem:[%s5249_s1 + $0x400] sm:$0xff] }
  0x7a   : > { %3215 = vmatprep.subr.bf16.mxu0 %v5255_v3  ;;  %3336 = vmatpush1.bf16.msra.mxu1 %v4244_v31  ;;  %v4381_v39 = vpack.c.bf16 %v1493_v27, %v1492_v25  ;;  %v4443_v25 = vld [vmem:[#allocation2 + $0x120] sm:$0xff]  ;;  %v4449_v27 = vld [vmem:[#allocation2 + $0x10a] sm:$0xff] }
  0x7b   : > { %1628 = vmatmul.mubr.f32.gmra.mrb[22].mxu1 %v700_v7  ;;  %3321 = vmatprep.subr.bf16.mxu1 %v5255_v3  ;;  %v1489_v7 = vld [vmem:[%s5249_s1 + $0x3e8] sm:$0xff]  ;;  %5316 = vst [vmem:[#allocation14_spill] sm:$0xff] %v4449_v27 }
  0x7c   : > { %1853 = vmatmul.mubr.f32.gmra.mrb[22].mxu0 %v4256_v34  ;;  %1632 = vmatprep.mubr.f32.mxu1 %v4258_v35  ;;  %v4350_v19 = vpack.c.bf16 %v1489_v7, %v1488_v6  ;;  %v4421_v6 = vld [vmem:[#allocation2 + $0xf1] sm:$0xff]  ;;  %v4423_v7 = vld [vmem:[#allocation2 + $0x108] sm:$0xff] }
  0x7d   : > { %1857 = vmatprep.mubr.f32.mxu0 %v4260_v37  ;;  %3217 = vmatpush1.bf16.msra.mxu0 %v3216_v36  ;;  %v4373_v36 = vld [vmem:[#allocation2 + $0xd8] sm:$0xff] }
  0x7e   : > { %3218 = vmatprep.subr.bf16.mxu0 %v5255_v3  ;;  %3337 = vmatpush1.bf16.msra.mxu1 %v4270_v40  ;;  %5308 = vst [vmem:[#allocation6_spill] sm:$0xff] %v4350_v19 }
  0x7f   : > { %1633 = vmatmul.mubr.f32.gmra.mrb[24].mxu1 %v4208_v17  ;;  %3322 = vmatprep.subr.bf16.mxu1 %v5255_v3 }
  0x80   : > { %1858 = vmatmul.mubr.f32.gmra.mrb[24].mxu0 %v4282_v43  ;;  %1637 = vmatprep.mubr.f32.mxu1 %v4284_v46 }
  0x81   : > { %1862 = vmatprep.mubr.f32.mxu0 %v4286_v49  ;;  %3220 = vmatpush1.bf16.msra.mxu0 %v3219_v48  ;;  %v4390_v48 = vld [vmem:[#allocation2 + $0xe0] sm:$0xff] }
  0x82   : > { %3221 = vmatprep.subr.bf16.mxu0 %v5255_v3  ;;  %3338 = vmatpush1.bf16.msra.mxu1 %v4296_v53  ;;  %v5341_v53 = vmov 0.0|0.0  }
  0x83   : > { %1638 = vmatmul.mubr.f32.gmra.mrb[26].mxu1 %v4234_v26  ;;  %3323 = vmatprep.subr.bf16.mxu1 %v5255_v3 }
  0x84   : > { %1863 = vmatmul.mubr.f32.gmra.mrb[26].mxu0 %v4309_v56  ;;  %1642 = vmatprep.mubr.f32.mxu1 %v4311_v59 }
  0x85   : > { %1867 = vmatprep.mubr.f32.mxu0 %v4313_v61  ;;  %3223 = vmatpush1.bf16.msra.mxu0 %v3222_v60  ;;  %v4411_v60 = vld [vmem:[#allocation2 + $0xe1] sm:$0xff] }
  0x86   : > { %3224 = vmatprep.subr.bf16.mxu0 %v5255_v3  ;;  %3339 = vmatpush1.bf16.msra.mxu1 %v4323_v1  ;;  %v4489_v1 = vld [vmem:[#allocation2 + $0x13a] sm:$0xff] }
  0x87   : > { %1643 = vmatmul.mubr.f32.gmra.mrb[28].mxu1 %v4260_v37  ;;  %3324 = vmatprep.subr.bf16.mxu1 %v5255_v3  ;;  %5325 = vst [vmem:[#allocation23_spill] sm:$0xff] %v4489_v1 }
  0x88   : > { %1868 = vmatmul.mubr.f32.gmra.mrb[28].mxu0 %v4336_v9  ;;  %1647 = vmatprep.mubr.f32.mxu1 %v4338_v10 }
  0x89   : > { %1872 = vmatprep.mubr.f32.mxu0 %v4340_v12  ;;  %3226 = vmatpush1.bf16.msra.mxu0 %v3225_v11  ;;  %v4429_v11 = vld [vmem:[#allocation2 + $0xf2] sm:$0xff] }
  0x8a   : > { %3227 = vmatprep.subr.bf16.mxu0 %v5255_v3  ;;  %3340 = vmatpush1.bf16.msra.mxu1 %v4350_v19  ;;  %5314 = vst [vmem:[#allocation12_spill] sm:$0xff] %v4429_v11  ;;  %v4479_v19 = vld [vmem:[#allocation2 + $0x12a] sm:$0xff] }
  0x8b   : > { %1648 = vmatmul.mubr.f32.gmra.mrb[30].mxu1 %v4286_v49  ;;  %3325 = vmatprep.subr.bf16.mxu1 %v5255_v3  ;;  %5322 = vst [vmem:[#allocation20_spill] sm:$0xff] %v4479_v19 }
  0x8c   : > { %1873 = vmatmul.mubr.f32.gmra.mrb[30].mxu0 %v4369_v29  ;;  %1652 = vmatprep.mubr.f32.mxu1 %v4371_v32 }
  0x8d   : > { %1877 = vmatprep.mubr.f32.mxu0 %v4373_v36  ;;  %3229 = vmatpush1.bf16.msra.mxu0 %v3228_v33  ;;  %v4451_v33 = vld [vmem:[#allocation2 + $0x111] sm:$0xff] }
  0x8e   : > { %3341 = vmatpush1.bf16.msra.mxu1 %v4377_v38  ;;  %3230 = vmatprep.subr.bf16.mxu0 %v5255_v3  ;;  %v4453_v3 = vld [vmem:[#allocation2 + $0x128] sm:$0xff] }
  0x8f   : > { %1653 = vmatmul.mubr.f32.gmra.mrb[32].mxu1 %v4313_v61  ;;  %3279 = vmatprep.subr.bf16.mxu1 %v4381_v39  ;;  %5317 = vst [vmem:[#allocation15_spill] sm:$0xff] %v4453_v3  ;;  %v4469_v38 = vld [vmem:[#allocation2 + $0x122] sm:$0xff] }
  0x90   : > { %1878 = vmatmul.mubr.f32.gmra.mrb[32].mxu0 %v4386_v41  ;;  %1657 = vmatprep.mubr.f32.mxu1 %v4388_v44  ;;  %5320 = vst [vmem:[#allocation18_spill] sm:$0xff] %v4469_v38  ;;  %v4493_v41 = vld [vmem:[#allocation2 + $0x158] sm:$0xff] }
  0x91   : > { %1882 = vmatprep.mubr.f32.mxu0 %v4390_v48  ;;  %5327 = vst [vmem:[#allocation25_spill] sm:$0xff] %v4493_v41 }
  0x93   : > { %1658 = vmatmul.mubr.f32.gmra.mrb[34].mxu1 %v4340_v12 }
  0x94   : > { %1883 = vmatmul.mubr.f32.gmra.mrb[34].mxu0 %v4399_v50  ;;  %1662 = vmatprep.mubr.f32.mxu1 %v4401_v52  ;;  %v4483_v50 = vld [vmem:[#allocation2 + $0x150] sm:$0xff] }
  0x95   : > { %1887 = vmatprep.mubr.f32.mxu0 %v4403_v45  ;;  %5324 = vst [vmem:[#allocation22_spill] sm:$0xff] %v4483_v50 }
  0x97   : > { %1663 = vmatmul.mubr.f32.gmra.mrb[36].mxu1 %v4373_v36 }
  0x98   : > { %1888 = vmatmul.mubr.f32.gmra.mrb[36].mxu0 %v4409_v55  ;;  %1667 = vmatprep.mubr.f32.mxu1 %v4411_v60  ;;  %v4473_v55 = vld [vmem:[#allocation2 + $0x140] sm:$0xff] }
  0x99   : > { %1892 = vmatprep.mubr.f32.mxu0 %v4413_v62  ;;  %5321 = vst [vmem:[#allocation19_spill] sm:$0xff] %v4473_v55 }
  0x9b   : > { %1668 = vmatmul.mubr.f32.gmra.mrb[38].mxu1 %v4390_v48 }
  0x9c   : > { %1893 = vmatmul.mubr.f32.gmra.mrb[38].mxu0 %v4419_v0  ;;  %1672 = vmatprep.mubr.f32.mxu1 %v4421_v6  ;;  %v4463_v0 = vld [vmem:[#allocation2 + $0x138] sm:$0xff] }
  0x9d   : > { %1897 = vmatprep.mubr.f32.mxu0 %v4423_v7  ;;  %5319 = vst [vmem:[#allocation17_spill] sm:$0xff] %v4463_v0 }
  0x9f   : > { %1673 = vmatmul.mubr.f32.gmra.mrb[40].mxu1 %v4403_v45 }
  0xa0   : > { %1898 = vmatmul.mubr.f32.gmra.mrb[40].mxu0 %v4429_v11  ;;  %1677 = vmatprep.mubr.f32.mxu1 %v4431_v15  ;;  %v4459_v11 = vld [vmem:[#allocation2 + $0x112] sm:$0xff] }
  0xa1   : > { %1902 = vmatprep.mubr.f32.mxu0 %v4433_v18  ;;  %5318 = vst [vmem:[#allocation16_spill] sm:$0xff] %v4459_v11 }
  0xa3   : > { %1678 = vmatmul.mubr.f32.gmra.mrb[42].mxu1 %v4413_v62 }
  0xa4   : > { %1903 = vmatmul.mubr.f32.gmra.mrb[42].mxu0 %v4439_v21  ;;  %1682 = vmatprep.mubr.f32.mxu1 %v4441_v22  ;;  %v4461_v21 = vld [vmem:[#allocation2 + $0x121] sm:$0xff] }
  0xa5   : > { %1907 = vmatprep.mubr.f32.mxu0 %v4443_v25 }
  0xa7   : > { %1683 = vmatmul.mubr.f32.gmra.mrb[44].mxu1 %v4423_v7 }
  0xa8   : > { %1908 = vmatmul.mubr.f32.gmra.mrb[44].mxu0 %v4449_v27  ;;  %1687 = vmatprep.mubr.f32.mxu1 %v4451_v33  ;;  %v4471_v27 = vld [vmem:[#allocation2 + $0x129] sm:$0xff] }
  0xa9   : > { %1912 = vmatprep.mubr.f32.mxu0 %v4453_v3 }
  0xab   : > { %1688 = vmatmul.mubr.f32.gmra.mrb[46].mxu1 %v4433_v18 }
  0xac   : > { %1913 = vmatmul.mubr.f32.gmra.mrb[46].mxu0 %v4459_v11  ;;  %1692 = vmatprep.mubr.f32.mxu1 %v4461_v21  ;;  %v4481_v11 = vld [vmem:[#allocation2 + $0x139] sm:$0xff] }
  0xad   : > { %1917 = vmatprep.mubr.f32.mxu0 %v4463_v0  ;;  %5323 = vst [vmem:[#allocation21_spill] sm:$0xff] %v4481_v11 }
  0xaf   : > { %1693 = vmatmul.mubr.f32.gmra.mrb[48].mxu1 %v4443_v25 }
  0xb0   : > { %1918 = vmatmul.mubr.f32.gmra.mrb[48].mxu0 %v4469_v38  ;;  %1697 = vmatprep.mubr.f32.mxu1 %v4471_v27  ;;  %v4491_v38 = vld [vmem:[#allocation2 + $0x141] sm:$0xff] }
  0xb1   : > { %1922 = vmatprep.mubr.f32.mxu0 %v4473_v55  ;;  %5326 = vst [vmem:[#allocation24_spill] sm:$0xff] %v4491_v38 }
  0xb3   : > { %1698 = vmatmul.mubr.f32.gmra.mrb[50].mxu1 %v4453_v3  ;;  %v4499_v3 = vld [vmem:[#allocation2 + $0x142] sm:$0xff] }
  0xb4   : > { %1923 = vmatmul.mubr.f32.gmra.mrb[50].mxu0 %v4479_v19  ;;  %1702 = vmatprep.mubr.f32.mxu1 %v4481_v11  ;;  %5328 = vst [vmem:[#allocation26_spill] sm:$0xff] %v4499_v3  ;;  %v4501_v19 = vld [vmem:[#allocation2 + $0x151] sm:$0xff]  ;;  %v4503_v11 = vld [vmem:[#allocation2 + $0x168] sm:$0xff] }
  0xb5   : > { %1927 = vmatprep.mubr.f32.mxu0 %v4483_v50  ;;  %5329 = vst [vmem:[#allocation27_spill] sm:$0xff] %v4501_v19  ;;  %5330 = vst [vmem:[#allocation28_spill] sm:$0xff] %v4503_v11 }
  0xb7   : > { %1703 = vmatmul.mubr.f32.gmra.mrb[52].mxu1 %v4463_v0  ;;  %v4509_v0 = vld [vmem:[#allocation2 + $0x152] sm:$0xff] }
  0xb8   : > { %1928 = vmatmul.mubr.f32.gmra.mrb[52].mxu0 %v4489_v1  ;;  %1707 = vmatprep.mubr.f32.mxu1 %v4491_v38  ;;  %5331 = vst [vmem:[#allocation29_spill] sm:$0xff] %v4509_v0  ;;  %v4511_v1 = vld [vmem:[#allocation2 + $0x159] sm:$0xff]  ;;  %v4513_v38 = vld [vmem:[#allocation2 + $0x170] sm:$0xff] }
  0xb9   : > { %1932 = vmatprep.mubr.f32.mxu0 %v4493_v41  ;;  %5332 = vst [vmem:[#allocation30_spill] sm:$0xff] %v4511_v1  ;;  %5333 = vst [vmem:[#allocation31_spill] sm:$0xff] %v4513_v38 }
  0xbb   : > { %1708 = vmatmul.mubr.f32.gmra.mrb[54].mxu1 %v4473_v55  ;;  %v4519_v55 = vld [vmem:[#allocation2 + $0x15a] sm:$0xff] }
  0xbc   : > { %1933 = vmatmul.mubr.f32.gmra.mrb[54].mxu0 %v4499_v3  ;;  %1712 = vmatprep.mubr.f32.mxu1 %v4501_v19  ;;  %5334 = vst [vmem:[#allocation32_spill] sm:$0xff] %v4519_v55  ;;  %v4521_v3 = vld [vmem:[#allocation2 + $0x169] sm:$0xff]  ;;  %v4523_v19 = vld [vmem:[#allocation2 + $0x180] sm:$0xff] }
  0xbd   : > { %1937 = vmatprep.mubr.f32.mxu0 %v4503_v11  ;;  %5335 = vst [vmem:[#allocation33_spill] sm:$0xff] %v4521_v3  ;;  %5336 = vst [vmem:[#allocation34_spill] sm:$0xff] %v4523_v19 }
  0xbf   : > { %1713 = vmatmul.mubr.f32.gmra.mrb[56].mxu1 %v4483_v50  ;;  %v4529_v50 = vld [vmem:[#allocation2 + $0x16a] sm:$0xff] }
  0xc0   : > { %1938 = vmatmul.mubr.f32.gmra.mrb[56].mxu0 %v4509_v0  ;;  %1717 = vmatprep.mubr.f32.mxu1 %v4511_v1  ;;  %5337 = vst [vmem:[#allocation35_spill] sm:$0xff] %v4529_v50  ;;  %v4531_v0 = vld [vmem:[#allocation2 + $0x171] sm:$0xff]  ;;  %v4533_v1 = vld [vmem:[#allocation2 + $0x188] sm:$0xff] }
  0xc1   : > { %1942 = vmatprep.mubr.f32.mxu0 %v4513_v38  ;;  %5338 = vst [vmem:[#allocation36_spill] sm:$0xff] %v4531_v0  ;;  %5339 = vst [vmem:[#allocation37_spill] sm:$0xff] %v4533_v1 }
  0xc3   : > { %1718 = vmatmul.mubr.f32.gmra.mrb[58].mxu1 %v4493_v41  ;;  %v4539_v41 = vld [vmem:[#allocation2 + $0x172] sm:$0xff] }
  0xc4   : > { %1943 = vmatmul.mubr.f32.gmra.mrb[58].mxu0 %v4519_v55  ;;  %1722 = vmatprep.mubr.f32.mxu1 %v4521_v3  ;;  %5340 = vst [vmem:[#allocation38_spill] sm:$0xff] %v4539_v41  ;;  %v819_v55 = vld [vmem:[#allocation2 + $0x1a] sm:$0xff]  ;;  %v4559_v3 = vld [vmem:[#allocation2 + $0x32] sm:$0xff] }
  0xc5   : > { %1947 = vmatprep.mubr.f32.mxu0 %v4523_v19  ;;  %v1494_v19 = vld [vmem:[%s5249_s1 + $0x410] sm:$0xff] }
  0xc7   : > { %1723 = vmatmul.mubr.f32.gmra.mrb[60].mxu1 %v4503_v11 }
  0xc8   : > { %1948 = vmatmul.mubr.f32.gmra.mrb[60].mxu0 %v4529_v50  ;;  %1727 = vmatprep.mubr.f32.mxu1 %v4531_v0  ;;  %v1495_v50 = vld [vmem:[%s5249_s1 + $0x418] sm:$0xff] }
  0xc9   : > { %1952 = vmatprep.mubr.f32.mxu0 %v4533_v1  ;;  %v755_v0 = vld [vmem:[#allocation2 + $0x19] sm:$0xff]  ;;  %v820_v1 = vld [vmem:[#allocation2 + $0x22] sm:$0xff]  ;;  %v3282_v11 = vpack.c.bf16 %v1495_v50, %v1494_v19  ;;  %v1498_v19 = vld [vmem:[%s5249_s1 + $0x430] sm:$0xff] }
  0xca   : > { %v1502_v50 = vld [vmem:[%s5249_s1 + $0x450] sm:$0xff] }
  0xcb   : > { %1728 = vmatmul.mubr.f32.gmra.mrb[62].mxu1 %v4513_v38  ;;  %v1497_v38 = vld [vmem:[%s5249_s1 + $0x428] sm:$0xff] }
  0xcc   : > { %1953 = vmatmul.mubr.f32.gmra.mrb[62].mxu0 %v4539_v41  ;;  %2287 = vmatprep.mubr.f32.mxu1 %v4258_v35  ;;  %v1496_v41 = vld [vmem:[%s5249_s1 + $0x420] sm:$0xff] }
  0xcd   : > { %2022 = vmatprep.mubr.f32.mxu0 %v819_v55  ;;  %v756_v55 = vld [vmem:[#allocation2 + $0x21] sm:$0xff] }
  0xcf   : > { %2288 = vmatmul.mubr.f32.vlgmr.msra.gmra.mrb[64].mxu1 %v4208_v17  ;;  %v3286_v17 = vpack.c.bf16 %v1497_v38, %v1496_v41  ;;  %v4588_v41 = vld [vmem:[#allocation2 + $0x39] sm:$0xff] }
  0xd0   : > { %2023 = vmatmul.mubr.f32.vlgmr.msra.gmra.mrb[0].mxu0 %v755_v0  ;;  %2292 = vmatprep.mubr.f32.mxu1 %v4284_v46  ;;  %v1503_v0 = vld [vmem:[%s5249_s1 + $0x458] sm:$0xff] }
  0xd1   : > { %3232 = vmatpush1.bf16.msra.mxu0 %v3992_v28  ;;  %2027 = vmatprep.mubr.f32.mxu0 %v820_v1  ;;  %v1499_v28 = vld [vmem:[%s5249_s1 + $0x438] sm:$0xff] }
  0xd2   : > { %3233 = vmatprep.subr.bf16.mxu0 %v5341_v53  ;;  %3281 = vmatpush3.bf16.msra.mxu1 %v4381_v39  ;;  %v4572_v1 = vld [vmem:[#allocation2 + $0x31] sm:$0xff]  ;;  %v3290_v38 = vpack.c.bf16 %v1499_v28, %v1498_v19  ;;  %v1500_v39 = vld [vmem:[%s5249_s1 + $0x440] sm:$0xff] }
  0xd3   : > { %2293 = vmatmul.mubr.f32.gmra.mrb[66].mxu1 %v4234_v26  ;;  %3283 = vmatprep.subr.bf16.mxu1 %v3282_v11  ;;  %v4575_v26 = vld [vmem:[#allocation2 + $0x3a] sm:$0xff]  ;;  %v1014_v19 = vld [vmem:[#allocation2 + $0x4a] sm:$0xff] }
  0xd4   : > { %2028 = vmatmul.mubr.f32.gmra.mrb[2].mxu0 %v756_v55  ;;  %2297 = vmatprep.mubr.f32.mxu1 %v4311_v59  ;;  %v1506_v55 = vld [vmem:[%s5249_s1 + $0x470] sm:$0xff] }
  0xd5   : > { %2032 = vmatprep.mubr.f32.mxu0 %v4559_v3  ;;  %3235 = vmatpush1.bf16.msra.mxu0 %v4024_v51  ;;  %v1501_v51 = vld [vmem:[%s5249_s1 + $0x448] sm:$0xff] }
  0xd6   : > { %3236 = vmatprep.subr.bf16.mxu0 %v5341_v53  ;;  %3285 = vmatpush3.bf16.msra.mxu1 %v3282_v11  ;;  %v1504_v11 = vld [vmem:[%s5249_s1 + $0x460] sm:$0xff] }
  0xd7   : > { %2298 = vmatmul.mubr.f32.gmra.mrb[68].mxu1 %v4260_v37  ;;  %3287 = vmatprep.subr.bf16.mxu1 %v3286_v17  ;;  %v3294_v37 = vpack.c.bf16 %v1501_v51, %v1500_v39  ;;  %v5372_v39 = vld [vmem:[#allocation26_spill] sm:$0xff] }
  0xd8   : > { %2033 = vmatmul.mubr.f32.gmra.mrb[4].mxu0 %v4572_v1  ;;  %2302 = vmatprep.mubr.f32.mxu1 %v4338_v10  ;;  %v1016_v51 = vld [vmem:[#allocation2 + $0x62] sm:$0xff] }
  0xd9   : > { %2037 = vmatprep.mubr.f32.mxu0 %v4575_v26  ;;  %3238 = vmatpush1.bf16.msra.mxu0 %v4052_v4  ;;  %v4602_v4 = vld [vmem:[#allocation2 + $0x49] sm:$0xff] }
  0xda   : > { %3239 = vmatprep.subr.bf16.mxu0 %v5341_v53  ;;  %3289 = vmatpush3.bf16.msra.mxu1 %v3286_v17 }
  0xdb   : > { %2303 = vmatmul.mubr.f32.gmra.mrb[70].mxu1 %v4286_v49  ;;  %3291 = vmatprep.subr.bf16.mxu1 %v3290_v38  ;;  %v3298_v49 = vpack.c.bf16 %v1503_v0, %v1502_v50  ;;  %v5373_v50 = vld [vmem:[#allocation29_spill] sm:$0xff] }
  0xdc   : > { %2038 = vmatmul.mubr.f32.gmra.mrb[6].mxu0 %v4588_v41  ;;  %2307 = vmatprep.mubr.f32.mxu1 %v4371_v32  ;;  %v1018_v0 = vld [vmem:[#allocation2 + $0x7a] sm:$0xff] }
  0xdd   : > { %2042 = vmatprep.mubr.f32.mxu0 %v4135_v47  ;;  %3241 = vmatpush1.bf16.msra.mxu0 %v4077_v16  ;;  %v1505_v47 = vld [vmem:[%s5249_s1 + $0x468] sm:$0xff]  ;;  %v4616_v16 = vld [vmem:[#allocation2 + $0x51] sm:$0xff] }
  0xde   : > { %3242 = vmatprep.subr.bf16.mxu0 %v5341_v53  ;;  %3293 = vmatpush3.bf16.msra.mxu1 %v3290_v38 }
  0xdf   : > { %2308 = vmatmul.mubr.f32.gmra.mrb[72].mxu1 %v4313_v61  ;;  %3295 = vmatprep.subr.bf16.mxu1 %v3294_v37  ;;  %v3302_v61 = vpack.c.bf16 %v1505_v47, %v1504_v11  ;;  %v1019_v11 = vld [vmem:[#allocation2 + $0x82] sm:$0xff]  ;;  %v5374_v47 = vld [vmem:[#allocation32_spill] sm:$0xff] }
  0xe0   : > { %2043 = vmatmul.mubr.f32.gmra.mrb[8].mxu0 %v4602_v4  ;;  %2312 = vmatprep.mubr.f32.mxu1 %v4388_v44 }
  0xe1   : > { %2047 = vmatprep.mubr.f32.mxu0 %v4157_v57  ;;  %3244 = vmatpush1.bf16.msra.mxu0 %v4102_v30  ;;  %v1507_v57 = vld [vmem:[%s5249_s1 + $0x478] sm:$0xff] }
  0xe2   : > { %3245 = vmatprep.subr.bf16.mxu0 %v5341_v53  ;;  %3297 = vmatpush3.bf16.msra.mxu1 %v3294_v37  ;;  %v3306_v30 = vpack.c.bf16 %v1507_v57, %v1506_v55 }
  0xe3   : > { %2313 = vmatmul.mubr.f32.gmra.mrb[74].mxu1 %v4340_v12  ;;  %3299 = vmatprep.subr.bf16.mxu1 %v3298_v49  ;;  %v5364_v12 = vld [vmem:[#allocation31_spill] sm:$0xff] }
  0xe4   : > { %2048 = vmatmul.mubr.f32.gmra.mrb[10].mxu0 %v4616_v16  ;;  %2317 = vmatprep.mubr.f32.mxu1 %v4401_v52 }
  0xe5   : > { %2052 = vmatprep.mubr.f32.mxu0 %v4181_v2  ;;  %3247 = vmatpush1.bf16.msra.mxu0 %v4124_v42  ;;  %v5342_v42 = vld [vmem:[#allocation4_spill] sm:$0xff]  ;;  %v5346_v2 = vld [vmem:[#allocation5_spill] sm:$0xff] }
  0xe6   : > { %3248 = vmatprep.subr.bf16.mxu0 %v5341_v53  ;;  %3301 = vmatpush3.bf16.msra.mxu1 %v3298_v49 }
  0xe7   : > { %2318 = vmatmul.mubr.f32.gmra.mrb[76].mxu1 %v4373_v36  ;;  %3303 = vmatprep.subr.bf16.mxu1 %v3302_v61  ;;  %v5366_v36 = vld [vmem:[#allocation34_spill] sm:$0xff] }
  0xe8   : > { %2053 = vmatmul.mubr.f32.gmra.mrb[12].mxu0 %v4159_v8  ;;  %2322 = vmatprep.mubr.f32.mxu1 %v4411_v60  ;;  %v5344_v8 = vld [vmem:[#allocation21_spill] sm:$0xff] }
  0xe9   : > { %2057 = vmatprep.mubr.f32.mxu0 %v4204_v13  ;;  %3250 = vmatpush1.bf16.msra.mxu0 %v4145_v54  ;;  %v5343_v54 = vld [vmem:[#allocation15_spill] sm:$0xff]  ;;  %v5349_v13 = vld [vmem:[#allocation9_spill] sm:$0xff] }
  0xea   : > { %3251 = vmatprep.subr.bf16.mxu0 %v5341_v53  ;;  %3305 = vmatpush3.bf16.msra.mxu1 %v3302_v61  ;;  %v1020_v61 = vld [vmem:[#allocation2 + $0x92] sm:$0xff] }
  0xeb   : > { %2323 = vmatmul.mubr.f32.gmra.mrb[78].mxu1 %v4390_v48  ;;  %3307 = vmatprep.subr.bf16.mxu1 %v3306_v30  ;;  %v978_v48 = vld [vmem:[#allocation2 + $0x199] sm:$0xff] }
  0xec   : > { %2058 = vmatmul.mubr.f32.gmra.mrb[14].mxu0 %v4183_v5  ;;  %2327 = vmatprep.mubr.f32.mxu1 %v4421_v6  ;;  %v5347_v5 = vld [vmem:[#allocation17_spill] sm:$0xff] }
  0xed   : > { %2062 = vmatprep.mubr.f32.mxu0 %v4230_v23  ;;  %3253 = vmatpush1.bf16.msra.mxu0 %v4169_v63  ;;  %v5345_v63 = vld [vmem:[#allocation8_spill] sm:$0xff]  ;;  %v5352_v23 = vld [vmem:[#allocation27_spill] sm:$0xff] }
  0xee   : > { %3254 = vmatprep.subr.bf16.mxu0 %v5341_v53  ;;  %3309 = vmatpush3.bf16.msra.mxu1 %v3306_v30  ;;  %v1021_v30 = vld [vmem:[#allocation2 + $0x9a] sm:$0xff] }
  0xef   : > { %2328 = vmatmul.mubr.f32.gmra.mrb[80].mxu1 %v4403_v45  ;;  %v5368_v45 = vld [vmem:[#allocation37_spill] sm:$0xff] }
  0xf0   : > { %2063 = vmatmul.mubr.f32.gmra.mrb[16].mxu0 %v4206_v14  ;;  %2332 = vmatprep.mubr.f32.mxu1 %v4431_v15  ;;  %v5350_v14 = vld [vmem:[#allocation6_spill] sm:$0xff] }
  0xf1   : > { %2067 = vmatprep.mubr.f32.mxu0 %v4256_v34  ;;  %3256 = vmatpush1.bf16.msra.mxu0 %v4193_v58  ;;  %v5348_v58 = vld [vmem:[#allocation24_spill] sm:$0xff]  ;;  %v5355_v34 = vld [vmem:[#allocation22_spill] sm:$0xff] }
  0xf2   : > { %3257 = vmatprep.subr.bf16.mxu0 %v5341_v53 }
  0xf3   : > { %2333 = vmatmul.mubr.f32.gmra.mrb[82].mxu1 %v4413_v62  ;;  %v5369_v62 = vld [vmem:[#allocation18_spill] sm:$0xff] }
  0xf4   : > { %2068 = vmatmul.mubr.f32.gmra.mrb[18].mxu0 %v4232_v24  ;;  %2337 = vmatprep.mubr.f32.mxu1 %v4441_v22  ;;  %v5353_v24 = vld [vmem:[#allocation10_spill] sm:$0xff] }
  0xf5   : > { %2072 = vmatprep.mubr.f32.mxu0 %v4282_v43  ;;  %3259 = vmatpush1.bf16.msra.mxu0 %v4218_v20  ;;  %v5351_v20 = vld [vmem:[#allocation19_spill] sm:$0xff]  ;;  %v5358_v43 = vld [vmem:[#allocation25_spill] sm:$0xff] }
  0xf6   : > { %3260 = vmatprep.subr.bf16.mxu0 %v5341_v53 }
  0xf7   : > { %2338 = vmatmul.mubr.f32.gmra.mrb[84].mxu1 %v4423_v7 }
  0xf8   : > { %2073 = vmatmul.mubr.f32.gmra.mrb[20].mxu0 %v4258_v35  ;;  %2342 = vmatprep.mubr.f32.mxu1 %v4451_v33  ;;  %v5356_v35 = vld [vmem:[#allocation30_spill] sm:$0xff] }
  0xf9   : > { %2077 = vmatprep.mubr.f32.mxu0 %v4309_v56  ;;  %3262 = vmatpush1.bf16.msra.mxu0 %v4244_v31  ;;  %v5354_v31 = vld [vmem:[#allocation7_spill] sm:$0xff]  ;;  %v5361_v56 = vld [vmem:[#allocation28_spill] sm:$0xff] }
  0xfa   : > { %3263 = vmatprep.subr.bf16.mxu0 %v5341_v53 }
  0xfb   : > { %2343 = vmatmul.mubr.f32.gmra.mrb[86].mxu1 %v4433_v18 }
  0xfc   : > { %2078 = vmatmul.mubr.f32.gmra.mrb[22].mxu0 %v4284_v46  ;;  %2347 = vmatprep.mubr.f32.mxu1 %v4461_v21  ;;  %v5359_v46 = vld [vmem:[#allocation33_spill] sm:$0xff] }
  0xfd   : > { %2082 = vmatprep.mubr.f32.mxu0 %v4336_v9  ;;  %3265 = vmatpush1.bf16.msra.mxu0 %v4270_v40  ;;  %v5357_v40 = vld [vmem:[#allocation11_spill] sm:$0xff]  ;;  %v5363_v9 = vld [vmem:[#allocation13_spill] sm:$0xff] }
  0xfe   : > { %3266 = vmatprep.subr.bf16.mxu0 %v5341_v53 }
  0xff   : > { %2348 = vmatmul.mubr.f32.gmra.mrb[88].mxu1 %v4443_v25 }
 0x100   : > { %2083 = vmatmul.mubr.f32.gmra.mrb[24].mxu0 %v4311_v59  ;;  %2352 = vmatprep.mubr.f32.mxu1 %v4471_v27  ;;  %v5362_v59 = vld [vmem:[#allocation36_spill] sm:$0xff] }
 0x101   : > { %2087 = vmatprep.mubr.f32.mxu0 %v4369_v29  ;;  %3268 = vmatpush1.bf16.msra.mxu0 %v5342_v42  ;;  %v5365_v29 = vld [vmem:[#allocation14_spill] sm:$0xff]  ;;  %v5375_v42 = vld [vmem:[#allocation35_spill] sm:$0xff] }
 0x102   : > { %3269 = vmatprep.subr.bf16.mxu0 %v5341_v53 }
 0x103   : > { %2353 = vmatmul.mubr.f32.gmra.mrb[90].mxu1 %v5343_v54  ;;  %v1022_v54 = vld [vmem:[#allocation2 + $0xaa] sm:$0xff] }
 0x104   : > { %2088 = vmatmul.mubr.f32.gmra.mrb[26].mxu0 %v4338_v10  ;;  %2357 = vmatprep.mubr.f32.mxu1 %v5344_v8  ;;  %v4703_v10 = vld [vmem:[#allocation2 + $0x181] sm:$0xff] }
 0x105   : > { %2092 = vmatprep.mubr.f32.mxu0 %v5345_v63  ;;  %3271 = vmatpush1.bf16.msra.mxu0 %v5346_v2  ;;  %v1023_v2 = vld [vmem:[#allocation2 + $0xb2] sm:$0xff] }
 0x106   : > { %3272 = vmatprep.subr.bf16.mxu0 %v5341_v53 }
 0x107   : > { %2358 = vmatmul.mubr.f32.gmra.mrb[92].mxu1 %v5347_v5  ;;  %v5376_v5 = vld [vmem:[#allocation38_spill] sm:$0xff] }
 0x108   : > { %2093 = vmatmul.mubr.f32.gmra.mrb[28].mxu0 %v4371_v32  ;;  %2362 = vmatprep.mubr.f32.mxu1 %v5348_v58  ;;  %v4709_v32 = vld [vmem:[#allocation2 + $0x189] sm:$0xff] }
 0x109   : > { %2097 = vmatprep.mubr.f32.mxu0 %v5349_v13  ;;  %3274 = vmatpush1.bf16.msra.mxu0 %v5350_v14  ;;  %v4750_v13 = vld [vmem:[#allocation2 + $0x182] sm:$0xff] }
 0x10a   : > { %3275 = vmatprep.subr.bf16.mxu0 %v5341_v53  ;;  %v5360_v53 = vld [vmem:[#allocation12_spill] sm:$0xff] }
 0x10b   : > { %2363 = vmatmul.mubr.f32.gmra.mrb[94].mxu1 %v5351_v20 }
 0x10c   : > { %2098 = vmatmul.mubr.f32.gmra.mrb[30].mxu0 %v4388_v44  ;;  %2367 = vmatprep.mubr.f32.mxu1 %v5352_v23  ;;  %v5367_v44 = vld [vmem:[#allocation16_spill] sm:$0xff] }
 0x10d   : > { %2102 = vmatprep.mubr.f32.mxu0 %v5353_v24  ;;  %3277 = vmatpush1.bf16.msra.mxu0 %v5354_v31  ;;  %v1026_v24 = vld [vmem:[#allocation2 + $0xda] sm:$0xff]  ;;  %v4756_v31 = vld [vmem:[#allocation2 + $0x18a] sm:$0xff] }
 0x10f   : > { %2368 = vmatmul.mubr.f32.gmra.mrb[96].mxu1 %v5355_v34 }
 0x110   : > { %2103 = vmatmul.mubr.f32.gmra.mrb[32].mxu0 %v4401_v52  ;;  %2372 = vmatprep.mubr.f32.mxu1 %v5356_v35 }
 0x111   : > { %2107 = vmatprep.mubr.f32.mxu0 %v5357_v40  ;;  %v1027_v40 = vld [vmem:[#allocation2 + $0xe2] sm:$0xff] }
 0x113   : > { %2373 = vmatmul.mubr.f32.gmra.mrb[98].mxu1 %v5358_v43  ;;  %v1028_v43 = vld [vmem:[#allocation2 + $0xf2] sm:$0xff] }
 0x114   : > { %2108 = vmatmul.mubr.f32.gmra.mrb[34].mxu0 %v4411_v60  ;;  %2377 = vmatprep.mubr.f32.mxu1 %v5359_v46 }
 0x115   : > { %2112 = vmatprep.mubr.f32.mxu0 %v5360_v53 }
 0x117   : > { %2378 = vmatmul.mubr.f32.gmra.mrb[100].mxu1 %v5361_v56  ;;  %v1029_v56 = vld [vmem:[#allocation2 + $0xfa] sm:$0xff] }
 0x118   : > { %2113 = vmatmul.mubr.f32.gmra.mrb[36].mxu0 %v4421_v6  ;;  %2382 = vmatprep.mubr.f32.mxu1 %v5362_v59  ;;  %v979_v6 = vld [vmem:[#allocation2 + $0x1a1] sm:$0xff] }
 0x119   : > { %2117 = vmatprep.mubr.f32.mxu0 %v5363_v9  ;;  %v1030_v9 = vld [vmem:[#allocation2 + $0x10a] sm:$0xff] }
 0x11b   : > { %2383 = vmatmul.mubr.f32.gmra.mrb[102].mxu1 %v5364_v12 }
 0x11c   : > { %2118 = vmatmul.mubr.f32.gmra.mrb[38].mxu0 %v4431_v15  ;;  %2387 = vmatprep.mubr.f32.mxu1 %v4703_v10  ;;  %v3488_v15 = vld [vmem:[#allocation2] sm:$0xff] }
 0x11d   : > { %2122 = vmatprep.mubr.f32.mxu0 %v5365_v29  ;;  %v1031_v29 = vld [vmem:[#allocation2 + $0x112] sm:$0xff] }
 0x11f   : > { %2388 = vmatmul.mubr.f32.gmra.mrb[104].mxu1 %v5366_v36  ;;  %v885_v36 = vld [vmem:[#allocation2 + $0x38] sm:$0xff] }
 0x120   : > { %2123 = vmatmul.mubr.f32.gmra.mrb[40].mxu0 %v4441_v22  ;;  %2392 = vmatprep.mubr.f32.mxu1 %v4709_v32  ;;  %v5370_v22 = vld [vmem:[#allocation20_spill] sm:$0xff] }
 0x121   : > { %2127 = vmatprep.mubr.f32.mxu0 %v5367_v44 }
 0x122   : > { %v4715_v52 = vpop.f32.mrb[0].mxu1 }
 0x123   : > { %2393 = vmatmul.mubr.f32.gmra.mrb[106].mxu1 %v5368_v45  ;;  %v1576_v60 = vpop.f32.mrb[1].mxu1 }
 0x124   : > { %2128 = vmatmul.mubr.f32.gmra.mrb[42].mxu0 %v4451_v33  ;;  %2397 = vmatprep.mubr.f32.mxu1 %v978_v48  ;;  %v5371_v33 = vld [vmem:[#allocation23_spill] sm:$0xff] }
 0x125   : > { %2132 = vmatprep.mubr.f32.mxu0 %v5369_v62  ;;  %v952_v60 = vld [vmem:[#allocation2 + $0x61] sm:$0xff] }
 0x126   : > { %v4720_v7 = vpop.f32.mrb[2].mxu1 }
 0x127   : > { %2398 = vmatmul.mubr.f32.gmra.mrb[108].mxu1 %v3488_v15  ;;  %v1581_v18 = vpop.f32.mrb[3].mxu1 }
 0x128   : > { %2133 = vmatmul.mubr.f32.gmra.mrb[44].mxu0 %v4461_v21  ;;  %2402 = vmatprep.mubr.f32.mxu1 %v979_v6  ;;  %v1015_v21 = vld [vmem:[#allocation2 + $0x52] sm:$0xff] }
 0x129   : > { %2137 = vmatprep.mubr.f32.mxu0 %v5370_v22 }
 0x12a   : > { %v4724_v25 = vpop.f32.mrb[4].mxu1 }
 0x12b   : > { %2403 = vmatmul.mubr.f32.gmra.mrb[110].mxu1 %v3488_v15  ;;  %v1586_v17 = vpop.f32.mrb[5].mxu1  ;;  %v953_v15 = vld [vmem:[#allocation2 + $0x69] sm:$0xff] }
 0x12c   : > { %2138 = vmatmul.mubr.f32.gmra.mrb[46].mxu0 %v4471_v27  ;;  %3038 = vmatprep.mubr.f32.mxu1 %v4559_v3  ;;  %v1017_v3 = vld [vmem:[#allocation2 + $0x6a] sm:$0xff]  ;;  %v954_v17 = vld [vmem:[#allocation2 + $0x79] sm:$0xff] }
 0x12d   : > { %2142 = vmatprep.mubr.f32.mxu0 %v5371_v33 }
 0x12e   : > { %v4729_v28 = vpop.f32.mrb[6].mxu1 }
 0x12f   : > { %3039 = vmatmul.mubr.f32.vlgmr.msra.gmra.mrb[112].mxu1 %v4575_v26  ;;  %v1591_v38 = vpop.f32.mrb[7].mxu1 }
 0x130   : > { %2143 = vmatmul.mubr.f32.gmra.mrb[48].mxu0 %v5344_v8  ;;  %3041 = vmatprep.mubr.f32.mxu1 %v1014_v19  ;;  %v890_v38 = vld [vmem:[#allocation2 + $0x78] sm:$0xff] }
 0x131   : > { %2147 = vmatprep.mubr.f32.mxu0 %v5372_v39 }
 0x132   : > { %v4734_v37 = vpop.f32.mrb[8].mxu1 }
 0x133   : > { %3042 = vmatmul.mubr.f32.gmra.mrb[114].mxu1 %v1015_v21  ;;  %v1596_v27 = vpop.f32.mrb[9].mxu1  ;;  %v1042_v21 = vld [vmem:[#allocation2 + $0x19a] sm:$0xff] }
 0x134   : > { %2148 = vmatmul.mubr.f32.gmra.mrb[50].mxu0 %v5348_v58  ;;  %3044 = vmatprep.mubr.f32.mxu1 %v1016_v51  ;;  %v1024_v58 = vld [vmem:[#allocation2 + $0xc2] sm:$0xff] }
 0x135   : > { %2152 = vmatprep.mubr.f32.mxu0 %v5373_v50 }
 0x136   : > { %v4738_v26 = vpop.f32.mrb[10].mxu1 }
 0x137   : > { %3045 = vmatmul.mubr.f32.gmra.mrb[116].mxu1 %v1017_v3  ;;  %v1601_v49 = vpop.f32.mrb[11].mxu1  ;;  %v1043_v3 = vld [vmem:[#allocation2 + $0x1a2] sm:$0xff] }
 0x138   : > { %2153 = vmatmul.mubr.f32.gmra.mrb[52].mxu0 %v5352_v23  ;;  %3047 = vmatprep.mubr.f32.mxu1 %v1018_v0  ;;  %v1025_v23 = vld [vmem:[#allocation2 + $0xca] sm:$0xff] }
 0x139   : > { %2157 = vmatprep.mubr.f32.mxu0 %v5374_v47 }
 0x13a   : > { %v4742_v55 = vpop.f32.mrb[12].mxu1 }
 0x13b   : > { %3048 = vmatmul.mubr.f32.gmra.mrb[118].mxu1 %v1019_v11  ;;  %v1606_v57 = vpop.f32.mrb[13].mxu1 }
 0x13c   : > { %2158 = vmatmul.mubr.f32.gmra.mrb[54].mxu0 %v5356_v35  ;;  %3050 = vmatprep.mubr.f32.mxu1 %v1020_v61 }
 0x13d   : > { %2162 = vmatprep.mubr.f32.mxu0 %v5375_v42 }
 0x13e   : > { %v4746_v8 = vpop.f32.mrb[14].mxu1 }
 0x13f   : > { %3051 = vmatmul.mubr.f32.gmra.mrb[120].mxu1 %v1021_v30  ;;  %v1611_v63 = vpop.f32.mrb[15].mxu1 }
 0x140   : > { %2163 = vmatmul.mubr.f32.gmra.mrb[56].mxu0 %v5359_v46  ;;  %3053 = vmatprep.mubr.f32.mxu1 %v1022_v54 }
 0x141   : > { %2167 = vmatprep.mubr.f32.mxu0 %v5376_v5 }
 0x142   : > { %v4752_v14 = vpop.f32.mrb[16].mxu1 }
 0x143   : > { %3054 = vmatmul.mubr.f32.gmra.mrb[122].mxu1 %v1023_v2  ;;  %v1616_v20 = vpop.f32.mrb[17].mxu1 }
 0x144   : > { %2168 = vmatmul.mubr.f32.gmra.mrb[58].mxu0 %v5362_v59  ;;  %3056 = vmatprep.mubr.f32.mxu1 %v1024_v58  ;;  %v884_v59 = vld [vmem:[#allocation2 + $0x30] sm:$0xff] }
 0x145   : > { %2172 = vmatprep.mubr.f32.mxu0 %v4750_v13 }
 0x146   : > { %v4758_v34 = vpop.f32.mrb[18].mxu1 }
 0x147   : > { %3057 = vmatmul.mubr.f32.gmra.mrb[124].mxu1 %v1025_v23  ;;  %v1621_v35 = vpop.f32.mrb[19].mxu1 }
 0x148   : > { %2173 = vmatmul.mubr.f32.gmra.mrb[60].mxu0 %v4703_v10  ;;  %3059 = vmatprep.mubr.f32.mxu1 %v1026_v24 }
 0x149   : > { %2177 = vmatprep.mubr.f32.mxu0 %v4756_v31 }
 0x14a   : > { %v4762_v46 = vpop.f32.mrb[20].mxu1 }
 0x14b   : > { %3060 = vmatmul.mubr.f32.gmra.mrb[126].mxu1 %v1027_v40  ;;  %v1626_v53 = vpop.f32.mrb[21].mxu1 }
 0x14c   : > { %2178 = vmatmul.mubr.f32.gmra.mrb[62].mxu0 %v4709_v32  ;;  %3062 = vmatprep.mubr.f32.mxu1 %v1028_v43 }
 0x14d   : > { %2247 = vmatprep.mubr.f32.mxu0 %v4572_v1  ;;  %v886_v1 = vld [vmem:[#allocation2 + $0x48] sm:$0xff] }
 0x14e   : > { %v4766_v12 = vpop.f32.mrb[22].mxu1 }
 0x14f   : > { %3063 = vmatmul.mubr.f32.gmra.mrb[128].mxu1 %v1029_v56  ;;  %v1631_v10 = vpop.f32.mrb[23].mxu1 }
 0x150   : > { %2248 = vmatmul.mubr.f32.vlgmr.msra.gmra.mrb[0].mxu0 %v884_v59  ;;  %3065 = vmatprep.mubr.f32.mxu1 %v1030_v9 }
 0x151   : > { %2252 = vmatprep.mubr.f32.mxu0 %v4588_v41  ;;  %v887_v41 = vld [vmem:[#allocation2 + $0x50] sm:$0xff] }
 0x152   : > { %v4769_v44 = vpop.f32.mrb[24].mxu1 }
 0x153   : > { %3066 = vmatmul.mubr.f32.gmra.mrb[130].mxu1 %v1031_v29  ;;  %v1636_v32 = vpop.f32.mrb[25].mxu1 }
 0x154   : > { %2253 = vmatmul.mubr.f32.gmra.mrb[2].mxu0 %v885_v36  ;;  %3068 = vmatprep.mubr.f32.mxu1 %v5369_v62 }
 0x155   : > { %2257 = vmatprep.mubr.f32.mxu0 %v4602_v4  ;;  %v888_v4 = vld [vmem:[#allocation2 + $0x60] sm:$0xff] }
 0x156   : > { %v4773_v48 = vpop.f32.mrb[26].mxu1 }
 0x157   : > { %3069 = vmatmul.mubr.f32.gmra.mrb[132].mxu1 %v5370_v22  ;;  %v1641_v45 = vpop.f32.mrb[27].mxu1 }
 0x158   : > { %2258 = vmatmul.mubr.f32.gmra.mrb[4].mxu0 %v886_v1  ;;  %3071 = vmatprep.mubr.f32.mxu1 %v5371_v33 }
 0x159   : > { %2262 = vmatprep.mubr.f32.mxu0 %v4616_v16  ;;  %v889_v16 = vld [vmem:[#allocation2 + $0x68] sm:$0xff] }
 0x15a   : > { %v4778_v6 = vpop.f32.mrb[28].mxu1 }
 0x15b   : > { %3072 = vmatmul.mubr.f32.gmra.mrb[134].mxu1 %v5372_v39  ;;  %v1646_v62 = vpop.f32.mrb[29].mxu1  ;;  %v955_v39 = vld [vmem:[#allocation2 + $0x81] sm:$0xff] }
 0x15c   : > { %2263 = vmatmul.mubr.f32.gmra.mrb[6].mxu0 %v887_v41  ;;  %3074 = vmatprep.mubr.f32.mxu1 %v5373_v50  ;;  %v891_v50 = vld [vmem:[#allocation2 + $0x80] sm:$0xff] }
 0x15d   : > { %2267 = vmatprep.mubr.f32.mxu0 %v952_v60 }
 0x15e   : > { %v4782_v18 = vpop.f32.mrb[30].mxu1 }
 0x15f   : > { %3075 = vmatmul.mubr.f32.gmra.mrb[136].mxu1 %v5374_v47  ;;  %v1651_v22 = vpop.f32.mrb[31].mxu1 }
 0x160   : > { %2268 = vmatmul.mubr.f32.gmra.mrb[8].mxu0 %v888_v4  ;;  %3077 = vmatprep.mubr.f32.mxu1 %v5375_v42 }
 0x161   : > { %2272 = vmatprep.mubr.f32.mxu0 %v953_v15 }
 0x162   : > { %v4786_v33 = vpop.f32.mrb[32].mxu1 }
 0x163   : > { %3078 = vmatmul.mubr.f32.gmra.mrb[138].mxu1 %v5376_v5  ;;  %v1656_v19 = vpop.f32.mrb[33].mxu1 }
 0x164   : > { %2273 = vmatmul.mubr.f32.gmra.mrb[10].mxu0 %v889_v16  ;;  %3080 = vmatprep.mubr.f32.mxu1 %v4750_v13 }
 0x165   : > { %2277 = vmatprep.mubr.f32.mxu0 %v954_v17 }
 0x166   : > { %v4790_v51 = vpop.f32.mrb[34].mxu1 }
 0x167   : > { %3081 = vmatmul.mubr.f32.gmra.mrb[140].mxu1 %v4756_v31  ;;  %v1661_v27 = vpop.f32.mrb[35].mxu1 }
 0x168   : > { %2278 = vmatmul.mubr.f32.gmra.mrb[12].mxu0 %v890_v38  ;;  %3083 = vmatprep.mubr.f32.mxu1 %v1042_v21 }
 0x169   : > { %2282 = vmatprep.mubr.f32.mxu0 %v955_v39 }
 0x16a   : > { %v4793_v0 = vpop.f32.mrb[36].mxu1 }
 0x16b   : > { %3084 = vmatmul.mubr.f32.gmra.mrb[142].mxu1 %v1043_v3  ;;  %v1666_v49 = vpop.f32.mrb[37].mxu1 }
 0x16c   : > { %2283 = vmatmul.mubr.f32.gmra.mrb[14].mxu0 %v891_v50 }
 0x16e   : > { %v4795_v11 = vpop.f32.mrb[38].mxu1 }
 0x16f   : > { %v1671_v47 = vpop.f32.mrb[39].mxu1 }
 0x172   : > { %v4797_v61 = vpop.f32.mrb[40].mxu1 }
 0x173   : > { %v1676_v57 = vpop.f32.mrb[41].mxu1 }
 0x176   : > { %v4799_v30 = vpop.f32.mrb[42].mxu1 }
 0x177   : > { %v1681_v42 = vpop.f32.mrb[43].mxu1 }
 0x17a   : > { %v4801_v54 = vpop.f32.mrb[44].mxu1 }
 0x17b   : > { %v1686_v63 = vpop.f32.mrb[45].mxu1 }
 0x17e   : > { %v4803_v2 = vpop.f32.mrb[46].mxu1 }
 0x17f   : > { %v1691_v5 = vpop.f32.mrb[47].mxu1 }
 0x182   : > { %v4805_v58 = vpop.f32.mrb[48].mxu1 }
 0x183   : > { %v1696_v13 = vpop.f32.mrb[49].mxu1 }
 0x186   : > { %v4807_v20 = vpop.f32.mrb[50].mxu1 }
 0x187   : > { %v1701_v23 = vpop.f32.mrb[51].mxu1 }
 0x18a   : > { %v4809_v24 = vpop.f32.mrb[52].mxu1 }
 0x18b   : > { %v1706_v31 = vpop.f32.mrb[53].mxu1 }
 0x18e   : > { %v4811_v35 = vpop.f32.mrb[54].mxu1 }
 0x18f   : > { %v1711_v40 = vpop.f32.mrb[55].mxu1 }
 0x192   : > { %v4813_v43 = vpop.f32.mrb[56].mxu1 }
 0x193   : > { %v1716_v53 = vpop.f32.mrb[57].mxu1 }
 0x196   : > { %v4815_v56 = vpop.f32.mrb[58].mxu1 }
 0x197   : > { %v1721_v59 = vpop.f32.mrb[59].mxu1 }
 0x19a   : > { %v4817_v9 = vpop.f32.mrb[60].mxu1 }
 0x19b   : > { %v1726_v10 = vpop.f32.mrb[61].mxu1 }
 0x19e   : > { %v4819_v29 = vpop.f32.mrb[62].mxu1 }
 0x19f   : > { %v1731_v36 = vpop.f32.mrb[63].mxu1 }
 0x1a2   : > { %v2289_v32 = vpop.f32.mrb[64].mxu1 }
 0x1a3   : > { %v2291_v1 = vpop.f32.mrb[65].mxu1 }
 0x1a6   : > { %v2294_v45 = vpop.f32.mrb[66].mxu1 }
 0x1a7   : > { %v2296_v41 = vpop.f32.mrb[67].mxu1 }
 0x1aa   : > { %v2299_v60 = vpop.f32.mrb[68].mxu1 }
 0x1ab   : > { %v2301_v62 = vpop.f32.mrb[69].mxu1 }
 0x1ae   : > { %v2304_v4 = vpop.f32.mrb[70].mxu1 }
 0x1af   : > { %v2306_v15 = vpop.f32.mrb[71].mxu1 }
 0x1b2   : > { %v2309_v22 = vpop.f32.mrb[72].mxu1 }
 0x1b3   : > { %v2311_v16 = vpop.f32.mrb[73].mxu1 }
 0x1b6   : > { %v2314_v17 = vpop.f32.mrb[74].mxu1 }
 0x1b7   : > { %v2316_v19 = vpop.f32.mrb[75].mxu1 }
 0x1ba   : > { %v2319_v38 = vpop.f32.mrb[76].mxu1 }
 0x1bb   : > { %v2321_v21 = vpop.f32.mrb[77].mxu1 }
 0x1be   : > { %v2324_v39 = vpop.f32.mrb[78].mxu1 }
 0x1bf   : > { %v2326_v27 = vpop.f32.mrb[79].mxu1 }
 0x1c2   : > { %v2329_v3 = vpop.f32.mrb[80].mxu1 }
 0x1c3   : > { %v2064_v50 = vpop.f32.mrb[16].mxu0  ;;  %v2331_v49 = vpop.f32.mrb[81].mxu1 }
 0x1c4   : > { %v3350_v47 = vadd.f32 %v2064_v50, %v4752_v14  ;;  %v2066_v57 = vpop.f32.mrb[17].mxu0 }
 0x1c6   : > { %v4822_v42 = vadd.f32 %v3350_v47, %v2289_v32  ;;  %v2334_v63 = vpop.f32.mrb[82].mxu1 }
 0x1c7   : > { %v2069_v5 = vpop.f32.mrb[18].mxu0  ;;  %v2336_v13 = vpop.f32.mrb[83].mxu1 }
 0x1c8   : > { %v3352_v23 = vadd.f32 %v2069_v5, %v4758_v34  ;;  %v2071_v31 = vpop.f32.mrb[19].mxu0 }
 0x1ca   : > { %v4825_v40 = vadd.f32 %v3352_v23, %v2294_v45  ;;  %v2339_v53 = vpop.f32.mrb[84].mxu1 }
 0x1cb   : > { %v2074_v59 = vpop.f32.mrb[20].mxu0  ;;  %v2341_v10 = vpop.f32.mrb[85].mxu1 }
 0x1cc   : > { %v3354_v36 = vadd.f32 %v2074_v59, %v4762_v46  ;;  %v2076_v1 = vpop.f32.mrb[21].mxu0 }
 0x1ce   : > { %v4828_v41 = vadd.f32 %v3354_v36, %v2299_v60  ;;  %v2344_v14 = vpop.f32.mrb[86].mxu1 }
 0x1cf   : > { %v2079_v62 = vpop.f32.mrb[22].mxu0  ;;  %v2346_v32 = vpop.f32.mrb[87].mxu1 }
 0x1d0   : > { %v3356_v15 = vadd.f32 %v2079_v62, %v4766_v12  ;;  %v2081_v16 = vpop.f32.mrb[23].mxu0 }
 0x1d2   : > { %v4831_v19 = vadd.f32 %v3356_v15, %v2304_v4  ;;  %v2349_v34 = vpop.f32.mrb[88].mxu1 }
 0x1d3   : > { %v2084_v21 = vpop.f32.mrb[24].mxu0  ;;  %v2351_v45 = vpop.f32.mrb[89].mxu1 }
 0x1d4   : > { %v3358_v27 = vadd.f32 %v2084_v21, %v4769_v44  ;;  %v2086_v50 = vpop.f32.mrb[25].mxu0 }
 0x1d6   : > { %v4834_v49 = vadd.f32 %v3358_v27, %v2309_v22  ;;  %v2354_v46 = vpop.f32.mrb[90].mxu1 }
 0x1d7   : > { %v2089_v47 = vpop.f32.mrb[26].mxu0  ;;  %v2356_v60 = vpop.f32.mrb[91].mxu1 }
 0x1d8   : > { %v3360_v57 = vadd.f32 %v2089_v47, %v4773_v48  ;;  %v2091_v5 = vpop.f32.mrb[27].mxu0 }
 0x1da   : > { %v4837_v13 = vadd.f32 %v3360_v57, %v2314_v17  ;;  %v2359_v12 = vpop.f32.mrb[92].mxu1 }
 0x1db   : > { %v2094_v23 = vpop.f32.mrb[28].mxu0  ;;  %v2361_v4 = vpop.f32.mrb[93].mxu1 }
 0x1dc   : > { %v3362_v31 = vadd.f32 %v2094_v23, %v4778_v6  ;;  %v2096_v59 = vpop.f32.mrb[29].mxu0 }
 0x1de   : > { %v4840_v10 = vadd.f32 %v3362_v31, %v2319_v38  ;;  %v2364_v44 = vpop.f32.mrb[94].mxu1 }
 0x1df   : > { %v2099_v36 = vpop.f32.mrb[30].mxu0  ;;  %v2366_v22 = vpop.f32.mrb[95].mxu1 }
 0x1e0   : > { %v3364_v1 = vadd.f32 %v2099_v36, %v4782_v18  ;;  %v2101_v62 = vpop.f32.mrb[31].mxu0 }
 0x1e2   : > { %v4843_v32 = vadd.f32 %v3364_v1, %v2324_v39  ;;  %v2369_v48 = vpop.f32.mrb[96].mxu1 }
 0x1e3   : > { %v2104_v15 = vpop.f32.mrb[32].mxu0  ;;  %v2371_v17 = vpop.f32.mrb[97].mxu1 }
 0x1e4   : > { %v3366_v16 = vadd.f32 %v2104_v15, %v4786_v33  ;;  %v2106_v21 = vpop.f32.mrb[33].mxu0 }
 0x1e6   : > { %v4846_v45 = vadd.f32 %v3366_v16, %v2329_v3  ;;  %v2374_v6 = vpop.f32.mrb[98].mxu1 }
 0x1e7   : > { %v2109_v27 = vpop.f32.mrb[34].mxu0  ;;  %v2376_v38 = vpop.f32.mrb[99].mxu1 }
 0x1e8   : > { %v3368_v50 = vadd.f32 %v2109_v27, %v4790_v51  ;;  %v2111_v47 = vpop.f32.mrb[35].mxu0 }
 0x1ea   : > { %v4849_v60 = vadd.f32 %v3368_v50, %v2334_v63  ;;  %v2379_v18 = vpop.f32.mrb[100].mxu1 }
 0x1eb   : > { %v2114_v57 = vpop.f32.mrb[36].mxu0  ;;  %v2381_v39 = vpop.f32.mrb[101].mxu1 }
 0x1ec   : > { %v3370_v5 = vadd.f32 %v2114_v57, %v4793_v0  ;;  %v2116_v23 = vpop.f32.mrb[37].mxu0 }
 0x1ee   : > { %v4852_v4 = vadd.f32 %v3370_v5, %v2339_v53  ;;  %v2384_v33 = vpop.f32.mrb[102].mxu1 }
 0x1ef   : > { %v2119_v31 = vpop.f32.mrb[38].mxu0  ;;  %v2386_v3 = vpop.f32.mrb[103].mxu1 }
 0x1f0   : > { %v3372_v59 = vadd.f32 %v2119_v31, %v4795_v11  ;;  %v2121_v36 = vpop.f32.mrb[39].mxu0 }
 0x1f2   : > { %v4855_v22 = vadd.f32 %v3372_v59, %v2344_v14  ;;  %v2389_v51 = vpop.f32.mrb[104].mxu1 }
 0x1f3   : > { %v2124_v1 = vpop.f32.mrb[40].mxu0  ;;  %v2391_v63 = vpop.f32.mrb[105].mxu1 }
 0x1f4   : > { %v3374_v62 = vadd.f32 %v2124_v1, %v4797_v61  ;;  %v2126_v15 = vpop.f32.mrb[41].mxu0 }
 0x1f6   : > { %v4858_v17 = vadd.f32 %v3374_v62, %v2349_v34  ;;  %v4860_v0 = vpop.f32.mrb[106].mxu1 }
 0x1f7   : > { %v2129_v53 = vpop.f32.mrb[42].mxu0  ;;  %v2396_v16 = vpop.f32.mrb[107].mxu1 }
 0x1f8   : > { %v3376_v21 = vadd.f32 %v2129_v53, %v4799_v30  ;;  %v2131_v27 = vpop.f32.mrb[43].mxu0 }
 0x1fa   : > { %v4863_v38 = vpop.f32.mrb[108].mxu1  ;;  %v4865_v11 = vadd.f32 %v3376_v21, %v2354_v46 }
 0x1fb   : > { %v2134_v14 = vpop.f32.mrb[44].mxu0  ;;  %v2401_v50 = vpop.f32.mrb[109].mxu1 }
 0x1fc   : > { %v3378_v47 = vadd.f32 %v2134_v14, %v4801_v54  ;;  %v2136_v57 = vpop.f32.mrb[45].mxu0 }
 0x1fe   : > { %v4868_v61 = vpop.f32.mrb[110].mxu1  ;;  %v4870_v34 = vadd.f32 %v3378_v47, %v2359_v12 }
 0x1ff   : > { %v2139_v39 = vpop.f32.mrb[46].mxu0  ;;  %v2406_v5 = vpop.f32.mrb[111].mxu1 }
 0x200   : > { %v3380_v23 = vadd.f32 %v2139_v39, %v4803_v2  ;;  %v2141_v31 = vpop.f32.mrb[47].mxu0 }
 0x202   : > { %v4873_v30 = vpop.f32.mrb[112].mxu1  ;;  %v4875_v3 = vadd.f32 %v3380_v23, %v2364_v44 }
 0x203   : > { %v2144_v46 = vpop.f32.mrb[48].mxu0  ;;  %v4877_v59 = vpop.f32.mrb[113].mxu1 }
 0x204   : > { %v3382_v36 = vadd.f32 %v2144_v46, %v4805_v58  ;;  %v2146_v54 = vpop.f32.mrb[49].mxu0 }
 0x206   : > { %v4880_v1 = vpop.f32.mrb[114].mxu1  ;;  %v4882_v63 = vadd.f32 %v3382_v36, %v2369_v48 }
 0x207   : > { %v2149_v12 = vpop.f32.mrb[50].mxu0  ;;  %v4884_v62 = vpop.f32.mrb[115].mxu1 }
 0x208   : > { %v3384_v2 = vadd.f32 %v2149_v12, %v4807_v20  ;;  %v2151_v15 = vpop.f32.mrb[51].mxu0 }
 0x20a   : > { %v4887_v53 = vpop.f32.mrb[116].mxu1  ;;  %v4889_v44 = vadd.f32 %v3384_v2, %v2374_v6 }
 0x20b   : > { %v2154_v16 = vpop.f32.mrb[52].mxu0  ;;  %v4891_v21 = vpop.f32.mrb[117].mxu1 }
 0x20c   : > { %v3386_v58 = vadd.f32 %v2154_v16, %v4809_v24  ;;  %v2156_v27 = vpop.f32.mrb[53].mxu0 }
 0x20e   : > { %v4894_v14 = vpop.f32.mrb[118].mxu1  ;;  %v4896_v48 = vadd.f32 %v3386_v58, %v2379_v18 }
 0x20f   : > { %v2159_v50 = vpop.f32.mrb[54].mxu0  ;;  %v4898_v47 = vpop.f32.mrb[119].mxu1 }
 0x210   : > { %v3388_v20 = vadd.f32 %v2159_v50, %v4811_v35  ;;  %v2161_v57 = vpop.f32.mrb[55].mxu0 }
 0x212   : > { %v3052_v24 = vpop.f32.mrb[120].mxu1  ;;  %v4908_v6 = vadd.f32 %v3388_v20, %v2384_v33 }
 0x213   : > { %v2164_v39 = vpop.f32.mrb[56].mxu0  ;;  %v4911_v18 = vadd.f32 %v4825_v40, %v3052_v24  ;;  %v2514_v5 = vpop.f32.mrb[121].mxu1 }
 0x214   : > { %v3390_v35 = vadd.f32 %v2164_v39, %v4813_v43  ;;  %v2166_v23 = vpop.f32.mrb[57].mxu0  ;;  %v4915_v31 = vadd.f32 %v4822_v42, %v2514_v5 }
 0x215   : > { %2815 = vst.msk [vmem:[%s4906_s7 + $0x48] sm:$0xff] %vm466_vm0, %v4911_v18 }
 0x216   : > { %2814 = vst.msk [vmem:[%s4906_s7 + $0x40] sm:$0xff] %vm466_vm0, %v4915_v31  ;;  %v3055_v33 = vpop.f32.mrb[122].mxu1  ;;  %v4923_v46 = vadd.f32 %v3390_v35, %v2389_v51 }
 0x217   : > { %v2169_v36 = vpop.f32.mrb[58].mxu0  ;;  %v4926_v40 = vadd.f32 %v4831_v19, %v3055_v33  ;;  %v2524_v43 = vpop.f32.mrb[123].mxu1 }
 0x218   : > { %v3392_v54 = vadd.f32 %v2169_v36, %v4815_v56  ;;  %v2171_v42 = vpop.f32.mrb[59].mxu0  ;;  %v4930_v12 = vadd.f32 %v4828_v41, %v2524_v43 }
 0x219   : > { %2817 = vst.msk [vmem:[%s4906_s7 + $0x58] sm:$0xff] %vm466_vm0, %v4926_v40 }
 0x21a   : > { %2816 = vst.msk [vmem:[%s4906_s7 + $0x50] sm:$0xff] %vm466_vm0, %v4930_v12  ;;  %v3058_v51 = vpop.f32.mrb[124].mxu1  ;;  %v4939_v2 = vadd.f32 %v3392_v54, %v4860_v0 }
 0x21b   : > { %v2174_v19 = vpop.f32.mrb[60].mxu0  ;;  %v4942_v15 = vadd.f32 %v4837_v13, %v3058_v51  ;;  %v2534_v56 = vpop.f32.mrb[125].mxu1 }
 0x21c   : > { %v3394_v41 = vadd.f32 %v2174_v19, %v4817_v9  ;;  %v2176_v16 = vpop.f32.mrb[61].mxu0  ;;  %v4946_v58 = vadd.f32 %v4834_v49, %v2534_v56 }
 0x21d   : > { %2819 = vst.msk [vmem:[%s4906_s7 + $0x68] sm:$0xff] %vm466_vm0, %v4942_v15 }
 0x21e   : > { %2818 = vst.msk [vmem:[%s4906_s7 + $0x60] sm:$0xff] %vm466_vm0, %v4946_v58  ;;  %v3061_v0 = vpop.f32.mrb[126].mxu1  ;;  %v4955_v27 = vadd.f32 %v3394_v41, %v4863_v38 }
 0x21f   : > { %v2179_v13 = vpop.f32.mrb[62].mxu0  ;;  %v4958_v50 = vadd.f32 %v4843_v32, %v3061_v0  ;;  %v2544_v9 = vpop.f32.mrb[127].mxu1 }
 0x220   : > { %v3396_v49 = vadd.f32 %v2179_v13, %v4819_v29  ;;  %v2181_v20 = vpop.f32.mrb[63].mxu0  ;;  %v4962_v57 = vadd.f32 %v4840_v10, %v2544_v9 }
 0x221   : > { %2821 = vst.msk [vmem:[%s4906_s7 + $0x78] sm:$0xff] %vm466_vm0, %v4958_v50 }
 0x222   : > { %2820 = vst.msk [vmem:[%s4906_s7 + $0x70] sm:$0xff] %vm466_vm0, %v4962_v57  ;;  %v3064_v38 = vpop.f32.mrb[128].mxu1  ;;  %v4971_v24 = vadd.f32 %v3396_v49, %v4868_v61 }
 0x223   : > { %v2249_v32 = vpop.f32.mrb[0].mxu0  ;;  %v4974_v39 = vadd.f32 %v4849_v60, %v3064_v38  ;;  %v2554_v29 = vpop.f32.mrb[129].mxu1 }
 0x224   : > { %v3342_v10 = vadd.f32 %v2249_v32, %v4715_v52  ;;  %v2251_v5 = vpop.f32.mrb[1].mxu0  ;;  %v4978_v35 = vadd.f32 %v4846_v45, %v2554_v29 }
 0x225   : > { %2823 = vst.msk [vmem:[%s4906_s7 + $0x88] sm:$0xff] %vm466_vm0, %v4974_v39 }
 0x226   : > { %v2475_v23 = vadd.f32 %v3342_v10, %v4877_v59  ;;  %2822 = vst.msk [vmem:[%s4906_s7 + $0x80] sm:$0xff] %vm466_vm0, %v4978_v35  ;;  %v3067_v61 = vpop.f32.mrb[130].mxu1 }
 0x227   : > { %v2254_v33 = vpop.f32.mrb[2].mxu0  ;;  %v4988_v60 = vadd.f32 %v4855_v22, %v3067_v61  ;;  %v2564_v36 = vpop.f32.mrb[131].mxu1 }
 0x228   : > { %2806 = vst.msk [vmem:[%s4906_s7] sm:$0xff] %vm466_vm0, %v2475_v23  ;;  %v3343_v52 = vadd.f32 %v2254_v33, %v4720_v7  ;;  %v2256_v45 = vpop.f32.mrb[3].mxu0  ;;  %v4997_v59 = vadd.f32 %v4852_v4, %v2564_v36  ;;  %v2704_v43 = vmul.f32 %v2475_v23, %v2475_v23  ;;  %v2633_v22 = vsel %vm466_vm0, %v2475_v23, 0.0 }
 0x229   : > { %2825 = vst.msk [vmem:[%s4906_s7 + $0x98] sm:$0xff] %vm466_vm0, %v4988_v60 }
 0x22a   : > { %v2480_v54 = vadd.f32 %v3343_v52, %v4873_v30  ;;  %v3070_v42 = vpop.f32.mrb[132].mxu1  ;;  %2824 = vst.msk [vmem:[%s4906_s7 + $0x90] sm:$0xff] %vm466_vm0, %v4997_v59 }
 0x22b   : > { %v2259_v51 = vpop.f32.mrb[4].mxu0  ;;  %v5005_v7 = vadd.f32 %v4865_v11, %v3070_v42  ;;  %v2574_v19 = vpop.f32.mrb[133].mxu1  ;;  %v2736_v11 = vsel %vm466_vm0, %v2704_v43, 0.0 }
 0x22c   : > { %v2634_v56 = vsel %vm466_vm0, %v2480_v54, 0.0  ;;  %v2705_v4 = vmul.f32 %v2480_v54, %v2480_v54  ;;  %2807 = vst.msk [vmem:[%s4906_s7 + $0x8] sm:$0xff] %vm466_vm0, %v2480_v54  ;;  %v3344_v41 = vadd.f32 %v2259_v51, %v4724_v25  ;;  %v2261_v30 = vpop.f32.mrb[5].mxu0  ;;  %v5012_v16 = vadd.f32 %v4858_v17, %v2574_v19 }
 0x22d   : > { %v2635_v0 = vadd.f32 %v2634_v56, %v2633_v22  ;;  %2827 = vst.msk [vmem:[%s4906_s7 + $0xa8] sm:$0xff] %vm466_vm0, %v5005_v7 }
 0x22e   : > { %v2737_v13 = vsel %vm466_vm0, %v2705_v4, 0.0  ;;  %v2485_v9 = vadd.f32 %v3344_v41, %v4884_v62  ;;  %2826 = vst.msk [vmem:[%s4906_s7 + $0xa0] sm:$0xff] %vm466_vm0, %v5012_v16  ;;  %v3073_v25 = vpop.f32.mrb[134].mxu1 }
 0x22f   : > { %v2738_v49 = vadd.f32 %v2737_v13, %v2736_v11  ;;  %v2264_v20 = vpop.f32.mrb[6].mxu0  ;;  %v5024_v17 = vadd.f32 %v4875_v3, %v3073_v25  ;;  %v2584_v38 = vpop.f32.mrb[135].mxu1 }
 0x230   : > { %v2636_v32 = vsel %vm466_vm0, %v2485_v9, 0.0  ;;  %v2706_v29 = vmul.f32 %v2485_v9, %v2485_v9  ;;  %2808 = vst.msk [vmem:[%s4906_s7 + $0x10] sm:$0xff] %vm466_vm0, %v2485_v9  ;;  %v3345_v10 = vadd.f32 %v2264_v20, %v4729_v28  ;;  %v2266_v62 = vpop.f32.mrb[7].mxu0  ;;  %v5034_v23 = vadd.f32 %v4870_v34, %v2584_v38 }
 0x231   : > { %v2637_v5 = vadd.f32 %v2636_v32, %v2635_v0  ;;  %2829 = vst.msk [vmem:[%s4906_s7 + $0xb8] sm:$0xff] %vm466_vm0, %v5024_v17 }
 0x232   : > { %v2739_v3 = vsel %vm466_vm0, %v2706_v29, 0.0  ;;  %v2490_v61 = vadd.f32 %v3345_v10, %v4880_v1  ;;  %v3076_v33 = vpop.f32.mrb[136].mxu1  ;;  %2828 = vst.msk [vmem:[%s4906_s7 + $0xb0] sm:$0xff] %vm466_vm0, %v5034_v23 }
 0x233   : > { %v2740_v36 = vadd.f32 %v2739_v3, %v2738_v49  ;;  %v2269_v28 = vpop.f32.mrb[8].mxu0  ;;  %v2594_v52 = vpop.f32.mrb[137].mxu1  ;;  %v5046_v54 = vadd.f32 %v4889_v44, %v3076_v33 }
 0x234   : > { %v2638_v45 = vsel %vm466_vm0, %v2490_v61, 0.0  ;;  %v2707_v43 = vmul.f32 %v2490_v61, %v2490_v61  ;;  %2809 = vst.msk [vmem:[%s4906_s7 + $0x18] sm:$0xff] %vm466_vm0, %v2490_v61  ;;  %v3346_v34 = vadd.f32 %v2269_v28, %v4734_v37  ;;  %v2271_v1 = vpop.f32.mrb[9].mxu0  ;;  %v5049_v22 = vadd.f32 %v4882_v63, %v2594_v52 }
 0x235   : > { %v2639_v42 = vadd.f32 %v2638_v45, %v2637_v5  ;;  %2831 = vst.msk [vmem:[%s4906_s7 + $0xc8] sm:$0xff] %vm466_vm0, %v5046_v54 }
 0x236   : > { %v2741_v51 = vsel %vm466_vm0, %v2707_v43, 0.0  ;;  %v2495_v19 = vadd.f32 %v3346_v34, %v4891_v21  ;;  %v3079_v56 = vpop.f32.mrb[138].mxu1  ;;  %2830 = vst.msk [vmem:[%s4906_s7 + $0xc0] sm:$0xff] %vm466_vm0, %v5049_v22 }
 0x237   : > { %v2742_v4 = vadd.f32 %v2741_v51, %v2740_v36  ;;  %v2274_v37 = vpop.f32.mrb[10].mxu0  ;;  %v5060_v44 = vadd.f32 %v4908_v6, %v3079_v56  ;;  %v2604_v41 = vpop.f32.mrb[139].mxu1 }
 0x238   : > { %v2640_v63 = vsel %vm466_vm0, %v2495_v19, 0.0  ;;  %v2708_v30 = vmul.f32 %v2495_v19, %v2495_v19  ;;  %2810 = vst.msk [vmem:[%s4906_s7 + $0x20] sm:$0xff] %vm466_vm0, %v2495_v19  ;;  %v3347_v21 = vadd.f32 %v2274_v37, %v4738_v26  ;;  %v2276_v0 = vpop.f32.mrb[11].mxu0  ;;  %v5072_v9 = vadd.f32 %v4896_v48, %v2604_v41 }
 0x239   : > { %v2641_v11 = vadd.f32 %v2640_v63, %v2639_v42  ;;  %2833 = vst.msk [vmem:[%s4906_s7 + $0xd8] sm:$0xff] %vm466_vm0, %v5060_v44  ;;  %v2713_v19 = vmul.f32 %v4911_v18, %v4911_v18  ;;  %v2650_v41 = vsel %vm466_vm0, %v4911_v18, 0.0  ;;  %v2654_v18 = vsel %vm466_vm0, %v4926_v40, 0.0 }
 0x23a   : > { %v2743_v13 = vsel %vm466_vm0, %v2708_v30, 0.0  ;;  %v2500_v6 = vadd.f32 %v3347_v21, %v4887_v53  ;;  %v3082_v25 = vpop.f32.mrb[140].mxu1  ;;  %2832 = vst.msk [vmem:[%s4906_s7 + $0xd0] sm:$0xff] %vm466_vm0, %v5072_v9  ;;  %v2714_v30 = vmul.f32 %v4930_v12, %v4930_v12 }
 0x23b   : > { %v2744_v49 = vadd.f32 %v2743_v13, %v2742_v4  ;;  %v2279_v20 = vpop.f32.mrb[12].mxu0  ;;  %v5075_v38 = vadd.f32 %v4939_v2, %v3082_v25  ;;  %v2614_v26 = vpop.f32.mrb[141].mxu1  ;;  %v2715_v13 = vmul.f32 %v4926_v40, %v4926_v40  ;;  %v2658_v40 = vsel %vm466_vm0, %v4942_v15, 0.0 }
 0x23c   : > { %v2642_v32 = vsel %vm466_vm0, %v2500_v6, 0.0  ;;  %v2709_v29 = vmul.f32 %v2500_v6, %v2500_v6  ;;  %2811 = vst.msk [vmem:[%s4906_s7 + $0x28] sm:$0xff] %vm466_vm0, %v2500_v6  ;;  %v2281_v53 = vpop.f32.mrb[13].mxu0  ;;  %v3348_v48 = vadd.f32 %v2279_v20, %v4742_v55  ;;  %v5089_v62 = vadd.f32 %v4923_v46, %v2614_v26 }
 0x23d   : > { %v2643_v10 = vadd.f32 %v2642_v32, %v2641_v11  ;;  %2835 = vst.msk [vmem:[%s4906_s7 + $0xe8] sm:$0xff] %vm466_vm0, %v5075_v38  ;;  %v2753_v11 = vsel %vm466_vm0, %v2713_v19, 0.0  ;;  %v2716_v20 = vmul.f32 %v4946_v58, %v4946_v58  ;;  %v2717_v53 = vmul.f32 %v4942_v15, %v4942_v15 }
 0x23e   : > { %v2745_v2 = vsel %vm466_vm0, %v2709_v29, 0.0  ;;  %v3085_v5 = vpop.f32.mrb[142].mxu1  ;;  %v2505_v61 = vadd.f32 %v3348_v48, %v4898_v47  ;;  %2834 = vst.msk [vmem:[%s4906_s7 + $0xe0] sm:$0xff] %vm466_vm0, %v5089_v62  ;;  %v2757_v29 = vsel %vm466_vm0, %v2715_v13, 0.0  ;;  %v2662_v15 = vsel %vm466_vm0, %v4958_v50, 0.0 }
 0x23f   : > { %v2746_v3 = vadd.f32 %v2745_v2, %v2744_v49  ;;  %v2284_v33 = vpop.f32.mrb[14].mxu0  ;;  %v5093_v36 = vadd.f32 %v4971_v24, %v3085_v5  ;;  %v2624_v55 = vpop.f32.mrb[143].mxu1  ;;  %v2755_v49 = vsel %vm466_vm0, %v2714_v30, 0.0  ;;  %v2759_v2 = vsel %vm466_vm0, %v2716_v20, 0.0 }
 0x240   : > { %v3349_v28 = vadd.f32 %v2284_v33, %v4746_v8  ;;  %v2286_v52 = vpop.f32.mrb[15].mxu0  ;;  %v5100_v46 = vadd.f32 %v4955_v27, %v2624_v55  ;;  %v2644_v45 = vsel %vm466_vm0, %v2505_v61, 0.0  ;;  %v2710_v43 = vmul.f32 %v2505_v61, %v2505_v61  ;;  %2812 = vst.msk [vmem:[%s4906_s7 + $0x30] sm:$0xff] %vm466_vm0, %v2505_v61 }
 0x241   : > { %2837 = vst.msk [vmem:[%s4906_s7 + $0xf8] sm:$0xff] %vm466_vm0, %v5093_v36  ;;  %v2645_v47 = vadd.f32 %v2644_v45, %v2643_v10  ;;  %v2712_v27 = vmul.f32 %v4915_v31, %v4915_v31  ;;  %v2718_v5 = vmul.f32 %v4962_v57, %v4962_v57  ;;  %v2761_v33 = vsel %vm466_vm0, %v2717_v53, 0.0 }
 0x242   : > { %v2510_v24 = vadd.f32 %v3349_v28, %v4894_v14  ;;  %2836 = vst.msk [vmem:[%s4906_s7 + $0xf0] sm:$0xff] %vm466_vm0, %v5100_v46  ;;  %v2747_v8 = vsel %vm466_vm0, %v2710_v43, 0.0  ;;  %v2648_v14 = vsel %vm466_vm0, %v4915_v31, 0.0  ;;  %v2652_v31 = vsel %vm466_vm0, %v4930_v12, 0.0 }
 0x243   : > { %v2748_v34 = vadd.f32 %v2747_v8, %v2746_v3  ;;  %v2751_v63 = vsel %vm466_vm0, %v2712_v27, 0.0  ;;  %v2656_v12 = vsel %vm466_vm0, %v4946_v58, 0.0  ;;  %v2719_v55 = vmul.f32 %v4958_v50, %v4958_v50 }
 0x244   : > { %v2646_v1 = vsel %vm466_vm0, %v2510_v24, 0.0  ;;  %v2711_v42 = vmul.f32 %v2510_v24, %v2510_v24  ;;  %2813 = vst.msk [vmem:[%s4906_s7 + $0x38] sm:$0xff] %vm466_vm0, %v2510_v24  ;;  %v2660_v58 = vsel %vm466_vm0, %v4962_v57, 0.0  ;;  %v2763_v45 = vsel %vm466_vm0, %v2718_v5, 0.0 }
 0x245   : > { %v2647_v51 = vadd.f32 %v2646_v1, %v2645_v47  ;;  %v2720_v43 = vmul.f32 %v4978_v35, %v4978_v35  ;;  %v2765_v8 = vsel %vm466_vm0, %v2719_v55, 0.0  ;;  %v2721_v27 = vmul.f32 %v4974_v39, %v4974_v39 }
 0x246   : > { %v2749_v56 = vsel %vm466_vm0, %v2711_v42, 0.0  ;;  %v2664_v57 = vsel %vm466_vm0, %v4978_v35, 0.0  ;;  %v2666_v50 = vsel %vm466_vm0, %v4974_v39, 0.0  ;;  %v2668_v35 = vsel %vm466_vm0, %v4997_v59, 0.0 }
 0x247   : > { %v2649_v4 = vadd.f32 %v2648_v14, %v2647_v51  ;;  %v2750_v37 = vadd.f32 %v2749_v56, %v2748_v34  ;;  %v2767_v42 = vsel %vm466_vm0, %v2720_v43, 0.0  ;;  %v2722_v51 = vmul.f32 %v4997_v59, %v4997_v59 }
 0x248   : > { %v2769_v56 = vsel %vm466_vm0, %v2721_v27, 0.0  ;;  %v2670_v39 = vsel %vm466_vm0, %v4988_v60, 0.0  ;;  %v2724_v30 = vmul.f32 %v5012_v16, %v5012_v16  ;;  %v2725_v13 = vmul.f32 %v5005_v7, %v5005_v7 }
 0x249   : > { %v2651_v21 = vadd.f32 %v2650_v41, %v2649_v4  ;;  %v2752_v0 = vadd.f32 %v2751_v63, %v2750_v37  ;;  %v2723_v4 = vmul.f32 %v4988_v60, %v4988_v60  ;;  %v2771_v63 = vsel %vm466_vm0, %v2722_v51, 0.0 }
 0x24a   : > { %v2672_v59 = vsel %vm466_vm0, %v5012_v16, 0.0  ;;  %v2674_v60 = vsel %vm466_vm0, %v5005_v7, 0.0  ;;  %v2676_v16 = vsel %vm466_vm0, %v5034_v23, 0.0  ;;  %v2678_v7 = vsel %vm466_vm0, %v5024_v17, 0.0 }
 0x24b   : > { %v2653_v6 = vadd.f32 %v2652_v31, %v2651_v21  ;;  %v2754_v25 = vadd.f32 %v2753_v11, %v2752_v0  ;;  %v2773_v11 = vsel %vm466_vm0, %v2723_v4, 0.0  ;;  %v2729_v5 = vmul.f32 %v5046_v54, %v5046_v54 }
 0x24c   : > { %v2730_v55 = vmul.f32 %v5072_v9, %v5072_v9  ;;  %v2734_v51 = vmul.f32 %v5100_v46, %v5100_v46  ;;  %v2735_v4 = vmul.f32 %v5093_v36, %v5093_v36 }
 0x24d   : > { %v2655_v26 = vadd.f32 %v2654_v18, %v2653_v6  ;;  %v2756_v32 = vadd.f32 %v2755_v49, %v2754_v25  ;;  %v2775_v25 = vsel %vm466_vm0, %v2724_v30, 0.0  ;;  %v2726_v18 = vmul.f32 %v5034_v23, %v5034_v23 }
 0x24e   : > { %v2680_v23 = vsel %vm466_vm0, %v5049_v22, 0.0  ;;  %v2797_v30 = vsel %vm466_vm0, %v2735_v4, 0.0 }
 0x24f   : > { %v2657_v10 = vadd.f32 %v2656_v12, %v2655_v26  ;;  %v2758_v48 = vadd.f32 %v2757_v29, %v2756_v32  ;;  %v2777_v26 = vsel %vm466_vm0, %v2725_v13, 0.0  ;;  %v2727_v32 = vmul.f32 %v5024_v17, %v5024_v17 }
 0x250   : > { %v2779_v12 = vsel %vm466_vm0, %v2726_v18, 0.0  ;;  %v2682_v17 = vsel %vm466_vm0, %v5046_v54, 0.0  ;;  %v2686_v54 = vsel %vm466_vm0, %v5060_v44, 0.0 }
 0x251   : > { %v2659_v3 = vadd.f32 %v2658_v40, %v2657_v10  ;;  %v2760_v61 = vadd.f32 %v2759_v2, %v2758_v48  ;;  %v2728_v10 = vmul.f32 %v5049_v22, %v5049_v22  ;;  %v2781_v2 = vsel %vm466_vm0, %v2727_v32, 0.0 }
 0x252   : > { %v2684_v22 = vsel %vm466_vm0, %v5072_v9, 0.0  ;;  %v2688_v9 = vsel %vm466_vm0, %v5089_v62, 0.0 }
 0x253   : > { %v2661_v28 = vadd.f32 %v2660_v58, %v2659_v3  ;;  %v2762_v52 = vadd.f32 %v2761_v33, %v2760_v61  ;;  %v2783_v33 = vsel %vm466_vm0, %v2728_v10, 0.0 }
 0x255   : > { %v2663_v47 = vadd.f32 %v2662_v15, %v2661_v28  ;;  %v2764_v24 = vadd.f32 %v2763_v45, %v2762_v52  ;;  %v2785_v52 = vsel %vm466_vm0, %v2729_v5, 0.0  ;;  %v2731_v15 = vmul.f32 %v5060_v44, %v5060_v44 }
 0x256   : > { %v2690_v44 = vsel %vm466_vm0, %v5075_v38, 0.0 }
 0x257   : > { %v2665_v34 = vadd.f32 %v2664_v57, %v2663_v47  ;;  %v2766_v1 = vadd.f32 %v2765_v8, %v2764_v24  ;;  %v2787_v47 = vsel %vm466_vm0, %v2730_v55, 0.0  ;;  %v2732_v24 = vmul.f32 %v5089_v62, %v5089_v62 }
 0x258   : > { %v2789_v57 = vsel %vm466_vm0, %v2731_v15, 0.0  ;;  %v2692_v62 = vsel %vm466_vm0, %v5100_v46, 0.0 }
 0x259   : > { %v2667_v19 = vadd.f32 %v2666_v50, %v2665_v34  ;;  %v2768_v14 = vadd.f32 %v2767_v42, %v2766_v1  ;;  %v2733_v34 = vmul.f32 %v5075_v38, %v5075_v38  ;;  %v2791_v42 = vsel %vm466_vm0, %v2732_v24, 0.0 }
 0x25a   : > { %v2694_v38 = vsel %vm466_vm0, %v5093_v36, 0.0 }
 0x25b   : > { %v2770_v37 = vadd.f32 %v2769_v56, %v2768_v14  ;;  %v2669_v41 = vadd.f32 %v2668_v35, %v2667_v19  ;;  %v2793_v56 = vsel %vm466_vm0, %v2733_v34, 0.0 }
 0x25d   : > { %v2671_v21 = vadd.f32 %v2670_v39, %v2669_v41  ;;  %v2772_v0 = vadd.f32 %v2771_v63, %v2770_v37  ;;  %v2795_v41 = vsel %vm466_vm0, %v2734_v51, 0.0 }
 0x25f   : > { %v2673_v31 = vadd.f32 %v2672_v59, %v2671_v21  ;;  %v2774_v6 = vadd.f32 %v2773_v11, %v2772_v0 }
 0x261   : > { %v2675_v49 = vadd.f32 %v2674_v60, %v2673_v31  ;;  %v2776_v20 = vadd.f32 %v2775_v25, %v2774_v6 }
 0x263   : > { %v2677_v29 = vadd.f32 %v2676_v16, %v2675_v49  ;;  %v2778_v53 = vadd.f32 %v2777_v26, %v2776_v20 }
 0x265   : > { %v2679_v48 = vadd.f32 %v2678_v7, %v2677_v29  ;;  %v2780_v40 = vadd.f32 %v2779_v12, %v2778_v53 }
 0x267   : > { %v2681_v3 = vadd.f32 %v2680_v23, %v2679_v48  ;;  %v2782_v61 = vadd.f32 %v2781_v2, %v2780_v40 }
 0x269   : > { %v2683_v58 = vadd.f32 %v2682_v17, %v2681_v3  ;;  %v2784_v28 = vadd.f32 %v2783_v33, %v2782_v61 }
 0x26b   : > { %v2685_v45 = vadd.f32 %v2684_v22, %v2683_v58  ;;  %v2786_v43 = vadd.f32 %v2785_v52, %v2784_v28 }
 0x26d   : > { %v2687_v8 = vadd.f32 %v2686_v54, %v2685_v45  ;;  %v2788_v27 = vadd.f32 %v2787_v47, %v2786_v43 }
 0x26f   : > { %v2689_v1 = vadd.f32 %v2688_v9, %v2687_v8  ;;  %v2790_v50 = vadd.f32 %v2789_v57, %v2788_v27 }
 0x271   : > { %v2691_v19 = vadd.f32 %v2690_v44, %v2689_v1  ;;  %v2792_v14 = vadd.f32 %v2791_v42, %v2790_v50 }
 0x273   : > { %v2693_v35 = vadd.f32 %v2692_v62, %v2691_v19  ;;  %v2794_v37 = vadd.f32 %v2793_v56, %v2792_v14 }
 0x275   : > { %v2695_v39 = vadd.f32 %v2694_v38, %v2693_v35  ;;  %v2796_v63 = vadd.f32 %v2795_v41, %v2794_v37 }
 0x277   : > { %v2696_v21 = vrot.slane %v2695_v39, 4  ;;  %v2798_v0 = vadd.f32 %v2797_v30, %v2796_v63 }
 0x279   : > { %v2697_v11 = vadd.f32 %v2696_v21, %v2695_v39  ;;  %v2799_v13 = vrot.slane %v2798_v0, 4 }
 0x27b   : > { %v2698_v59 = vrot.slane %v2697_v11, 2  ;;  %v2800_v31 = vadd.f32 %v2799_v13, %v2798_v0 }
 0x27d   : > { %v2699_v46 = vadd.f32 %v2698_v59, %v2697_v11  ;;  %v2801_v6 = vrot.slane %v2800_v31, 2 }
 0x27f   : > { %v2700_v60 = vrot.slane %v2699_v46, 1  ;;  %v2802_v25 = vadd.f32 %v2801_v6, %v2800_v31 }
 0x281   : > { %v2701_v36 = vadd.f32 %v2700_v60, %v2699_v46  ;;  %v2803_v18 = vrot.slane %v2802_v25, 1 }
 0x283   : > { %2703 = vst.msk [vmem:[%s265_s9] sm:$0x1] %vm2702_vm1, %v2701_v36  ;;  %v2804_v49 = vadd.f32 %v2803_v18, %v2802_v25 }
 0x285   : > { %2805 = vst.msk [vmem:[%s268_s12] sm:$0x1] %vm2702_vm1, %v2804_v49 }
 0x286 PF: > { %s17_s21 = sadd.s32 1, %s3495_s21  }
 0x287   : > { %p14_p4 = scmp.ge.s32.totalorder %s17_s21, 4  }
 0x289   :  { %16 = sbr.rel (!%p14_p4) target bundleno = 1 (0x1), region = 92 }

</bundles_post_ra>
